<compile_context>
chip_gen: v7x
topology: tpu7x:2x2x1
jax: 0.10.0
libtpu: 0.0.40
codegen_flags: <defaults>
</compile_context>

<pallas_src>
import functools
import math

import jax
import jax.numpy as jnp
from jax.experimental import pallas as pl
from jax.experimental.pallas import tpu as pltpu


# =============================== Pallas kernel ===============================

def _upblock_kernel(*refs, nconv):
    """refs = (up, skip, w_0, b_0, ..., w_{n-1}, b_{n-1}, out, pad_scratch).

    up, skip : (H, W, Ch)            upsampled input / skip connection (batch squeezed)
    w_l      : (9, Cin_l, Cout_l)    3x3 conv taps (tap index = 3*dy + dx), BN folded
    b_l      : (1, Cout_l)           folded bias
    out      : (H, W, Cout_last)
    pad      : (H+2, W+2, Cpad)      VMEM halo scratch shared by all conv layers
    """
    up_ref, skip_ref = refs[0], refs[1]
    wb = refs[2:2 + 2 * nconv]
    o_ref = refs[2 + 2 * nconv]
    pad_ref = refs[3 + 2 * nconv]

    H, W, Ch = up_ref.shape

    # torch.cat([up, skip_x], dim=1): write both halves straight into the
    # zero-padded halo buffer -> the concat itself costs nothing extra.
    pad_ref[...] = jnp.zeros_like(pad_ref)
    pad_ref[1:H + 1, 1:W + 1, 0:Ch] = up_ref[...]
    pad_ref[1:H + 1, 1:W + 1, Ch:2 * Ch] = skip_ref[...]

    y = None
    for layer in range(nconv):
        w_ref, b_ref = wb[2 * layer], wb[2 * layer + 1]
        cin, cout = w_ref.shape[1], w_ref.shape[2]
        if layer > 0:
            # Halo rows/cols of channels [0:cin] are still zero from the initial
            # memset; only the interior changes between layers.
            pad_ref[1:H + 1, 1:W + 1, 0:cin] = y.reshape(H, W, cin)
        acc = jnp.zeros((H * W, cout), jnp.float32)
        for dy in range(3):
            for dx in range(3):
                tap = pad_ref[dy:dy + H, dx:dx + W, 0:cin].reshape(H * W, cin)
                acc = acc + jnp.dot(tap, w_ref[3 * dy + dx],
                                    preferred_element_type=jnp.float32)
        # conv bias + folded BatchNorm + ReLU
        y = jnp.maximum(acc + b_ref[...], 0.0)
    o_ref[...] = y.reshape(o_ref.shape)


# ============================== forward wrapper ==============================

def upblock_forward(params, x, skip_x):
    """UpBlock forward.  x: (B, h, w, Cin//2) NHWC, skip_x: (B, 2h, 2w, Cin//2)."""
    Bn, h, w, Ch = x.shape
    H, W = 2 * h, 2 * w
    convs = params["convs"]
    nconv = len(convs)
    cout = convs[-1]["w"].shape[-1]
    c_pad = max(c["w"].shape[1] for c in convs)          # widest conv input
    assert skip_x.shape == (Bn, H, W, Ch), (skip_x.shape, (Bn, H, W, Ch))

    # --- ConvTranspose2d(Ch, Ch, (2,2), stride=2) --------------------------------
    # stride == kernel -> no overlapping taps: out[2i+a, 2j+b, o] =
    # sum_c x[i, j, c] * W[c, o, a, b] + bias[o].  Tiny matmul; keep it in XLA
    # (fuses with the interleaving reshape) per the performance review.
    up = jnp.einsum("nijc,coab->niajbo", x, params["up_w"]).reshape(Bn, H, W, Ch)
    up = up + params["up_b"]

    in_specs = [
        pl.BlockSpec((None, H, W, Ch), lambda b: (b, 0, 0, 0)),   # up
        pl.BlockSpec((None, H, W, Ch), lambda b: (b, 0, 0, 0)),   # skip
    ]
    args = [up, skip_x]
    for c in convs:
        in_specs.append(pl.BlockSpec(c["w"].shape, lambda b: (0, 0, 0)))
        in_specs.append(pl.BlockSpec(c["b"].shape, lambda b: (0, 0)))
        args += [c["w"], c["b"]]

    return pl.pallas_call(
        functools.partial(_upblock_kernel, nconv=nconv),
        grid=(Bn,),                                       # one batch element per step
        in_specs=in_specs,
        out_specs=pl.BlockSpec((None, H, W, cout), lambda b: (b, 0, 0, 0)),
        out_shape=jax.ShapeDtypeStruct((Bn, H, W, cout), jnp.float32),
        scratch_shapes=[pltpu.VMEM((H + 2, W + 2, c_pad), jnp.float32)],
        # NOTE(perf): ~4 MB VMEM per step here, far under the 32 MiB default
        # scoped limit; re-derive the tiling / vmem_limit_bytes if scaled to the
        # full 224x224, base_channel=64 config (esp. v7x's 64 MiB VMEM).
        compiler_params=pltpu.CompilerParams(dimension_semantics=("parallel",)),
    )(*args)


# ============================ plain-XLA reference ============================

def upblock_reference(params, x, skip_x):
    """Independent lax.conv reference, used only for the correctness check."""
    Bn, h, w, Ch = x.shape
    H, W = 2 * h, 2 * w
    up = jnp.einsum("nijc,coab->niajbo", x, params["up_w"]).reshape(Bn, H, W, Ch)
    up = up + params["up_b"]
    y = jnp.concatenate([up, skip_x], axis=-1)            # torch.cat([out, skip], 1)
    for c in params["convs"]:
        cin, co = c["w"].shape[1], c["w"].shape[2]
        y = jax.lax.conv_general_dilated(
            y, c["w"].reshape(3, 3, cin, co),
            window_strides=(1, 1), padding="SAME",
            dimension_numbers=("NHWC", "HWIO", "NHWC"),
            precision=jax.lax.Precision.HIGHEST)
        y = jnp.maximum(y + c["b"].reshape(1, 1, 1, co), 0.0)
    return y


# ============================ parameter construction ===========================

def init_upblock(key, in_channels, out_channels, nb_conv=2):
    """Parameters for UpBlock(in_channels, out_channels, nb_Conv).

    BatchNorm2d (eval mode, running stats) is folded into each conv's w/b.
    # TODO(synk): training-mode BatchNorm (batch statistics) is not modeled.
    """
    half = in_channels // 2
    keys = iter(jax.random.split(key, 4 + 6 * nb_conv))
    nxt = lambda: next(keys)
    p = {
        # ConvTranspose2d(half, half, (2,2), 2); torch weight layout (Cin, Cout, kH, kW)
        "up_w": (1.0 / math.sqrt(4 * half)) *
                jax.random.normal(nxt(), (half, half, 2, 2), jnp.float32),
        "up_b": 0.02 * jax.random.normal(nxt(), (half,), jnp.float32),
        "convs": [],
    }
    cin = in_channels
    for _ in range(nb_conv):
        w = (1.0 / math.sqrt(9 * cin)) * jax.random.normal(
            nxt(), (9, cin, out_channels), jnp.float32)
        b = 0.02 * jax.random.normal(nxt(), (out_channels,), jnp.float32)
        gamma = 1.0 + 0.1 * jax.random.normal(nxt(), (out_channels,), jnp.float32)
        beta = 0.05 * jax.random.normal(nxt(), (out_channels,), jnp.float32)
        mean = 0.02 * jax.random.normal(nxt(), (out_channels,), jnp.float32)
        var = 0.9 + 0.2 * jax.random.uniform(nxt(), (out_channels,), jnp.float32)
        scale = gamma * jax.lax.rsqrt(var + 1e-5)
        p["convs"].append({"w": w * scale,
                           "b": ((b - mean) * scale + beta).reshape(1, out_channels)})
        cin = out_channels
    return p


# ==================================== main ====================================

if __name__ == "__main__":
    # UpBlock(in_channels=256, out_channels=128, nb_Conv=2) -- the standard
    # LViT / UNet decoder configuration.  NHWC inputs:
    #   x      : (2,  8,  8, 128)   (== NCHW (2, 128,  8,  8))
    #   skip_x : (2, 16, 16, 128)   (== NCHW (2, 128, 16, 16))
    IN_CH, OUT_CH, NB_CONV = 256, 128, 2
    Bn, hs, ws = 2, 8, 8
    half = IN_CH // 2

    kp, kx, ks = jax.random.split(jax.random.PRNGKey(0), 3)
    params = init_upblock(kp, IN_CH, OUT_CH, NB_CONV)
    x = jax.random.normal(kx, (Bn, hs, ws, half), jnp.float32)
    skip_x = jax.random.normal(ks, (Bn, 2 * hs, 2 * ws, half), jnp.float32)

    out = jax.block_until_ready(jax.jit(upblock_forward)(params, x, skip_x))
    ref = jax.block_until_ready(jax.jit(upblock_reference)(params, x, skip_x))

    assert out.shape == (Bn, 2 * hs, 2 * ws, OUT_CH), out.shape
    assert bool(jnp.all(jnp.isfinite(out)))
    assert bool(jnp.all(out >= 0.0))                       # ReLU output
    rel = float(jnp.max(jnp.abs(out - ref)) /
                jnp.maximum(1.0, jnp.max(jnp.abs(ref))))
    assert rel < 2e-2, rel
    print("KERNEL_OK")
</pallas_src>

<mosaic_0001>
module attributes {stable_mosaic.version = 11 : i64} {
  func.func @_upblock_kernel(%arg0: i32, %arg1: memref<1x16x16x128xf32, #tpu.memory_space<vmem>>, %arg2: memref<1x16x16x128xf32, #tpu.memory_space<vmem>>, %arg3: memref<9x256x128xf32, #tpu.memory_space<vmem>>, %arg4: memref<1x128xf32, #tpu.memory_space<vmem>>, %arg5: memref<9x128x128xf32, #tpu.memory_space<vmem>>, %arg6: memref<1x128xf32, #tpu.memory_space<vmem>>, %arg7: memref<1x16x16x128xf32, #tpu.memory_space<vmem>>, %arg8: memref<18x18x256xf32, #tpu.memory_space<vmem>>) attributes {dimension_semantics = [#tpu.dimension_semantics<parallel>], iteration_bounds = array<i64: 2>, scalar_prefetch = 0 : i64, scratch_operands = 1 : i64, tpu.core_type = #tpu.core_type<tc>, window_params = [{transform_indices = @transform_0, window_bounds = array<i64: 1, 16, 16, 128>}, {transform_indices = @transform_1, window_bounds = array<i64: 1, 16, 16, 128>}, {pipeline_mode = #tpu.pipeline_mode<synchronous>, transform_indices = @transform_2, window_bounds = array<i64: 9, 256, 128>}, {pipeline_mode = #tpu.pipeline_mode<synchronous>, transform_indices = @transform_3, window_bounds = array<i64: 1, 128>}, {pipeline_mode = #tpu.pipeline_mode<synchronous>, transform_indices = @transform_4, window_bounds = array<i64: 9, 128, 128>}, {pipeline_mode = #tpu.pipeline_mode<synchronous>, transform_indices = @transform_5, window_bounds = array<i64: 1, 128>}, {transform_indices = @transform_6, window_bounds = array<i64: 1, 16, 16, 128>}]} {
    %cst = arith.constant 0.000000e+00 : f32
    %0 = vector.broadcast %cst : f32 to vector<18x18x256xf32>
    %c0 = arith.constant 0 : index
    %c0_0 = arith.constant 0 : index
    %c0_1 = arith.constant 0 : index
    %1 = vector.load %arg8[%c0, %c0_0, %c0_1] : memref<18x18x256xf32, #tpu.memory_space<vmem>>, vector<18x18x256xf32>
    tpu.vector_store %arg8[%c0, %c0_0, %c0_1], %0 {strides = array<i32>} : memref<18x18x256xf32, #tpu.memory_space<vmem>>, vector<18x18x256xf32>,
    %c0_2 = arith.constant 0 : index
    %c0_3 = arith.constant 0 : index
    %c0_4 = arith.constant 0 : index
    %c0_5 = arith.constant 0 : index
    %2 = vector.load %arg1[%c0_2, %c0_3, %c0_4, %c0_5] : memref<1x16x16x128xf32, #tpu.memory_space<vmem>>, vector<1x16x16x128xf32>
    %3 = vector.shape_cast %2 : vector<1x16x16x128xf32> to vector<16x16x128xf32>
    %c1 = arith.constant 1 : index
    %c1_6 = arith.constant 1 : index
    %c0_7 = arith.constant 0 : index
    %4 = vector.load %arg8[%c1, %c1_6, %c0_7] : memref<18x18x256xf32, #tpu.memory_space<vmem>>, vector<16x16x128xf32>
    tpu.vector_store %arg8[%c1, %c1_6, %c0_7], %3 {strides = array<i32>} : memref<18x18x256xf32, #tpu.memory_space<vmem>>, vector<16x16x128xf32>,
    %c0_8 = arith.constant 0 : index
    %c0_9 = arith.constant 0 : index
    %c0_10 = arith.constant 0 : index
    %c0_11 = arith.constant 0 : index
    %5 = vector.load %arg2[%c0_8, %c0_9, %c0_10, %c0_11] : memref<1x16x16x128xf32, #tpu.memory_space<vmem>>, vector<1x16x16x128xf32>
    %6 = vector.shape_cast %5 : vector<1x16x16x128xf32> to vector<16x16x128xf32>
    %c1_12 = arith.constant 1 : index
    %c1_13 = arith.constant 1 : index
    %c128 = arith.constant 128 : index
    %7 = vector.load %arg8[%c1_12, %c1_13, %c128] : memref<18x18x256xf32, #tpu.memory_space<vmem>>, vector<16x16x128xf32>
    tpu.vector_store %arg8[%c1_12, %c1_13, %c128], %6 {strides = array<i32>} : memref<18x18x256xf32, #tpu.memory_space<vmem>>, vector<16x16x128xf32>,
    %cst_14 = arith.constant 0.000000e+00 : f32
    %8 = vector.broadcast %cst_14 : f32 to vector<256x128xf32>
    %c0_15 = arith.constant 0 : index
    %c0_16 = arith.constant 0 : index
    %c0_17 = arith.constant 0 : index
    %9 = vector.load %arg8[%c0_15, %c0_16, %c0_17] : memref<18x18x256xf32, #tpu.memory_space<vmem>>, vector<16x16x256xf32>
    %10 = vector.shape_cast %9 : vector<16x16x256xf32> to vector<256x256xf32>
    %c0_18 = arith.constant 0 : index
    %c0_19 = arith.constant 0 : index
    %c0_20 = arith.constant 0 : index
    %11 = vector.load %arg3[%c0_18, %c0_19, %c0_20] : memref<9x256x128xf32, #tpu.memory_space<vmem>>, vector<1x256x128xf32>
    %12 = vector.shape_cast %11 : vector<1x256x128xf32> to vector<256x128xf32>
    %cst_21 = arith.constant dense<0.000000e+00> : vector<256x128xf32>
    %13 = tpu.matmul %10, %12, %cst_21 {dimension_numbers = #tpu.dot_dimension_numbers<[1], [0], [0], [1], [0, 0, 1, 1], [], []>} : vector<256x256xf32>, vector<256x128xf32>, vector<256x128xf32> -> vector<256x128xf32>
    %14 = arith.addf %8, %13 : vector<256x128xf32>
    %c0_22 = arith.constant 0 : index
    %c1_23 = arith.constant 1 : index
    %c0_24 = arith.constant 0 : index
    %15 = vector.load %arg8[%c0_22, %c1_23, %c0_24] : memref<18x18x256xf32, #tpu.memory_space<vmem>>, vector<16x16x256xf32>
    %16 = vector.shape_cast %15 : vector<16x16x256xf32> to vector<256x256xf32>
    %c1_25 = arith.constant 1 : index
    %c0_26 = arith.constant 0 : index
    %c0_27 = arith.constant 0 : index
    %17 = vector.load %arg3[%c1_25, %c0_26, %c0_27] : memref<9x256x128xf32, #tpu.memory_space<vmem>>, vector<1x256x128xf32>
    %18 = vector.shape_cast %17 : vector<1x256x128xf32> to vector<256x128xf32>
    %cst_28 = arith.constant dense<0.000000e+00> : vector<256x128xf32>
    %19 = tpu.matmul %16, %18, %cst_28 {dimension_numbers = #tpu.dot_dimension_numbers<[1], [0], [0], [1], [0, 0, 1, 1], [], []>} : vector<256x256xf32>, vector<256x128xf32>, vector<256x128xf32> -> vector<256x128xf32>
    %20 = arith.addf %14, %19 : vector<256x128xf32>
    %c0_29 = arith.constant 0 : index
    %c2 = arith.constant 2 : index
    %c0_30 = arith.constant 0 : index
    %21 = vector.load %arg8[%c0_29, %c2, %c0_30] : memref<18x18x256xf32, #tpu.memory_space<vmem>>, vector<16x16x256xf32>
    %22 = vector.shape_cast %21 : vector<16x16x256xf32> to vector<256x256xf32>
    %c2_31 = arith.constant 2 : index
    %c0_32 = arith.constant 0 : index
    %c0_33 = arith.constant 0 : index
    %23 = vector.load %arg3[%c2_31, %c0_32, %c0_33] : memref<9x256x128xf32, #tpu.memory_space<vmem>>, vector<1x256x128xf32>
    %24 = vector.shape_cast %23 : vector<1x256x128xf32> to vector<256x128xf32>
    %cst_34 = arith.constant dense<0.000000e+00> : vector<256x128xf32>
    %25 = tpu.matmul %22, %24, %cst_34 {dimension_numbers = #tpu.dot_dimension_numbers<[1], [0], [0], [1], [0, 0, 1, 1], [], []>} : vector<256x256xf32>, vector<256x128xf32>, vector<256x128xf32> -> vector<256x128xf32>
    %26 = arith.addf %20, %25 : vector<256x128xf32>
    %c1_35 = arith.constant 1 : index
    %c0_36 = arith.constant 0 : index
    %c0_37 = arith.constant 0 : index
    %27 = vector.load %arg8[%c1_35, %c0_36, %c0_37] : memref<18x18x256xf32, #tpu.memory_space<vmem>>, vector<16x16x256xf32>
    %28 = vector.shape_cast %27 : vector<16x16x256xf32> to vector<256x256xf32>
    %c3 = arith.constant 3 : index
    %c0_38 = arith.constant 0 : index
    %c0_39 = arith.constant 0 : index
    %29 = vector.load %arg3[%c3, %c0_38, %c0_39] : memref<9x256x128xf32, #tpu.memory_space<vmem>>, vector<1x256x128xf32>
    %30 = vector.shape_cast %29 : vector<1x256x128xf32> to vector<256x128xf32>
    %cst_40 = arith.constant dense<0.000000e+00> : vector<256x128xf32>
    %31 = tpu.matmul %28, %30, %cst_40 {dimension_numbers = #tpu.dot_dimension_numbers<[1], [0], [0], [1], [0, 0, 1, 1], [], []>} : vector<256x256xf32>, vector<256x128xf32>, vector<256x128xf32> -> vector<256x128xf32>
    %32 = arith.addf %26, %31 : vector<256x128xf32>
    %c1_41 = arith.constant 1 : index
    %c1_42 = arith.constant 1 : index
    %c0_43 = arith.constant 0 : index
    %33 = vector.load %arg8[%c1_41, %c1_42, %c0_43] : memref<18x18x256xf32, #tpu.memory_space<vmem>>, vector<16x16x256xf32>
    %34 = vector.shape_cast %33 : vector<16x16x256xf32> to vector<256x256xf32>
    %c4 = arith.constant 4 : index
    %c0_44 = arith.constant 0 : index
    %c0_45 = arith.constant 0 : index
    %35 = vector.load %arg3[%c4, %c0_44, %c0_45] : memref<9x256x128xf32, #tpu.memory_space<vmem>>, vector<1x256x128xf32>
    %36 = vector.shape_cast %35 : vector<1x256x128xf32> to vector<256x128xf32>
    %cst_46 = arith.constant dense<0.000000e+00> : vector<256x128xf32>
    %37 = tpu.matmul %34, %36, %cst_46 {dimension_numbers = #tpu.dot_dimension_numbers<[1], [0], [0], [1], [0, 0, 1, 1], [], []>} : vector<256x256xf32>, vector<256x128xf32>, vector<256x128xf32> -> vector<256x128xf32>
    %38 = arith.addf %32, %37 : vector<256x128xf32>
    %c1_47 = arith.constant 1 : index
    %c2_48 = arith.constant 2 : index
    %c0_49 = arith.constant 0 : index
    %39 = vector.load %arg8[%c1_47, %c2_48, %c0_49] : memref<18x18x256xf32, #tpu.memory_space<vmem>>, vector<16x16x256xf32>
    %40 = vector.shape_cast %39 : vector<16x16x256xf32> to vector<256x256xf32>
    %c5 = arith.constant 5 : index
    %c0_50 = arith.constant 0 : index
    %c0_51 = arith.constant 0 : index
    %41 = vector.load %arg3[%c5, %c0_50, %c0_51] : memref<9x256x128xf32, #tpu.memory_space<vmem>>, vector<1x256x128xf32>
    %42 = vector.shape_cast %41 : vector<1x256x128xf32> to vector<256x128xf32>
    %cst_52 = arith.constant dense<0.000000e+00> : vector<256x128xf32>
    %43 = tpu.matmul %40, %42, %cst_52 {dimension_numbers = #tpu.dot_dimension_numbers<[1], [0], [0], [1], [0, 0, 1, 1], [], []>} : vector<256x256xf32>, vector<256x128xf32>, vector<256x128xf32> -> vector<256x128xf32>
    %44 = arith.addf %38, %43 : vector<256x128xf32>
    %c2_53 = arith.constant 2 : index
    %c0_54 = arith.constant 0 : index
    %c0_55 = arith.constant 0 : index
    %45 = vector.load %arg8[%c2_53, %c0_54, %c0_55] : memref<18x18x256xf32, #tpu.memory_space<vmem>>, vector<16x16x256xf32>
    %46 = vector.shape_cast %45 : vector<16x16x256xf32> to vector<256x256xf32>
    %c6 = arith.constant 6 : index
    %c0_56 = arith.constant 0 : index
    %c0_57 = arith.constant 0 : index
    %47 = vector.load %arg3[%c6, %c0_56, %c0_57] : memref<9x256x128xf32, #tpu.memory_space<vmem>>, vector<1x256x128xf32>
    %48 = vector.shape_cast %47 : vector<1x256x128xf32> to vector<256x128xf32>
    %cst_58 = arith.constant dense<0.000000e+00> : vector<256x128xf32>
    %49 = tpu.matmul %46, %48, %cst_58 {dimension_numbers = #tpu.dot_dimension_numbers<[1], [0], [0], [1], [0, 0, 1, 1], [], []>} : vector<256x256xf32>, vector<256x128xf32>, vector<256x128xf32> -> vector<256x128xf32>
    %50 = arith.addf %44, %49 : vector<256x128xf32>
    %c2_59 = arith.constant 2 : index
    %c1_60 = arith.constant 1 : index
    %c0_61 = arith.constant 0 : index
    %51 = vector.load %arg8[%c2_59, %c1_60, %c0_61] : memref<18x18x256xf32, #tpu.memory_space<vmem>>, vector<16x16x256xf32>
    %52 = vector.shape_cast %51 : vector<16x16x256xf32> to vector<256x256xf32>
    %c7 = arith.constant 7 : index
    %c0_62 = arith.constant 0 : index
    %c0_63 = arith.constant 0 : index
    %53 = vector.load %arg3[%c7, %c0_62, %c0_63] : memref<9x256x128xf32, #tpu.memory_space<vmem>>, vector<1x256x128xf32>
    %54 = vector.shape_cast %53 : vector<1x256x128xf32> to vector<256x128xf32>
    %cst_64 = arith.constant dense<0.000000e+00> : vector<256x128xf32>
    %55 = tpu.matmul %52, %54, %cst_64 {dimension_numbers = #tpu.dot_dimension_numbers<[1], [0], [0], [1], [0, 0, 1, 1], [], []>} : vector<256x256xf32>, vector<256x128xf32>, vector<256x128xf32> -> vector<256x128xf32>
    %56 = arith.addf %50, %55 : vector<256x128xf32>
    %c2_65 = arith.constant 2 : index
    %c2_66 = arith.constant 2 : index
    %c0_67 = arith.constant 0 : index
    %57 = vector.load %arg8[%c2_65, %c2_66, %c0_67] : memref<18x18x256xf32, #tpu.memory_space<vmem>>, vector<16x16x256xf32>
    %58 = vector.shape_cast %57 : vector<16x16x256xf32> to vector<256x256xf32>
    %c8 = arith.constant 8 : index
    %c0_68 = arith.constant 0 : index
    %c0_69 = arith.constant 0 : index
    %59 = vector.load %arg3[%c8, %c0_68, %c0_69] : memref<9x256x128xf32, #tpu.memory_space<vmem>>, vector<1x256x128xf32>
    %60 = vector.shape_cast %59 : vector<1x256x128xf32> to vector<256x128xf32>
    %cst_70 = arith.constant dense<0.000000e+00> : vector<256x128xf32>
    %61 = tpu.matmul %58, %60, %cst_70 {dimension_numbers = #tpu.dot_dimension_numbers<[1], [0], [0], [1], [0, 0, 1, 1], [], []>} : vector<256x256xf32>, vector<256x128xf32>, vector<256x128xf32> -> vector<256x128xf32>
    %62 = arith.addf %56, %61 : vector<256x128xf32>
    %c0_71 = arith.constant 0 : index
    %c0_72 = arith.constant 0 : index
    %63 = vector.load %arg4[%c0_71, %c0_72] : memref<1x128xf32, #tpu.memory_space<vmem>>, vector<1x128xf32>
    %64 = vector.broadcast %63 : vector<1x128xf32> to vector<256x128xf32>
    %65 = arith.addf %62, %64 : vector<256x128xf32>
    %cst_73 = arith.constant 0.000000e+00 : f32
    %66 = vector.broadcast %cst_73 : f32 to vector<256x128xf32>
    %67 = arith.maximumf %65, %66 : vector<256x128xf32>
    %68 = vector.shape_cast %67 : vector<256x128xf32> to vector<16x16x128xf32>
    %c1_74 = arith.constant 1 : index
    %c1_75 = arith.constant 1 : index
    %c0_76 = arith.constant 0 : index
    %69 = vector.load %arg8[%c1_74, %c1_75, %c0_76] : memref<18x18x256xf32, #tpu.memory_space<vmem>>, vector<16x16x128xf32>
    tpu.vector_store %arg8[%c1_74, %c1_75, %c0_76], %68 {strides = array<i32>} : memref<18x18x256xf32, #tpu.memory_space<vmem>>, vector<16x16x128xf32>,
    %cst_77 = arith.constant 0.000000e+00 : f32
    %70 = vector.broadcast %cst_77 : f32 to vector<256x128xf32>
    %c0_78 = arith.constant 0 : index
    %c0_79 = arith.constant 0 : index
    %c0_80 = arith.constant 0 : index
    %71 = vector.load %arg8[%c0_78, %c0_79, %c0_80] : memref<18x18x256xf32, #tpu.memory_space<vmem>>, vector<16x16x128xf32>
    %72 = vector.shape_cast %71 : vector<16x16x128xf32> to vector<256x128xf32>
    %c0_81 = arith.constant 0 : index
    %c0_82 = arith.constant 0 : index
    %c0_83 = arith.constant 0 : index
    %73 = vector.load %arg5[%c0_81, %c0_82, %c0_83] : memref<9x128x128xf32, #tpu.memory_space<vmem>>, vector<1x128x128xf32>
    %74 = vector.shape_cast %73 : vector<1x128x128xf32> to vector<128x128xf32>
    %cst_84 = arith.constant dense<0.000000e+00> : vector<256x128xf32>
    %75 = tpu.matmul %72, %74, %cst_84 {dimension_numbers = #tpu.dot_dimension_numbers<[1], [0], [0], [1], [0, 0, 1, 1], [], []>} : vector<256x128xf32>, vector<128x128xf32>, vector<256x128xf32> -> vector<256x128xf32>
    %76 = arith.addf %70, %75 : vector<256x128xf32>
    %c0_85 = arith.constant 0 : index
    %c1_86 = arith.constant 1 : index
    %c0_87 = arith.constant 0 : index
    %77 = vector.load %arg8[%c0_85, %c1_86, %c0_87] : memref<18x18x256xf32, #tpu.memory_space<vmem>>, vector<16x16x128xf32>
    %78 = vector.shape_cast %77 : vector<16x16x128xf32> to vector<256x128xf32>
    %c1_88 = arith.constant 1 : index
    %c0_89 = arith.constant 0 : index
    %c0_90 = arith.constant 0 : index
    %79 = vector.load %arg5[%c1_88, %c0_89, %c0_90] : memref<9x128x128xf32, #tpu.memory_space<vmem>>, vector<1x128x128xf32>
    %80 = vector.shape_cast %79 : vector<1x128x128xf32> to vector<128x128xf32>
    %cst_91 = arith.constant dense<0.000000e+00> : vector<256x128xf32>
    %81 = tpu.matmul %78, %80, %cst_91 {dimension_numbers = #tpu.dot_dimension_numbers<[1], [0], [0], [1], [0, 0, 1, 1], [], []>} : vector<256x128xf32>, vector<128x128xf32>, vector<256x128xf32> -> vector<256x128xf32>
    %82 = arith.addf %76, %81 : vector<256x128xf32>
    %c0_92 = arith.constant 0 : index
    %c2_93 = arith.constant 2 : index
    %c0_94 = arith.constant 0 : index
    %83 = vector.load %arg8[%c0_92, %c2_93, %c0_94] : memref<18x18x256xf32, #tpu.memory_space<vmem>>, vector<16x16x128xf32>
    %84 = vector.shape_cast %83 : vector<16x16x128xf32> to vector<256x128xf32>
    %c2_95 = arith.constant 2 : index
    %c0_96 = arith.constant 0 : index
    %c0_97 = arith.constant 0 : index
    %85 = vector.load %arg5[%c2_95, %c0_96, %c0_97] : memref<9x128x128xf32, #tpu.memory_space<vmem>>, vector<1x128x128xf32>
    %86 = vector.shape_cast %85 : vector<1x128x128xf32> to vector<128x128xf32>
    %cst_98 = arith.constant dense<0.000000e+00> : vector<256x128xf32>
    %87 = tpu.matmul %84, %86, %cst_98 {dimension_numbers = #tpu.dot_dimension_numbers<[1], [0], [0], [1], [0, 0, 1, 1], [], []>} : vector<256x128xf32>, vector<128x128xf32>, vector<256x128xf32> -> vector<256x128xf32>
    %88 = arith.addf %82, %87 : vector<256x128xf32>
    %c1_99 = arith.constant 1 : index
    %c0_100 = arith.constant 0 : index
    %c0_101 = arith.constant 0 : index
    %89 = vector.load %arg8[%c1_99, %c0_100, %c0_101] : memref<18x18x256xf32, #tpu.memory_space<vmem>>, vector<16x16x128xf32>
    %90 = vector.shape_cast %89 : vector<16x16x128xf32> to vector<256x128xf32>
    %c3_102 = arith.constant 3 : index
    %c0_103 = arith.constant 0 : index
    %c0_104 = arith.constant 0 : index
    %91 = vector.load %arg5[%c3_102, %c0_103, %c0_104] : memref<9x128x128xf32, #tpu.memory_space<vmem>>, vector<1x128x128xf32>
    %92 = vector.shape_cast %91 : vector<1x128x128xf32> to vector<128x128xf32>
    %cst_105 = arith.constant dense<0.000000e+00> : vector<256x128xf32>
    %93 = tpu.matmul %90, %92, %cst_105 {dimension_numbers = #tpu.dot_dimension_numbers<[1], [0], [0], [1], [0, 0, 1, 1], [], []>} : vector<256x128xf32>, vector<128x128xf32>, vector<256x128xf32> -> vector<256x128xf32>
    %94 = arith.addf %88, %93 : vector<256x128xf32>
    %c1_106 = arith.constant 1 : index
    %c1_107 = arith.constant 1 : index
    %c0_108 = arith.constant 0 : index
    %95 = vector.load %arg8[%c1_106, %c1_107, %c0_108] : memref<18x18x256xf32, #tpu.memory_space<vmem>>, vector<16x16x128xf32>
    %96 = vector.shape_cast %95 : vector<16x16x128xf32> to vector<256x128xf32>
    %c4_109 = arith.constant 4 : index
    %c0_110 = arith.constant 0 : index
    %c0_111 = arith.constant 0 : index
    %97 = vector.load %arg5[%c4_109, %c0_110, %c0_111] : memref<9x128x128xf32, #tpu.memory_space<vmem>>, vector<1x128x128xf32>
    %98 = vector.shape_cast %97 : vector<1x128x128xf32> to vector<128x128xf32>
    %cst_112 = arith.constant dense<0.000000e+00> : vector<256x128xf32>
    %99 = tpu.matmul %96, %98, %cst_112 {dimension_numbers = #tpu.dot_dimension_numbers<[1], [0], [0], [1], [0, 0, 1, 1], [], []>} : vector<256x128xf32>, vector<128x128xf32>, vector<256x128xf32> -> vector<256x128xf32>
    %100 = arith.addf %94, %99 : vector<256x128xf32>
    %c1_113 = arith.constant 1 : index
    %c2_114 = arith.constant 2 : index
    %c0_115 = arith.constant 0 : index
    %101 = vector.load %arg8[%c1_113, %c2_114, %c0_115] : memref<18x18x256xf32, #tpu.memory_space<vmem>>, vector<16x16x128xf32>
    %102 = vector.shape_cast %101 : vector<16x16x128xf32> to vector<256x128xf32>
    %c5_116 = arith.constant 5 : index
    %c0_117 = arith.constant 0 : index
    %c0_118 = arith.constant 0 : index
    %103 = vector.load %arg5[%c5_116, %c0_117, %c0_118] : memref<9x128x128xf32, #tpu.memory_space<vmem>>, vector<1x128x128xf32>
    %104 = vector.shape_cast %103 : vector<1x128x128xf32> to vector<128x128xf32>
    %cst_119 = arith.constant dense<0.000000e+00> : vector<256x128xf32>
    %105 = tpu.matmul %102, %104, %cst_119 {dimension_numbers = #tpu.dot_dimension_numbers<[1], [0], [0], [1], [0, 0, 1, 1], [], []>} : vector<256x128xf32>, vector<128x128xf32>, vector<256x128xf32> -> vector<256x128xf32>
    %106 = arith.addf %100, %105 : vector<256x128xf32>
    %c2_120 = arith.constant 2 : index
    %c0_121 = arith.constant 0 : index
    %c0_122 = arith.constant 0 : index
    %107 = vector.load %arg8[%c2_120, %c0_121, %c0_122] : memref<18x18x256xf32, #tpu.memory_space<vmem>>, vector<16x16x128xf32>
    %108 = vector.shape_cast %107 : vector<16x16x128xf32> to vector<256x128xf32>
    %c6_123 = arith.constant 6 : index
    %c0_124 = arith.constant 0 : index
    %c0_125 = arith.constant 0 : index
    %109 = vector.load %arg5[%c6_123, %c0_124, %c0_125] : memref<9x128x128xf32, #tpu.memory_space<vmem>>, vector<1x128x128xf32>
    %110 = vector.shape_cast %109 : vector<1x128x128xf32> to vector<128x128xf32>
    %cst_126 = arith.constant dense<0.000000e+00> : vector<256x128xf32>
    %111 = tpu.matmul %108, %110, %cst_126 {dimension_numbers = #tpu.dot_dimension_numbers<[1], [0], [0], [1], [0, 0, 1, 1], [], []>} : vector<256x128xf32>, vector<128x128xf32>, vector<256x128xf32> -> vector<256x128xf32>
    %112 = arith.addf %106, %111 : vector<256x128xf32>
    %c2_127 = arith.constant 2 : index
    %c1_128 = arith.constant 1 : index
    %c0_129 = arith.constant 0 : index
    %113 = vector.load %arg8[%c2_127, %c1_128, %c0_129] : memref<18x18x256xf32, #tpu.memory_space<vmem>>, vector<16x16x128xf32>
    %114 = vector.shape_cast %113 : vector<16x16x128xf32> to vector<256x128xf32>
    %c7_130 = arith.constant 7 : index
    %c0_131 = arith.constant 0 : index
    %c0_132 = arith.constant 0 : index
    %115 = vector.load %arg5[%c7_130, %c0_131, %c0_132] : memref<9x128x128xf32, #tpu.memory_space<vmem>>, vector<1x128x128xf32>
    %116 = vector.shape_cast %115 : vector<1x128x128xf32> to vector<128x128xf32>
    %cst_133 = arith.constant dense<0.000000e+00> : vector<256x128xf32>
    %117 = tpu.matmul %114, %116, %cst_133 {dimension_numbers = #tpu.dot_dimension_numbers<[1], [0], [0], [1], [0, 0, 1, 1], [], []>} : vector<256x128xf32>, vector<128x128xf32>, vector<256x128xf32> -> vector<256x128xf32>
    %118 = arith.addf %112, %117 : vector<256x128xf32>
    %c2_134 = arith.constant 2 : index
    %c2_135 = arith.constant 2 : index
    %c0_136 = arith.constant 0 : index
    %119 = vector.load %arg8[%c2_134, %c2_135, %c0_136] : memref<18x18x256xf32, #tpu.memory_space<vmem>>, vector<16x16x128xf32>
    %120 = vector.shape_cast %119 : vector<16x16x128xf32> to vector<256x128xf32>
    %c8_137 = arith.constant 8 : index
    %c0_138 = arith.constant 0 : index
    %c0_139 = arith.constant 0 : index
    %121 = vector.load %arg5[%c8_137, %c0_138, %c0_139] : memref<9x128x128xf32, #tpu.memory_space<vmem>>, vector<1x128x128xf32>
    %122 = vector.shape_cast %121 : vector<1x128x128xf32> to vector<128x128xf32>
    %cst_140 = arith.constant dense<0.000000e+00> : vector<256x128xf32>
    %123 = tpu.matmul %120, %122, %cst_140 {dimension_numbers = #tpu.dot_dimension_numbers<[1], [0], [0], [1], [0, 0, 1, 1], [], []>} : vector<256x128xf32>, vector<128x128xf32>, vector<256x128xf32> -> vector<256x128xf32>
    %124 = arith.addf %118, %123 : vector<256x128xf32>
    %c0_141 = arith.constant 0 : index
    %c0_142 = arith.constant 0 : index
    %125 = vector.load %arg6[%c0_141, %c0_142] : memref<1x128xf32, #tpu.memory_space<vmem>>, vector<1x128xf32>
    %126 = vector.broadcast %125 : vector<1x128xf32> to vector<256x128xf32>
    %127 = arith.addf %124, %126 : vector<256x128xf32>
    %cst_143 = arith.constant 0.000000e+00 : f32
    %128 = vector.broadcast %cst_143 : f32 to vector<256x128xf32>
    %129 = arith.maximumf %127, %128 : vector<256x128xf32>
    %130 = vector.shape_cast %129 : vector<256x128xf32> to vector<16x16x128xf32>
    %c0_144 = arith.constant 0 : index
    %c0_145 = arith.constant 0 : index
    %c0_146 = arith.constant 0 : index
    %c0_147 = arith.constant 0 : index
    %131 = vector.load %arg7[%c0_144, %c0_145, %c0_146, %c0_147] : memref<1x16x16x128xf32, #tpu.memory_space<vmem>>, vector<1x16x16x128xf32>
    %132 = vector.shape_cast %131 : vector<1x16x16x128xf32> to vector<16x16x128xf32>
    %133 = vector.shape_cast %130 : vector<16x16x128xf32> to vector<1x16x16x128xf32>
    tpu.vector_store %arg7[%c0_144, %c0_145, %c0_146, %c0_147], %133 {strides = array<i32>} : memref<1x16x16x128xf32, #tpu.memory_space<vmem>>, vector<1x16x16x128xf32>,
    return
  }
  func.func @transform_0(%arg0: i32) -> (i32, i32, i32, i32) {
    %c0_i32 = arith.constant 0 : i32
    %c0_i32_0 = arith.constant 0 : i32
    %c0_i32_1 = arith.constant 0 : i32
    %c0_i32_2 = arith.constant 0 : i32
    return %arg0, %c0_i32, %c0_i32_0, %c0_i32_1 : i32, i32, i32, i32
  }
  func.func @transform_1(%arg0: i32) -> (i32, i32, i32, i32) {
    %c0_i32 = arith.constant 0 : i32
    %c0_i32_0 = arith.constant 0 : i32
    %c0_i32_1 = arith.constant 0 : i32
    %c0_i32_2 = arith.constant 0 : i32
    return %arg0, %c0_i32, %c0_i32_0, %c0_i32_1 : i32, i32, i32, i32
  }
  func.func @transform_2(%arg0: i32) -> (i32, i32, i32) {
    %c0_i32 = arith.constant 0 : i32
    %c0_i32_0 = arith.constant 0 : i32
    %c0_i32_1 = arith.constant 0 : i32
    %c0_i32_2 = arith.constant 0 : i32
    return %c0_i32, %c0_i32_0, %c0_i32_1 : i32, i32, i32
  }
  func.func @transform_3(%arg0: i32) -> (i32, i32) {
    %c0_i32 = arith.constant 0 : i32
    %c0_i32_0 = arith.constant 0 : i32
    %c0_i32_1 = arith.constant 0 : i32
    return %c0_i32, %c0_i32_0 : i32, i32
  }
  func.func @transform_4(%arg0: i32) -> (i32, i32, i32) {
    %c0_i32 = arith.constant 0 : i32
    %c0_i32_0 = arith.constant 0 : i32
    %c0_i32_1 = arith.constant 0 : i32
    %c0_i32_2 = arith.constant 0 : i32
    return %c0_i32, %c0_i32_0, %c0_i32_1 : i32, i32, i32
  }
  func.func @transform_5(%arg0: i32) -> (i32, i32) {
    %c0_i32 = arith.constant 0 : i32
    %c0_i32_0 = arith.constant 0 : i32
    %c0_i32_1 = arith.constant 0 : i32
    return %c0_i32, %c0_i32_0 : i32, i32
  }
  func.func @transform_6(%arg0: i32) -> (i32, i32, i32, i32) {
    %c0_i32 = arith.constant 0 : i32
    %c0_i32_0 = arith.constant 0 : i32
    %c0_i32_1 = arith.constant 0 : i32
    %c0_i32_2 = arith.constant 0 : i32
    return %arg0, %c0_i32, %c0_i32_0, %c0_i32_1 : i32, i32, i32, i32
  }
}

</mosaic_0001>

<bundles_post_ra>
// kernel: upblock_forward.1
= control target key start
LH: loop header
LB: loop body
LE: loop exit
PB: predicated region body
PF: predicated region fallthrough
CT: control target
= control target key end

     0   :  { %11 = vsyncpa [#allocation4], 0  ;;  %s16225_s0 = inlined_call_operand.vmem [shape: f32[2,16,16,128], index: 0, kind: input, shape index: {}]   ;;  %s16226_s1 = inlined_call_operand.vmem [shape: f32[2,16,16,128], index: 1, kind: input, shape index: {}]   ;;  %s16227_s2 = inlined_call_operand.vmem [shape: f32[9,256,128], index: 2, kind: input, shape index: {}]   ;;  %s16228_s3 = inlined_call_operand.vmem [shape: f32[1,128], index: 3, kind: input, shape index: {}]   ;;  %s16229_s4 = inlined_call_operand.hbm [shape: f32[9,128,128], index: 4, kind: input, shape index: {}]   ;;  %s16230_s5 = inlined_call_operand.vmem [shape: f32[1,128], index: 5, kind: input, shape index: {}]   ;;  %s16231_s6 = inlined_call_operand.hbm [shape: f32[2,16,16,128], index: 6, kind: output, shape index: {}]  }
   0x1   :  { %12 = vsyncpa [#allocation5], 0 }
   0x2   :  { %14 = vsyncpa [#allocation5 + $0x1], 0  ;;  %s12634_s21 = smov 0   ;;  %s12636_s22 = smov 0  }
   0x3   :  { %s12638_s23 = smov 0   ;;  %s12640_s24 = smov 0  }
   0x4 LB: > { %s12655_s25 = sadd.s32 4294967295, %s12589_s24   ;;  %s9906_s26 = sadd.s32 4294967294, %s12589_s24   ;;  %s12589_s24 = sphi %s12640_s24, %s16424_s24   ;;  %s12585_s23 = sphi %s12638_s23, %s16423_s23   ;;  %s12581_s22 = sphi %s12636_s22, %s16422_s22   ;;  %s12577_s21 = sphi %s12634_s21, %s16421_s21  }
   0x5   : > { %s12659_s27 = sadd.s32 1, %s12589_s24   ;;  %s163_s28 = sadd.s32 1, %s12585_s23 }
   0x6   : > { %s160_s29 = ssub.s32 %s12589_s24, %s12659_s27  ;;  %p173_p0 = scmp.ne.s32.totalorder %s12585_s23, %s12581_s22 }
   0x7   : > { %p161_p1 = scmp.eq.s32.totalorder %s160_s29, 0  ;;  %p174_p2 = scmp.eq.s32.totalorder %s12655_s25, 1 }
   0x8   : > { %p179_p3 = scmp.ne.s32.totalorder %s12581_s22, %s12577_s21  ;;  %p180_p4 = scmp.eq.s32.totalorder %s9906_s26, 1 }
   0x9   : > { %s12670_s30 = scalar_select %p161_p1, %s12585_s23, %s163_s28  }
   0xa   : > { %p12672_p5 = por %p174_p2, %p173_p0  ;;  %p12676_p6 = por %p180_p4, %p179_p3 }
   0xb   : > { %p9907_p7 = scmp.ge.s32.totalorder %s12589_s24, 1  ;;  %p187_p8 = scmp.lt.s32.totalorder %s12589_s24, 3 }
   0xc   : > { %s16243_s7 = scalar_select %p12672_p5, 1, 0 }
   0xd   : > { %s16244_s8 = scalar_select %p12676_p6, 1, 0 }
   0xe   : > { %p16232_p9 = scmp.eq.s32.totalorder %s12655_s25, 0  ;;  %p12683_p10 = pnand %p9907_p7, %p187_p8 }
   0xf   : > { %s12591_s10 = smov [#allocation3]   ;;  %s12495_s15 = scalar_lea.hbm %s16229_s4, 18432 }
  0x10   : > { %s16245_s9 = scalar_select %p12683_p10, 1, 0 }
  0x11   : > { %s205_s11 = sshll.u32 %s12591_s10, 4  ;;  %p12349_p11 = pneg %p12683_p10  ;;  %s206_s11 = int_to_ptr.vmem [resolvable:$true] %s205_s11 }
  0x12   : > { %p12496_p13 = scmp.ne.s32.totalorder %s16229_s4, %s12495_s15  ;;  %p12502_p3 = scmp.lt.u32.totalorder %s12495_s15, %s16229_s4 }
  0x13   : > { %p12691_p12 = pnand %p16232_p9, %p12349_p11 }
  0x15   : > { %p12497_p0 = pneg %p12691_p12 }
  0x17   : > { %p12498_p1 = pnand %p12497_p0, %p12496_p13 }
  0x19   : > { %p12499_p2 = pneg %p12498_p1 }
  0x1b   : > { %p12504_p4 = pnand %p12502_p3, %p12499_p2 }
  0x1d   : > { %12507 = shalt.err (!%p12504_p4)
}
  0x1e   : > { %s12508_s20 = scalar_lea.vmem %s206_s11, 18432  ;;  %p12516_p9 = scmp.lt.s32.totalorder %s206_s11, %s206_s11 }
  0x1f   : > { %p12509_p7 = scmp.ne.s32.totalorder %s206_s11, %s12508_s20  ;;  %p12517_p6 = scmp.lt.s32.totalorder %s12508_s20, %s12508_s20 }
  0x21   : > { %p12511_p8 = pnand %p12509_p7, %p12497_p0  ;;  %p12518_p5 = por %p12517_p6, %p12516_p9 }
  0x23   : > { %p12512_p11 = pneg %p12511_p8 }
  0x25   : > { %p12519_p10 = pnand %p12518_p5, %p12512_p11 }
  0x27   : > { %12522 = shalt.err (!%p12519_p10)
}
  0x28   : > { %s12592_s26 = smov 128   ;;  %s12593_s28 = smov 8  }
  0x29   : > { %12352 = dma.hbm_to_vmem [thread:$0]  (!%p12691_p12), %s16229_s4, 18432, %s206_s11, [#allocation4], %s12592_s26, %s12592_s26, %s12593_s28  }
  0x2a   : > { %p16247_p13 = scmp.ne.s32.totalorder %s16245_s9, 0 }
  0x2c   : > { %240 = sbr.rel (%p16247_p13) target bundleno = 1951 (0x79f), region = 44 }
  0x33   : > { %p16248_p1 = scmp.eq.s32.totalorder %s12655_s25, 0 }
  0x35   : > { %12568 = dma.done.wait (%p16248_p1), [#allocation4], 18432   ;;  %p16249_p0 = pmov %p16248_p1 }
  0x36   : > { %v16235_v0 = vmov 0.0|0.0   ;;  %v12595_v1 = vmov 0.0   ;;  %p275_p5 = scmp.lt.s32.totalorder %s12655_s25, 1  ;;  %v9917_v2 = vld [vmem:[%s16227_s2 + $0x100] sm:$0xff]  ;;  %v9918_v3 = vld [vmem:[%s16227_s2 + $0x108] sm:$0xff]  ;;  %v9919_v4 = vld [vmem:[%s16227_s2 + $0x110] sm:$0xff] }
  0x37   : > { %12570 = vsyncadd (%p16249_p0), [#allocation4], 4294948864  ;;  %11335 = vmatprep.subr.bf16.mxu0 %v16235_v0  ;;  %286 = vst [vmem:[#allocation2 + $0x8] sm:$0xff] %v12595_v1  ;;  %11479 = vmatprep.subr.bf16.mxu1 %v16235_v0  ;;  %v11336_v5 = vpack.c.bf16 %v9918_v3, %v9917_v2  ;;  %v9920_v6 = vld [vmem:[%s16227_s2 + $0x118] sm:$0xff]  ;;  %v9921_v8 = vld [vmem:[%s16227_s2 + $0x120] sm:$0xff]  ;;  %v12820_v13 = vrot.slane %v12595_v1, 1 }
  0x38   : > { %285 = vst [vmem:[#allocation2] sm:$0xff] %v12595_v1  ;;  %289 = vst [vmem:[#allocation2 + $0x20] sm:$0x3] %v12595_v1  ;;  %s276_s18 = scalar_select %p275_p5, %s12655_s25, 1  ;;  %v11339_v7 = vpack.c.bf16 %v9920_v6, %v9919_v4  ;;  %v9922_v9 = vld [vmem:[%s16227_s2 + $0x128] sm:$0xff]  ;;  %v9923_v11 = vld [vmem:[%s16227_s2 + $0x130] sm:$0xff] }
  0x39   : > { %290 = vst [vmem:[#allocation2 + $0x28] sm:$0x3] %v12595_v1  ;;  %291 = vst [vmem:[#allocation2 + $0x30] sm:$0xff] %v12595_v1  ;;  %11337 = vmatpush1.bf16.msra.mxu0 %v11336_v5  ;;  %v11342_v10 = vpack.c.bf16 %v9922_v9, %v9921_v8  ;;  %v9924_v12 = vld [vmem:[%s16227_s2 + $0x138] sm:$0xff]  ;;  %vm1067_vm0 = vcmask 1046528   ;;  %v9925_v17 = vld [vmem:[%s16227_s2 + $0x140] sm:$0xff] }
  0x3a   : > { %292 = vst [vmem:[#allocation2 + $0x38] sm:$0xff] %v12595_v1  ;;  %295 = vst [vmem:[#allocation2 + $0x50] sm:$0x3] %v12595_v1  ;;  %11338 = vmatprep.subr.bf16.mxu0 %v16235_v0  ;;  %s10180_s29 = sshll.u32 %s276_s18, 8  ;;  %v11345_v15 = vpack.c.bf16 %v9924_v12, %v9923_v11  ;;  %v9926_v18 = vld [vmem:[%s16227_s2 + $0x148] sm:$0xff]  ;;  %vm457_vm1 = vcmask 1040384  }
  0x3b   : > { %296 = vst [vmem:[#allocation2 + $0x58] sm:$0x3] %v12595_v1  ;;  %297 = vst [vmem:[#allocation2 + $0x60] sm:$0xff] %v12595_v1  ;;  %s12825_s15 = scalar_lea.vmem %s16226_s1, %s10180_s29  ;;  %s12830_s18 = scalar_lea.vmem %s16225_s0, %s10180_s29  ;;  %v11348_v29 = vpack.c.bf16 %v9926_v18, %v9925_v17  ;;  %v9927_v34 = vld [vmem:[%s16227_s2 + $0x150] sm:$0xff]  ;;  %v9928_v35 = vld [vmem:[%s16227_s2 + $0x158] sm:$0xff]  ;;  %vm1903_vm2 = vcmask 1045504  }
  0x3c   : > { %298 = vst [vmem:[#allocation2 + $0x68] sm:$0xff] %v12595_v1  ;;  %301 = vst [vmem:[#allocation2 + $0x80] sm:$0x3] %v12595_v1  ;;  %v603_v19 = vld [vmem:[%s12825_s15] sm:$0xff]  ;;  %v604_v21 = vld [vmem:[%s12825_s15 + $0x8] sm:$0xff]  ;;  %v11351_v50 = vpack.c.bf16 %v9928_v35, %v9927_v34  ;;  %s10182_s16 = sshll.u32 %s12655_s25, 12 }
  0x3d   : > { %302 = vst [vmem:[#allocation2 + $0x88] sm:$0x3] %v12595_v1  ;;  %303 = vst [vmem:[#allocation2 + $0x90] sm:$0xff] %v12595_v1  ;;  %11340 = vmatpush1.bf16.msra.mxu0 %v11339_v7  ;;  %v667_v22 = vrot.slane %v603_v19, 7  ;;  %v393_v23 = vld [vmem:[%s12830_s18] sm:$0xff]  ;;  %v394_v24 = vld [vmem:[%s12830_s18 + $0x8] sm:$0xff]  ;;  %s16176_s26 = scalar_lea.hbm %s16231_s6, %s10182_s16 }
  0x3e   : > { %304 = vst [vmem:[#allocation2 + $0x98] sm:$0xff] %v12595_v1  ;;  %307 = vst [vmem:[#allocation2 + $0xb0] sm:$0x3] %v12595_v1  ;;  %11341 = vmatprep.subr.bf16.mxu0 %v16235_v0  ;;  %v908_v14 = vld [vmem:[#allocation2 + $0x8] sm:$0xfe]  ;;  %v668_v25 = vrot.slane %v604_v21, 7 }
  0x3f   : > { %308 = vst [vmem:[#allocation2 + $0xb8] sm:$0x3] %v12595_v1  ;;  %309 = vst [vmem:[#allocation2 + $0xc0] sm:$0xff] %v12595_v1  ;;  %v1071_v16 = vrot.slane %v908_v14, 1  ;;  %v458_v26 = vrot.slane %v393_v23, 7  ;;  %v459_v27 = vrot.slane %v394_v24, 7 }
  0x40   : > { %310 = vst [vmem:[#allocation2 + $0xc8] sm:$0xff] %v12595_v1  ;;  %313 = vst [vmem:[#allocation2 + $0xe0] sm:$0x3] %v12595_v1  ;;  %v605_v28 = vld [vmem:[%s12825_s15 + $0x10] sm:$0xff]  ;;  %v606_v30 = vld [vmem:[%s12825_s15 + $0x18] sm:$0xff]  ;;  %v12857_v36 = vsel %vm457_vm1, %v667_v22, %v668_v25  ;;  %p16419_p9 = scmp.ne.s32.totalorder %s16243_s7, 0 }
  0x41   : > { %314 = vst [vmem:[#allocation2 + $0xe8] sm:$0x3] %v12595_v1  ;;  %315 = vst [vmem:[#allocation2 + $0xf0] sm:$0xff] %v12595_v1  ;;  %11343 = vmatpush1.bf16.msra.mxu0 %v11342_v10  ;;  %v1073_v20 = vsel %vm1067_vm0, %v1071_v16, %v12820_v13  ;;  %v670_v31 = vrot.slane %v605_v28, 7  ;;  %v395_v32 = vld [vmem:[%s12830_s18 + $0x10] sm:$0xff]  ;;  %v396_v33 = vld [vmem:[%s12830_s18 + $0x18] sm:$0xff]  ;;  %v12860_v37 = vsel %vm457_vm1, %v458_v26, %v459_v27 }
  0x42   : > { %316 = vst [vmem:[#allocation2 + $0xf8] sm:$0xff] %v12595_v1  ;;  %319 = vst [vmem:[#allocation2 + $0x110] sm:$0x3] %v12595_v1  ;;  %11344 = vmatprep.subr.bf16.mxu0 %v16235_v0  ;;  %1389 = vmatprep.mubr.f32.mxu0 %v1073_v20  ;;  %v671_v38 = vrot.slane %v606_v30, 7  ;;  %v461_v39 = vrot.slane %v395_v32, 7  ;;  %v607_v40 = vld [vmem:[%s12825_s15 + $0x20] sm:$0xff] }
  0x43   : > { %320 = vst [vmem:[#allocation2 + $0x118] sm:$0x3] %v12595_v1  ;;  %321 = vst [vmem:[#allocation2 + $0x120] sm:$0xff] %v12595_v1  ;;  %v462_v41 = vrot.slane %v396_v33, 7  ;;  %v608_v42 = vld [vmem:[%s12825_s15 + $0x28] sm:$0xff]  ;;  %v397_v43 = vld [vmem:[%s12830_s18 + $0x20] sm:$0xff] }
  0x44   : > { %322 = vst [vmem:[#allocation2 + $0x128] sm:$0xff] %v12595_v1  ;;  %325 = vst [vmem:[#allocation2 + $0x140] sm:$0x3] %v12595_v1  ;;  %v398_v44 = vld [vmem:[%s12830_s18 + $0x28] sm:$0xff]  ;;  %v12869_v45 = vsel %vm457_vm1, %v670_v31, %v671_v38  ;;  %v673_v46 = vrot.slane %v607_v40, 7  ;;  %v674_v47 = vrot.slane %v608_v42, 7 }
  0x45   : > { %326 = vst [vmem:[#allocation2 + $0x148] sm:$0x3] %v12595_v1  ;;  %327 = vst [vmem:[#allocation2 + $0x150] sm:$0xff] %v12595_v1  ;;  %11346 = vmatpush1.bf16.msra.mxu0 %v11345_v15  ;;  %v464_v48 = vrot.slane %v397_v43, 7  ;;  %v609_v49 = vld [vmem:[%s12825_s15 + $0x30] sm:$0xff]  ;;  %v12874_v51 = vsel %vm457_vm1, %v461_v39, %v462_v41  ;;  %v465_v52 = vrot.slane %v398_v44, 7 }
  0x46   : > { %328 = vst [vmem:[#allocation2 + $0x158] sm:$0xff] %v12595_v1  ;;  %331 = vst [vmem:[#allocation2 + $0x170] sm:$0x3] %v12595_v1  ;;  %11347 = vmatprep.subr.bf16.mxu0 %v16235_v0  ;;  %v610_v53 = vld [vmem:[%s12825_s15 + $0x38] sm:$0xff]  ;;  %v399_v54 = vld [vmem:[%s12830_s18 + $0x30] sm:$0xff]  ;;  %v12888_v58 = vsel %vm457_vm1, %v673_v46, %v674_v47  ;;  %v676_v59 = vrot.slane %v609_v49, 7 }
  0x47   : > { %332 = vst [vmem:[#allocation2 + $0x178] sm:$0x3] %v12595_v1  ;;  %333 = vst [vmem:[#allocation2 + $0x180] sm:$0xff] %v12595_v1  ;;  %v400_v55 = vld [vmem:[%s12830_s18 + $0x38] sm:$0xff]  ;;  %v9929_v56 = vld [vmem:[%s16227_s2 + $0x160] sm:$0xff]  ;;  %v677_v60 = vrot.slane %v610_v53, 7  ;;  %v12893_v62 = vsel %vm457_vm1, %v464_v48, %v465_v52 }
  0x48   : > { %334 = vst [vmem:[#allocation2 + $0x188] sm:$0xff] %v12595_v1  ;;  %337 = vst [vmem:[#allocation2 + $0x1a0] sm:$0x3] %v12595_v1  ;;  %v9930_v57 = vld [vmem:[%s16227_s2 + $0x168] sm:$0xff]  ;;  %v611_v61 = vld [vmem:[%s12825_s15 + $0x40] sm:$0xff]  ;;  %v467_v63 = vrot.slane %v399_v54, 7 }
  0x49   : > { %338 = vst [vmem:[#allocation2 + $0x1a8] sm:$0x3] %v12595_v1  ;;  %339 = vst [vmem:[#allocation2 + $0x1b0] sm:$0xff] %v12595_v1  ;;  %11349 = vmatpush1.bf16.msra.mxu0 %v11348_v29  ;;  %v12897_v2 = vsel %vm457_vm1, %v676_v59, %v677_v60  ;;  %v679_v3 = vrot.slane %v611_v61, 7  ;;  %v11354_v4 = vpack.c.bf16 %v9930_v57, %v9929_v56  ;;  %v9931_v6 = vld [vmem:[%s16227_s2 + $0x170] sm:$0xff]  ;;  %v9932_v7 = vld [vmem:[%s16227_s2 + $0x178] sm:$0xff] }
  0x4a   : > { %340 = vst [vmem:[#allocation2 + $0x1b8] sm:$0xff] %v12595_v1  ;;  %343 = vst [vmem:[#allocation2 + $0x1d0] sm:$0x3] %v12595_v1  ;;  %11350 = vmatprep.subr.bf16.mxu0 %v16235_v0  ;;  %v11357_v8 = vpack.c.bf16 %v9932_v7, %v9931_v6  ;;  %v9933_v9 = vld [vmem:[%s16227_s2 + $0x180] sm:$0xff]  ;;  %v9934_v10 = vld [vmem:[%s16227_s2 + $0x188] sm:$0xff]  ;;  %s12596_s29 = smov [#allocation6]  }
  0x4b   : > { %344 = vst [vmem:[#allocation2 + $0x1d8] sm:$0x3] %v12595_v1  ;;  %345 = vst [vmem:[#allocation2 + $0x1e0] sm:$0xff] %v12595_v1  ;;  %v612_v11 = vld [vmem:[%s12825_s15 + $0x48] sm:$0xff]  ;;  %v401_v12 = vld [vmem:[%s12830_s18 + $0x40] sm:$0xff]  ;;  %v11360_v15 = vpack.c.bf16 %v9934_v10, %v9933_v9  ;;  %s12527_s10 = sshll.u32 %s12596_s29, 4  ;;  %s12528_s10 = int_to_ptr.vmem [resolvable:$false] %s12527_s10 }
  0x4c   : > { %346 = vst [vmem:[#allocation2 + $0x1e8] sm:$0xff] %v12595_v1  ;;  %349 = vst [vmem:[#allocation2 + $0x200] sm:$0x3] %v12595_v1  ;;  %v402_v14 = vld [vmem:[%s12830_s18 + $0x48] sm:$0xff]  ;;  %v613_v16 = vld [vmem:[%s12825_s15 + $0x50] sm:$0xff]  ;;  %v680_v21 = vrot.slane %v612_v11, 7 }
  0x4d   : > { %350 = vst [vmem:[#allocation2 + $0x208] sm:$0x3] %v12595_v1  ;;  %351 = vst [vmem:[#allocation2 + $0x210] sm:$0xff] %v12595_v1  ;;  %11352 = vmatpush1.bf16.msra.mxu0 %v11351_v50  ;;  %v614_v17 = vld [vmem:[%s12825_s15 + $0x58] sm:$0xff]  ;;  %v403_v18 = vld [vmem:[%s12830_s18 + $0x50] sm:$0xff]  ;;  %v470_v23 = vrot.slane %v401_v12, 7 }
  0x4e   : > { %352 = vst [vmem:[#allocation2 + $0x218] sm:$0xff] %v12595_v1  ;;  %355 = vst [vmem:[#allocation2 + $0x230] sm:$0x3] %v12595_v1  ;;  %11353 = vmatprep.subr.bf16.mxu0 %v16235_v0  ;;  %v9935_v19 = vld [vmem:[%s16227_s2 + $0x190] sm:$0xff]  ;;  %v9936_v20 = vld [vmem:[%s16227_s2 + $0x198] sm:$0xff]  ;;  %v471_v24 = vrot.slane %v402_v14, 7 }
  0x4f   : > { %356 = vst [vmem:[#allocation2 + $0x238] sm:$0x3] %v12595_v1  ;;  %357 = vst [vmem:[#allocation2 + $0x240] sm:$0xff] %v12595_v1  ;;  %v682_v28 = vrot.slane %v613_v16, 7  ;;  %v683_v29 = vrot.slane %v614_v17, 7  ;;  %v473_v30 = vrot.slane %v403_v18, 7  ;;  %v11363_v32 = vpack.c.bf16 %v9936_v20, %v9935_v19 }
  0x50   : > { %358 = vst [vmem:[#allocation2 + $0x248] sm:$0xff] %v12595_v1  ;;  %361 = vst [vmem:[#allocation2 + $0x260] sm:$0x3] %v12595_v1  ;;  %v9937_v33 = vld [vmem:[%s16227_s2 + $0x1a0] sm:$0xff]  ;;  %v9938_v34 = vld [vmem:[%s16227_s2 + $0x1a8] sm:$0xff]  ;;  %v12946_v35 = vsel %vm457_vm1, %v470_v23, %v471_v24  ;;  %s12529_s9 = scalar_lea.vmem %s12528_s10, 8192 }
  0x51   : > { %362 = vst [vmem:[#allocation2 + $0x268] sm:$0x3] %v12595_v1  ;;  %363 = vst [vmem:[#allocation2 + $0x270] sm:$0xff] %v12595_v1  ;;  %11355 = vmatpush1.bf16.msra.mxu0 %v11354_v4  ;;  %v12952_v40 = vsel %vm457_vm1, %v682_v28, %v683_v29  ;;  %v617_v43 = vld [vmem:[%s12825_s15 + $0x70] sm:$0xff]  ;;  %v618_v44 = vld [vmem:[%s12825_s15 + $0x78] sm:$0xff]  ;;  %v11366_v56 = vpack.c.bf16 %v9938_v34, %v9937_v33 }
  0x52   : > { %364 = vst [vmem:[#allocation2 + $0x278] sm:$0xff] %v12595_v1  ;;  %367 = vst [vmem:[#allocation2 + $0x290] sm:$0x3] %v12595_v1  ;;  %11356 = vmatprep.subr.bf16.mxu0 %v16235_v0  ;;  %v408_v49 = vld [vmem:[%s12830_s18 + $0x78] sm:$0xff]  ;;  %v619_v50 = vld [vmem:[%s12825_s15 + $0x80] sm:$0xff]  ;;  %v688_v57 = vrot.slane %v617_v43, 7 }
  0x53   : > { %368 = vst [vmem:[#allocation2 + $0x298] sm:$0x3] %v12595_v1  ;;  %369 = vst [vmem:[#allocation2 + $0x2a0] sm:$0xff] %v12595_v1  ;;  %v620_v54 = vld [vmem:[%s12825_s15 + $0x88] sm:$0xff]  ;;  %v9939_v61 = vld [vmem:[%s16227_s2 + $0x1b0] sm:$0xff]  ;;  %v691_v4 = vrot.slane %v619_v50, 7 }
  0x54   : > { %370 = vst [vmem:[#allocation2 + $0x2a8] sm:$0xff] %v12595_v1  ;;  %373 = vst [vmem:[#allocation2 + $0x2c0] sm:$0x3] %v12595_v1  ;;  %v692_v7 = vrot.slane %v620_v54, 7  ;;  %v9941_v12 = vld [vmem:[%s16227_s2 + $0x1c0] sm:$0xff]  ;;  %v9942_v14 = vld [vmem:[%s16227_s2 + $0x1c8] sm:$0xff] }
  0x55   : > { %374 = vst [vmem:[#allocation2 + $0x2c8] sm:$0x3] %v12595_v1  ;;  %375 = vst [vmem:[#allocation2 + $0x2d0] sm:$0xff] %v12595_v1  ;;  %11358 = vmatpush1.bf16.msra.mxu0 %v11357_v8  ;;  %v410_v16 = vld [vmem:[%s12830_s18 + $0x88] sm:$0xff]  ;;  %v9943_v17 = vld [vmem:[%s16227_s2 + $0x1d0] sm:$0xff] }
  0x56   : > { %376 = vst [vmem:[#allocation2 + $0x2d8] sm:$0xff] %v12595_v1  ;;  %379 = vst [vmem:[#allocation2 + $0x2f0] sm:$0x3] %v12595_v1  ;;  %11359 = vmatprep.subr.bf16.mxu0 %v16235_v0  ;;  %v12990_v11 = vsel %vm457_vm1, %v691_v4, %v692_v7  ;;  %v9944_v18 = vld [vmem:[%s16227_s2 + $0x1d8] sm:$0xff]  ;;  %v621_v19 = vld [vmem:[%s12825_s15 + $0x90] sm:$0xff]  ;;  %v483_v20 = vrot.slane %v410_v16, 7 }
  0x57   : > { %380 = vst [vmem:[#allocation2 + $0x2f8] sm:$0x3] %v12595_v1  ;;  %381 = vst [vmem:[#allocation2 + $0x300] sm:$0xff] %v12595_v1  ;;  %v414_v34 = vld [vmem:[%s12830_s18 + $0xa8] sm:$0xff]  ;;  %v415_v54 = vld [vmem:[%s12830_s18 + $0xb0] sm:$0xff] }
  0x58   : > { %382 = vst [vmem:[#allocation2 + $0x308] sm:$0xff] %v12595_v1  ;;  %385 = vst [vmem:[#allocation2 + $0x320] sm:$0x3] %v12595_v1 }
  0x59   : > { %386 = vst [vmem:[#allocation2 + $0x328] sm:$0x3] %v12595_v1  ;;  %387 = vst [vmem:[#allocation2 + $0x330] sm:$0xff] %v12595_v1  ;;  %11361 = vmatpush1.bf16.msra.mxu0 %v11360_v15  ;;  %v11372_v15 = vpack.c.bf16 %v9942_v14, %v9941_v12  ;;  %v491_v12 = vrot.slane %v415_v54, 7 }
  0x5a   : > { %388 = vst [vmem:[#allocation2 + $0x338] sm:$0xff] %v12595_v1  ;;  %391 = vst [vmem:[#allocation2 + $0x350] sm:$0x3] %v12595_v1  ;;  %11362 = vmatprep.subr.bf16.mxu0 %v16235_v0 }
  0x5b   : > { %392 = vst [vmem:[#allocation2 + $0x358] sm:$0x3] %v12595_v1  ;;  %763 = vst [vmem:[#allocation2 + $0x38] sm:$0xfe] %v667_v22  ;;  %v468_v1 = vrot.slane %v400_v55, 7  ;;  %v404_v22 = vld [vmem:[%s12830_s18 + $0x58] sm:$0xff] }
  0x5c   : > { %765 = vst [vmem:[#allocation2 + $0x58] sm:$0x1] %v668_v25  ;;  %555 = vst [vmem:[#allocation2 + $0x30] sm:$0xfe] %v458_v26  ;;  %v615_v25 = vld [vmem:[%s12825_s15 + $0x60] sm:$0xff]  ;;  %v616_v26 = vld [vmem:[%s12825_s15 + $0x68] sm:$0xff] }
  0x5d   : > { %557 = vst [vmem:[#allocation2 + $0x50] sm:$0x1] %v459_v27  ;;  %764 = vst [vmem:[#allocation2 + $0x48] sm:$0xff] %v12857_v36  ;;  %v12901_v5 = vsel %vm457_vm1, %v467_v63, %v468_v1  ;;  %v12935_v27 = vsel %vm457_vm1, %v679_v3, %v680_v21  ;;  %v686_v42 = vrot.slane %v616_v26, 7  ;;  %v409_v55 = vld [vmem:[%s12830_s18 + $0x80] sm:$0xff]  ;;  %11364 = vmatpush1.bf16.msra.mxu0 %v11363_v32 }
  0x5e   : > { %556 = vst [vmem:[#allocation2 + $0x40] sm:$0xff] %v12860_v37  ;;  %766 = vst [vmem:[#allocation2 + $0x68] sm:$0xfe] %v670_v31  ;;  %v405_v31 = vld [vmem:[%s12830_s18 + $0x60] sm:$0xff]  ;;  %11365 = vmatprep.subr.bf16.mxu0 %v16235_v0  ;;  %v482_v8 = vrot.slane %v409_v55, 7  ;;  %v416_v55 = vld [vmem:[%s12830_s18 + $0xb8] sm:$0xff] }
  0x5f   : > { %768 = vst [vmem:[#allocation2 + $0x88] sm:$0x1] %v671_v38  ;;  %558 = vst [vmem:[#allocation2 + $0x60] sm:$0xfe] %v461_v39  ;;  %v474_v38 = vrot.slane %v404_v22, 7  ;;  %v406_v39 = vld [vmem:[%s12830_s18 + $0x68] sm:$0xff] }
  0x60   : > { %767 = vst [vmem:[#allocation2 + $0x78] sm:$0xff] %v12869_v45  ;;  %560 = vst [vmem:[#allocation2 + $0x80] sm:$0x1] %v462_v41  ;;  %v685_v41 = vrot.slane %v615_v25, 7  ;;  %v477_v53 = vrot.slane %v406_v39, 7  ;;  %v411_v22 = vld [vmem:[%s12830_s18 + $0x90] sm:$0xff] }
  0x61   : > { %559 = vst [vmem:[#allocation2 + $0x70] sm:$0xff] %v12874_v51  ;;  %769 = vst [vmem:[#allocation2 + $0x98] sm:$0xfe] %v673_v46  ;;  %v407_v46 = vld [vmem:[%s12830_s18 + $0x70] sm:$0xff]  ;;  %11367 = vmatpush1.bf16.msra.mxu0 %v11366_v56  ;;  %v412_v25 = vld [vmem:[%s12830_s18 + $0x98] sm:$0xff]  ;;  %v492_v14 = vrot.slane %v416_v55, 7 }
  0x62   : > { %771 = vst [vmem:[#allocation2 + $0xb8] sm:$0x1] %v674_v47  ;;  %561 = vst [vmem:[#allocation2 + $0x90] sm:$0xfe] %v464_v48  ;;  %v12959_v47 = vsel %vm457_vm1, %v473_v30, %v474_v38  ;;  %v476_v48 = vrot.slane %v405_v31, 7  ;;  %11368 = vmatprep.subr.bf16.mxu0 %v16235_v0  ;;  %v623_v26 = vld [vmem:[%s12825_s15 + $0xa0] sm:$0xff]  ;;  %v13022_v31 = vsel %vm457_vm1, %v482_v8, %v483_v20 }
  0x63   : > { %770 = vst [vmem:[#allocation2 + $0xa8] sm:$0xff] %v12888_v58  ;;  %563 = vst [vmem:[#allocation2 + $0xb0] sm:$0x1] %v465_v52  ;;  %v12965_v52 = vsel %vm457_vm1, %v685_v41, %v686_v42  ;;  %v413_v32 = vld [vmem:[%s12830_s18 + $0xa0] sm:$0xff]  ;;  %v13035_v39 = vld [vmem:[%s16227_s2 + $0x1f8] sm:$0xff]  ;;  %v697_v43 = vrot.slane %v623_v26, 7 }
  0x64   : > { %562 = vst [vmem:[#allocation2 + $0xa0] sm:$0xff] %v12893_v62  ;;  %772 = vst [vmem:[#allocation2 + $0xc8] sm:$0xfe] %v676_v59  ;;  %v689_v59 = vrot.slane %v618_v44, 7  ;;  %v488_v50 = vrot.slane %v413_v32, 7  ;;  %v1079_v55 = vrot.slane %v12860_v37, 1 }
  0x65   : > { %774 = vst [vmem:[#allocation2 + $0xe8] sm:$0x1] %v677_v60  ;;  %773 = vst [vmem:[#allocation2 + $0xd8] sm:$0xff] %v12897_v2  ;;  %v479_v60 = vrot.slane %v407_v46, 7  ;;  %v625_v46 = vld [vmem:[%s12825_s15 + $0xb0] sm:$0xff] }
  0x66   : > { %564 = vst [vmem:[#allocation2 + $0xc0] sm:$0xfe] %v467_v63  ;;  %566 = vst [vmem:[#allocation2 + $0xe0] sm:$0x1] %v468_v1  ;;  %v9940_v63 = vld [vmem:[%s16227_s2 + $0x1b8] sm:$0xff]  ;;  %v12978_v1 = vsel %vm457_vm1, %v476_v48, %v477_v53  ;;  %v12982_v6 = vsel %vm457_vm1, %v688_v57, %v689_v59 }
  0x67   : > { %565 = vst [vmem:[#allocation2 + $0xd0] sm:$0xff] %v12901_v5  ;;  %775 = vst [vmem:[#allocation2 + $0xf8] sm:$0xfe] %v679_v3  ;;  %v480_v3 = vrot.slane %v408_v49, 7  ;;  %v11369_v10 = vpack.c.bf16 %v9940_v63, %v9939_v61  ;;  %v907_v56 = vld [vmem:[#allocation2] sm:$0xfe] }
  0x68   : > { %777 = vst [vmem:[#allocation2 + $0x118] sm:$0x1] %v680_v21  ;;  %776 = vst [vmem:[#allocation2 + $0x108] sm:$0xff] %v12935_v27  ;;  %v622_v21 = vld [vmem:[%s12825_s15 + $0x98] sm:$0xff]  ;;  %v627_v61 = vld [vmem:[%s12825_s15 + $0xc0] sm:$0xff]  ;;  %v1068_v16 = vrot.slane %v907_v56, 1 }
  0x69   : > { %567 = vst [vmem:[#allocation2 + $0xf0] sm:$0xfe] %v470_v23  ;;  %569 = vst [vmem:[#allocation2 + $0x110] sm:$0x1] %v471_v24  ;;  %v12986_v9 = vsel %vm457_vm1, %v479_v60, %v480_v3  ;;  %11370 = vmatpush1.bf16.msra.mxu0 %v11369_v10  ;;  %v11375_v23 = vpack.c.bf16 %v9944_v18, %v9943_v17  ;;  %v694_v24 = vrot.slane %v621_v19, 7  ;;  %v695_v33 = vrot.slane %v622_v21, 7 }
  0x6a   : > { %568 = vst [vmem:[#allocation2 + $0x100] sm:$0xff] %v12946_v35  ;;  %778 = vst [vmem:[#allocation2 + $0x128] sm:$0xfe] %v682_v28  ;;  %11371 = vmatprep.subr.bf16.mxu0 %v16235_v0  ;;  %v624_v28 = vld [vmem:[%s12825_s15 + $0xa8] sm:$0xff]  ;;  %v875_v17 = vld [vmem:[%s16227_s2] sm:$0xff]  ;;  %v703_v18 = vrot.slane %v627_v61, 7 }
  0x6b   : > { %780 = vst [vmem:[#allocation2 + $0x148] sm:$0x1] %v683_v29  ;;  %570 = vst [vmem:[#allocation2 + $0x120] sm:$0xfe] %v473_v30  ;;  %v9945_v29 = vld [vmem:[%s16227_s2 + $0x1e0] sm:$0xff]  ;;  %v9946_v30 = vld [vmem:[%s16227_s2 + $0x1e8] sm:$0xff]  ;;  %v13039_v49 = vsel %vm457_vm1, %v694_v24, %v695_v33 }
  0x6c   : > { %779 = vst [vmem:[#allocation2 + $0x138] sm:$0xff] %v12952_v40  ;;  %572 = vst [vmem:[#allocation2 + $0x140] sm:$0x1] %v474_v38  ;;  %v13030_v38 = vld [vmem:[%s16227_s2 + $0x1f0] sm:$0xff]  ;;  %v698_v44 = vrot.slane %v624_v28, 7  ;;  %v628_v63 = vld [vmem:[%s12825_s15 + $0xc8] sm:$0xff] }
  0x6d   : > { %571 = vst [vmem:[#allocation2 + $0x130] sm:$0xff] %v12959_v47  ;;  %781 = vst [vmem:[#allocation2 + $0x158] sm:$0xfe] %v685_v41  ;;  %11373 = vmatpush1.bf16.msra.mxu0 %v11372_v15  ;;  %v485_v41 = vrot.slane %v411_v22, 7  ;;  %v11381_v15 = vpack.c.bf16 %v13035_v39, %v13030_v38  ;;  %v704_v19 = vrot.slane %v628_v63, 7  ;;  %v876_v21 = vld [vmem:[%s16227_s2 + $0x8] sm:$0xff] }
  0x6e   : > { %783 = vst [vmem:[#allocation2 + $0x178] sm:$0x1] %v686_v42  ;;  %782 = vst [vmem:[#allocation2 + $0x168] sm:$0xff] %v12965_v52  ;;  %11374 = vmatprep.subr.bf16.mxu0 %v16235_v0  ;;  %v486_v42 = vrot.slane %v412_v25, 7  ;;  %v13075_v25 = vsel %vm457_vm1, %v491_v12, %v492_v14  ;;  %v13078_v28 = vld [vmem:[%s12825_s15 + $0xd0] sm:$0xff]  ;;  %v880_v61 = vld [vmem:[%s16227_s2 + $0x28] sm:$0xff] }
  0x6f   : > { %573 = vst [vmem:[#allocation2 + $0x150] sm:$0xfe] %v476_v48  ;;  %575 = vst [vmem:[#allocation2 + $0x170] sm:$0x1] %v477_v53  ;;  %v11378_v48 = vpack.c.bf16 %v9946_v30, %v9945_v29  ;;  %v626_v53 = vld [vmem:[%s12825_s15 + $0xb8] sm:$0xff]  ;;  %v13083_v30 = vsel %vm457_vm1, %v703_v18, %v704_v19  ;;  %v706_v39 = vrot.slane %v13078_v28, 7 }
  0x70   : > { %574 = vst [vmem:[#allocation2 + $0x160] sm:$0xff] %v12978_v1  ;;  %784 = vst [vmem:[#allocation2 + $0x188] sm:$0xfe] %v688_v57  ;;  %v13047_v57 = vsel %vm457_vm1, %v485_v41, %v486_v42  ;;  %v701_v10 = vrot.slane %v626_v53, 7  ;;  %v912_v29 = vld [vmem:[#allocation2 + $0x38] sm:$0xfe] }
  0x71   : > { %786 = vst [vmem:[#allocation2 + $0x1a8] sm:$0x1] %v689_v59  ;;  %576 = vst [vmem:[#allocation2 + $0x180] sm:$0xfe] %v479_v60  ;;  %11376 = vmatpush1.bf16.msra.mxu0 %v11375_v23  ;;  %v13050_v59 = vsel %vm457_vm1, %v697_v43, %v698_v44  ;;  %v489_v60 = vrot.slane %v414_v34, 7  ;;  %v11384_v34 = vpack.c.bf16 %v876_v21, %v875_v17 }
  0x72   : > { %785 = vst [vmem:[#allocation2 + $0x198] sm:$0xff] %v12982_v6  ;;  %578 = vst [vmem:[#allocation2 + $0x1a0] sm:$0x1] %v480_v3  ;;  %11377 = vmatprep.subr.bf16.mxu0 %v16235_v0  ;;  %v910_v3 = vld [vmem:[#allocation2 + $0x28] sm:$0x1] }
  0x73   : > { %787 = vst [vmem:[#allocation2 + $0x1b8] sm:$0xfe] %v691_v4  ;;  %577 = vst [vmem:[#allocation2 + $0x190] sm:$0xff] %v12986_v9  ;;  %v700_v4 = vrot.slane %v625_v46, 7  ;;  %v1076_v22 = vrot.slane %v910_v3, 1  ;;  %v877_v46 = vld [vmem:[%s16227_s2 + $0x10] sm:$0xff] }
  0x74   : > { %789 = vst [vmem:[#allocation2 + $0x1d8] sm:$0x1] %v692_v7  ;;  %579 = vst [vmem:[#allocation2 + $0x1b0] sm:$0xfe] %v482_v8  ;;  %v417_v7 = vld [vmem:[%s12830_s18 + $0xc0] sm:$0xff]  ;;  %v13058_v8 = vsel %vm457_vm1, %v488_v50, %v489_v60 }
  0x75   : > { %788 = vst [vmem:[#allocation2 + $0x1c8] sm:$0xff] %v12990_v11  ;;  %581 = vst [vmem:[#allocation2 + $0x1d0] sm:$0x1] %v483_v20  ;;  %11379 = vmatpush1.bf16.msra.mxu0 %v11378_v48  ;;  %v418_v20 = vld [vmem:[%s12830_s18 + $0xc8] sm:$0xff]  ;;  %v909_v23 = vld [vmem:[#allocation2 + $0x20] sm:$0x1] }
  0x76   : > { %580 = vst [vmem:[#allocation2 + $0x1c0] sm:$0xff] %v13022_v31  ;;  %790 = vst [vmem:[#allocation2 + $0x1e8] sm:$0xfe] %v694_v24  ;;  %11380 = vmatprep.subr.bf16.mxu0 %v16235_v0  ;;  %v13072_v24 = vsel %vm457_vm1, %v700_v4, %v701_v10  ;;  %v494_v26 = vrot.slane %v417_v7, 7  ;;  %v495_v32 = vrot.slane %v418_v20, 7  ;;  %v1074_v38 = vrot.slane %v909_v23, 1 }
  0x77   : > { %792 = vst [vmem:[#allocation2 + $0x208] sm:$0x1] %v695_v33  ;;  %791 = vst [vmem:[#allocation2 + $0x1f8] sm:$0xff] %v13039_v49  ;;  %v1070_v33 = vsel %vm1067_vm0, %v1068_v16, %v12820_v13  ;;  %v878_v48 = vld [vmem:[%s16227_s2 + $0x18] sm:$0xff]  ;;  %v419_v7 = vld [vmem:[%s12830_s18 + $0xd0] sm:$0xff] }
  0x78   : > { %582 = vst [vmem:[#allocation2 + $0x1e0] sm:$0xfe] %v485_v41  ;;  %584 = vst [vmem:[#allocation2 + $0x200] sm:$0x1] %v486_v42  ;;  %v1077_v41 = vsel %vm1067_vm0, %v12820_v13, %v1076_v22  ;;  %v1081_v42 = vrot.slane %v912_v29, 1  ;;  %v11387_v56 = vpack.c.bf16 %v878_v48, %v877_v46  ;;  %v632_v16 = vld [vmem:[%s12825_s15 + $0xe8] sm:$0xff] }
  0x79   : > { %793 = vst [vmem:[#allocation2 + $0x218] sm:$0xfe] %v697_v43  ;;  %795 = vst [vmem:[#allocation2 + $0x238] sm:$0x1] %v698_v44  ;;  %11382 = vmatpush1.bf16.msra.mxu0 %v11381_v15  ;;  %v1082_v43 = vrot.slane %v12857_v36, 1  ;;  %v1075_v36 = vsel %vm1067_vm0, %v12820_v13, %v1074_v38  ;;  %v631_v15 = vld [vmem:[%s12825_s15 + $0xe0] sm:$0xff] }
  0x7a   : > { %583 = vst [vmem:[#allocation2 + $0x1f0] sm:$0xff] %v13047_v57  ;;  %794 = vst [vmem:[#allocation2 + $0x228] sm:$0xff] %v13050_v59  ;;  %11383 = vmatprep.subr.bf16.mxu0 %v16235_v0  ;;  %v911_v44 = vld [vmem:[#allocation2 + $0x30] sm:$0xfe]  ;;  %v914_v53 = vld [vmem:[#allocation2 + $0x58] sm:$0x1] }
  0x7b   : > { %585 = vst [vmem:[#allocation2 + $0x210] sm:$0xfe] %v488_v50  ;;  %587 = vst [vmem:[#allocation2 + $0x230] sm:$0x1] %v489_v60  ;;  %v13100_v50 = vsel %vm457_vm1, %v494_v26, %v495_v32  ;;  %v1078_v54 = vrot.slane %v911_v44, 1  ;;  %v879_v60 = vld [vmem:[%s16227_s2 + $0x20] sm:$0xff]  ;;  %v1083_v63 = vsel %vm1067_vm0, %v1081_v42, %v1082_v43 }
  0x7c   : > { %586 = vst [vmem:[#allocation2 + $0x220] sm:$0xff] %v13058_v8  ;;  %796 = vst [vmem:[#allocation2 + $0x248] sm:$0xfe] %v700_v4  ;;  %1390 = vmatmul.mubr.f32.vlgmr.msra.gmra.mrb[0].mxu0 %v1070_v33  ;;  %v1086_v3 = vrot.slane %v914_v53, 1  ;;  %v913_v13 = vld [vmem:[#allocation2 + $0x50] sm:$0x1] }
  0x7d   : > { %798 = vst [vmem:[#allocation2 + $0x268] sm:$0x1] %v701_v10  ;;  %588 = vst [vmem:[#allocation2 + $0x240] sm:$0xfe] %v491_v12  ;;  %11385 = vmatpush1.bf16.msra.mxu0 %v11384_v34  ;;  %1394 = vmatprep.mubr.f32.mxu0 %v1077_v41  ;;  %v630_v4 = vld [vmem:[%s12825_s15 + $0xd8] sm:$0xff]  ;;  %v11390_v12 = vpack.c.bf16 %v880_v61, %v879_v60  ;;  %v1080_v17 = vsel %vm1067_vm0, %v1078_v54, %v1079_v55  ;;  %v497_v21 = vrot.slane %v419_v7, 7 }
  0x7e   : > { %590 = vst [vmem:[#allocation2 + $0x260] sm:$0x1] %v492_v14  ;;  %797 = vst [vmem:[#allocation2 + $0x258] sm:$0xff] %v13072_v24  ;;  %11386 = vmatprep.subr.bf16.mxu0 %v16235_v0  ;;  %v916_v37 = vld [vmem:[#allocation2 + $0x68] sm:$0xfe]  ;;  %v420_v10 = vld [vmem:[%s12830_s18 + $0xd8] sm:$0xff] }
  0x7f   : > { %589 = vst [vmem:[#allocation2 + $0x250] sm:$0xff] %v13075_v25  ;;  %799 = vst [vmem:[#allocation2 + $0x278] sm:$0xfe] %v703_v18  ;;  %v881_v14 = vld [vmem:[%s16227_s2 + $0x30] sm:$0xff]  ;;  %v1084_v18 = vrot.slane %v913_v13, 1  ;;  %v707_v20 = vrot.slane %v630_v4, 7 }
  0x80   : > { %801 = vst [vmem:[#allocation2 + $0x298] sm:$0x1] %v704_v19  ;;  %800 = vst [vmem:[#allocation2 + $0x288] sm:$0xff] %v13083_v30  ;;  %1395 = vmatmul.mubr.f32.gmra.mrb[2].mxu0 %v1075_v36  ;;  %v882_v19 = vld [vmem:[%s16227_s2 + $0x38] sm:$0xff]  ;;  %v421_v22 = vld [vmem:[%s12830_s18 + $0xe0] sm:$0xff]  ;;  %v1091_v28 = vrot.slane %v916_v37, 1 }
  0x81   : > { %591 = vst [vmem:[#allocation2 + $0x270] sm:$0xfe] %v494_v26  ;;  %593 = vst [vmem:[#allocation2 + $0x290] sm:$0x1] %v495_v32  ;;  %1399 = vmatprep.mubr.f32.mxu0 %v1083_v63  ;;  %11388 = vmatpush1.bf16.msra.mxu0 %v11387_v56  ;;  %v13127_v23 = vld [vmem:[#allocation2 + $0x38] sm:$0xff]  ;;  %v1087_v26 = vsel %vm1067_vm0, %v1082_v43, %v1086_v3  ;;  %v1092_v29 = vrot.slane %v12869_v45, 1  ;;  %v13135_v41 = vsel %vm457_vm1, %v706_v39, %v707_v20 }
  0x82   : > { %592 = vst [vmem:[#allocation2 + $0x280] sm:$0xff] %v13100_v50  ;;  %802 = vst [vmem:[#allocation2 + $0x2a8] sm:$0xfe] %v706_v39  ;;  %v915_v32 = vld [vmem:[#allocation2 + $0x60] sm:$0xfe]  ;;  %11389 = vmatprep.subr.bf16.mxu0 %v16235_v0  ;;  %v498_v33 = vrot.slane %v420_v10, 7  ;;  %2579 = vmatprep.mubr.f32.mxu1 %v13127_v23  ;;  %v11393_v46 = vpack.c.bf16 %v882_v19, %v881_v14  ;;  %v1085_v53 = vsel %vm1067_vm0, %v1079_v55, %v1084_v18 }
  0x83   : > { %v422_v34 = vld [vmem:[%s12830_s18 + $0xe8] sm:$0xff]  ;;  %804 = vst [vmem:[#allocation2 + $0x2c8] sm:$0x1] %v707_v20  ;;  %594 = vst [vmem:[#allocation2 + $0x2a0] sm:$0xfe] %v497_v21  ;;  %v709_v42 = vrot.slane %v631_v15, 7  ;;  %v1093_v54 = vsel %vm1067_vm0, %v1091_v28, %v1092_v29 }
  0x84   : > { %v918_v38 = vld [vmem:[#allocation2 + $0x88] sm:$0x1]  ;;  %v710_v44 = vrot.slane %v632_v16, 7  ;;  %1400 = vmatmul.mubr.f32.gmra.mrb[4].mxu0 %v1080_v17  ;;  %v1089_v43 = vrot.slane %v12874_v51, 1  ;;  %803 = vst [vmem:[#allocation2 + $0x2b8] sm:$0xff] %v13135_v41  ;;  %v13140_v45 = vsel %vm457_vm1, %v497_v21, %v498_v33  ;;  %v500_v48 = vrot.slane %v421_v22, 7 }
  0x85   : > { %596 = vst [vmem:[#allocation2 + $0x2c0] sm:$0x1] %v498_v33  ;;  %1404 = vmatprep.mubr.f32.mxu0 %v1087_v26  ;;  %v1088_v39 = vrot.slane %v915_v32, 1  ;;  %11391 = vmatpush1.bf16.msra.mxu0 %v11390_v12  ;;  %595 = vst [vmem:[#allocation2 + $0x2b0] sm:$0xff] %v13140_v45  ;;  %v501_v51 = vrot.slane %v422_v34, 7  ;;  %v1096_v56 = vrot.slane %v918_v38, 1 }
  0x86   : > { %v13145_v36 = vsel %vm457_vm1, %v709_v42, %v710_v44  ;;  %805 = vst [vmem:[#allocation2 + $0x2d8] sm:$0xfe] %v709_v42  ;;  %807 = vst [vmem:[#allocation2 + $0x2f8] sm:$0x1] %v710_v44  ;;  %v917_v60 = vld [vmem:[#allocation2 + $0x80] sm:$0x1]  ;;  %11392 = vmatprep.subr.bf16.mxu0 %v16235_v0 }
  0x87   : > { %v883_v55 = vld [vmem:[%s16227_s2 + $0x40] sm:$0xff]  ;;  %v884_v61 = vld [vmem:[%s16227_s2 + $0x48] sm:$0xff]  ;;  %806 = vst [vmem:[#allocation2 + $0x2e8] sm:$0xff] %v13145_v36  ;;  %597 = vst [vmem:[#allocation2 + $0x2d0] sm:$0xfe] %v500_v48  ;;  %v13157_v3 = vsel %vm457_vm1, %v500_v48, %v501_v51  ;;  %v1090_v13 = vsel %vm1067_vm0, %v1088_v39, %v1089_v43  ;;  %v1094_v4 = vrot.slane %v917_v60, 1  ;;  %v1097_v37 = vsel %vm1067_vm0, %v1092_v29, %v1096_v56 }
  0x88   : > { %v920_v63 = vld [vmem:[#allocation2 + $0x98] sm:$0xfe]  ;;  %599 = vst [vmem:[#allocation2 + $0x2f0] sm:$0x1] %v501_v51  ;;  %1405 = vmatmul.mubr.f32.gmra.mrb[6].mxu0 %v1085_v53  ;;  %598 = vst [vmem:[#allocation2 + $0x2e0] sm:$0xff] %v13157_v3  ;;  %v11396_v7 = vpack.c.bf16 %v884_v61, %v883_v55  ;;  %v1102_v12 = vrot.slane %v12888_v58, 1 }
  0x89   : > { %1409 = vmatprep.mubr.f32.mxu0 %v1093_v54  ;;  %11394 = vmatpush1.bf16.msra.mxu0 %v11393_v46  ;;  %v1101_v10 = vrot.slane %v920_v63, 1  ;;  %v919_v14 = vld [vmem:[#allocation2 + $0x90] sm:$0xfe]  ;;  %v886_v16 = vld [vmem:[%s16227_s2 + $0x58] sm:$0xff]  ;;  %v1095_v18 = vsel %vm1067_vm0, %v1089_v43, %v1094_v4  ;;  %v1099_v20 = vrot.slane %v12893_v62, 1  ;;  %v887_v28 = vld [vmem:[%s16227_s2 + $0x60] sm:$0xff] }
  0x8a   : > { %11395 = vmatprep.subr.bf16.mxu0 %v16235_v0  ;;  %v885_v15 = vld [vmem:[%s16227_s2 + $0x50] sm:$0xff]  ;;  %v922_v17 = vld [vmem:[#allocation2 + $0xb8] sm:$0x1]  ;;  %v1098_v19 = vrot.slane %v919_v14, 1  ;;  %v888_v29 = vld [vmem:[%s16227_s2 + $0x68] sm:$0xff]  ;;  %v1112_v44 = vrot.slane %v12897_v2, 1 }
  0x8b   : > { %v11399_v58 = vpack.c.bf16 %v886_v16, %v885_v15  ;;  %v1103_v21 = vsel %vm1067_vm0, %v1101_v10, %v1102_v12  ;;  %v1106_v22 = vrot.slane %v922_v17, 1  ;;  %v921_v26 = vld [vmem:[#allocation2 + $0xb0] sm:$0x1]  ;;  %v924_v32 = vld [vmem:[#allocation2 + $0xc8] sm:$0xfe]  ;;  %v11402_v34 = vpack.c.bf16 %v888_v29, %v887_v28  ;;  %v890_v48 = vld [vmem:[%s16227_s2 + $0x78] sm:$0xff] }
  0x8c   : > { %1410 = vmatmul.mubr.f32.gmra.mrb[8].mxu0 %v1090_v13  ;;  %v1100_v62 = vsel %vm1067_vm0, %v1098_v19, %v1099_v20  ;;  %v1104_v33 = vrot.slane %v921_v26, 1  ;;  %v1111_v42 = vrot.slane %v924_v32, 1  ;;  %v923_v43 = vld [vmem:[#allocation2 + $0xc0] sm:$0xfe]  ;;  %v889_v46 = vld [vmem:[%s16227_s2 + $0x70] sm:$0xff]  ;;  %v1109_v54 = vrot.slane %v12901_v5, 1 }
  0x8d   : > { %1414 = vmatprep.mubr.f32.mxu0 %v1097_v37  ;;  %11397 = vmatpush1.bf16.msra.mxu0 %v11396_v7  ;;  %v1107_v38 = vsel %vm1067_vm0, %v1102_v12, %v1106_v22  ;;  %v926_v53 = vld [vmem:[#allocation2 + $0xe8] sm:$0x1]  ;;  %v1108_v51 = vrot.slane %v923_v43, 1  ;;  %v11405_v2 = vpack.c.bf16 %v890_v48, %v889_v46  ;;  %v925_v55 = vld [vmem:[#allocation2 + $0xe0] sm:$0x1]  ;;  %v1122_v12 = vrot.slane %v12935_v27, 1 }
  0x8e   : > { %11398 = vmatprep.subr.bf16.mxu0 %v16235_v0  ;;  %v1105_v39 = vsel %vm1067_vm0, %v1099_v20, %v1104_v33  ;;  %v1113_v56 = vsel %vm1067_vm0, %v1111_v42, %v1112_v44  ;;  %v1116_v60 = vrot.slane %v926_v53, 1  ;;  %v891_v61 = vld [vmem:[%s16227_s2 + $0x80] sm:$0xff]  ;;  %v892_v63 = vld [vmem:[%s16227_s2 + $0x88] sm:$0xff]  ;;  %v928_v13 = vld [vmem:[#allocation2 + $0xf8] sm:$0xfe]  ;;  %v1114_v4 = vrot.slane %v925_v55, 1 }
  0x8f   : > { %v1110_v5 = vsel %vm1067_vm0, %v1108_v51, %v1109_v54  ;;  %v11408_v7 = vpack.c.bf16 %v892_v63, %v891_v61  ;;  %v1121_v10 = vrot.slane %v928_v13, 1  ;;  %v927_v14 = vld [vmem:[#allocation2 + $0xf0] sm:$0xfe]  ;;  %v894_v16 = vld [vmem:[%s16227_s2 + $0x98] sm:$0xff]  ;;  %v1119_v20 = vrot.slane %v12946_v35, 1  ;;  %v895_v26 = vld [vmem:[%s16227_s2 + $0xa0] sm:$0xff] }
  0x90   : > { %1415 = vmatmul.mubr.f32.gmra.mrb[10].mxu0 %v1095_v18  ;;  %v1117_v37 = vsel %vm1067_vm0, %v1112_v44, %v1116_v60  ;;  %v893_v15 = vld [vmem:[%s16227_s2 + $0x90] sm:$0xff]  ;;  %v930_v17 = vld [vmem:[#allocation2 + $0x118] sm:$0x1]  ;;  %v1115_v18 = vsel %vm1067_vm0, %v1109_v54, %v1114_v4  ;;  %v1118_v19 = vrot.slane %v927_v14, 1  ;;  %v896_v28 = vld [vmem:[%s16227_s2 + $0xa8] sm:$0xff]  ;;  %v1142_v4 = vrot.slane %v12965_v52, 1 }
  0x91   : > { %1419 = vmatprep.mubr.f32.mxu0 %v1103_v21  ;;  %11400 = vmatpush1.bf16.msra.mxu0 %v11399_v58  ;;  %v11411_v27 = vpack.c.bf16 %v894_v16, %v893_v15  ;;  %v1123_v58 = vsel %vm1067_vm0, %v1121_v10, %v1122_v12  ;;  %v1126_v21 = vrot.slane %v930_v17, 1  ;;  %v929_v22 = vld [vmem:[#allocation2 + $0x110] sm:$0x1]  ;;  %v932_v29 = vld [vmem:[#allocation2 + $0x128] sm:$0xfe]  ;;  %v898_v43 = vld [vmem:[%s16227_s2 + $0xb8] sm:$0xff] }
  0x92   : > { %11401 = vmatprep.subr.bf16.mxu0 %v16235_v0  ;;  %v1120_v35 = vsel %vm1067_vm0, %v1118_v19, %v1119_v20  ;;  %v1124_v32 = vrot.slane %v929_v22, 1  ;;  %v931_v42 = vld [vmem:[#allocation2 + $0x120] sm:$0xfe]  ;;  %v897_v44 = vld [vmem:[%s16227_s2 + $0xb0] sm:$0xff]  ;;  %v934_v46 = vld [vmem:[#allocation2 + $0x148] sm:$0x1] }
  0x93   : > { %v1127_v33 = vsel %vm1067_vm0, %v1122_v12, %v1126_v21  ;;  %v1128_v53 = vrot.slane %v931_v42, 1  ;;  %v1136_v54 = vrot.slane %v934_v46, 1  ;;  %v900_v60 = vld [vmem:[%s16227_s2 + $0xc8] sm:$0xff]  ;;  %v936_v55 = vld [vmem:[#allocation2 + $0x158] sm:$0xfe]  ;;  %v1139_v16 = vrot.slane %v12978_v1, 1 }
  0x94   : > { %1420 = vmatmul.mubr.f32.gmra.mrb[12].mxu0 %v1100_v62  ;;  %v11414_v62 = vpack.c.bf16 %v896_v28, %v895_v26  ;;  %v1125_v48 = vsel %vm1067_vm0, %v1119_v20, %v1124_v32  ;;  %v902_v10 = vld [vmem:[%s16227_s2 + $0xd8] sm:$0xff]  ;;  %v937_v19 = vld [vmem:[#allocation2 + $0x170] sm:$0x1]  ;;  %v903_v20 = vld [vmem:[%s16227_s2 + $0xe0] sm:$0xff]  ;;  %v1149_v42 = vrot.slane %v12986_v9, 1  ;;  %v1162_v9 = vrot.slane %v12990_v11, 1 }
  0x95   : > { %1424 = vmatprep.mubr.f32.mxu0 %v1107_v38  ;;  %11403 = vmatpush1.bf16.msra.mxu0 %v11402_v34  ;;  %v1131_v34 = vrot.slane %v932_v29, 1  ;;  %v1132_v38 = vrot.slane %v12952_v40, 1  ;;  %v11417_v40 = vpack.c.bf16 %v898_v43, %v897_v44  ;;  %v938_v12 = vld [vmem:[#allocation2 + $0x178] sm:$0x1]  ;;  %v1144_v21 = vrot.slane %v937_v19, 1  ;;  %v905_v32 = vld [vmem:[%s16227_s2 + $0xf0] sm:$0xff] }
  0x96   : > { %11404 = vmatprep.subr.bf16.mxu0 %v16235_v0  ;;  %v1152_v29 = vrot.slane %v12982_v6, 1  ;;  %v941_v46 = vld [vmem:[#allocation2 + $0x1a0] sm:$0x1] }
  0x97   : > { %v1133_v51 = vsel %vm1067_vm0, %v1131_v34, %v1132_v38  ;;  %v1137_v13 = vsel %vm1067_vm0, %v1132_v38, %v1136_v54  ;;  %v1145_v34 = vsel %vm1067_vm0, %v1139_v16, %v1144_v21  ;;  %v943_v54 = vld [vmem:[#allocation2 + $0x1b0] sm:$0xfe]  ;;  %v949_v21 = vld [vmem:[#allocation2 + $0x200] sm:$0x1] }
  0x98   : > { %1425 = vmatmul.mubr.f32.gmra.mrb[14].mxu0 %v1105_v39  ;;  %v1129_v39 = vrot.slane %v12959_v47, 1 }
  0x99   : > { %1429 = vmatprep.mubr.f32.mxu0 %v1113_v56  ;;  %11406 = vmatpush1.bf16.msra.mxu0 %v11405_v2  ;;  %v933_v2 = vld [vmem:[#allocation2 + $0x140] sm:$0x1] }
  0x9a   : > { %11407 = vmatprep.subr.bf16.mxu0 %v16235_v0  ;;  %v899_v56 = vld [vmem:[%s16227_s2 + $0xc0] sm:$0xff]  ;;  %v1130_v47 = vsel %vm1067_vm0, %v1128_v53, %v1129_v39  ;;  %v1134_v61 = vrot.slane %v933_v2, 1  ;;  %v946_v2 = vld [vmem:[#allocation2 + $0x1d8] sm:$0x1] }
  0x9b   : > { %v11420_v63 = vpack.c.bf16 %v900_v60, %v899_v56  ;;  %v9981_v56 = vld [vmem:[%s16227_s2 + $0x300] sm:$0xff] }
  0x9c   : > { %1430 = vmatmul.mubr.f32.gmra.mrb[16].mxu0 %v1110_v5  ;;  %v1141_v5 = vrot.slane %v936_v55, 1  ;;  %v1135_v14 = vsel %vm1067_vm0, %v1129_v39, %v1134_v61  ;;  %v1154_v39 = vrot.slane %v941_v46, 1  ;;  %v1158_v55 = vrot.slane %v943_v54, 1  ;;  %v9982_v61 = vld [vmem:[%s16227_s2 + $0x308] sm:$0xff] }
  0x9d   : > { %1434 = vmatprep.mubr.f32.mxu0 %v1117_v37  ;;  %11409 = vmatpush1.bf16.msra.mxu0 %v11408_v7  ;;  %v935_v7 = vld [vmem:[#allocation2 + $0x150] sm:$0xfe]  ;;  %v1179_v46 = vrot.slane %v13058_v8, 1  ;;  %v9992_v8 = vld [vmem:[%s16227_s2 + $0x358] sm:$0xff] }
  0x9e   : > { %11410 = vmatprep.subr.bf16.mxu0 %v16235_v0  ;;  %v901_v37 = vld [vmem:[%s16227_s2 + $0xd0] sm:$0xff]  ;;  %v1138_v15 = vrot.slane %v935_v7, 1  ;;  %v1143_v17 = vsel %vm1067_vm0, %v1141_v5, %v1142_v4  ;;  %v1155_v60 = vsel %vm1067_vm0, %v1149_v42, %v1154_v39  ;;  %v11480_v5 = vpack.c.bf16 %v9982_v61, %v9981_v56  ;;  %v955_v61 = vld [vmem:[#allocation2 + $0x240] sm:$0xfe] }
  0x9f   : > { %v11423_v52 = vpack.c.bf16 %v902_v10, %v901_v37  ;;  %v9983_v7 = vld [vmem:[%s16227_s2 + $0x310] sm:$0xff] }
  0xa0   : > { %1435 = vmatmul.mubr.f32.gmra.mrb[18].mxu0 %v1115_v18  ;;  %v1146_v18 = vrot.slane %v938_v12, 1  ;;  %v1140_v1 = vsel %vm1067_vm0, %v1138_v15, %v1139_v16  ;;  %11481 = vmatpush1.bf16.msra.mxu1 %v11480_v5  ;;  %v1172_v16 = vrot.slane %v13039_v49, 1  ;;  %v9986_v49 = vld [vmem:[%s16227_s2 + $0x328] sm:$0xff]  ;;  %v953_v39 = vld [vmem:[#allocation2 + $0x230] sm:$0x1]  ;;  %v1188_v5 = vrot.slane %v955_v61, 1 }
  0xa1   : > { %1439 = vmatprep.mubr.f32.mxu0 %v1123_v58  ;;  %11412 = vmatpush1.bf16.msra.mxu0 %v11411_v27  ;;  %v904_v27 = vld [vmem:[%s16227_s2 + $0xe8] sm:$0xff]  ;;  %v967_v61 = vld [vmem:[#allocation2 + $0x2d0] sm:$0xfe] }
  0xa2   : > { %11413 = vmatprep.subr.bf16.mxu0 %v16235_v0  ;;  %v940_v58 = vld [vmem:[#allocation2 + $0x188] sm:$0xfe]  ;;  %v11426_v22 = vpack.c.bf16 %v904_v27, %v903_v20  ;;  %v1147_v26 = vsel %vm1067_vm0, %v1142_v4, %v1146_v18  ;;  %11482 = vmatprep.subr.bf16.mxu1 %v16235_v0  ;;  %v9985_v18 = vld [vmem:[%s16227_s2 + $0x320] sm:$0xff]  ;;  %v1169_v27 = vrot.slane %v13047_v57, 1  ;;  %v9988_v57 = vld [vmem:[%s16227_s2 + $0x338] sm:$0xff] }
  0xa3   : > { %v1151_v28 = vrot.slane %v940_v58, 1  ;;  %v948_v4 = vld [vmem:[#allocation2 + $0x1e8] sm:$0xfe] }
  0xa4   : > { %1440 = vmatmul.mubr.f32.gmra.mrb[20].mxu0 %v1120_v35  ;;  %v939_v35 = vld [vmem:[#allocation2 + $0x180] sm:$0xfe]  ;;  %v1171_v15 = vrot.slane %v948_v4, 1  ;;  %v1189_v4 = vrot.slane %v13075_v25, 1  ;;  %v9996_v25 = vld [vmem:[%s16227_s2 + $0x378] sm:$0xff] }
  0xa5   : > { %1444 = vmatprep.mubr.f32.mxu0 %v1127_v33  ;;  %11415 = vmatpush1.bf16.msra.mxu0 %v11414_v62  ;;  %v906_v62 = vld [vmem:[%s16227_s2 + $0xf8] sm:$0xff]  ;;  %v942_v33 = vld [vmem:[#allocation2 + $0x1a8] sm:$0x1]  ;;  %v1148_v38 = vrot.slane %v939_v35, 1  ;;  %v1153_v44 = vsel %vm1067_vm0, %v1151_v28, %v1152_v29  ;;  %v9987_v28 = vld [vmem:[%s16227_s2 + $0x330] sm:$0xff]  ;;  %v1174_v35 = vrot.slane %v949_v21, 1 }
  0xa6   : > { %11416 = vmatprep.subr.bf16.mxu0 %v16235_v0  ;;  %v11429_v6 = vpack.c.bf16 %v906_v62, %v905_v32  ;;  %v1156_v43 = vrot.slane %v942_v33, 1  ;;  %v1173_v58 = vsel %vm1067_vm0, %v1171_v15, %v1172_v16  ;;  %v11489_v32 = vpack.c.bf16 %v9988_v57, %v9987_v28  ;;  %v961_v28 = vld [vmem:[#allocation2 + $0x290] sm:$0x1] }
  0xa7   : > { %v1150_v53 = vsel %vm1067_vm0, %v1148_v38, %v1149_v42  ;;  %v951_v38 = vld [vmem:[#allocation2 + $0x210] sm:$0xfe]  ;;  %v954_v42 = vld [vmem:[#allocation2 + $0x238] sm:$0x1]  ;;  %v1190_v15 = vsel %vm1067_vm0, %v1188_v5, %v1189_v4  ;;  %v1199_v21 = vrot.slane %v13100_v50, 1  ;;  %v1218_v5 = vrot.slane %v967_v61, 1 }
  0xa8   : > { %1445 = vmatmul.mubr.f32.gmra.mrb[22].mxu0 %v1125_v48  ;;  %v944_v48 = vld [vmem:[#allocation2 + $0x1b8] sm:$0xfe]  ;;  %v828_v61 = vld [vmem:[#allocation2 + $0xc8] sm:$0xff] }
  0xa9   : > { %1449 = vmatprep.mubr.f32.mxu0 %v1133_v51  ;;  %11418 = vmatpush1.bf16.msra.mxu0 %v11417_v40  ;;  %v1157_v40 = vsel %vm1067_vm0, %v1152_v29, %v1156_v43  ;;  %v1161_v51 = vrot.slane %v944_v48, 1  ;;  %v1178_v43 = vrot.slane %v951_v38, 1  ;;  %v10000_v50 = vld [vmem:[%s16227_s2 + $0x398] sm:$0xff] }
  0xaa   : > { %11419 = vmatprep.subr.bf16.mxu0 %v16235_v0 }
  0xab   : > { %v1163_v11 = vsel %vm1067_vm0, %v1161_v51, %v1162_v9  ;;  %v956_v51 = vld [vmem:[#allocation2 + $0x248] sm:$0xfe]  ;;  %v1180_v54 = vsel %vm1067_vm0, %v1178_v43, %v1179_v46  ;;  %v10001_v43 = vld [vmem:[%s16227_s2 + $0x3a0] sm:$0xff] }
  0xac   : > { %1450 = vmatmul.mubr.f32.gmra.mrb[24].mxu0 %v1130_v47  ;;  %v1159_v47 = vrot.slane %v13022_v31, 1  ;;  %v9984_v31 = vld [vmem:[%s16227_s2 + $0x318] sm:$0xff] }
  0xad   : > { %1454 = vmatprep.mubr.f32.mxu0 %v1137_v13  ;;  %11421 = vmatpush1.bf16.msra.mxu0 %v11420_v63  ;;  %v1166_v63 = vrot.slane %v946_v2, 1  ;;  %v945_v13 = vld [vmem:[#allocation2 + $0x1d0] sm:$0x1]  ;;  %v11483_v12 = vpack.c.bf16 %v9984_v31, %v9983_v7  ;;  %v1184_v2 = vrot.slane %v953_v39, 1 }
  0xae   : > { %11422 = vmatprep.subr.bf16.mxu0 %v16235_v0  ;;  %v1160_v37 = vsel %vm1067_vm0, %v1158_v55, %v1159_v47  ;;  %v1164_v10 = vrot.slane %v945_v13, 1  ;;  %v1191_v55 = vrot.slane %v956_v51, 1 }
  0xaf   : > { %11484 = vmatpush1.bf16.msra.mxu1 %v11483_v12  ;;  %v1185_v13 = vsel %vm1067_vm0, %v1179_v46, %v1184_v2  ;;  %v960_v12 = vld [vmem:[#allocation2 + $0x278] sm:$0xfe] }
  0xb0   : > { %1455 = vmatmul.mubr.f32.gmra.mrb[26].mxu0 %v1135_v14  ;;  %v1167_v14 = vsel %vm1067_vm0, %v1162_v9, %v1166_v63  ;;  %v1165_v19 = vsel %vm1067_vm0, %v1159_v47, %v1164_v10  ;;  %11485 = vmatprep.subr.bf16.mxu1 %v16235_v0  ;;  %v9991_v9 = vld [vmem:[%s16227_s2 + $0x350] sm:$0xff]  ;;  %v1192_v47 = vrot.slane %v13072_v24, 1  ;;  %v9993_v63 = vld [vmem:[%s16227_s2 + $0x360] sm:$0xff]  ;;  %v9994_v24 = vld [vmem:[%s16227_s2 + $0x368] sm:$0xff] }
  0xb1   : > { %1459 = vmatprep.mubr.f32.mxu0 %v1143_v17  ;;  %11424 = vmatpush1.bf16.msra.mxu0 %v11423_v52  ;;  %v947_v52 = vld [vmem:[#allocation2 + $0x1e0] sm:$0xfe]  ;;  %v950_v17 = vld [vmem:[#allocation2 + $0x208] sm:$0x1]  ;;  %v11495_v56 = vpack.c.bf16 %v9992_v8, %v9991_v9  ;;  %v11498_v10 = vpack.c.bf16 %v9994_v24, %v9993_v63  ;;  %v968_v9 = vld [vmem:[#allocation2 + $0x2d8] sm:$0xfe] }
  0xb2   : > { %11425 = vmatprep.subr.bf16.mxu0 %v16235_v0  ;;  %v1168_v20 = vrot.slane %v947_v52, 1  ;;  %v1193_v7 = vsel %vm1067_vm0, %v1191_v55, %v1192_v47  ;;  %v10003_v8 = vld [vmem:[%s16227_s2 + $0x3b0] sm:$0xff]  ;;  %v1221_v55 = vrot.slane %v968_v9, 1  ;;  %v10005_v63 = vld [vmem:[%s16227_s2 + $0x3c0] sm:$0xff] }
  0xb3   : > { %v823_v9 = vld [vmem:[#allocation2 + $0x90] sm:$0xff] }
  0xb4   : > { %1460 = vmatmul.mubr.f32.gmra.mrb[28].mxu0 %v1140_v1  ;;  %v1176_v1 = vrot.slane %v950_v17, 1  ;;  %v1170_v29 = vsel %vm1067_vm0, %v1168_v20, %v1169_v27  ;;  %v959_v20 = vld [vmem:[#allocation2 + $0x270] sm:$0xfe] }
  0xb5   : > { %1464 = vmatprep.mubr.f32.mxu0 %v1147_v26  ;;  %11427 = vmatpush1.bf16.msra.mxu0 %v11426_v22  ;;  %v11486_v22 = vpack.c.bf16 %v9986_v49, %v9985_v18  ;;  %v952_v26 = vld [vmem:[#allocation2 + $0x218] sm:$0xfe]  ;;  %v1201_v18 = vrot.slane %v960_v12, 1  ;;  %v9997_v49 = vld [vmem:[%s16227_s2 + $0x380] sm:$0xff] }
  0xb6   : > { %11428 = vmatprep.subr.bf16.mxu0 %v16235_v0  ;;  %v1177_v62 = vsel %vm1067_vm0, %v1172_v16, %v1176_v1  ;;  %v1181_v33 = vrot.slane %v952_v26, 1  ;;  %v1198_v1 = vrot.slane %v959_v20, 1 }
  0xb7   : > { %11487 = vmatpush1.bf16.msra.mxu1 %v11486_v22 }
  0xb8   : > { %1465 = vmatmul.mubr.f32.gmra.mrb[30].mxu0 %v1145_v34  ;;  %11488 = vmatprep.subr.bf16.mxu1 %v16235_v0  ;;  %v1182_v34 = vrot.slane %v13050_v59, 1  ;;  %v9990_v59 = vld [vmem:[%s16227_s2 + $0x348] sm:$0xff] }
  0xb9   : > { %1469 = vmatprep.mubr.f32.mxu0 %v1153_v44  ;;  %11430 = vmatpush1.bf16.msra.mxu0 %v11429_v6  ;;  %v9989_v6 = vld [vmem:[%s16227_s2 + $0x340] sm:$0xff]  ;;  %v1175_v44 = vsel %vm1067_vm0, %v1169_v27, %v1174_v35  ;;  %v962_v27 = vld [vmem:[#allocation2 + $0x298] sm:$0x1]  ;;  %v9999_v35 = vld [vmem:[%s16227_s2 + $0x390] sm:$0xff] }
  0xba   : > { %11431 = vmatprep.subr.bf16.mxu0 %v16235_v0  ;;  %v1183_v48 = vsel %vm1067_vm0, %v1181_v33, %v1182_v34  ;;  %v1206_v26 = vrot.slane %v962_v27, 1  ;;  %v11507_v33 = vpack.c.bf16 %v10000_v50, %v9999_v35  ;;  %v10011_v27 = vld [vmem:[%s16227_s2 + $0x3f0] sm:$0xff]  ;;  %v2421_v35 = vld [vmem:[#allocation2 + $0x48] sm:$0xff]  ;;  %v2420_v50 = vld [vmem:[#allocation2 + $0x40] sm:$0xff] }
  0xbb   : > { %11490 = vmatpush1.bf16.msra.mxu1 %v11489_v32  ;;  %v1200_v32 = vsel %vm1067_vm0, %v1198_v1, %v1199_v21 }
  0xbc   : > { %1470 = vmatmul.mubr.f32.gmra.mrb[32].mxu0 %v1150_v53  ;;  %11491 = vmatprep.subr.bf16.mxu1 %v16235_v0  ;;  %v1186_v53 = vrot.slane %v954_v42, 1  ;;  %v1212_v42 = vrot.slane %v13135_v41, 1  ;;  %v10002_v41 = vld [vmem:[%s16227_s2 + $0x3a8] sm:$0xff] }
  0xbd   : > { %1474 = vmatprep.mubr.f32.mxu0 %v1157_v40  ;;  %v11492_v40 = vpack.c.bf16 %v9990_v59, %v9989_v6  ;;  %v963_v6 = vld [vmem:[#allocation2 + $0x2a0] sm:$0xfe]  ;;  %v11510_v51 = vpack.c.bf16 %v10002_v41, %v10001_v43  ;;  %v9959_v41 = vld [vmem:[%s16227_s2 + $0x250] sm:$0xff] }
  0xbe   : > { %v1208_v59 = vrot.slane %v963_v6, 1  ;;  %v9957_v6 = vld [vmem:[%s16227_s2 + $0x240] sm:$0xff] }
  0xbf   : > { %11493 = vmatpush1.bf16.msra.mxu1 %v11492_v40  ;;  %v965_v40 = vld [vmem:[#allocation2 + $0x2c0] sm:$0x1] }
  0xc0   : > { %1475 = vmatmul.mubr.f32.gmra.mrb[34].mxu0 %v1155_v60  ;;  %11494 = vmatprep.subr.bf16.mxu1 %v16235_v0  ;;  %v1187_v60 = vsel %vm1067_vm0, %v1182_v34, %v1186_v53  ;;  %v1214_v2 = vrot.slane %v965_v40, 1  ;;  %v13475_v43 = vld [vmem:[#allocation2 + $0x40] sm:$0xff]  ;;  %v13485_v40 = vld [vmem:[#allocation2 + $0x78] sm:$0xff] }
  0xc1   : > { %1479 = vmatprep.mubr.f32.mxu0 %v1163_v11  ;;  %v958_v11 = vld [vmem:[#allocation2 + $0x268] sm:$0x1] }
  0xc2   : > { %v1196_v31 = vrot.slane %v958_v11, 1  ;;  %v970_v11 = vld [vmem:[#allocation2 + $0x2f8] sm:$0x1] }
  0xc3   : > { %11496 = vmatpush1.bf16.msra.mxu1 %v11495_v56 }
  0xc4   : > { %1480 = vmatmul.mubr.f32.gmra.mrb[36].mxu0 %v1160_v37  ;;  %11497 = vmatprep.subr.bf16.mxu1 %v16235_v0  ;;  %v957_v37 = vld [vmem:[#allocation2 + $0x260] sm:$0x1]  ;;  %v1197_v17 = vsel %vm1067_vm0, %v1192_v47, %v1196_v31  ;;  %v1222_v47 = vrot.slane %v13145_v36, 1  ;;  %v10006_v36 = vld [vmem:[%s16227_s2 + $0x3c8] sm:$0xff]  ;;  %v969_v31 = vld [vmem:[#allocation2 + $0x2f0] sm:$0x1] }
  0xc5   : > { %1484 = vmatprep.mubr.f32.mxu0 %v1167_v14  ;;  %v9995_v14 = vld [vmem:[%s16227_s2 + $0x370] sm:$0xff]  ;;  %v1194_v16 = vrot.slane %v957_v37, 1  ;;  %v11516_v37 = vpack.c.bf16 %v10006_v36, %v10005_v63  ;;  %v13515_v36 = vld [vmem:[#allocation2 + $0xa0] sm:$0xff] }
  0xc6   : > { %v11501_v52 = vpack.c.bf16 %v9996_v25, %v9995_v14  ;;  %v1223_v24 = vsel %vm1067_vm0, %v1221_v55, %v1222_v47  ;;  %v1224_v14 = vrot.slane %v969_v31, 1  ;;  %v9963_v55 = vld [vmem:[%s16227_s2 + $0x270] sm:$0xff] }
  0xc7   : > { %11499 = vmatpush1.bf16.msra.mxu1 %v11498_v10  ;;  %v10007_v10 = vld [vmem:[%s16227_s2 + $0x3d0] sm:$0xff] }
  0xc8   : > { %1485 = vmatmul.mubr.f32.gmra.mrb[38].mxu0 %v1165_v19  ;;  %11500 = vmatprep.subr.bf16.mxu1 %v16235_v0  ;;  %v1202_v19 = vrot.slane %v13083_v30, 1  ;;  %v9998_v30 = vld [vmem:[%s16227_s2 + $0x388] sm:$0xff] }
  0xc9   : > { %1489 = vmatprep.mubr.f32.mxu0 %v1173_v58  ;;  %v1195_v58 = vsel %vm1067_vm0, %v1189_v4, %v1194_v16  ;;  %v11504_v57 = vpack.c.bf16 %v9998_v30, %v9997_v49  ;;  %v1219_v4 = vrot.slane %v13157_v3, 1  ;;  %v10008_v3 = vld [vmem:[%s16227_s2 + $0x3d8] sm:$0xff]  ;;  %v10009_v16 = vld [vmem:[%s16227_s2 + $0x3e0] sm:$0xff]  ;;  %v9951_v30 = vld [vmem:[%s16227_s2 + $0x210] sm:$0xff] }
  0xca   : > { %v1203_v22 = vsel %vm1067_vm0, %v1201_v18, %v1202_v19  ;;  %v1207_v34 = vsel %vm1067_vm0, %v1202_v19, %v1206_v26  ;;  %v11519_v25 = vpack.c.bf16 %v10008_v3, %v10007_v10  ;;  %v9949_v18 = vld [vmem:[%s16227_s2 + $0x200] sm:$0xff]  ;;  %v9950_v19 = vld [vmem:[%s16227_s2 + $0x208] sm:$0xff]  ;;  %v10012_v49 = vld [vmem:[%s16227_s2 + $0x3f8] sm:$0xff] }
  0xcb   : > { %11502 = vmatpush1.bf16.msra.mxu1 %v11501_v52  ;;  %v1220_v12 = vsel %vm1067_vm0, %v1218_v5, %v1219_v4  ;;  %v1225_v52 = vsel %vm1067_vm0, %v1219_v4, %v1224_v14  ;;  %v11432_v1 = vpack.c.bf16 %v9950_v19, %v9949_v18  ;;  %v9965_v5 = vld [vmem:[%s16227_s2 + $0x280] sm:$0xff]  ;;  %v9966_v4 = vld [vmem:[%s16227_s2 + $0x288] sm:$0xff]  ;;  %v9968_v10 = vld [vmem:[%s16227_s2 + $0x298] sm:$0xff] }
  0xcc   : > { %1490 = vmatmul.mubr.f32.gmra.mrb[40].mxu0 %v1170_v29  ;;  %11503 = vmatprep.subr.bf16.mxu1 %v16235_v0  ;;  %v964_v29 = vld [vmem:[#allocation2 + $0x2a8] sm:$0xfe]  ;;  %v11456_v31 = vpack.c.bf16 %v9966_v4, %v9965_v5  ;;  %v832_v3 = vld [vmem:[#allocation2 + $0xf8] sm:$0xff]  ;;  %v2436_v18 = vld [vmem:[#allocation2 + $0x100] sm:$0xff] }
  0xcd   : > { %1494 = vmatprep.mubr.f32.mxu0 %v1177_v62  ;;  %v1204_v62 = vrot.slane %v961_v28, 1  ;;  %v1211_v38 = vrot.slane %v964_v29, 1  ;;  %v815_v28 = vld [vmem:[#allocation2 + $0x30] sm:$0xff]  ;;  %v9954_v29 = vld [vmem:[%s16227_s2 + $0x228] sm:$0xff] }
  0xce   : > { %v12415_v5 = vld [vmem:[#allocation2 + $0x190] sm:$0xff]  ;;  %v2453_v4 = vld [vmem:[#allocation2 + $0x1c8] sm:$0xff] }
  0xcf   : > { %11505 = vmatpush1.bf16.msra.mxu1 %v11504_v57  ;;  %v1205_v46 = vsel %vm1067_vm0, %v1199_v21, %v1204_v62  ;;  %v1213_v53 = vsel %vm1067_vm0, %v1211_v38, %v1212_v42  ;;  %v11525_v21 = vpack.c.bf16 %v10012_v49, %v10011_v27  ;;  %v9953_v57 = vld [vmem:[%s16227_s2 + $0x220] sm:$0xff]  ;;  %v9955_v62 = vld [vmem:[%s16227_s2 + $0x230] sm:$0xff]  ;;  %v13465_v38 = vld [vmem:[#allocation2 + $0x48] sm:$0xff] }
  0xd0   : > { %1495 = vmatmul.mubr.f32.gmra.mrb[42].mxu0 %v1175_v44  ;;  %11506 = vmatprep.subr.bf16.mxu1 %v16235_v0  ;;  %v966_v44 = vld [vmem:[#allocation2 + $0x2c8] sm:$0x1]  ;;  %v9972_v27 = vld [vmem:[%s16227_s2 + $0x2b8] sm:$0xff] }
  0xd1   : > { %1499 = vmatprep.mubr.f32.mxu0 %v1183_v48  ;;  %v1209_v48 = vrot.slane %v13140_v45, 1  ;;  %v1216_v39 = vrot.slane %v966_v44, 1  ;;  %v10004_v45 = vld [vmem:[%s16227_s2 + $0x3b8] sm:$0xff]  ;;  %v9958_v44 = vld [vmem:[%s16227_s2 + $0x248] sm:$0xff] }
  0xd2   : > { %v11513_v56 = vpack.c.bf16 %v10004_v45, %v10003_v8  ;;  %v9961_v8 = vld [vmem:[%s16227_s2 + $0x260] sm:$0xff]  ;;  %v9962_v45 = vld [vmem:[%s16227_s2 + $0x268] sm:$0xff] }
  0xd3   : > { %11508 = vmatpush1.bf16.msra.mxu1 %v11507_v33  ;;  %v9956_v33 = vld [vmem:[%s16227_s2 + $0x238] sm:$0xff]  ;;  %v836_v49 = vld [vmem:[#allocation2 + $0x128] sm:$0xff] }
  0xd4   : > { %1500 = vmatmul.mubr.f32.gmra.mrb[44].mxu0 %v1180_v54  ;;  %11509 = vmatprep.subr.bf16.mxu1 %v16235_v0  ;;  %v1210_v54 = vsel %vm1067_vm0, %v1208_v59, %v1209_v48  ;;  %v2424_v59 = vld [vmem:[#allocation2 + $0x70] sm:$0xff] }
  0xd5   : > { %1504 = vmatprep.mubr.f32.mxu0 %v1187_v60  ;;  %v1217_v60 = vsel %vm1067_vm0, %v1212_v42, %v1216_v39  ;;  %v819_v42 = vld [vmem:[#allocation2 + $0x60] sm:$0xff]  ;;  %v824_v39 = vld [vmem:[#allocation2 + $0x98] sm:$0xff] }
  0xd7   : > { %11511 = vmatpush1.bf16.msra.mxu1 %v11510_v51 }
  0xd8   : > { %1505 = vmatmul.mubr.f32.gmra.mrb[46].mxu0 %v1185_v13  ;;  %11512 = vmatprep.subr.bf16.mxu1 %v16235_v0  ;;  %v1215_v13 = vsel %vm1067_vm0, %v1209_v48, %v1214_v2  ;;  %v11444_v48 = vpack.c.bf16 %v9958_v44, %v9957_v6  ;;  %v2429_v2 = vld [vmem:[#allocation2 + $0xa8] sm:$0xff]  ;;  %v12411_v44 = vld [vmem:[#allocation2 + $0x130] sm:$0xff] }
  0xd9   : > { %1509 = vmatprep.mubr.f32.mxu0 %v1193_v7  ;;  %v1226_v7 = vrot.slane %v970_v11, 1  ;;  %v13505_v11 = vld [vmem:[#allocation2 + $0xa8] sm:$0xff] }
  0xda   : > { %v9978_v6 = vld [vmem:[%s16227_s2 + $0x2e8] sm:$0xff] }
  0xdb   : > { %11514 = vmatpush1.bf16.msra.mxu1 %v11513_v56  ;;  %v2428_v56 = vld [vmem:[#allocation2 + $0xa0] sm:$0xff] }
  0xdc   : > { %1510 = vmatmul.mubr.f32.gmra.mrb[48].mxu0 %v1190_v15  ;;  %11515 = vmatprep.subr.bf16.mxu1 %v16235_v0  ;;  %v1227_v15 = vsel %vm1067_vm0, %v1222_v47, %v1226_v7  ;;  %v9964_v47 = vld [vmem:[%s16227_s2 + $0x278] sm:$0xff]  ;;  %v2432_v7 = vld [vmem:[#allocation2 + $0xd0] sm:$0xff] }
  0xdd   : > { %1514 = vmatprep.mubr.f32.mxu0 %v1197_v17  ;;  %v10010_v17 = vld [vmem:[%s16227_s2 + $0x3e8] sm:$0xff]  ;;  %v11453_v63 = vpack.c.bf16 %v9964_v47, %v9963_v55  ;;  %v10045_v55 = vld [vmem:[%s16227_s2 + $0x500] sm:$0xff]  ;;  %v12414_v47 = vld [vmem:[#allocation2 + $0x198] sm:$0xff] }
  0xde   : > { %v11522_v20 = vpack.c.bf16 %v10010_v17, %v10009_v16  ;;  %v9970_v16 = vld [vmem:[%s16227_s2 + $0x2a8] sm:$0xff] }
  0xdf   : > { %11517 = vmatpush1.bf16.msra.mxu1 %v11516_v37  ;;  %v9967_v37 = vld [vmem:[%s16227_s2 + $0x290] sm:$0xff]  ;;  %v2437_v17 = vld [vmem:[#allocation2 + $0x108] sm:$0xff] }
  0xe0   : > { %1515 = vmatmul.mubr.f32.gmra.mrb[50].mxu0 %v1195_v58  ;;  %11518 = vmatprep.subr.bf16.mxu1 %v16235_v0  ;;  %v13436_v58 = vld [vmem:[#allocation2 + $0x8] sm:$0xff]  ;;  %v11459_v14 = vpack.c.bf16 %v9968_v10, %v9967_v37 }
  0xe1   : > { %1519 = vmatprep.mubr.f32.mxu0 %v1203_v22  ;;  %v9952_v22 = vld [vmem:[%s16227_s2 + $0x218] sm:$0xff]  ;;  %v852_v10 = vld [vmem:[#allocation2 + $0x1e8] sm:$0xff] }
  0xe2   : > { %v11435_v26 = vpack.c.bf16 %v9952_v22, %v9951_v30  ;;  %v835_v30 = vld [vmem:[#allocation2 + $0x120] sm:$0xff] }
  0xe3   : > { %11520 = vmatpush1.bf16.msra.mxu1 %v11519_v25  ;;  %v831_v25 = vld [vmem:[#allocation2 + $0xf0] sm:$0xff]  ;;  %v9973_v22 = vld [vmem:[%s16227_s2 + $0x2c0] sm:$0xff] }
  0xe4   : > { %1520 = vmatmul.mubr.f32.gmra.mrb[52].mxu0 %v1200_v32  ;;  %11521 = vmatprep.subr.bf16.mxu1 %v16235_v0  ;;  %v11438_v32 = vpack.c.bf16 %v9954_v29, %v9953_v57  ;;  %v2441_v57 = vld [vmem:[#allocation2 + $0x138] sm:$0xff]  ;;  %v2440_v29 = vld [vmem:[#allocation2 + $0x130] sm:$0xff] }
  0xe5   : > { %1524 = vmatprep.mubr.f32.mxu0 %v1207_v34  ;;  %v820_v34 = vld [vmem:[#allocation2 + $0x68] sm:$0xff] }
  0xe7   : > { %11523 = vmatpush1.bf16.msra.mxu1 %v11522_v20  ;;  %v9971_v20 = vld [vmem:[%s16227_s2 + $0x2b0] sm:$0xff] }
  0xe8   : > { %1525 = vmatmul.mubr.f32.gmra.mrb[54].mxu0 %v1205_v46  ;;  %11524 = vmatprep.subr.bf16.mxu1 %v16235_v0  ;;  %v2425_v46 = vld [vmem:[#allocation2 + $0x78] sm:$0xff] }
  0xe9   : > { %1529 = vmatprep.mubr.f32.mxu0 %v1213_v53  ;;  %v9960_v53 = vld [vmem:[%s16227_s2 + $0x258] sm:$0xff] }
  0xea   : > { %v11447_v51 = vpack.c.bf16 %v9960_v53, %v9959_v41  ;;  %v9979_v41 = vld [vmem:[%s16227_s2 + $0x2f0] sm:$0xff]  ;;  %v9980_v53 = vld [vmem:[%s16227_s2 + $0x2f8] sm:$0xff] }
  0xeb   : > { %11526 = vmatpush1.bf16.msra.mxu1 %v11525_v21  ;;  %v11465_v21 = vpack.c.bf16 %v9972_v27, %v9971_v20  ;;  %v10051_v20 = vld [vmem:[%s16227_s2 + $0x530] sm:$0xff]  ;;  %v10052_v27 = vld [vmem:[%s16227_s2 + $0x538] sm:$0xff] }
  0xec   : > { %1530 = vmatmul.mubr.f32.gmra.mrb[56].mxu0 %v1210_v54  ;;  %11575 = vmatprep.subr.bf16.mxu1 %v16235_v0  ;;  %v13495_v54 = vld [vmem:[#allocation2 + $0x70] sm:$0xff] }
  0xed   : > { %1534 = vmatprep.mubr.f32.mxu0 %v1217_v60  ;;  %v11450_v60 = vpack.c.bf16 %v9962_v45, %v9961_v8  ;;  %v843_v8 = vld [vmem:[#allocation2 + $0x180] sm:$0xff] }
  0xee   : > { %2580 = vmatmul.mubr.f32.vlgmr.msra.gmra.mrb[0].mxu1 %v815_v28  ;;  %v12413_v45 = vld [vmem:[#allocation2 + $0x160] sm:$0xff] }
  0xef   : > { %2584 = vmatprep.mubr.f32.mxu1 %v2421_v35 }
  0xf0   : > { %1535 = vmatmul.mubr.f32.gmra.mrb[58].mxu0 %v1215_v13  ;;  %v827_v13 = vld [vmem:[#allocation2 + $0xc0] sm:$0xff] }
  0xf1   : > { %1539 = vmatprep.mubr.f32.mxu0 %v1223_v24  ;;  %v2433_v24 = vld [vmem:[#allocation2 + $0xd8] sm:$0xff] }
  0xf2   : > { %2585 = vmatmul.mubr.f32.gmra.mrb[2].mxu1 %v2420_v50  ;;  %v9975_v50 = vld [vmem:[%s16227_s2 + $0x2d0] sm:$0xff] }
  0xf3   : > { %2589 = vmatprep.mubr.f32.mxu1 %v820_v34 }
  0xf4   : > { %1540 = vmatmul.mubr.f32.gmra.mrb[60].mxu0 %v1220_v12  ;;  %v13525_v12 = vld [vmem:[#allocation2 + $0xd8] sm:$0xff] }
  0xf5   : > { %1544 = vmatprep.mubr.f32.mxu0 %v1227_v15  ;;  %v9969_v15 = vld [vmem:[%s16227_s2 + $0x2a0] sm:$0xff] }
  0xf6   : > { %2590 = vmatmul.mubr.f32.gmra.mrb[4].mxu1 %v819_v42  ;;  %v11462_v19 = vpack.c.bf16 %v9970_v16, %v9969_v15  ;;  %v851_v15 = vld [vmem:[#allocation2 + $0x1e0] sm:$0xff] }
  0xf7   : > { %2594 = vmatprep.mubr.f32.mxu1 %v2425_v46  ;;  %v2445_v46 = vld [vmem:[#allocation2 + $0x168] sm:$0xff] }
  0xf8   : > { %1545 = vmatmul.mubr.f32.gmra.mrb[62].mxu0 %v1225_v52  ;;  %v13535_v52 = vld [vmem:[#allocation2 + $0xd0] sm:$0xff] }
  0xf9   : > { %1614 = vmatprep.mubr.f32.mxu0 %v13436_v58 }
  0xfa   : > { %2595 = vmatmul.mubr.f32.gmra.mrb[6].mxu1 %v2424_v59  ;;  %v2444_v59 = vld [vmem:[#allocation2 + $0x160] sm:$0xff] }
  0xfb   : > { %2599 = vmatprep.mubr.f32.mxu1 %v824_v39 }
  0xfc   : > { %1615 = vmatmul.mubr.f32.vlgmr.msra.gmra.mrb[64].mxu0 %v13436_v58 }
  0xfd   : > { %11433 = vmatpush1.bf16.msra.mxu0 %v11432_v1  ;;  %1619 = vmatprep.mubr.f32.mxu0 %v13436_v58  ;;  %v13545_v1 = vld [vmem:[#allocation2 + $0x108] sm:$0xff] }
  0xfe   : > { %11434 = vmatprep.subr.bf16.mxu0 %v16235_v0  ;;  %2600 = vmatmul.mubr.f32.gmra.mrb[8].mxu1 %v823_v9 }
  0xff   : > { %2604 = vmatprep.mubr.f32.mxu1 %v2429_v2  ;;  %v2449_v2 = vld [vmem:[#allocation2 + $0x198] sm:$0xff] }
 0x100   : > { %1620 = vmatmul.mubr.f32.gmra.mrb[66].mxu0 %v13436_v58 }
 0x101   : > { %1624 = vmatprep.mubr.f32.mxu0 %v13127_v23  ;;  %11436 = vmatpush1.bf16.msra.mxu0 %v11435_v26  ;;  %v11441_v23 = vpack.c.bf16 %v9956_v33, %v9955_v62  ;;  %v9974_v26 = vld [vmem:[%s16227_s2 + $0x2c8] sm:$0xff]  ;;  %v840_v62 = vld [vmem:[#allocation2 + $0x158] sm:$0xff] }
 0x102   : > { %11437 = vmatprep.subr.bf16.mxu0 %v16235_v0  ;;  %2605 = vmatmul.mubr.f32.gmra.mrb[10].mxu1 %v2428_v56  ;;  %v11468_v35 = vpack.c.bf16 %v9974_v26, %v9973_v22  ;;  %v12410_v33 = vld [vmem:[#allocation2 + $0x138] sm:$0xff]  ;;  %v2448_v56 = vld [vmem:[#allocation2 + $0x190] sm:$0xff]  ;;  %v10054_v26 = vld [vmem:[%s16227_s2 + $0x548] sm:$0xff] }
 0x103   : > { %2609 = vmatprep.mubr.f32.mxu1 %v828_v61  ;;  %v12418_v22 = vld [vmem:[#allocation2 + $0x1f8] sm:$0xff] }
 0x104   : > { %1625 = vmatmul.mubr.f32.gmra.mrb[68].mxu0 %v815_v28  ;;  %v12409_v28 = vld [vmem:[#allocation2 + $0x100] sm:$0xff] }
 0x105   : > { %1629 = vmatprep.mubr.f32.mxu0 %v13465_v38  ;;  %11439 = vmatpush1.bf16.msra.mxu0 %v11438_v32  ;;  %v9976_v32 = vld [vmem:[%s16227_s2 + $0x2d8] sm:$0xff] }
 0x106   : > { %11440 = vmatprep.subr.bf16.mxu0 %v16235_v0  ;;  %2610 = vmatmul.mubr.f32.gmra.mrb[12].mxu1 %v827_v13 }
 0x107   : > { %2614 = vmatprep.mubr.f32.mxu1 %v2433_v24  ;;  %v2452_v24 = vld [vmem:[#allocation2 + $0x1c0] sm:$0xff] }
 0x108   : > { %1630 = vmatmul.mubr.f32.gmra.mrb[70].mxu0 %v13475_v43 }
 0x109   : > { %1634 = vmatprep.mubr.f32.mxu0 %v820_v34  ;;  %11442 = vmatpush1.bf16.msra.mxu0 %v11441_v23  ;;  %v11471_v34 = vpack.c.bf16 %v9976_v32, %v9975_v50  ;;  %v839_v23 = vld [vmem:[#allocation2 + $0x150] sm:$0xff]  ;;  %v2461_v32 = vld [vmem:[#allocation2 + $0x228] sm:$0xff] }
 0x10a   : > { %11443 = vmatprep.subr.bf16.mxu0 %v16235_v0  ;;  %2615 = vmatmul.mubr.f32.gmra.mrb[14].mxu1 %v2432_v7  ;;  %v10047_v7 = vld [vmem:[%s16227_s2 + $0x510] sm:$0xff] }
 0x10b   : > { %2619 = vmatprep.mubr.f32.mxu1 %v832_v3  ;;  %v12419_v50 = vld [vmem:[#allocation2 + $0x1f0] sm:$0xff] }
 0x10c   : > { %1635 = vmatmul.mubr.f32.gmra.mrb[72].mxu0 %v819_v42  ;;  %v9977_v42 = vld [vmem:[%s16227_s2 + $0x2e0] sm:$0xff] }
 0x10d   : > { %1639 = vmatprep.mubr.f32.mxu0 %v13485_v40  ;;  %11445 = vmatpush1.bf16.msra.mxu0 %v11444_v48  ;;  %v11474_v48 = vpack.c.bf16 %v9978_v6, %v9977_v42 }
 0x10e   : > { %11446 = vmatprep.subr.bf16.mxu0 %v16235_v0  ;;  %2620 = vmatmul.mubr.f32.gmra.mrb[16].mxu1 %v831_v25 }
 0x10f   : > { %2624 = vmatprep.mubr.f32.mxu1 %v2437_v17  ;;  %v12417_v17 = vld [vmem:[#allocation2 + $0x1c0] sm:$0xff] }
 0x110   : > { %1640 = vmatmul.mubr.f32.gmra.mrb[74].mxu0 %v13495_v54 }
 0x111   : > { %1644 = vmatprep.mubr.f32.mxu0 %v824_v39  ;;  %11448 = vmatpush1.bf16.msra.mxu0 %v11447_v51  ;;  %v844_v39 = vld [vmem:[#allocation2 + $0x188] sm:$0xff] }
 0x112   : > { %11449 = vmatprep.subr.bf16.mxu0 %v16235_v0  ;;  %2625 = vmatmul.mubr.f32.gmra.mrb[18].mxu1 %v2436_v18  ;;  %v12412_v51 = vld [vmem:[#allocation2 + $0x168] sm:$0xff]  ;;  %v2457_v18 = vld [vmem:[#allocation2 + $0x1f8] sm:$0xff] }
 0x113   : > { %2629 = vmatprep.mubr.f32.mxu1 %v836_v49 }
 0x114   : > { %1645 = vmatmul.mubr.f32.gmra.mrb[76].mxu0 %v823_v9  ;;  %v11477_v9 = vpack.c.bf16 %v9980_v53, %v9979_v41  ;;  %v10058_v41 = vld [vmem:[%s16227_s2 + $0x568] sm:$0xff] }
 0x115   : > { %1649 = vmatprep.mubr.f32.mxu0 %v13505_v11  ;;  %11451 = vmatpush1.bf16.msra.mxu0 %v11450_v60  ;;  %v848_v60 = vld [vmem:[#allocation2 + $0x1b8] sm:$0xff]  ;;  %v860_v53 = vld [vmem:[#allocation2 + $0x248] sm:$0xff] }
 0x116   : > { %11452 = vmatprep.subr.bf16.mxu0 %v16235_v0  ;;  %2630 = vmatmul.mubr.f32.gmra.mrb[20].mxu1 %v835_v30 }
 0x117   : > { %2634 = vmatprep.mubr.f32.mxu1 %v2441_v57 }
 0x118   : > { %1650 = vmatmul.mubr.f32.gmra.mrb[78].mxu0 %v13515_v36 }
 0x119   : > { %1654 = vmatprep.mubr.f32.mxu0 %v828_v61  ;;  %11454 = vmatpush1.bf16.msra.mxu0 %v11453_v63  ;;  %v10046_v61 = vld [vmem:[%s16227_s2 + $0x508] sm:$0xff]  ;;  %v847_v63 = vld [vmem:[#allocation2 + $0x1b0] sm:$0xff] }
 0x11a   : > { %11455 = vmatprep.subr.bf16.mxu0 %v16235_v0  ;;  %2635 = vmatmul.mubr.f32.gmra.mrb[22].mxu1 %v2440_v29 }
 0x11b   : > { %2639 = vmatprep.mubr.f32.mxu1 %v840_v62 }
 0x11c   : > { %1655 = vmatmul.mubr.f32.gmra.mrb[80].mxu0 %v827_v13  ;;  %v11576_v13 = vpack.c.bf16 %v10046_v61, %v10045_v55  ;;  %v10060_v55 = vld [vmem:[%s16227_s2 + $0x578] sm:$0xff] }
 0x11d   : > { %1659 = vmatprep.mubr.f32.mxu0 %v13525_v12  ;;  %11457 = vmatpush1.bf16.msra.mxu0 %v11456_v31  ;;  %v10048_v31 = vld [vmem:[%s16227_s2 + $0x518] sm:$0xff] }
 0x11e   : > { %11458 = vmatprep.subr.bf16.mxu0 %v16235_v0  ;;  %2640 = vmatmul.mubr.f32.gmra.mrb[24].mxu1 %v839_v23  ;;  %v11579_v37 = vpack.c.bf16 %v10048_v31, %v10047_v7  ;;  %v10062_v7 = vld [vmem:[%s16227_s2 + $0x588] sm:$0xff]  ;;  %v864_v31 = vld [vmem:[#allocation2 + $0x278] sm:$0xff] }
 0x11f   : > { %2644 = vmatprep.mubr.f32.mxu1 %v2445_v46  ;;  %11577 = vmatpush1.bf16.msra.mxu1 %v11576_v13  ;;  %v12420_v46 = vld [vmem:[#allocation2 + $0x228] sm:$0xff]  ;;  %v2467_v13 = vld [vmem:[#allocation2 + $0x278] sm:$0xff] }
 0x120   : > { %1660 = vmatmul.mubr.f32.gmra.mrb[82].mxu0 %v13535_v52  ;;  %11578 = vmatprep.subr.bf16.mxu1 %v16235_v0 }
 0x121   : > { %1664 = vmatprep.mubr.f32.mxu0 %v832_v3  ;;  %11460 = vmatpush1.bf16.msra.mxu0 %v11459_v14  ;;  %v10049_v3 = vld [vmem:[%s16227_s2 + $0x520] sm:$0xff]  ;;  %v12416_v14 = vld [vmem:[#allocation2 + $0x1c8] sm:$0xff] }
 0x122   : > { %11461 = vmatprep.subr.bf16.mxu0 %v16235_v0  ;;  %2645 = vmatmul.mubr.f32.gmra.mrb[26].mxu1 %v2444_v59  ;;  %v2462_v59 = vld [vmem:[#allocation2 + $0x240] sm:$0xff] }
 0x123   : > { %2649 = vmatprep.mubr.f32.mxu1 %v844_v39  ;;  %11580 = vmatpush1.bf16.msra.mxu1 %v11579_v37 }
 0x124   : > { %1665 = vmatmul.mubr.f32.gmra.mrb[84].mxu0 %v831_v25  ;;  %v10050_v25 = vld [vmem:[%s16227_s2 + $0x528] sm:$0xff]  ;;  %11581 = vmatprep.subr.bf16.mxu1 %v16235_v0 }
 0x125   : > { %1669 = vmatprep.mubr.f32.mxu0 %v13545_v1  ;;  %11463 = vmatpush1.bf16.msra.mxu0 %v11462_v19  ;;  %v11582_v16 = vpack.c.bf16 %v10050_v25, %v10049_v3  ;;  %v2456_v19 = vld [vmem:[#allocation2 + $0x1f0] sm:$0xff]  ;;  %v2469_v25 = vld [vmem:[#allocation2 + $0x288] sm:$0xff] }
 0x126   : > { %11464 = vmatprep.subr.bf16.mxu0 %v16235_v0  ;;  %2650 = vmatmul.mubr.f32.gmra.mrb[28].mxu1 %v843_v8 }
 0x127   : > { %2654 = vmatprep.mubr.f32.mxu1 %v2449_v2  ;;  %11583 = vmatpush1.bf16.msra.mxu1 %v11582_v16  ;;  %v2464_v2 = vld [vmem:[#allocation2 + $0x250] sm:$0xff] }
 0x128   : > { %1670 = vmatmul.mubr.f32.gmra.mrb[86].mxu0 %v12409_v28  ;;  %11584 = vmatprep.subr.bf16.mxu1 %v16235_v0  ;;  %v855_v28 = vld [vmem:[#allocation2 + $0x210] sm:$0xff] }
 0x129   : > { %1674 = vmatprep.mubr.f32.mxu0 %v836_v49  ;;  %11466 = vmatpush1.bf16.msra.mxu0 %v11465_v21  ;;  %v11585_v49 = vpack.c.bf16 %v10052_v27, %v10051_v20  ;;  %v856_v21 = vld [vmem:[#allocation2 + $0x218] sm:$0xff]  ;;  %v10063_v16 = vld [vmem:[%s16227_s2 + $0x590] sm:$0xff] }
 0x12a   : > { %11467 = vmatprep.subr.bf16.mxu0 %v16235_v0  ;;  %2655 = vmatmul.mubr.f32.gmra.mrb[30].mxu1 %v2448_v56  ;;  %v10059_v56 = vld [vmem:[%s16227_s2 + $0x570] sm:$0xff] }
 0x12b   : > { %2659 = vmatprep.mubr.f32.mxu1 %v848_v60  ;;  %11586 = vmatpush1.bf16.msra.mxu1 %v11585_v49  ;;  %v2471_v49 = vld [vmem:[#allocation2 + $0x2a8] sm:$0xff] }
 0x12c   : > { %1675 = vmatmul.mubr.f32.gmra.mrb[88].mxu0 %v835_v30  ;;  %v10053_v30 = vld [vmem:[%s16227_s2 + $0x540] sm:$0xff]  ;;  %11587 = vmatprep.subr.bf16.mxu1 %v16235_v0 }
 0x12d   : > { %1679 = vmatprep.mubr.f32.mxu0 %v12410_v33  ;;  %11469 = vmatpush1.bf16.msra.mxu0 %v11468_v35  ;;  %v11588_v57 = vpack.c.bf16 %v10054_v26, %v10053_v30  ;;  %v10055_v33 = vld [vmem:[%s16227_s2 + $0x550] sm:$0xff]  ;;  %v2470_v30 = vld [vmem:[#allocation2 + $0x2a0] sm:$0xff]  ;;  %v10066_v26 = vld [vmem:[%s16227_s2 + $0x5a8] sm:$0xff] }
 0x12e   : > { %11470 = vmatprep.subr.bf16.mxu0 %v16235_v0  ;;  %2660 = vmatmul.mubr.f32.gmra.mrb[32].mxu1 %v847_v63 }
 0x12f   : > { %2664 = vmatprep.mubr.f32.mxu1 %v2453_v4  ;;  %11589 = vmatpush1.bf16.msra.mxu1 %v11588_v57  ;;  %v2466_v4 = vld [vmem:[#allocation2 + $0x270] sm:$0xff] }
 0x130   : > { %1680 = vmatmul.mubr.f32.gmra.mrb[90].mxu0 %v12411_v44  ;;  %11590 = vmatprep.subr.bf16.mxu1 %v16235_v0  ;;  %v2463_v44 = vld [vmem:[#allocation2 + $0x248] sm:$0xff] }
 0x131   : > { %1684 = vmatprep.mubr.f32.mxu0 %v840_v62  ;;  %11472 = vmatpush1.bf16.msra.mxu0 %v11471_v34  ;;  %v2460_v62 = vld [vmem:[#allocation2 + $0x220] sm:$0xff]  ;;  %v10056_v34 = vld [vmem:[%s16227_s2 + $0x558] sm:$0xff] }
 0x132   : > { %11473 = vmatprep.subr.bf16.mxu0 %v16235_v0  ;;  %2665 = vmatmul.mubr.f32.gmra.mrb[34].mxu1 %v2452_v24  ;;  %v10061_v24 = vld [vmem:[%s16227_s2 + $0x580] sm:$0xff] }
 0x133   : > { %2669 = vmatprep.mubr.f32.mxu1 %v852_v10  ;;  %v11600_v37 = vpack.c.bf16 %v10062_v7, %v10061_v24  ;;  %v2476_v24 = vld [vmem:[#allocation2 + $0x2e0] sm:$0xff]  ;;  %v10071_v7 = vld [vmem:[%s16227_s2 + $0x5d0] sm:$0xff] }
 0x134   : > { %1685 = vmatmul.mubr.f32.gmra.mrb[92].mxu0 %v839_v23  ;;  %v11591_v23 = vpack.c.bf16 %v10056_v34, %v10055_v33  ;;  %v2472_v33 = vld [vmem:[#allocation2 + $0x2b0] sm:$0xff] }
 0x135   : > { %1689 = vmatprep.mubr.f32.mxu0 %v12412_v51  ;;  %11475 = vmatpush1.bf16.msra.mxu0 %v11474_v48  ;;  %v10057_v48 = vld [vmem:[%s16227_s2 + $0x560] sm:$0xff]  ;;  %v10067_v34 = vld [vmem:[%s16227_s2 + $0x5b0] sm:$0xff] }
 0x136   : > { %11476 = vmatprep.subr.bf16.mxu0 %v16235_v0  ;;  %2670 = vmatmul.mubr.f32.gmra.mrb[36].mxu1 %v851_v15 }
 0x137   : > { %2674 = vmatprep.mubr.f32.mxu1 %v2457_v18  ;;  %11592 = vmatpush1.bf16.msra.mxu1 %v11591_v23  ;;  %v10064_v18 = vld [vmem:[%s16227_s2 + $0x598] sm:$0xff]  ;;  %v867_v23 = vld [vmem:[#allocation2 + $0x2a0] sm:$0xff] }
 0x138   : > { %1690 = vmatmul.mubr.f32.gmra.mrb[94].mxu0 %v12413_v45  ;;  %11593 = vmatprep.subr.bf16.mxu1 %v16235_v0  ;;  %v2465_v45 = vld [vmem:[#allocation2 + $0x258] sm:$0xff] }
 0x139   : > { %1694 = vmatprep.mubr.f32.mxu0 %v844_v39  ;;  %11478 = vmatpush1.bf16.msra.mxu0 %v11477_v9  ;;  %v11594_v39 = vpack.c.bf16 %v10058_v41, %v10057_v48  ;;  %v13682_v41 = vld [vmem:[%s12830_s18 + $0xf0] sm:$0xff] }
 0x13a   : > { %11527 = vmatprep.subr.bf16.mxu0 %v16235_v0  ;;  %2675 = vmatmul.mubr.f32.gmra.mrb[38].mxu1 %v2456_v19  ;;  %v11603_v19 = vpack.c.bf16 %v10064_v18, %v10063_v16 }
 0x13b   : > { %2679 = vmatprep.mubr.f32.mxu1 %v856_v21  ;;  %11595 = vmatpush1.bf16.msra.mxu1 %v11594_v39  ;;  %v2475_v39 = vld [vmem:[#allocation2 + $0x2d8] sm:$0xff] }
 0x13c   : > { %1695 = vmatmul.mubr.f32.gmra.mrb[96].mxu0 %v843_v8  ;;  %v12421_v8 = vld [vmem:[#allocation2 + $0x220] sm:$0xff]  ;;  %11596 = vmatprep.subr.bf16.mxu1 %v16235_v0 }
 0x13d   : > { %1699 = vmatprep.mubr.f32.mxu0 %v12414_v47  ;;  %v11597_v47 = vpack.c.bf16 %v10060_v55, %v10059_v56  ;;  %v10070_v56 = vld [vmem:[%s16227_s2 + $0x5c8] sm:$0xff] }
 0x13e   : > { %2680 = vmatmul.mubr.f32.gmra.mrb[40].mxu1 %v855_v28 }
 0x13f   : > { %2684 = vmatprep.mubr.f32.mxu1 %v2461_v32  ;;  %11598 = vmatpush1.bf16.msra.mxu1 %v11597_v47  ;;  %v12425_v32 = vld [vmem:[#allocation2 + $0x280] sm:$0xff] }
 0x140   : > { %1700 = vmatmul.mubr.f32.gmra.mrb[98].mxu0 %v12415_v5  ;;  %v12422_v5 = vld [vmem:[#allocation2 + $0x258] sm:$0xff]  ;;  %11599 = vmatprep.subr.bf16.mxu1 %v16235_v0 }
 0x141   : > { %1704 = vmatprep.mubr.f32.mxu0 %v848_v60  ;;  %v859_v60 = vld [vmem:[#allocation2 + $0x240] sm:$0xff] }
 0x142   : > { %2685 = vmatmul.mubr.f32.gmra.mrb[42].mxu1 %v2460_v62  ;;  %v2473_v62 = vld [vmem:[#allocation2 + $0x2b8] sm:$0xff] }
 0x143   : > { %2689 = vmatprep.mubr.f32.mxu1 %v2463_v44  ;;  %11601 = vmatpush1.bf16.msra.mxu1 %v11600_v37  ;;  %v1775_v37 = vld [vmem:[#allocation2] sm:$0xfc] }
 0x144   : > { %1705 = vmatmul.mubr.f32.gmra.mrb[100].mxu0 %v847_v63  ;;  %11602 = vmatprep.subr.bf16.mxu1 %v16235_v0 }
 0x145   : > { %1709 = vmatprep.mubr.f32.mxu0 %v12416_v14  ;;  %v12423_v14 = vld [vmem:[#allocation2 + $0x250] sm:$0xff] }
 0x146   : > { %2690 = vmatmul.mubr.f32.gmra.mrb[44].mxu1 %v2462_v59 }
 0x147   : > { %2694 = vmatprep.mubr.f32.mxu1 %v2465_v45  ;;  %11604 = vmatpush1.bf16.msra.mxu1 %v11603_v19  ;;  %v2474_v45 = vld [vmem:[#allocation2 + $0x2d0] sm:$0xff]  ;;  %v1904_v19 = vrot.slane %v1775_v37, 2  ;;  %v1918_v37 = vrot.slane %v13465_v38, 2 }
 0x148   : > { %1710 = vmatmul.mubr.f32.gmra.mrb[102].mxu0 %v12417_v17  ;;  %v863_v17 = vld [vmem:[#allocation2 + $0x270] sm:$0xff]  ;;  %11605 = vmatprep.subr.bf16.mxu1 %v16235_v0 }
 0x149   : > { %1714 = vmatprep.mubr.f32.mxu0 %v852_v10 }
 0x14a   : > { %2695 = vmatmul.mubr.f32.gmra.mrb[46].mxu1 %v2464_v2  ;;  %v10069_v2 = vld [vmem:[%s16227_s2 + $0x5c0] sm:$0xff] }
 0x14b   : > { %2699 = vmatprep.mubr.f32.mxu1 %v2467_v13  ;;  %v11612_v55 = vpack.c.bf16 %v10070_v56, %v10069_v2  ;;  %v1779_v2 = vld [vmem:[#allocation2 + $0x30] sm:$0xfc] }
 0x14c   : > { %1715 = vmatmul.mubr.f32.gmra.mrb[104].mxu0 %v851_v15  ;;  %v2468_v15 = vld [vmem:[#allocation2 + $0x280] sm:$0xff]  ;;  %v10075_v56 = vld [vmem:[%s16227_s2 + $0x5f0] sm:$0xff] }
 0x14d   : > { %1719 = vmatprep.mubr.f32.mxu0 %v12418_v22  ;;  %v10065_v22 = vld [vmem:[%s16227_s2 + $0x5a0] sm:$0xff] }
 0x14e   : > { %2700 = vmatmul.mubr.f32.gmra.mrb[48].mxu1 %v2466_v4  ;;  %v11606_v57 = vpack.c.bf16 %v10066_v26, %v10065_v22  ;;  %v2477_v4 = vld [vmem:[#allocation2 + $0x2e8] sm:$0xff]  ;;  %v10073_v26 = vld [vmem:[%s16227_s2 + $0x5e0] sm:$0xff] }
 0x14f   : > { %v13612_v29 = vpop.f32.mrb[0].mxu0  ;;  %2704 = vmatprep.mubr.f32.mxu1 %v2469_v25  ;;  %v13705_v25 = vrot.slane %v13436_v58, 2  ;;  %v13718_v58 = vld [vmem:[%s16227_s2 + $0x408] sm:$0xff] }
 0x150   : > { %v1393_v35 = vpop.f32.mrb[1].mxu0  ;;  %1720 = vmatmul.mubr.f32.gmra.mrb[106].mxu0 %v12419_v50  ;;  %11607 = vmatpush1.bf16.msra.mxu1 %v11606_v57 }
 0x151   : > { %1724 = vmatprep.mubr.f32.mxu0 %v856_v21  ;;  %v12424_v21 = vld [vmem:[#allocation2 + $0x288] sm:$0xff]  ;;  %11608 = vmatprep.subr.bf16.mxu1 %v16235_v0 }
 0x152   : > { %2705 = vmatmul.mubr.f32.gmra.mrb[50].mxu1 %v2468_v15 }
 0x153   : > { %v13621_v42 = vpop.f32.mrb[2].mxu0  ;;  %2709 = vmatprep.mubr.f32.mxu1 %v2471_v49  ;;  %v1777_v49 = vld [vmem:[#allocation2 + $0x20] sm:$0x3] }
 0x154   : > { %v1398_v6 = vpop.f32.mrb[3].mxu0  ;;  %1725 = vmatmul.mubr.f32.gmra.mrb[108].mxu0 %v855_v28  ;;  %v868_v28 = vld [vmem:[#allocation2 + $0x2a8] sm:$0xff] }
 0x155   : > { %1729 = vmatprep.mubr.f32.mxu0 %v12420_v46  ;;  %v10068_v6 = vld [vmem:[%s16227_s2 + $0x5b8] sm:$0xff]  ;;  %v13676_v46 = vld [vmem:[%s12825_s15 + $0xf0] sm:$0xff] }
 0x156   : > { %2710 = vmatmul.mubr.f32.gmra.mrb[52].mxu1 %v2470_v30  ;;  %v11609_v44 = vpack.c.bf16 %v10068_v6, %v10067_v34  ;;  %v712_v48 = vrot.slane %v13676_v46, 7  ;;  %v12428_v30 = vld [vmem:[#allocation2 + $0x2e8] sm:$0xff]  ;;  %v424_v34 = vld [vmem:[%s12830_s18 + $0xf8] sm:$0xff]  ;;  %s272_s18 = sand.u32 1, %s12581_s22  }
 0x157   : > { %v13630_v51 = vpop.f32.mrb[4].mxu0  ;;  %2714 = vmatprep.mubr.f32.mxu1 %v2473_v62  ;;  %v2775_v46 = vld [vmem:[#allocation2 + $0x48] sm:$0xff]  ;;  %s9912_s13 = sshll.u32 %s272_s18, 8  ;;  %s16184_s25 = scalar_lea.sflag [#allocation5], %s272_s18 }
 0x158   : > { %v1403_v9 = vpop.f32.mrb[5].mxu0  ;;  %1730 = vmatmul.mubr.f32.gmra.mrb[110].mxu0 %v12421_v8  ;;  %11610 = vmatpush1.bf16.msra.mxu1 %v11609_v44  ;;  %v12426_v8 = vld [vmem:[#allocation2 + $0x2b8] sm:$0xff]  ;;  %808 = vst [vmem:[#allocation2 + $0x308] sm:$0xfe] %v712_v48  ;;  %v504_v44 = vrot.slane %v424_v34, 7  ;;  %s16109_s14 = scalar_lea.vmem [#allocation6], %s9912_s13 }
 0x159   : > { %1734 = vmatprep.mubr.f32.mxu0 %v860_v53  ;;  %v503_v9 = vrot.slane %v13682_v41, 7  ;;  %11611 = vmatprep.subr.bf16.mxu1 %v16235_v0  ;;  %s9820_s17 = sshll.u32 %s16109_s14, 4  ;;  %s16178_s17 = int_to_ptr.vmem [resolvable:$true] %s9820_s17 }
 0x15a   : > { %2715 = vmatmul.mubr.f32.gmra.mrb[54].mxu1 %v2472_v33  ;;  %v634_v33 = vld [vmem:[%s12825_s15 + $0xf8] sm:$0xff]  ;;  %602 = vst [vmem:[#allocation2 + $0x320] sm:$0x1] %v504_v44  ;;  %s12523_s28 = scalar_lea.vmem %s16178_s17, 4096  ;;  %p12530_p2 = scmp.lt.s32.totalorder %s16178_s17, %s12528_s10 }
 0x15b   : > { %v13639_v61 = vpop.f32.mrb[6].mxu0  ;;  %2719 = vmatprep.mubr.f32.mxu1 %v2475_v39  ;;  %600 = vst [vmem:[#allocation2 + $0x300] sm:$0xfe] %v503_v9  ;;  %v713_v6 = vrot.slane %v634_v33, 7  ;;  %v12429_v39 = vld [vmem:[#allocation2 + $0x2e0] sm:$0xff]  ;;  %p12524_p6 = scmp.ne.s32.totalorder %s16178_s17, %s12523_s28  ;;  %p12531_p3 = scmp.lt.s32.totalorder %s12529_s9, %s12523_s28 }
 0x15c   : > { %v1408_v63 = vpop.f32.mrb[7].mxu0  ;;  %1735 = vmatmul.mubr.f32.gmra.mrb[112].mxu0 %v859_v60  ;;  %v872_v60 = vld [vmem:[#allocation2 + $0x2d8] sm:$0xff]  ;;  %11613 = vmatpush1.bf16.msra.mxu1 %v11612_v55  ;;  %v3480_v33 = vld [vmem:[#allocation2 + $0x50] sm:$0x3] }
 0x15d   : > { %1739 = vmatprep.mubr.f32.mxu0 %v12422_v5  ;;  %v1776_v63 = vld [vmem:[#allocation2 + $0x8] sm:$0xfc]  ;;  %v12427_v5 = vld [vmem:[#allocation2 + $0x2b0] sm:$0xff]  ;;  %11614 = vmatprep.subr.bf16.mxu1 %v16235_v0  ;;  %810 = vst [vmem:[#allocation2 + $0x328] sm:$0x1] %v713_v6  ;;  %p12525_p10 = pnand %p12524_p6, %p16419_p9  ;;  %p12532_p4 = por %p12531_p3, %p12530_p2 }
 0x15e   : > { %2720 = vmatmul.mubr.f32.gmra.mrb[56].mxu1 %v2474_v45  ;;  %v1910_v45 = vrot.slane %v1777_v49, 2  ;;  %v1915_v49 = vrot.slane %v13475_v43, 2  ;;  %v10017_v43 = vld [vmem:[%s16227_s2 + $0x420] sm:$0xff] }
 0x15f   : > { %v13648_v10 = vpop.f32.mrb[8].mxu0  ;;  %2724 = vmatprep.mubr.f32.mxu1 %v2477_v4  ;;  %v714_v4 = vsel %vm457_vm1, %v712_v48, %v713_v6  ;;  %v2774_v48 = vld [vmem:[#allocation2 + $0x40] sm:$0xff]  ;;  %v3612_v6 = vrot.slane %v3480_v33, 2  ;;  %v1787_v33 = vld [vmem:[#allocation2 + $0x90] sm:$0xfc]  ;;  %p12526_p12 = pneg %p12525_p10 }
 0x160   : > { %v1413_v3 = vpop.f32.mrb[9].mxu0  ;;  %1740 = vmatmul.mubr.f32.gmra.mrb[114].mxu0 %v12423_v14  ;;  %v1907_v14 = vrot.slane %v1776_v63, 2  ;;  %809 = vst [vmem:[#allocation2 + $0x318] sm:$0xff] %v714_v4  ;;  %v1911_v38 = vsel %vm1903_vm2, %v13705_v25, %v1910_v45 }
 0x161   : > { %1744 = vmatprep.mubr.f32.mxu0 %v864_v31  ;;  %v871_v31 = vld [vmem:[#allocation2 + $0x2d0] sm:$0xff]  ;;  %v10072_v3 = vld [vmem:[%s16227_s2 + $0x5d8] sm:$0xff]  ;;  %p12533_p7 = pnand %p12532_p4, %p12526_p12 }
 0x162   : > { %v11615_v15 = vpack.c.bf16 %v10072_v3, %v10071_v7  ;;  %2725 = vmatmul.mubr.f32.gmra.mrb[58].mxu1 %v2476_v24  ;;  %v2478_v22 = vld [vmem:[#allocation2 + $0x300] sm:$0xff]  ;;  %v1909_v57 = vsel %vm1903_vm2, %v1907_v14, %v13705_v25  ;;  %v505_v24 = vsel %vm457_vm1, %v503_v9, %v504_v44  ;;  %v3479_v7 = vld [vmem:[#allocation2 + $0x38] sm:$0xfc]  ;;  %v1782_v9 = vld [vmem:[#allocation2 + $0x58] sm:$0x3] }
 0x163   : > { %v13657_v20 = vpop.f32.mrb[10].mxu0  ;;  %601 = vst [vmem:[#allocation2 + $0x310] sm:$0xff] %v505_v24  ;;  %v3609_v14 = vrot.slane %v3479_v7, 2  ;;  %v2780_v7 = vld [vmem:[#allocation2 + $0x70] sm:$0xff] }
 0x164   : > { %v1418_v27 = vpop.f32.mrb[11].mxu0  ;;  %1745 = vmatmul.mubr.f32.gmra.mrb[116].mxu0 %v863_v17  ;;  %v1778_v17 = vld [vmem:[#allocation2 + $0x28] sm:$0x3]  ;;  %11616 = vmatpush1.bf16.msra.mxu1 %v11615_v15  ;;  %v3478_v15 = vld [vmem:[#allocation2 + $0x30] sm:$0xfc] }
 0x165   : > { %1749 = vmatprep.mubr.f32.mxu0 %v12424_v21  ;;  %v13713_v27 = vld [vmem:[%s16227_s2 + $0x400] sm:$0xff]  ;;  %v2479_v21 = vld [vmem:[#allocation2 + $0x308] sm:$0xff]  ;;  %11617 = vmatprep.subr.bf16.mxu1 %v16235_v0 }
 0x166   : > { %2729 = vmatprep.mubr.f32.mxu1 %v2479_v21  ;;  %v11528_v55 = vpack.c.bf16 %v13718_v58, %v13713_v27  ;;  %v1914_v58 = vrot.slane %v1779_v2, 2 }
 0x167   : > { %v13666_v35 = vpop.f32.mrb[12].mxu0  ;;  %2730 = vmatmul.mubr.f32.gmra.mrb[60].mxu1 %v2478_v22  ;;  %v1784_v22 = vld [vmem:[#allocation2 + $0x68] sm:$0xfc] }
 0x168   : > { %v1423_v50 = vpop.f32.mrb[13].mxu0  ;;  %1750 = vmatmul.mubr.f32.gmra.mrb[118].mxu0 %v12425_v32  ;;  %v1780_v32 = vld [vmem:[#allocation2 + $0x38] sm:$0xfc]  ;;  %2734 = vmatprep.mubr.f32.mxu1 %v714_v4  ;;  %v1927_v2 = vrot.slane %v1784_v22, 2 }
 0x169   : > { %1754 = vmatprep.mubr.f32.mxu0 %v868_v28  ;;  %v10074_v28 = vld [vmem:[%s16227_s2 + $0x5e8] sm:$0xff]  ;;  %v1912_v50 = vrot.slane %v1778_v17, 2  ;;  %v1917_v63 = vrot.slane %v1780_v32, 2  ;;  %v3610_v17 = vrot.slane %v2775_v46, 2  ;;  %v1922_v32 = vrot.slane %v1782_v9, 2 }
 0x16a   : > { %v11618_v62 = vpack.c.bf16 %v10074_v28, %v10073_v26  ;;  %v3482_v46 = vld [vmem:[#allocation2 + $0x60] sm:$0xfc] }
 0x16b   : > { %v13678_v59 = vpop.f32.mrb[14].mxu0  ;;  %2735 = vmatmul.mubr.f32.gmra.mrb[62].mxu1 %v505_v24  ;;  %v3611_v26 = vsel %vm1903_vm2, %v3609_v14, %v3610_v17  ;;  %v1923_v4 = vsel %vm1903_vm2, %v1918_v37, %v1922_v32  ;;  %v10020_v24 = vld [vmem:[%s16227_s2 + $0x438] sm:$0xff]  ;;  %v3616_v14 = vrot.slane %v3482_v46, 2 }
 0x16c   : > { %v1428_v53 = vpop.f32.mrb[15].mxu0  ;;  %1755 = vmatmul.mubr.f32.gmra.mrb[120].mxu0 %v867_v23  ;;  %11619 = vmatpush1.bf16.msra.mxu1 %v11618_v62 }
 0x16d   : > { %1759 = vmatprep.mubr.f32.mxu0 %v12426_v8  ;;  %v1906_v8 = vsel %vm1903_vm2, %v1904_v19, %v13705_v25  ;;  %11620 = vmatprep.subr.bf16.mxu1 %v16235_v0  ;;  %v3607_v19 = vrot.slane %v2774_v48, 2  ;;  %v1786_v48 = vld [vmem:[#allocation2 + $0x88] sm:$0x3] }
 0x16e   : > { %3927 = vmatprep.mubr.f32.mxu1 %v3611_v26  ;;  %v1932_v26 = vrot.slane %v1786_v48, 2  ;;  %v1935_v48 = vrot.slane %v13515_v36, 2  ;;  %v10025_v36 = vld [vmem:[%s16227_s2 + $0x460] sm:$0xff] }
 0x16f   : > { %v13696_v47 = vpop.f32.mrb[16].mxu0 }
 0x170   : > { %v1433_v13 = vpop.f32.mrb[17].mxu0  ;;  %1760 = vmatmul.mubr.f32.gmra.mrb[122].mxu0 %v12427_v5  ;;  %v10016_v5 = vld [vmem:[%s16227_s2 + $0x418] sm:$0xff] }
 0x171   : > { %1764 = vmatprep.mubr.f32.mxu0 %v872_v60  ;;  %v10076_v60 = vld [vmem:[%s16227_s2 + $0x5f8] sm:$0xff]  ;;  %v10015_v13 = vld [vmem:[%s16227_s2 + $0x410] sm:$0xff] }
 0x172   : > { %v11621_v3 = vpack.c.bf16 %v10076_v60, %v10075_v56  ;;  %v11531_v21 = vpack.c.bf16 %v10016_v5, %v10015_v13  ;;  %v1928_v56 = vrot.slane %v13485_v40, 2  ;;  %v2781_v13 = vld [vmem:[#allocation2 + $0x78] sm:$0xff]  ;;  %v3483_v5 = vld [vmem:[#allocation2 + $0x68] sm:$0xfc] }
 0x173   : > { %v13708_v16 = vpop.f32.mrb[18].mxu0  ;;  %v3619_v40 = vrot.slane %v3483_v5, 2 }
 0x174   : > { %v1438_v18 = vpop.f32.mrb[19].mxu0  ;;  %1765 = vmatmul.mubr.f32.gmra.mrb[124].mxu0 %v871_v31  ;;  %v1913_v31 = vsel %vm1903_vm2, %v13705_v25, %v1912_v50  ;;  %11622 = vmatpush1.bf16.msra.mxu1 %v11621_v3  ;;  %v1919_v50 = vsel %vm1903_vm2, %v1917_v63, %v1918_v37  ;;  %v10018_v25 = vld [vmem:[%s16227_s2 + $0x428] sm:$0xff]  ;;  %v3613_v63 = vsel %vm1903_vm2, %v3607_v19, %v3612_v6 }
 0x175   : > { %1769 = vmatprep.mubr.f32.mxu0 %v12428_v30  ;;  %v3606_v18 = vrot.slane %v3478_v15, 2  ;;  %v1781_v30 = vld [vmem:[#allocation2 + $0x50] sm:$0x3]  ;;  %12055 = vmatprep.subr.bf16.mxu1 %v16235_v0  ;;  %v11534_v60 = vpack.c.bf16 %v10018_v25, %v10017_v43  ;;  %v3617_v15 = vrot.slane %v2780_v7, 2  ;;  %v1929_v22 = vsel %vm1903_vm2, %v1927_v2, %v1928_v56  ;;  %v2787_v2 = vld [vmem:[#allocation2 + $0xa8] sm:$0xff] }
 0x176   : > { %v3630_v5 = vrot.slane %v2787_v2, 2  ;;  %v1790_v7 = vld [vmem:[#allocation2 + $0xb8] sm:$0x3] }
 0x177   : > { %v13731_v23 = vpop.f32.mrb[20].mxu0  ;;  %v3608_v28 = vsel %vm1903_vm2, %v3606_v18, %v3607_v19 }
 0x178   : > { %v1443_v53 = vpop.f32.mrb[21].mxu0  ;;  %1770 = vmatmul.mubr.f32.gmra.mrb[126].mxu0 %v12429_v39  ;;  %3928 = vmatmul.mubr.f32.vlgmr.msra.gmra.mrb[64].mxu1 %v3608_v28  ;;  %v1920_v39 = vrot.slane %v1781_v30, 2  ;;  %v3485_v30 = vld [vmem:[#allocation2 + $0x88] sm:$0x3] }
 0x179   : > { %2225 = vmatprep.mubr.f32.mxu0 %v1909_v57  ;;  %v3481_v57 = vld [vmem:[#allocation2 + $0x58] sm:$0x3]  ;;  %v1916_v53 = vsel %vm1903_vm2, %v1914_v58, %v1915_v49  ;;  %v3624_v28 = vrot.slane %v3485_v30, 2  ;;  %v3488_v30 = vld [vmem:[#allocation2 + $0xb0] sm:$0x3] }
 0x17a   : > { %v3614_v62 = vrot.slane %v3481_v57, 2  ;;  %v1921_v19 = vsel %vm1903_vm2, %v1915_v49, %v1920_v39  ;;  %v10022_v49 = vld [vmem:[%s16227_s2 + $0x448] sm:$0xff]  ;;  %v3484_v57 = vld [vmem:[#allocation2 + $0x80] sm:$0x3] }
 0x17b   : > { %v13759_v41 = vpop.f32.mrb[22].mxu0  ;;  %v3622_v32 = vrot.slane %v3484_v57, 2  ;;  %v1791_v57 = vld [vmem:[#allocation2 + $0xc0] sm:$0xfc] }
 0x17c   : > { %v1448_v27 = vpop.f32.mrb[23].mxu0  ;;  %2226 = vmatmul.mubr.f32.vlgmr.msra.gmra.mrb[128].mxu0 %v1906_v8  ;;  %v1783_v8 = vld [vmem:[#allocation2 + $0x60] sm:$0xfc]  ;;  %v3615_v45 = vsel %vm1903_vm2, %v3610_v17, %v3614_v62  ;;  %v1925_v17 = vrot.slane %v13495_v54, 2 }
 0x17d   : > { %11529 = vmatpush1.bf16.msra.mxu0 %v11528_v55  ;;  %2230 = vmatprep.mubr.f32.mxu0 %v1913_v31  ;;  %v10019_v55 = vld [vmem:[%s16227_s2 + $0x430] sm:$0xff]  ;;  %v3620_v31 = vrot.slane %v2781_v13, 2  ;;  %v1924_v37 = vrot.slane %v1783_v8, 2  ;;  %v1785_v27 = vld [vmem:[#allocation2 + $0x80] sm:$0x3] }
 0x17e   : > { %11530 = vmatprep.subr.bf16.mxu0 %v16235_v0  ;;  %3932 = vmatprep.mubr.f32.mxu1 %v3615_v45  ;;  %v11537_v58 = vpack.c.bf16 %v10020_v24, %v10019_v55  ;;  %v10021_v54 = vld [vmem:[%s16227_s2 + $0x440] sm:$0xff]  ;;  %v1930_v62 = vrot.slane %v1785_v27, 2  ;;  %v10023_v8 = vld [vmem:[%s16227_s2 + $0x450] sm:$0xff]  ;;  %v3623_v45 = vsel %vm1903_vm2, %v3617_v15, %v3622_v32  ;;  %v1933_v55 = vsel %vm1903_vm2, %v1928_v56, %v1932_v26  ;;  %v3489_v27 = vld [vmem:[#allocation2 + $0xb8] sm:$0x3] }
 0x17f   : > { %v13774_v34 = vpop.f32.mrb[24].mxu0  ;;  %3933 = vmatmul.mubr.f32.gmra.mrb[66].mxu1 %v3613_v63  ;;  %v3621_v18 = vsel %vm1903_vm2, %v3619_v40, %v3620_v31  ;;  %v1926_v25 = vsel %vm1903_vm2, %v1924_v37, %v1925_v17  ;;  %v3625_v6 = vsel %vm1903_vm2, %v3620_v31, %v3624_v28  ;;  %v11540_v39 = vpack.c.bf16 %v10022_v49, %v10021_v54  ;;  %v10024_v63 = vld [vmem:[%s16227_s2 + $0x458] sm:$0xff]  ;;  %v1792_v37 = vld [vmem:[#allocation2 + $0xc8] sm:$0xfc] }
 0x180   : > { %v1453_v44 = vpop.f32.mrb[25].mxu0  ;;  %2231 = vmatmul.mubr.f32.gmra.mrb[130].mxu0 %v1911_v38  ;;  %v1788_v38 = vld [vmem:[#allocation2 + $0x98] sm:$0xfc]  ;;  %3937 = vmatprep.mubr.f32.mxu1 %v3621_v18  ;;  %v1934_v56 = vrot.slane %v1787_v33, 2  ;;  %v11543_v18 = vpack.c.bf16 %v10024_v63, %v10023_v8  ;;  %v3632_v26 = vrot.slane %v3488_v30, 2  ;;  %v10027_v33 = vld [vmem:[%s16227_s2 + $0x470] sm:$0xff] }
 0x181   : > { %2235 = vmatprep.mubr.f32.mxu0 %v1919_v50  ;;  %11532 = vmatpush1.bf16.msra.mxu0 %v11531_v21  ;;  %v3618_v21 = vsel %vm1903_vm2, %v3616_v14, %v3617_v15  ;;  %v1937_v44 = vrot.slane %v1788_v38, 2  ;;  %v1931_v15 = vsel %vm1903_vm2, %v1925_v17, %v1930_v62  ;;  %v10026_v17 = vld [vmem:[%s16227_s2 + $0x468] sm:$0xff]  ;;  %v1795_v30 = vld [vmem:[#allocation2 + $0xf0] sm:$0xfc] }
 0x182   : > { %11533 = vmatprep.subr.bf16.mxu0 %v16235_v0  ;;  %v1936_v49 = vsel %vm1903_vm2, %v1934_v56, %v1935_v48  ;;  %v11546_v62 = vpack.c.bf16 %v10026_v17, %v10025_v36  ;;  %v1796_v56 = vld [vmem:[#allocation2 + $0xf8] sm:$0xfc] }
 0x183   : > { %v13789_v3 = vpop.f32.mrb[26].mxu0  ;;  %3938 = vmatmul.mubr.f32.gmra.mrb[68].mxu1 %v3618_v21  ;;  %v3634_v21 = vrot.slane %v3489_v27, 2  ;;  %v3492_v27 = vld [vmem:[#allocation2 + $0xe0] sm:$0x3] }
 0x184   : > { %v1458_v9 = vpop.f32.mrb[27].mxu0  ;;  %2236 = vmatmul.mubr.f32.gmra.mrb[132].mxu0 %v1916_v53  ;;  %v1938_v53 = vrot.slane %v13505_v11, 2  ;;  %3942 = vmatprep.mubr.f32.mxu1 %v3625_v6  ;;  %v2786_v11 = vld [vmem:[#allocation2 + $0xa0] sm:$0xff] }
 0x185   : > { %2240 = vmatprep.mubr.f32.mxu0 %v1923_v4  ;;  %11535 = vmatpush1.bf16.msra.mxu0 %v11534_v60  ;;  %v3487_v60 = vld [vmem:[#allocation2 + $0x98] sm:$0xfc]  ;;  %v3486_v4 = vld [vmem:[#allocation2 + $0x90] sm:$0xfc]  ;;  %v3627_v31 = vrot.slane %v2786_v11, 2  ;;  %v3635_v32 = vsel %vm1903_vm2, %v3630_v5, %v3634_v21 }
 0x186   : > { %11536 = vmatprep.subr.bf16.mxu0 %v16235_v0  ;;  %v3629_v13 = vrot.slane %v3487_v60, 2  ;;  %v3626_v40 = vrot.slane %v3486_v4, 2  ;;  %v1789_v9 = vld [vmem:[#allocation2 + $0xb0] sm:$0x3]  ;;  %v1939_v38 = vsel %vm1903_vm2, %v1937_v44, %v1938_v53  ;;  %v2793_v44 = vld [vmem:[#allocation2 + $0xd8] sm:$0xff] }
 0x187   : > { %v13803_v50 = vpop.f32.mrb[28].mxu0  ;;  %3943 = vmatmul.mubr.f32.gmra.mrb[70].mxu1 %v3623_v45  ;;  %v1940_v28 = vrot.slane %v1789_v9, 2  ;;  %v3633_v6 = vsel %vm1903_vm2, %v3627_v31, %v3632_v26  ;;  %v10028_v45 = vld [vmem:[%s16227_s2 + $0x478] sm:$0xff]  ;;  %v3640_v60 = vrot.slane %v2793_v44, 2  ;;  %v1794_v11 = vld [vmem:[#allocation2 + $0xe8] sm:$0x3] }
 0x188   : > { %v1463_v43 = vpop.f32.mrb[29].mxu0  ;;  %2241 = vmatmul.mubr.f32.gmra.mrb[134].mxu0 %v1921_v19  ;;  %v3631_v14 = vsel %vm1903_vm2, %v3629_v13, %v3630_v5  ;;  %v3628_v19 = vsel %vm1903_vm2, %v3626_v40, %v3627_v31  ;;  %v3493_v9 = vld [vmem:[#allocation2 + $0xe8] sm:$0x3] }
 0x189   : > { %2245 = vmatprep.mubr.f32.mxu0 %v1929_v22  ;;  %11538 = vmatpush1.bf16.msra.mxu0 %v11537_v58  ;;  %v1942_v58 = vrot.slane %v1790_v7, 2  ;;  %v1947_v43 = vrot.slane %v1792_v37, 2  ;;  %v1945_v7 = vrot.slane %v13535_v52, 2  ;;  %v1941_v31 = vsel %vm1903_vm2, %v1935_v48, %v1940_v28  ;;  %v10029_v52 = vld [vmem:[%s16227_s2 + $0x480] sm:$0xff]  ;;  %v10030_v48 = vld [vmem:[%s16227_s2 + $0x488] sm:$0xff] }
 0x18a   : > { %11539 = vmatprep.subr.bf16.mxu0 %v16235_v0  ;;  %3947 = vmatprep.mubr.f32.mxu1 %v3631_v14  ;;  %v11549_v14 = vpack.c.bf16 %v10028_v45, %v10027_v33  ;;  %v11552_v28 = vpack.c.bf16 %v10030_v48, %v10029_v52 }
 0x18b   : > { %v13817_v24 = vpop.f32.mrb[30].mxu0  ;;  %3948 = vmatmul.mubr.f32.gmra.mrb[72].mxu1 %v3628_v19  ;;  %v1943_v8 = vsel %vm1903_vm2, %v1938_v53, %v1942_v58  ;;  %v1944_v53 = vrot.slane %v1791_v57, 2  ;;  %v3644_v19 = vrot.slane %v3493_v9, 2  ;;  %v3642_v58 = vrot.slane %v3492_v27, 2  ;;  %v10031_v57 = vld [vmem:[%s16227_s2 + $0x490] sm:$0xff]  ;;  %v10033_v9 = vld [vmem:[%s16227_s2 + $0x4a0] sm:$0xff] }
 0x18c   : > { %v1468_v46 = vpop.f32.mrb[31].mxu0  ;;  %2246 = vmatmul.mubr.f32.gmra.mrb[136].mxu0 %v1926_v25  ;;  %v1948_v25 = vrot.slane %v13525_v12, 2  ;;  %3952 = vmatprep.mubr.f32.mxu1 %v3635_v32  ;;  %v2792_v12 = vld [vmem:[#allocation2 + $0xd0] sm:$0xff] }
 0x18d   : > { %2250 = vmatprep.mubr.f32.mxu0 %v1933_v55  ;;  %11541 = vmatpush1.bf16.msra.mxu0 %v11540_v39  ;;  %v3491_v39 = vld [vmem:[#allocation2 + $0xc8] sm:$0xfc]  ;;  %v3490_v55 = vld [vmem:[#allocation2 + $0xc0] sm:$0xfc]  ;;  %v3637_v5 = vrot.slane %v2792_v12, 2  ;;  %v1946_v17 = vsel %vm1903_vm2, %v1944_v53, %v1945_v7  ;;  %v3645_v26 = vsel %vm1903_vm2, %v3640_v60, %v3644_v19 }
 0x18e   : > { %11542 = vmatprep.subr.bf16.mxu0 %v16235_v0  ;;  %v3639_v2 = vrot.slane %v3491_v39, 2  ;;  %v3636_v13 = vrot.slane %v3490_v55, 2  ;;  %v1793_v46 = vld [vmem:[#allocation2 + $0xe0] sm:$0x3]  ;;  %v1949_v37 = vsel %vm1903_vm2, %v1947_v43, %v1948_v25  ;;  %v2799_v43 = vld [vmem:[#allocation2 + $0x108] sm:$0xff] }
 0x18f   : > { %v13831_v22 = vpop.f32.mrb[32].mxu0  ;;  %3953 = vmatmul.mubr.f32.gmra.mrb[74].mxu1 %v3633_v6  ;;  %v1950_v21 = vrot.slane %v1793_v46, 2  ;;  %v3643_v32 = vsel %vm1903_vm2, %v3637_v5, %v3642_v58  ;;  %v10032_v6 = vld [vmem:[%s16227_s2 + $0x498] sm:$0xff]  ;;  %v3650_v39 = vrot.slane %v2799_v43, 2  ;;  %v1797_v53 = vld [vmem:[#allocation2 + $0x110] sm:$0x3] }
 0x190   : > { %v1473_v54 = vpop.f32.mrb[33].mxu0  ;;  %2251 = vmatmul.mubr.f32.gmra.mrb[138].mxu0 %v1931_v15  ;;  %v3641_v40 = vsel %vm1903_vm2, %v3639_v2, %v3640_v60  ;;  %v3638_v15 = vsel %vm1903_vm2, %v3636_v13, %v3637_v5  ;;  %v1798_v12 = vld [vmem:[#allocation2 + $0x118] sm:$0x3]  ;;  %v1960_v58 = vrot.slane %v1797_v53, 2  ;;  %v3499_v43 = vld [vmem:[#allocation2 + $0x128] sm:$0xfc] }
 0x191   : > { %2255 = vmatprep.mubr.f32.mxu0 %v1939_v38  ;;  %11544 = vmatpush1.bf16.msra.mxu0 %v11543_v18  ;;  %v1952_v18 = vrot.slane %v1794_v11, 2  ;;  %v1957_v54 = vrot.slane %v1796_v56, 2  ;;  %v12430_v11 = vld [vmem:[#allocation2 + $0x100] sm:$0xff]  ;;  %v3497_v56 = vld [vmem:[#allocation2 + $0x118] sm:$0x3] }
 0x192   : > { %11545 = vmatprep.subr.bf16.mxu0 %v16235_v0  ;;  %3957 = vmatprep.mubr.f32.mxu1 %v3641_v40  ;;  %v1955_v13 = vrot.slane %v12430_v11, 2  ;;  %v1800_v40 = vld [vmem:[#allocation2 + $0x128] sm:$0xfc]  ;;  %v1801_v53 = vld [vmem:[#allocation2 + $0x140] sm:$0x3] }
 0x193   : > { %v13845_v63 = vpop.f32.mrb[34].mxu0  ;;  %3958 = vmatmul.mubr.f32.gmra.mrb[76].mxu1 %v3638_v15  ;;  %v1953_v33 = vsel %vm1903_vm2, %v1948_v25, %v1952_v18  ;;  %v1954_v25 = vrot.slane %v1795_v30, 2  ;;  %v1962_v15 = vrot.slane %v1798_v12, 2  ;;  %v3496_v18 = vld [vmem:[#allocation2 + $0x110] sm:$0x3]  ;;  %v13890_v30 = vld [vmem:[#allocation2 + $0x138] sm:$0xff] }
 0x194   : > { %v1478_v4 = vpop.f32.mrb[35].mxu0  ;;  %2256 = vmatmul.mubr.f32.gmra.mrb[140].mxu0 %v1936_v49  ;;  %v1958_v49 = vrot.slane %v13545_v1, 2  ;;  %3962 = vmatprep.mubr.f32.mxu1 %v3645_v26  ;;  %v2798_v1 = vld [vmem:[#allocation2 + $0x100] sm:$0xff]  ;;  %v3652_v48 = vrot.slane %v3496_v18, 2  ;;  %v1968_v26 = vrot.slane %v13890_v30, 2  ;;  %v13919_v30 = vld [vmem:[#allocation2 + $0x168] sm:$0xff] }
 0x195   : > { %2260 = vmatprep.mubr.f32.mxu0 %v1943_v8  ;;  %11547 = vmatpush1.bf16.msra.mxu0 %v11546_v62  ;;  %v3495_v62 = vld [vmem:[#allocation2 + $0xf8] sm:$0xfc]  ;;  %v3494_v8 = vld [vmem:[#allocation2 + $0xf0] sm:$0xfc]  ;;  %v3647_v60 = vrot.slane %v2798_v1, 2  ;;  %v1951_v4 = vsel %vm1903_vm2, %v1945_v7, %v1950_v21  ;;  %v10034_v7 = vld [vmem:[%s16227_s2 + $0x4a8] sm:$0xff]  ;;  %v1956_v27 = vsel %vm1903_vm2, %v1954_v25, %v1955_v13 }
 0x196   : > { %11548 = vmatprep.subr.bf16.mxu0 %v16235_v0  ;;  %v3649_v44 = vrot.slane %v3495_v62, 2  ;;  %v3646_v2 = vrot.slane %v3494_v8, 2  ;;  %v1967_v21 = vrot.slane %v1800_v40, 2  ;;  %v1963_v62 = vsel %vm1903_vm2, %v1958_v49, %v1962_v15  ;;  %v1802_v12 = vld [vmem:[#allocation2 + $0x148] sm:$0x3]  ;;  %v12432_v25 = vld [vmem:[#allocation2 + $0x130] sm:$0xff] }
 0x197   : > { %v13859_v38 = vpop.f32.mrb[36].mxu0  ;;  %3963 = vmatmul.mubr.f32.gmra.mrb[78].mxu1 %v3643_v32  ;;  %v2805_v32 = vld [vmem:[#allocation2 + $0x138] sm:$0xff]  ;;  %v3659_v1 = vrot.slane %v3499_v43, 2  ;;  %v1965_v11 = vrot.slane %v12432_v25, 2  ;;  %v1972_v15 = vrot.slane %v1802_v12, 2  ;;  %v2811_v43 = vld [vmem:[#allocation2 + $0x168] sm:$0xff] }
 0x198   : > { %v1483_v36 = vpop.f32.mrb[37].mxu0  ;;  %2261 = vmatmul.mubr.f32.gmra.mrb[142].mxu0 %v1941_v31  ;;  %v3651_v5 = vsel %vm1903_vm2, %v3649_v44, %v3650_v39  ;;  %v11555_v31 = vpack.c.bf16 %v10032_v6, %v10031_v57  ;;  %v3648_v46 = vsel %vm1903_vm2, %v3646_v2, %v3647_v60  ;;  %v3653_v57 = vsel %vm1903_vm2, %v3647_v60, %v3652_v48  ;;  %v2804_v6 = vld [vmem:[#allocation2 + $0x130] sm:$0xff]  ;;  %v1804_v40 = vld [vmem:[#allocation2 + $0x158] sm:$0xfc] }
 0x199   : > { %2265 = vmatprep.mubr.f32.mxu0 %v1949_v37  ;;  %11550 = vmatpush1.bf16.msra.mxu0 %v11549_v14  ;;  %v1959_v14 = vsel %vm1903_vm2, %v1957_v54, %v1958_v49  ;;  %v3654_v37 = vrot.slane %v3497_v56, 2  ;;  %v1799_v36 = vld [vmem:[#allocation2 + $0x120] sm:$0xfc]  ;;  %v11558_v54 = vpack.c.bf16 %v10034_v7, %v10033_v9  ;;  %v3660_v44 = vrot.slane %v2805_v32, 2  ;;  %v3501_v56 = vld [vmem:[#allocation2 + $0x148] sm:$0x3] }
 0x19a   : > { %11551 = vmatprep.subr.bf16.mxu0 %v16235_v0  ;;  %3967 = vmatprep.mubr.f32.mxu1 %v3651_v5  ;;  %v3657_v60 = vrot.slane %v2804_v6, 2  ;;  %v1964_v49 = vrot.slane %v1799_v36, 2  ;;  %v10037_v9 = vld [vmem:[%s16227_s2 + $0x4c0] sm:$0xff]  ;;  %v3664_v7 = vrot.slane %v3501_v56, 2  ;;  %v1803_v36 = vld [vmem:[#allocation2 + $0x150] sm:$0xfc] }
 0x19b   : > { %v13873_v45 = vpop.f32.mrb[38].mxu0  ;;  %3968 = vmatmul.mubr.f32.gmra.mrb[80].mxu1 %v3648_v46  ;;  %v3661_v5 = vsel %vm1903_vm2, %v3659_v1, %v3660_v44  ;;  %v10040_v6 = vld [vmem:[%s16227_s2 + $0x4d8] sm:$0xff]  ;;  %v2810_v1 = vld [vmem:[#allocation2 + $0x160] sm:$0xff]  ;;  %v3502_v12 = vld [vmem:[#allocation2 + $0x150] sm:$0xfc] }
 0x19c   : > { %v1488_v55 = vpop.f32.mrb[39].mxu0  ;;  %2266 = vmatmul.mubr.f32.gmra.mrb[144].mxu0 %v1946_v17  ;;  %v3655_v17 = vsel %vm1903_vm2, %v3650_v39, %v3654_v37  ;;  %v3498_v39 = vld [vmem:[#allocation2 + $0x120] sm:$0xfc]  ;;  %v3500_v37 = vld [vmem:[#allocation2 + $0x140] sm:$0x3] }
 0x19d   : > { %2270 = vmatprep.mubr.f32.mxu0 %v1953_v33  ;;  %11553 = vmatpush1.bf16.msra.mxu0 %v11552_v28  ;;  %v10035_v28 = vld [vmem:[%s16227_s2 + $0x4b0] sm:$0xff]  ;;  %v10036_v33 = vld [vmem:[%s16227_s2 + $0x4b8] sm:$0xff]  ;;  %v3656_v2 = vrot.slane %v3498_v39, 2  ;;  %v3662_v48 = vrot.slane %v3500_v37, 2  ;;  %v3670_v39 = vrot.slane %v2811_v43, 2 }
 0x19e   : > { %11554 = vmatprep.subr.bf16.mxu0 %v16235_v0  ;;  %3972 = vmatprep.mubr.f32.mxu1 %v3655_v17  ;;  %v3665_v17 = vsel %vm1903_vm2, %v3660_v44, %v3664_v7  ;;  %v10041_v7 = vld [vmem:[%s16227_s2 + $0x4e0] sm:$0xff] }
 0x19f   : > { %v13886_v52 = vpop.f32.mrb[40].mxu0  ;;  %3973 = vmatmul.mubr.f32.gmra.mrb[82].mxu1 %v3653_v57  ;;  %v3658_v46 = vsel %vm1903_vm2, %v3656_v2, %v3657_v60  ;;  %v10039_v57 = vld [vmem:[%s16227_s2 + $0x4d0] sm:$0xff]  ;;  %v3663_v32 = vsel %vm1903_vm2, %v3657_v60, %v3662_v48  ;;  %v3666_v60 = vrot.slane %v3502_v12, 2 }
 0x1a0   : > { %v1493_v19 = vpop.f32.mrb[41].mxu0  ;;  %2271 = vmatmul.mubr.f32.gmra.mrb[146].mxu0 %v1951_v4  ;;  %v1961_v4 = vsel %vm1903_vm2, %v1955_v13, %v1960_v58  ;;  %v10038_v13 = vld [vmem:[%s16227_s2 + $0x4c8] sm:$0xff]  ;;  %3977 = vmatprep.mubr.f32.mxu1 %v3661_v5  ;;  %v1970_v58 = vrot.slane %v1801_v53, 2  ;;  %v12434_v5 = vld [vmem:[#allocation2 + $0x160] sm:$0xff]  ;;  %v11567_v56 = vpack.c.bf16 %v10040_v6, %v10039_v57  ;;  %v3504_v48 = vld [vmem:[#allocation2 + $0x170] sm:$0x3] }
 0x1a1   : > { %2275 = vmatprep.mubr.f32.mxu0 %v1959_v14  ;;  %11556 = vmatpush1.bf16.msra.mxu0 %v11555_v31  ;;  %v11561_v31 = vpack.c.bf16 %v10036_v33, %v10035_v28  ;;  %v1969_v14 = vsel %vm1903_vm2, %v1967_v21, %v1968_v26  ;;  %v1977_v21 = vrot.slane %v1804_v40, 2  ;;  %v11564_v28 = vpack.c.bf16 %v10038_v13, %v10037_v9  ;;  %v12435_v57 = vld [vmem:[#allocation2 + $0x198] sm:$0xff]  ;;  %v2816_v12 = vld [vmem:[#allocation2 + $0x190] sm:$0xff] }
 0x1a2   : > { %11557 = vmatprep.subr.bf16.mxu0 %v16235_v0  ;;  %v1973_v33 = vsel %vm1903_vm2, %v1968_v26, %v1972_v15  ;;  %v1974_v26 = vrot.slane %v1803_v36, 2  ;;  %v1971_v40 = vsel %vm1903_vm2, %v1965_v11, %v1970_v58  ;;  %v3505_v15 = vld [vmem:[#allocation2 + $0x178] sm:$0x3] }
 0x1a3   : > { %v13902_v8 = vpop.f32.mrb[42].mxu0  ;;  %3978 = vmatmul.mubr.f32.gmra.mrb[84].mxu1 %v3658_v46  ;;  %v1808_v46 = vld [vmem:[#allocation2 + $0x188] sm:$0xfc]  ;;  %v3674_v37 = vrot.slane %v3505_v15, 2  ;;  %v2817_v6 = vld [vmem:[#allocation2 + $0x198] sm:$0xff] }
 0x1a4   : > { %v1498_v55 = vpop.f32.mrb[43].mxu0  ;;  %2276 = vmatmul.mubr.f32.gmra.mrb[148].mxu0 %v1956_v27  ;;  %v1966_v27 = vsel %vm1903_vm2, %v1964_v49, %v1965_v11  ;;  %3982 = vmatprep.mubr.f32.mxu1 %v3665_v17  ;;  %v3667_v49 = vrot.slane %v2810_v1, 2  ;;  %v10042_v11 = vld [vmem:[%s16227_s2 + $0x4e8] sm:$0xff]  ;;  %v1809_v15 = vld [vmem:[#allocation2 + $0x1a0] sm:$0x3] }
 0x1a5   : > { %2280 = vmatprep.mubr.f32.mxu0 %v1963_v62  ;;  %11559 = vmatpush1.bf16.msra.mxu0 %v11558_v54  ;;  %v1978_v54 = vrot.slane %v13919_v30, 2  ;;  %v3503_v62 = vld [vmem:[#allocation2 + $0x158] sm:$0xfc]  ;;  %v1806_v55 = vld [vmem:[#allocation2 + $0x178] sm:$0x3]  ;;  %v3675_v30 = vsel %vm1903_vm2, %v3670_v39, %v3674_v37  ;;  %v11570_v43 = vpack.c.bf16 %v10042_v11, %v10041_v7 }
 0x1a6   : > { %11560 = vmatprep.subr.bf16.mxu0 %v16235_v0  ;;  %v3669_v44 = vrot.slane %v3503_v62, 2  ;;  %v1982_v13 = vrot.slane %v1806_v55, 2  ;;  %v10043_v62 = vld [vmem:[%s16227_s2 + $0x4f0] sm:$0xff]  ;;  %v3507_v1 = vld [vmem:[#allocation2 + $0x188] sm:$0xfc] }
 0x1a7   : > { %v13915_v18 = vpop.f32.mrb[44].mxu0  ;;  %3983 = vmatmul.mubr.f32.gmra.mrb[86].mxu1 %v3663_v32  ;;  %v1979_v9 = vsel %vm1903_vm2, %v1977_v21, %v1978_v54  ;;  %v1807_v21 = vld [vmem:[#allocation2 + $0x180] sm:$0xfc]  ;;  %v1988_v32 = vrot.slane %v12435_v57, 2  ;;  %v3679_v55 = vrot.slane %v3507_v1, 2 }
 0x1a8   : > { %v1503_v19 = vpop.f32.mrb[45].mxu0  ;;  %2281 = vmatmul.mubr.f32.gmra.mrb[150].mxu0 %v1961_v4  ;;  %v1975_v4 = vrot.slane %v12434_v5, 2  ;;  %v3671_v53 = vsel %vm1903_vm2, %v3669_v44, %v3670_v39  ;;  %v1983_v44 = vsel %vm1903_vm2, %v1978_v54, %v1982_v13  ;;  %v10044_v39 = vld [vmem:[%s16227_s2 + $0x4f8] sm:$0xff]  ;;  %v1810_v5 = vld [vmem:[#allocation2 + $0x1a8] sm:$0x3] }
 0x1a9   : > { %2285 = vmatprep.mubr.f32.mxu0 %v1969_v14  ;;  %11562 = vmatpush1.bf16.msra.mxu0 %v11561_v31  ;;  %v1805_v31 = vld [vmem:[#allocation2 + $0x170] sm:$0x3]  ;;  %v3668_v14 = vsel %vm1903_vm2, %v3666_v60, %v3667_v49  ;;  %v3680_v60 = vrot.slane %v2817_v6, 2  ;;  %v3509_v7 = vld [vmem:[#allocation2 + $0x1a8] sm:$0x3]  ;;  %v1992_v37 = vrot.slane %v1810_v5, 2 }
 0x1aa   : > { %11563 = vmatprep.subr.bf16.mxu0 %v16235_v0  ;;  %3987 = vmatprep.mubr.f32.mxu1 %v3671_v53  ;;  %v1976_v36 = vsel %vm1903_vm2, %v1974_v26, %v1975_v4  ;;  %v1980_v17 = vrot.slane %v1805_v31, 2  ;;  %v3677_v53 = vrot.slane %v2816_v12, 2  ;;  %v3511_v6 = vld [vmem:[#allocation2 + $0x1b8] sm:$0xfc]  ;;  %v2822_v12 = vld [vmem:[#allocation2 + $0x1c0] sm:$0xff] }
 0x1ab   : > { %v13931_v2 = vpop.f32.mrb[46].mxu0  ;;  %3988 = vmatmul.mubr.f32.gmra.mrb[88].mxu1 %v3668_v14  ;;  %v3681_v31 = vsel %vm1903_vm2, %v3679_v55, %v3680_v60  ;;  %v1993_v1 = vsel %vm1903_vm2, %v1988_v32, %v1992_v37  ;;  %v3689_v55 = vrot.slane %v3511_v6, 2  ;;  %v3515_v6 = vld [vmem:[#allocation2 + $0x1e8] sm:$0xfc] }
 0x1ac   : > { %v1508_v25 = vpop.f32.mrb[47].mxu0  ;;  %2286 = vmatmul.mubr.f32.gmra.mrb[152].mxu0 %v1966_v27  ;;  %v3672_v27 = vrot.slane %v3504_v48, 2  ;;  %3992 = vmatprep.mubr.f32.mxu1 %v3675_v30  ;;  %v1981_v54 = vsel %vm1903_vm2, %v1975_v4, %v1980_v17  ;;  %v1812_v48 = vld [vmem:[#allocation2 + $0x1b8] sm:$0xfc]  ;;  %v3684_v4 = vrot.slane %v3509_v7, 2 }
 0x1ad   : > { %2290 = vmatprep.mubr.f32.mxu0 %v1973_v33  ;;  %11565 = vmatpush1.bf16.msra.mxu0 %v11564_v28  ;;  %v1987_v28 = vrot.slane %v1808_v46, 2  ;;  %v3506_v25 = vld [vmem:[#allocation2 + $0x180] sm:$0xfc]  ;;  %v1984_v46 = vrot.slane %v1807_v21, 2  ;;  %v1990_v21 = vrot.slane %v1809_v15, 2 }
 0x1ae   : > { %11566 = vmatprep.subr.bf16.mxu0 %v16235_v0  ;;  %v3673_v33 = vsel %vm1903_vm2, %v3667_v49, %v3672_v27  ;;  %v3676_v49 = vrot.slane %v3506_v25, 2  ;;  %v3508_v27 = vld [vmem:[#allocation2 + $0x1a0] sm:$0x3]  ;;  %v3685_v30 = vsel %vm1903_vm2, %v3680_v60, %v3684_v4  ;;  %v3510_v25 = vld [vmem:[#allocation2 + $0x1b0] sm:$0xfc] }
 0x1af   : > { %v13944_v19 = vpop.f32.mrb[48].mxu0  ;;  %3993 = vmatmul.mubr.f32.gmra.mrb[90].mxu1 %v3673_v33  ;;  %v1989_v11 = vsel %vm1903_vm2, %v1987_v28, %v1988_v32  ;;  %v1997_v28 = vrot.slane %v1812_v48, 2  ;;  %v2823_v33 = vld [vmem:[#allocation2 + $0x1c8] sm:$0xff]  ;;  %v3513_v7 = vld [vmem:[#allocation2 + $0x1d8] sm:$0x3] }
 0x1b0   : > { %v1513_v58 = vpop.f32.mrb[49].mxu0  ;;  %2291 = vmatmul.mubr.f32.gmra.mrb[154].mxu0 %v1971_v40  ;;  %v3678_v13 = vsel %vm1903_vm2, %v3676_v49, %v3677_v53  ;;  %3997 = vmatprep.mubr.f32.mxu1 %v3681_v31  ;;  %v3690_v60 = vrot.slane %v2823_v33, 2  ;;  %v1814_v49 = vld [vmem:[#allocation2 + $0x1d8] sm:$0x3]  ;;  %v1816_v48 = vld [vmem:[#allocation2 + $0x1e8] sm:$0xfc] }
 0x1b1   : > { %2295 = vmatprep.mubr.f32.mxu0 %v1979_v9  ;;  %11568 = vmatpush1.bf16.msra.mxu0 %v11567_v56  ;;  %v12436_v56 = vld [vmem:[#allocation2 + $0x190] sm:$0xff]  ;;  %v11573_v9 = vpack.c.bf16 %v10044_v39, %v10043_v62  ;;  %v2002_v37 = vrot.slane %v1814_v49, 2  ;;  %v3694_v4 = vrot.slane %v3513_v7, 2  ;;  %v2829_v33 = vld [vmem:[#allocation2 + $0x1f8] sm:$0xff]  ;;  %v1817_v7 = vld [vmem:[#allocation2 + $0x200] sm:$0x3] }
 0x1b2   : > { %11569 = vmatprep.subr.bf16.mxu0 %v16235_v0  ;;  %v1985_v14 = vrot.slane %v12436_v56, 2  ;;  %v3691_v31 = vsel %vm1903_vm2, %v3689_v55, %v3690_v60  ;;  %v12438_v56 = vld [vmem:[#allocation2 + $0x1c0] sm:$0xff]  ;;  %v2828_v55 = vld [vmem:[#allocation2 + $0x1f0] sm:$0xff]  ;;  %v3700_v49 = vrot.slane %v2829_v33, 2 }
 0x1b3   : > { %v13957_v26 = vpop.f32.mrb[50].mxu0  ;;  %3998 = vmatmul.mubr.f32.gmra.mrb[92].mxu1 %v3678_v13  ;;  %v1995_v15 = vrot.slane %v12438_v56, 2 }
 0x1b4   : > { %v1518_v40 = vpop.f32.mrb[51].mxu0  ;;  %2296 = vmatmul.mubr.f32.gmra.mrb[156].mxu0 %v1976_v36  ;;  %v3682_v36 = vrot.slane %v3508_v27, 2  ;;  %v1986_v57 = vsel %vm1903_vm2, %v1984_v46, %v1985_v14  ;;  %4002 = vmatprep.mubr.f32.mxu1 %v3685_v30  ;;  %v1991_v32 = vsel %vm1903_vm2, %v1985_v14, %v1990_v21  ;;  %v3512_v27 = vld [vmem:[#allocation2 + $0x1d0] sm:$0x3]  ;;  %v3695_v21 = vsel %vm1903_vm2, %v3690_v60, %v3694_v4  ;;  %v1818_v60 = vld [vmem:[#allocation2 + $0x208] sm:$0x3] }
 0x1b5   : > { %2300 = vmatprep.mubr.f32.mxu0 %v1983_v44  ;;  %11571 = vmatpush1.bf16.msra.mxu0 %v11570_v43  ;;  %v1811_v43 = vld [vmem:[#allocation2 + $0x1b0] sm:$0xfc]  ;;  %v12437_v44 = vld [vmem:[#allocation2 + $0x1c8] sm:$0xff]  ;;  %v3686_v40 = vrot.slane %v3510_v25, 2  ;;  %v3699_v25 = vrot.slane %v3515_v6, 2  ;;  %v2012_v4 = vrot.slane %v1818_v60, 2 }
 0x1b6   : > { %11572 = vmatprep.subr.bf16.mxu0 %v16235_v0  ;;  %v3683_v62 = vsel %vm1903_vm2, %v3677_v53, %v3682_v36  ;;  %v1998_v39 = vrot.slane %v12437_v44, 2  ;;  %v1994_v46 = vrot.slane %v1811_v43, 2  ;;  %v2007_v43 = vrot.slane %v1816_v48, 2  ;;  %v12439_v44 = vld [vmem:[#allocation2 + $0x1f8] sm:$0xff]  ;;  %v1819_v6 = vld [vmem:[#allocation2 + $0x210] sm:$0xfc] }
 0x1b7   : > { %v13964_v58 = vpop.f32.mrb[52].mxu0  ;;  %4003 = vmatmul.mubr.f32.gmra.mrb[94].mxu1 %v3683_v62  ;;  %v1815_v62 = vld [vmem:[#allocation2 + $0x1e0] sm:$0xfc] }
 0x1b8   : > { %v1523_v17 = vpop.f32.mrb[53].mxu0  ;;  %2301 = vmatmul.mubr.f32.gmra.mrb[158].mxu0 %v1981_v54  ;;  %v3687_v54 = vrot.slane %v2822_v12, 2  ;;  %4007 = vmatprep.mubr.f32.mxu1 %v3691_v31  ;;  %v2008_v12 = vrot.slane %v12439_v44, 2  ;;  %v3519_v44 = vld [vmem:[#allocation2 + $0x218] sm:$0xfc]  ;;  %v2834_v60 = vld [vmem:[#allocation2 + $0x220] sm:$0xff] }
 0x1b9   : > { %2305 = vmatprep.mubr.f32.mxu0 %v1989_v11  ;;  %11574 = vmatpush1.bf16.msra.mxu0 %v11573_v9  ;;  %v1813_v9 = vld [vmem:[#allocation2 + $0x1d0] sm:$0x3]  ;;  %v1999_v11 = vsel %vm1903_vm2, %v1997_v28, %v1998_v39  ;;  %v3692_v17 = vrot.slane %v3512_v27, 2  ;;  %v1820_v27 = vld [vmem:[#allocation2 + $0x218] sm:$0xfc] }
 0x1ba   : > { %11623 = vmatprep.subr.bf16.mxu0 %v16235_v0  ;;  %v3688_v13 = vsel %vm1903_vm2, %v3686_v40, %v3687_v54  ;;  %v2000_v14 = vrot.slane %v1813_v9, 2  ;;  %v3514_v40 = vld [vmem:[#allocation2 + $0x1e0] sm:$0xfc]  ;;  %v12440_v9 = vld [vmem:[#allocation2 + $0x1f0] sm:$0xff]  ;;  %v2009_v48 = vsel %vm1903_vm2, %v2007_v43, %v2008_v12  ;;  %v2017_v33 = vrot.slane %v1820_v27, 2 }
 0x1bb   : > { %v13971_v5 = vpop.f32.mrb[54].mxu0  ;;  %4008 = vmatmul.mubr.f32.gmra.mrb[96].mxu1 %v3688_v13  ;;  %v3693_v28 = vsel %vm1903_vm2, %v3687_v54, %v3692_v17  ;;  %v3696_v31 = vrot.slane %v3514_v40, 2  ;;  %v3701_v54 = vsel %vm1903_vm2, %v3699_v25, %v3700_v49  ;;  %v2005_v13 = vrot.slane %v12440_v9, 2  ;;  %v12441_v25 = vld [vmem:[#allocation2 + $0x228] sm:$0xff]  ;;  %v12450_v0 = vld [vmem:[#allocation2 + $0x2e0] sm:$0xff] }
 0x1bc   : > { %v1528_v53 = vpop.f32.mrb[55].mxu0  ;;  %2306 = vmatmul.mubr.f32.gmra.mrb[160].mxu0 %v1986_v57  ;;  %v1996_v57 = vsel %vm1903_vm2, %v1994_v46, %v1995_v15  ;;  %4012 = vmatprep.mubr.f32.mxu1 %v3695_v21  ;;  %v2001_v56 = vsel %vm1903_vm2, %v1995_v15, %v2000_v14  ;;  %v2010_v15 = vrot.slane %v1817_v7, 2  ;;  %v2018_v40 = vrot.slane %v12441_v25, 2  ;;  %v1824_v27 = vld [vmem:[#allocation2 + $0x248] sm:$0xfc] }
 0x1bd   : > { %2310 = vmatprep.mubr.f32.mxu0 %v1993_v1  ;;  %v2003_v1 = vsel %vm1903_vm2, %v1998_v39, %v2002_v37  ;;  %v2004_v39 = vrot.slane %v1815_v62, 2  ;;  %v3517_v37 = vld [vmem:[#allocation2 + $0x208] sm:$0x3]  ;;  %v3707_v9 = vrot.slane %v2834_v60, 2  ;;  %v12443_v60 = vld [vmem:[#allocation2 + $0x258] sm:$0xff] }
 0x1be   : > { %v3704_v17 = vrot.slane %v3517_v37, 2 }
 0x1bf   : > { %v13977_v36 = vpop.f32.mrb[56].mxu0  ;;  %4013 = vmatmul.mubr.f32.gmra.mrb[98].mxu1 %v3693_v28  ;;  %v2006_v62 = vsel %vm1903_vm2, %v2004_v39, %v2005_v13 }
 0x1c0   : > { %v1533_v30 = vpop.f32.mrb[57].mxu0  ;;  %2311 = vmatmul.mubr.f32.gmra.mrb[162].mxu0 %v1991_v32  ;;  %v3697_v32 = vrot.slane %v2828_v55, 2  ;;  %4017 = vmatprep.mubr.f32.mxu1 %v3701_v54  ;;  %v3705_v14 = vsel %vm1903_vm2, %v3700_v49, %v3704_v17  ;;  %v2013_v55 = vsel %vm1903_vm2, %v2008_v12, %v2012_v4  ;;  %v3518_v54 = vld [vmem:[#allocation2 + $0x210] sm:$0xfc]  ;;  %v1822_v49 = vld [vmem:[#allocation2 + $0x238] sm:$0x3]  ;;  %v2011_v12 = vsel %vm1903_vm2, %v2005_v13, %v2010_v15 }
 0x1c1   : > { %2315 = vmatprep.mubr.f32.mxu0 %v1999_v11  ;;  %v3516_v30 = vld [vmem:[#allocation2 + $0x200] sm:$0x3]  ;;  %v3706_v39 = vrot.slane %v3518_v54, 2  ;;  %v1821_v4 = vld [vmem:[#allocation2 + $0x230] sm:$0x3]  ;;  %v2027_v15 = vrot.slane %v1824_v27, 2 }
 0x1c2   : > { %v3698_v11 = vsel %vm1903_vm2, %v3696_v31, %v3697_v32  ;;  %v3709_v31 = vrot.slane %v3519_v44, 2  ;;  %v2020_v13 = vrot.slane %v1821_v4, 2  ;;  %v3522_v4 = vld [vmem:[#allocation2 + $0x240] sm:$0xfc]  ;;  %v1826_v27 = vld [vmem:[#allocation2 + $0x268] sm:$0x3] }
 0x1c3   : > { %v13983_v53 = vpop.f32.mrb[58].mxu0  ;;  %4018 = vmatmul.mubr.f32.gmra.mrb[100].mxu1 %v3698_v11  ;;  %v2014_v11 = vrot.slane %v1819_v6, 2  ;;  %v3708_v17 = vsel %vm1903_vm2, %v3706_v39, %v3707_v9  ;;  %v3523_v39 = vld [vmem:[#allocation2 + $0x248] sm:$0xfc] }
 0x1c4   : > { %v1538_v46 = vpop.f32.mrb[59].mxu0  ;;  %2316 = vmatmul.mubr.f32.gmra.mrb[164].mxu0 %v1996_v57  ;;  %v3702_v57 = vrot.slane %v3516_v30, 2  ;;  %4022 = vmatprep.mubr.f32.mxu1 %v3705_v14  ;;  %v3521_v30 = vld [vmem:[#allocation2 + $0x238] sm:$0x3] }
 0x1c5   : > { %2320 = vmatprep.mubr.f32.mxu0 %v2003_v1  ;;  %v2835_v1 = vld [vmem:[#allocation2 + $0x228] sm:$0xff]  ;;  %v3714_v14 = vrot.slane %v3521_v30, 2 }
 0x1c6   : > { %v3703_v43 = vsel %vm1903_vm2, %v3697_v32, %v3702_v57  ;;  %v3710_v46 = vrot.slane %v2835_v1, 2  ;;  %v12442_v32 = vld [vmem:[#allocation2 + $0x220] sm:$0xff]  ;;  %v2019_v57 = vsel %vm1903_vm2, %v2017_v33, %v2018_v40  ;;  %v2028_v33 = vrot.slane %v12443_v60, 2  ;;  %v3525_v60 = vld [vmem:[#allocation2 + $0x268] sm:$0x3] }
 0x1c7   : > { %v13989_v21 = vpop.f32.mrb[60].mxu0  ;;  %4023 = vmatmul.mubr.f32.gmra.mrb[102].mxu1 %v3703_v43  ;;  %v2015_v37 = vrot.slane %v12442_v32, 2  ;;  %v3520_v43 = vld [vmem:[#allocation2 + $0x230] sm:$0x3] }
 0x1c8   : > { %v1543_v28 = vpop.f32.mrb[61].mxu0  ;;  %2321 = vmatmul.mubr.f32.gmra.mrb[166].mxu0 %v2001_v56  ;;  %v3712_v6 = vrot.slane %v3520_v43, 2  ;;  %v2840_v32 = vld [vmem:[#allocation2 + $0x250] sm:$0xff] }
 0x1c9   : > { %2325 = vmatprep.mubr.f32.mxu0 %v2009_v48  ;;  %v3711_v48 = vsel %vm1903_vm2, %v3709_v31, %v3710_v46  ;;  %v2022_v28 = vrot.slane %v1822_v49, 2  ;;  %v2016_v25 = vsel %vm1903_vm2, %v2014_v11, %v2015_v37  ;;  %v1823_v31 = vld [vmem:[#allocation2 + $0x240] sm:$0xfc]  ;;  %v2841_v49 = vld [vmem:[#allocation2 + $0x258] sm:$0xff]  ;;  %v3717_v30 = vrot.slane %v2840_v32, 2  ;;  %v12444_v43 = vld [vmem:[#allocation2 + $0x250] sm:$0xff] }
 0x1ca   : > { %4027 = vmatprep.mubr.f32.mxu1 %v3711_v48  ;;  %v3713_v54 = vsel %vm1903_vm2, %v3707_v9, %v3712_v6  ;;  %v3719_v48 = vrot.slane %v3523_v39, 2  ;;  %v1825_v6 = vld [vmem:[#allocation2 + $0x260] sm:$0x3] }
 0x1cb   : > { %v13995_v56 = vpop.f32.mrb[62].mxu0  ;;  %4028 = vmatmul.mubr.f32.gmra.mrb[104].mxu1 %v3708_v17  ;;  %v3716_v17 = vrot.slane %v3522_v4, 2 }
 0x1cc   : > { %v1548_v7 = vpop.f32.mrb[63].mxu0  ;;  %2326 = vmatmul.mubr.f32.gmra.mrb[168].mxu0 %v2006_v62 }
 0x1cd   : > { %2330 = vmatprep.mubr.f32.mxu0 %v2013_v55  ;;  %v3715_v55 = vsel %vm1903_vm2, %v3710_v46, %v3714_v14  ;;  %v14008_v7 = vpop.f32.mrb[0].mxu1  ;;  %v2024_v14 = vrot.slane %v1823_v31, 2  ;;  %v3524_v31 = vld [vmem:[#allocation2 + $0x260] sm:$0x3] }
 0x1ce   : > { %4032 = vmatprep.mubr.f32.mxu1 %v3715_v55  ;;  %v2583_v11 = vpop.f32.mrb[1].mxu1  ;;  %v3718_v55 = vsel %vm1903_vm2, %v3716_v17, %v3717_v30  ;;  %v1827_v17 = vld [vmem:[#allocation2 + $0x270] sm:$0xfc] }
 0x1cf   : > { %v1616_v62 = vpop.f32.mrb[64].mxu0  ;;  %4033 = vmatmul.mubr.f32.gmra.mrb[106].mxu1 %v3713_v54  ;;  %v2029_v54 = vsel %vm1903_vm2, %v2027_v15, %v2028_v33 }
 0x1d0   : > { %v14002_v1 = vadd.f32 %v1616_v62, %v13612_v29  ;;  %v1618_v44 = vpop.f32.mrb[65].mxu0  ;;  %2331 = vmatmul.mubr.f32.gmra.mrb[170].mxu0 %v2011_v12  ;;  %v2023_v29 = vsel %vm1903_vm2, %v2018_v40, %v2022_v28  ;;  %v3720_v12 = vrot.slane %v2841_v49, 2  ;;  %v2025_v40 = vrot.slane %v12444_v43, 2  ;;  %v14017_v49 = vpop.f32.mrb[2].mxu1  ;;  %v2847_v43 = vld [vmem:[#allocation2 + $0x288] sm:$0xff] }
 0x1d1   : > { %2335 = vmatprep.mubr.f32.mxu0 %v2019_v57  ;;  %v2021_v62 = vsel %vm1903_vm2, %v2015_v37, %v2020_v13  ;;  %v1828_v44 = vld [vmem:[#allocation2 + $0x278] sm:$0xfc]  ;;  %v2588_v32 = vpop.f32.mrb[3].mxu1  ;;  %v2030_v13 = vrot.slane %v1825_v6, 2 }
 0x1d2   : > { %v3721_v28 = vsel %vm1903_vm2, %v3719_v48, %v3720_v12  ;;  %v3722_v48 = vrot.slane %v3524_v31, 2  ;;  %v2037_v4 = vrot.slane %v1828_v44, 2  ;;  %v2026_v15 = vsel %vm1903_vm2, %v2024_v14, %v2025_v40 }
 0x1d3   : > { %v1621_v46 = vpop.f32.mrb[66].mxu0  ;;  %4037 = vmatprep.mubr.f32.mxu1 %v3721_v28  ;;  %v3527_v28 = vld [vmem:[#allocation2 + $0x278] sm:$0xfc]  ;;  %v3730_v44 = vrot.slane %v2847_v43, 2  ;;  %v2034_v32 = vrot.slane %v1827_v17, 2 }
 0x1d4   : > { %v14011_v57 = vadd.f32 %v1621_v46, %v13621_v42  ;;  %v1623_v9 = vpop.f32.mrb[67].mxu0  ;;  %2336 = vmatmul.mubr.f32.gmra.mrb[172].mxu0 %v2016_v25  ;;  %v2032_v42 = vrot.slane %v1826_v27, 2  ;;  %v3724_v25 = vrot.slane %v3525_v60, 2  ;;  %4038 = vmatmul.mubr.f32.gmra.mrb[108].mxu1 %v3718_v55  ;;  %v12445_v27 = vld [vmem:[#allocation2 + $0x288] sm:$0xff]  ;;  %v14026_v55 = vpop.f32.mrb[4].mxu1  ;;  %v3729_v6 = vrot.slane %v3527_v28, 2 }
 0x1d5   : > { %2340 = vmatprep.mubr.f32.mxu0 %v2023_v29  ;;  %v2038_v11 = vrot.slane %v12445_v27, 2  ;;  %v3723_v9 = vsel %vm1903_vm2, %v3717_v30, %v3722_v48  ;;  %v3526_v60 = vld [vmem:[#allocation2 + $0x270] sm:$0xfc]  ;;  %v2593_v14 = vpop.f32.mrb[5].mxu1  ;;  %v12446_v48 = vld [vmem:[#allocation2 + $0x280] sm:$0xff] }
 0x1d6   : > { %v3725_v46 = vsel %vm1903_vm2, %v3720_v12, %v3724_v25  ;;  %v3726_v25 = vrot.slane %v3526_v60, 2  ;;  %v1832_v27 = vld [vmem:[#allocation2 + $0x2a8] sm:$0xfc]  ;;  %v3529_v43 = vld [vmem:[#allocation2 + $0x298] sm:$0x3] }
 0x1d7   : > { %v1626_v39 = vpop.f32.mrb[68].mxu0  ;;  %4042 = vmatprep.mubr.f32.mxu1 %v3725_v46  ;;  %v1829_v46 = vld [vmem:[#allocation2 + $0x290] sm:$0x3]  ;;  %v2039_v28 = vsel %vm1903_vm2, %v2037_v4, %v2038_v11  ;;  %v2047_v14 = vrot.slane %v1832_v27, 2 }
 0x1d8   : > { %v14020_v29 = vadd.f32 %v1626_v39, %v13630_v51  ;;  %v1628_v37 = vpop.f32.mrb[69].mxu0  ;;  %2341 = vmatmul.mubr.f32.gmra.mrb[174].mxu0 %v2021_v62  ;;  %v2033_v51 = vsel %vm1903_vm2, %v2028_v33, %v2032_v42  ;;  %v2846_v62 = vld [vmem:[#allocation2 + $0x280] sm:$0xff]  ;;  %4043 = vmatmul.mubr.f32.gmra.mrb[110].mxu1 %v3723_v9  ;;  %v2035_v33 = vrot.slane %v12446_v48, 2  ;;  %v3731_v42 = vsel %vm1903_vm2, %v3729_v6, %v3730_v44  ;;  %v3528_v17 = vld [vmem:[#allocation2 + $0x290] sm:$0x3] }
 0x1d9   : > { %2345 = vmatprep.mubr.f32.mxu0 %v2029_v54  ;;  %v1830_v54 = vld [vmem:[#allocation2 + $0x298] sm:$0x3]  ;;  %v3727_v31 = vrot.slane %v2846_v62, 2  ;;  %v2031_v37 = vsel %vm1903_vm2, %v2025_v40, %v2030_v13  ;;  %4047 = vmatprep.mubr.f32.mxu1 %v3731_v42  ;;  %v14035_v62 = vpop.f32.mrb[6].mxu1  ;;  %v3732_v6 = vrot.slane %v3528_v17, 2  ;;  %v2040_v13 = vrot.slane %v1829_v46, 2 }
 0x1da   : > { %v2036_v4 = vsel %vm1903_vm2, %v2034_v32, %v2035_v33  ;;  %v1831_v48 = vld [vmem:[#allocation2 + $0x2a0] sm:$0xfc] }
 0x1db   : > { %v1631_v12 = vpop.f32.mrb[70].mxu0  ;;  %v3728_v9 = vsel %vm1903_vm2, %v3726_v25, %v3727_v31  ;;  %v3733_v42 = vsel %vm1903_vm2, %v3727_v31, %v3732_v6  ;;  %v2044_v6 = vrot.slane %v1831_v48, 2  ;;  %v3532_v48 = vld [vmem:[#allocation2 + $0x2c0] sm:$0x3] }
 0x1dc   : > { %v14029_v39 = vadd.f32 %v1631_v12, %v13639_v61  ;;  %v1633_v30 = vpop.f32.mrb[71].mxu0  ;;  %2346 = vmatmul.mubr.f32.gmra.mrb[176].mxu0 %v2026_v15  ;;  %v2042_v61 = vrot.slane %v1830_v54, 2  ;;  %v3734_v15 = vrot.slane %v3529_v43, 2  ;;  %4048 = vmatmul.mubr.f32.gmra.mrb[112].mxu1 %v3728_v9  ;;  %v2598_v12 = vpop.f32.mrb[7].mxu1  ;;  %v12447_v54 = vld [vmem:[#allocation2 + $0x2b8] sm:$0xff] }
 0x1dd   : > { %2350 = vmatprep.mubr.f32.mxu0 %v2033_v51  ;;  %v2048_v30 = vrot.slane %v12447_v54, 2  ;;  %v2853_v9 = vld [vmem:[#allocation2 + $0x2b8] sm:$0xff]  ;;  %v3531_v43 = vld [vmem:[#allocation2 + $0x2a8] sm:$0xfc]  ;;  %v14044_v17 = vpop.f32.mrb[8].mxu1  ;;  %v2041_v54 = vsel %vm1903_vm2, %v2035_v33, %v2040_v13 }
 0x1de   : > { %v3735_v25 = vsel %vm1903_vm2, %v3730_v44, %v3734_v15  ;;  %v3739_v46 = vrot.slane %v3531_v43, 2  ;;  %v3740_v27 = vrot.slane %v2853_v9, 2  ;;  %v2603_v32 = vpop.f32.mrb[9].mxu1  ;;  %v1833_v9 = vld [vmem:[#allocation2 + $0x2c0] sm:$0x3] }
 0x1df   : > { %v1636_v60 = vpop.f32.mrb[72].mxu0  ;;  %4052 = vmatprep.mubr.f32.mxu1 %v3735_v25  ;;  %v12448_v25 = vld [vmem:[#allocation2 + $0x2b0] sm:$0xff]  ;;  %v1836_v43 = vld [vmem:[#allocation2 + $0x2d8] sm:$0xfc]  ;;  %v2050_v13 = vrot.slane %v1833_v9, 2 }
 0x1e0   : > { %v14038_v51 = vadd.f32 %v1636_v60, %v13648_v10  ;;  %v1638_v40 = vpop.f32.mrb[73].mxu0  ;;  %2351 = vmatmul.mubr.f32.gmra.mrb[178].mxu0 %v2031_v37  ;;  %v2043_v10 = vsel %vm1903_vm2, %v2038_v11, %v2042_v61  ;;  %v2852_v37 = vld [vmem:[#allocation2 + $0x2b0] sm:$0xff]  ;;  %v3530_v60 = vld [vmem:[#allocation2 + $0x2a0] sm:$0xfc]  ;;  %4053 = vmatmul.mubr.f32.gmra.mrb[114].mxu1 %v3733_v42  ;;  %v2045_v11 = vrot.slane %v12448_v25, 2  ;;  %v3741_v61 = vsel %vm1903_vm2, %v3739_v46, %v3740_v27 }
 0x1e1   : > { %2355 = vmatprep.mubr.f32.mxu0 %v2039_v28  ;;  %v1834_v28 = vld [vmem:[#allocation2 + $0x2c8] sm:$0x3]  ;;  %v3736_v15 = vrot.slane %v3530_v60, 2  ;;  %v3737_v12 = vrot.slane %v2852_v37, 2  ;;  %4057 = vmatprep.mubr.f32.mxu1 %v3741_v61  ;;  %v2049_v37 = vsel %vm1903_vm2, %v2047_v14, %v2048_v30  ;;  %v3742_v46 = vrot.slane %v3532_v48, 2 }
 0x1e2   : > { %v3533_v60 = vld [vmem:[#allocation2 + $0x2c8] sm:$0x3]  ;;  %v2057_v25 = vrot.slane %v1836_v43, 2  ;;  %v2046_v14 = vsel %vm1903_vm2, %v2044_v6, %v2045_v11  ;;  %v3535_v48 = vld [vmem:[#allocation2 + $0x2d8] sm:$0xfc] }
 0x1e3   : > { %v1641_v44 = vpop.f32.mrb[74].mxu0  ;;  %v3738_v42 = vsel %vm1903_vm2, %v3736_v15, %v3737_v12  ;;  %v3749_v9 = vrot.slane %v3535_v48, 2  ;;  %v1837_v48 = vld [vmem:[#allocation2 + $0x2f0] sm:$0x3] }
 0x1e4   : > { %v14047_v40 = vadd.f32 %v1641_v44, %v13657_v20  ;;  %v1643_v31 = vpop.f32.mrb[75].mxu0  ;;  %2356 = vmatmul.mubr.f32.gmra.mrb[180].mxu0 %v2036_v4  ;;  %v2052_v20 = vrot.slane %v1834_v28, 2  ;;  %v14053_v44 = vpop.f32.mrb[10].mxu1  ;;  %v3744_v4 = vrot.slane %v3533_v60, 2  ;;  %4058 = vmatmul.mubr.f32.gmra.mrb[116].mxu1 %v3738_v42  ;;  %v12449_v28 = vld [vmem:[#allocation2 + $0x2e8] sm:$0xff]  ;;  %v3743_v42 = vsel %vm1903_vm2, %v3737_v12, %v3742_v46 }
 0x1e5   : > { %2360 = vmatprep.mubr.f32.mxu0 %v2043_v10  ;;  %v2608_v31 = vpop.f32.mrb[11].mxu1  ;;  %v2058_v61 = vrot.slane %v12449_v28, 2  ;;  %v1835_v60 = vld [vmem:[#allocation2 + $0x2d0] sm:$0xfc] }
 0x1e6   : > { %v3745_v15 = vsel %vm1903_vm2, %v3740_v27, %v3744_v4  ;;  %v2859_v31 = vld [vmem:[#allocation2 + $0x2e8] sm:$0xff]  ;;  %v2054_v46 = vrot.slane %v1835_v60, 2  ;;  %v3536_v60 = vld [vmem:[#allocation2 + $0x2f0] sm:$0x3] }
 0x1e7   : > { %v1646_v32 = vpop.f32.mrb[76].mxu0  ;;  %4062 = vmatprep.mubr.f32.mxu1 %v3745_v15  ;;  %v3750_v43 = vrot.slane %v2859_v31, 2  ;;  %v2051_v31 = vsel %vm1903_vm2, %v2045_v11, %v2050_v13  ;;  %v2060_v13 = vrot.slane %v1837_v48, 2 }
 0x1e8   : > { %v14056_v10 = vadd.f32 %v1646_v32, %v13666_v35  ;;  %v1648_v33 = vpop.f32.mrb[77].mxu0  ;;  %2361 = vmatmul.mubr.f32.gmra.mrb[182].mxu0 %v2041_v54  ;;  %v2053_v35 = vsel %vm1903_vm2, %v2048_v30, %v2052_v20  ;;  %v14062_v32 = vpop.f32.mrb[12].mxu1  ;;  %v2858_v54 = vld [vmem:[#allocation2 + $0x2e0] sm:$0xff]  ;;  %4063 = vmatmul.mubr.f32.gmra.mrb[118].mxu1 %v3743_v42  ;;  %v2055_v30 = vrot.slane %v12450_v0, 2 }
 0x1e9   : > { %2365 = vmatprep.mubr.f32.mxu0 %v2049_v37  ;;  %16250 = vst [vmem:[#allocation9_spill] sm:$0xff] %v14062_v32  ;;  %v3534_v33 = vld [vmem:[#allocation2 + $0x2d0] sm:$0xfc]  ;;  %v1838_v37 = vld [vmem:[#allocation2 + $0x2f8] sm:$0x3]  ;;  %v2613_v6 = vpop.f32.mrb[13].mxu1  ;;  %v3751_v20 = vsel %vm1903_vm2, %v3749_v9, %v3750_v43 }
 0x1ea   : > { %v3746_v4 = vrot.slane %v3534_v33, 2  ;;  %v3747_v28 = vrot.slane %v2858_v54, 2  ;;  %v2773_v32 = vld [vmem:[#allocation2 + $0x38] sm:$0xfe]  ;;  %4067 = vmatprep.mubr.f32.mxu1 %v3751_v20  ;;  %v2059_v54 = vsel %vm1903_vm2, %v2057_v25, %v2058_v61  ;;  %v3752_v9 = vrot.slane %v3536_v60, 2 }
 0x1eb   : > { %v1651_v27 = vpop.f32.mrb[78].mxu0  ;;  %v3537_v33 = vld [vmem:[#allocation2 + $0x2f8] sm:$0x3]  ;;  %v2056_v25 = vsel %vm1903_vm2, %v2054_v46, %v2055_v30 }
 0x1ec   : > { %v14065_v15 = vadd.f32 %v1651_v27, %v13678_v59  ;;  %v1653_v12 = vpop.f32.mrb[79].mxu0  ;;  %2366 = vmatmul.mubr.f32.gmra.mrb[184].mxu0 %v2046_v14  ;;  %v3748_v42 = vsel %vm1903_vm2, %v3746_v4, %v3747_v28  ;;  %v2062_v59 = vrot.slane %v1838_v37, 2  ;;  %v14071_v27 = vpop.f32.mrb[14].mxu1  ;;  %v3754_v14 = vrot.slane %v3537_v33, 2  ;;  %v2772_v4 = vld [vmem:[#allocation2 + $0x30] sm:$0xfe] }
 0x1ed   : > { %2370 = vmatprep.mubr.f32.mxu0 %v2053_v35  ;;  %16251 = vst [vmem:[#allocation10_spill] sm:$0xff] %v14071_v27  ;;  %4068 = vmatmul.mubr.f32.gmra.mrb[120].mxu1 %v3748_v42  ;;  %v2618_v0 = vpop.f32.mrb[15].mxu1  ;;  %v2967_v12 = vrot.slane %v2773_v32, 1  ;;  %v12451_v37 = vld [vmem:[#allocation2 + $0x48] sm:$0xff]  ;;  %v2777_v27 = vld [vmem:[#allocation2 + $0x58] sm:$0x1]  ;;  %v3753_v42 = vsel %vm1903_vm2, %v3747_v28, %v3752_v9 }
 0x1ee   : > { %v3755_v20 = vsel %vm1903_vm2, %v3750_v43, %v3754_v14  ;;  %v2968_v33 = vrot.slane %v12451_v37, 1  ;;  %v2865_v60 = vld [vmem:[#allocation2 + $0x318] sm:$0xff]  ;;  %v3539_v0 = vld [vmem:[#allocation2 + $0x308] sm:$0xfc]  ;;  %v2964_v28 = vrot.slane %v2772_v4, 1 }
 0x1ef   : > { %v1656_v6 = vpop.f32.mrb[80].mxu0  ;;  %4072 = vmatprep.mubr.f32.mxu1 %v3755_v20  ;;  %v3759_v32 = vrot.slane %v3539_v0, 2  ;;  %v3760_v48 = vrot.slane %v2865_v60, 2  ;;  %v10078_v60 = vld [vmem:[%s16227_s2 + $0x608] sm:$0xff] }
 0x1f0   : > { %v14074_v35 = vadd.f32 %v1656_v6, %v13696_v47  ;;  %v1658_v11 = vpop.f32.mrb[81].mxu0  ;;  %2371 = vmatmul.mubr.f32.gmra.mrb[186].mxu0 %v2051_v31  ;;  %v2063_v47 = vsel %vm1903_vm2, %v2058_v61, %v2062_v59  ;;  %v14080_v6 = vpop.f32.mrb[16].mxu1  ;;  %v2864_v31 = vld [vmem:[#allocation2 + $0x310] sm:$0xff]  ;;  %v2061_v61 = vsel %vm1903_vm2, %v2055_v30, %v2060_v13  ;;  %v12452_v59 = vld [vmem:[#allocation2 + $0x40] sm:$0xff]  ;;  %v3541_v4 = vld [vmem:[#allocation2 + $0x328] sm:$0x3] }
 0x1f1   : > { %2375 = vmatprep.mubr.f32.mxu0 %v2059_v54  ;;  %16252 = vst [vmem:[#allocation11_spill] sm:$0xff] %v14080_v6  ;;  %v3538_v11 = vld [vmem:[#allocation2 + $0x300] sm:$0xfc]  ;;  %4073 = vmatmul.mubr.f32.gmra.mrb[122].mxu1 %v3753_v42  ;;  %v2623_v54 = vpop.f32.mrb[17].mxu1  ;;  %v3757_v14 = vrot.slane %v2864_v31, 2  ;;  %v3761_v9 = vsel %vm1903_vm2, %v3759_v32, %v3760_v48  ;;  %v2965_v0 = vrot.slane %v12452_v59, 1  ;;  %v2969_v31 = vsel %vm1067_vm0, %v2967_v12, %v2968_v33 }
 0x1f2   : > { %v3756_v46 = vrot.slane %v3538_v11, 2  ;;  %v10077_v42 = vld [vmem:[%s16227_s2 + $0x600] sm:$0xff]  ;;  %4077 = vmatprep.mubr.f32.mxu1 %v3761_v9  ;;  %v14095_v32 = vpop.f32.mrb[18].mxu1  ;;  %v3764_v30 = vrot.slane %v3541_v4, 2 }
 0x1f3   : > { %v1661_v43 = vpop.f32.mrb[82].mxu0  ;;  %16254 = vst [vmem:[#allocation13_spill] sm:$0xff] %v14095_v32  ;;  %v3540_v13 = vld [vmem:[#allocation2 + $0x320] sm:$0x3]  ;;  %v2628_v54 = vpop.f32.mrb[19].mxu1  ;;  %v2966_v12 = vsel %vm1067_vm0, %v2964_v28, %v2965_v0  ;;  %v11624_v9 = vpack.c.bf16 %v10078_v60, %v10077_v42 }
 0x1f4   : > { %v14083_v37 = vadd.f32 %v1661_v43, %v13708_v16  ;;  %v1663_v20 = vpop.f32.mrb[83].mxu0  ;;  %2376 = vmatmul.mubr.f32.gmra.mrb[188].mxu0 %v2056_v25  ;;  %v2972_v16 = vrot.slane %v2777_v27, 1  ;;  %v3758_v25 = vsel %vm1903_vm2, %v3756_v46, %v3757_v14  ;;  %v2779_v43 = vld [vmem:[#allocation2 + $0x68] sm:$0xfe]  ;;  %v3765_v46 = vsel %vm1903_vm2, %v3760_v48, %v3764_v30  ;;  %v2778_v32 = vld [vmem:[#allocation2 + $0x60] sm:$0xfe] }
 0x1f5   : > { %2380 = vmatprep.mubr.f32.mxu0 %v2063_v47  ;;  %v2776_v47 = vld [vmem:[#allocation2 + $0x50] sm:$0x1]  ;;  %4078 = vmatmul.mubr.f32.gmra.mrb[124].mxu1 %v3758_v25  ;;  %v3762_v20 = vrot.slane %v3540_v13, 2  ;;  %v2977_v54 = vrot.slane %v2779_v43, 1  ;;  %v12453_v13 = vld [vmem:[#allocation2 + $0x78] sm:$0xff]  ;;  %v14110_v28 = vpop.f32.mrb[20].mxu1 }
 0x1f6   : > { %16253 = vst [vmem:[#allocation12_spill] sm:$0xff] %v14083_v37  ;;  %v2970_v37 = vrot.slane %v2776_v47, 1  ;;  %4082 = vmatprep.mubr.f32.mxu1 %v3765_v46  ;;  %v2973_v25 = vsel %vm1067_vm0, %v2968_v33, %v2972_v16  ;;  %v2978_v6 = vrot.slane %v12453_v13, 1  ;;  %v10080_v48 = vld [vmem:[%s16227_s2 + $0x618] sm:$0xff]  ;;  %v2783_v42 = vld [vmem:[#allocation2 + $0x88] sm:$0x1] }
 0x1f7   : > { %v1666_v11 = vpop.f32.mrb[84].mxu0  ;;  %v3763_v4 = vsel %vm1903_vm2, %v3757_v14, %v3762_v20  ;;  %v2633_v60 = vpop.f32.mrb[21].mxu1  ;;  %v2974_v16 = vrot.slane %v2778_v32, 1  ;;  %v12454_v47 = vld [vmem:[#allocation2 + $0x70] sm:$0xff]  ;;  %v2782_v43 = vld [vmem:[#allocation2 + $0x80] sm:$0x1] }
 0x1f8   : > { %v14098_v59 = vadd.f32 %v1666_v11, %v13731_v23  ;;  %v1668_v27 = vpop.f32.mrb[85].mxu0  ;;  %2381 = vmatmul.mubr.f32.gmra.mrb[190].mxu0 %v2061_v61  ;;  %v10079_v23 = vld [vmem:[%s16227_s2 + $0x610] sm:$0xff]  ;;  %v2975_v30 = vrot.slane %v12454_v47, 1  ;;  %v2785_v20 = vld [vmem:[#allocation2 + $0x98] sm:$0xfe]  ;;  %v2979_v46 = vsel %vm1067_vm0, %v2977_v54, %v2978_v6  ;;  %v10082_v32 = vld [vmem:[%s16227_s2 + $0x628] sm:$0xff] }
 0x1f9   : > { %3285 = vmatprep.mubr.f32.mxu0 %v2969_v31  ;;  %4083 = vmatmul.mubr.f32.gmra.mrb[126].mxu1 %v3763_v4  ;;  %v2971_v31 = vsel %vm1067_vm0, %v2965_v0, %v2970_v37  ;;  %v11627_v11 = vpack.c.bf16 %v10080_v48, %v10079_v23  ;;  %v10081_v27 = vld [vmem:[%s16227_s2 + $0x620] sm:$0xff]  ;;  %v2982_v4 = vrot.slane %v2783_v42, 1  ;;  %v10110_v0 = vld [vmem:[%s16227_s2 + $0x708] sm:$0xff]  ;;  %v2987_v42 = vrot.slane %v2785_v20, 1 }
 0x1fa   : > { %v10109_v37 = vld [vmem:[%s16227_s2 + $0x700] sm:$0xff]  ;;  %v2976_v48 = vsel %vm1067_vm0, %v2974_v16, %v2975_v30  ;;  %v11630_v60 = vpack.c.bf16 %v10082_v32, %v10081_v27  ;;  %v12455_v47 = vld [vmem:[#allocation2 + $0xa8] sm:$0xff] }
 0x1fb   : > { %v1671_v61 = vpop.f32.mrb[86].mxu0  ;;  %v12456_v32 = vld [vmem:[#allocation2 + $0xa0] sm:$0xff] }
 0x1fc   : > { %v14113_v14 = vadd.f32 %v1671_v61, %v13759_v41  ;;  %v1673_v33 = vpop.f32.mrb[87].mxu0  ;;  %3286 = vmatmul.mubr.f32.vlgmr.msra.gmra.mrb[192].mxu0 %v2966_v12  ;;  %v16256_v41 = vmov 0.0|0.0   ;;  %v14124_v12 = vpop.f32.mrb[22].mxu1  ;;  %v2980_v61 = vrot.slane %v2782_v43, 1  ;;  %v2789_v43 = vld [vmem:[#allocation2 + $0xb8] sm:$0x1] }
 0x1fd   : > { %11625 = vmatpush1.bf16.msra.mxu0 %v11624_v9  ;;  %3290 = vmatprep.mubr.f32.mxu0 %v2973_v25  ;;  %16257 = vst [vmem:[#allocation15_spill] sm:$0xff] %v14124_v12  ;;  %v14132_v25 = vpack.c.bf16 %v10110_v0, %v10109_v37  ;;  %v2638_v54 = vpop.f32.mrb[23].mxu1  ;;  %v2983_v33 = vsel %vm1067_vm0, %v2978_v6, %v2982_v4  ;;  %v2988_v12 = vrot.slane %v12455_v47, 1  ;;  %v2985_v37 = vrot.slane %v12456_v32, 1  ;;  %v2788_v0 = vld [vmem:[#allocation2 + $0xb0] sm:$0x1] }
 0x1fe   : > { %16255 = vst [vmem:[#allocation14_spill] sm:$0xff] %v14113_v14  ;;  %11626 = vmatprep.subr.bf16.mxu0 %v16256_v41  ;;  %v2784_v14 = vld [vmem:[#allocation2 + $0x90] sm:$0xfe]  ;;  %v14146_v16 = vpop.f32.mrb[24].mxu1  ;;  %v10085_v54 = vld [vmem:[%s16227_s2 + $0x640] sm:$0xff]  ;;  %v2992_v47 = vrot.slane %v2789_v43, 1 }
 0x1ff   : > { %v1676_v9 = vpop.f32.mrb[88].mxu0  ;;  %16258 = vst [vmem:[#allocation16_spill] sm:$0xff] %v14146_v16  ;;  %12071 = vmatpush1.bf16.msra.mxu1 %v14132_v25  ;;  %v2643_v6 = vpop.f32.mrb[25].mxu1  ;;  %v2984_v4 = vrot.slane %v2784_v14, 1  ;;  %v10111_v14 = vld [vmem:[%s16227_s2 + $0x710] sm:$0xff]  ;;  %v2990_v43 = vrot.slane %v2788_v0, 1 }
 0x200   : > { %v14135_v13 = vadd.f32 %v1676_v9, %v13774_v34  ;;  %v1678_v23 = vpop.f32.mrb[89].mxu0  ;;  %3291 = vmatmul.mubr.f32.gmra.mrb[194].mxu0 %v2971_v31  ;;  %v10083_v34 = vld [vmem:[%s16227_s2 + $0x630] sm:$0xff]  ;;  %v10084_v31 = vld [vmem:[%s16227_s2 + $0x638] sm:$0xff]  ;;  %12056 = vmatprep.subr.bf16.mxu1 %v16256_v41  ;;  %v2790_v6 = vld [vmem:[#allocation2 + $0xc0] sm:$0xfe]  ;;  %v2993_v32 = vsel %vm1067_vm0, %v2988_v12, %v2992_v47 }
 0x201   : > { %3295 = vmatprep.mubr.f32.mxu0 %v2979_v46  ;;  %11628 = vmatpush1.bf16.msra.mxu0 %v11627_v11  ;;  %v2981_v46 = vsel %vm1067_vm0, %v2975_v30, %v2980_v61  ;;  %v11633_v9 = vpack.c.bf16 %v10084_v31, %v10083_v34  ;;  %v2989_v23 = vsel %vm1067_vm0, %v2987_v42, %v2988_v12  ;;  %v14162_v30 = vpop.f32.mrb[26].mxu1 }
 0x202   : > { %11629 = vmatprep.subr.bf16.mxu0 %v16256_v41  ;;  %16260 = vst [vmem:[#allocation18_spill] sm:$0xff] %v14162_v30  ;;  %v2991_v47 = vsel %vm1067_vm0, %v2985_v37, %v2990_v43  ;;  %v10113_v43 = vld [vmem:[%s16227_s2 + $0x720] sm:$0xff] }
 0x203   : > { %v1681_v11 = vpop.f32.mrb[90].mxu0 }
 0x204   : > { %v14151_v20 = vadd.f32 %v1681_v11, %v13789_v3  ;;  %v1683_v27 = vpop.f32.mrb[91].mxu0  ;;  %3296 = vmatmul.mubr.f32.gmra.mrb[196].mxu0 %v2976_v48  ;;  %v10086_v3 = vld [vmem:[%s16227_s2 + $0x648] sm:$0xff]  ;;  %v10112_v48 = vld [vmem:[%s16227_s2 + $0x718] sm:$0xff]  ;;  %v2986_v11 = vsel %vm1067_vm0, %v2984_v4, %v2985_v37 }
 0x205   : > { %3300 = vmatprep.mubr.f32.mxu0 %v2983_v33  ;;  %11631 = vmatpush1.bf16.msra.mxu0 %v11630_v60  ;;  %v2791_v60 = vld [vmem:[#allocation2 + $0xc8] sm:$0xfe]  ;;  %v14170_v42 = vpack.c.bf16 %v10112_v48, %v10111_v14  ;;  %v2648_v33 = vpop.f32.mrb[27].mxu1  ;;  %v11636_v27 = vpack.c.bf16 %v10086_v3, %v10085_v54  ;;  %v12458_v3 = vld [vmem:[#allocation2 + $0xd0] sm:$0xff]  ;;  %v2794_v48 = vld [vmem:[#allocation2 + $0xe0] sm:$0x1] }
 0x206   : > { %16259 = vst [vmem:[#allocation17_spill] sm:$0xff] %v14151_v20  ;;  %11632 = vmatprep.subr.bf16.mxu0 %v16256_v41  ;;  %v2997_v30 = vrot.slane %v2791_v60, 1  ;;  %v12457_v20 = vld [vmem:[#allocation2 + $0xd8] sm:$0xff]  ;;  %v14184_v4 = vpop.f32.mrb[28].mxu1  ;;  %v2995_v14 = vrot.slane %v12458_v3, 1  ;;  %v10089_v33 = vld [vmem:[%s16227_s2 + $0x660] sm:$0xff] }
 0x207   : > { %v1686_v61 = vpop.f32.mrb[92].mxu0  ;;  %v2998_v16 = vrot.slane %v12457_v20, 1  ;;  %16261 = vst [vmem:[#allocation19_spill] sm:$0xff] %v14184_v4  ;;  %12072 = vmatpush1.bf16.msra.mxu1 %v14170_v42  ;;  %v2653_v12 = vpop.f32.mrb[29].mxu1  ;;  %v2796_v4 = vld [vmem:[#allocation2 + $0xf0] sm:$0xfe] }
 0x208   : > { %v14173_v34 = vadd.f32 %v1686_v61, %v13803_v50  ;;  %v1688_v31 = vpop.f32.mrb[93].mxu0  ;;  %3301 = vmatmul.mubr.f32.gmra.mrb[198].mxu0 %v2981_v46  ;;  %v10087_v50 = vld [vmem:[%s16227_s2 + $0x650] sm:$0xff]  ;;  %v10088_v46 = vld [vmem:[%s16227_s2 + $0x658] sm:$0xff]  ;;  %12057 = vmatprep.subr.bf16.mxu1 %v16256_v41  ;;  %v14200_v37 = vpop.f32.mrb[30].mxu1 }
 0x209   : > { %3305 = vmatprep.mubr.f32.mxu0 %v2989_v23  ;;  %11634 = vmatpush1.bf16.msra.mxu0 %v11633_v9  ;;  %v2795_v9 = vld [vmem:[#allocation2 + $0xe8] sm:$0x1]  ;;  %v2994_v23 = vrot.slane %v2790_v6, 1  ;;  %v2797_v61 = vld [vmem:[#allocation2 + $0xf8] sm:$0xfe]  ;;  %v11639_v60 = vpack.c.bf16 %v10088_v46, %v10087_v50  ;;  %v2999_v31 = vsel %vm1067_vm0, %v2997_v30, %v2998_v16  ;;  %16263 = vst [vmem:[#allocation21_spill] sm:$0xff] %v14200_v37 }
 0x20a   : > { %11635 = vmatprep.subr.bf16.mxu0 %v16256_v41  ;;  %v10114_v6 = vld [vmem:[%s16227_s2 + $0x728] sm:$0xff]  ;;  %v2658_v30 = vpop.f32.mrb[31].mxu1  ;;  %v3007_v12 = vrot.slane %v2797_v61, 1  ;;  %v2801_v61 = vld [vmem:[#allocation2 + $0x118] sm:$0x1] }
 0x20b   : > { %v1691_v0 = vpop.f32.mrb[94].mxu0  ;;  %v12459_v37 = vld [vmem:[#allocation2 + $0x108] sm:$0xff] }
 0x20c   : > { %v14189_v20 = vadd.f32 %v1691_v0, %v13817_v24  ;;  %v1693_v54 = vpop.f32.mrb[95].mxu0  ;;  %3306 = vmatmul.mubr.f32.gmra.mrb[200].mxu0 %v2986_v11  ;;  %v3002_v24 = vrot.slane %v2795_v9, 1  ;;  %v10090_v11 = vld [vmem:[%s16227_s2 + $0x668] sm:$0xff]  ;;  %v2996_v0 = vsel %vm1067_vm0, %v2994_v23, %v2995_v14  ;;  %v3000_v9 = vrot.slane %v2794_v48, 1  ;;  %v14222_v23 = vpop.f32.mrb[32].mxu1 }
 0x20d   : > { %3310 = vmatprep.mubr.f32.mxu0 %v2993_v32  ;;  %11637 = vmatpush1.bf16.msra.mxu0 %v11636_v27  ;;  %v14208_v32 = vpack.c.bf16 %v10114_v6, %v10113_v43  ;;  %v11642_v54 = vpack.c.bf16 %v10090_v11, %v10089_v33  ;;  %16264 = vst [vmem:[#allocation22_spill] sm:$0xff] %v14222_v23  ;;  %v12460_v11 = vld [vmem:[#allocation2 + $0x100] sm:$0xff]  ;;  %v2800_v43 = vld [vmem:[#allocation2 + $0x110] sm:$0x1] }
 0x20e   : > { %16262 = vst [vmem:[#allocation20_spill] sm:$0xff] %v14189_v20  ;;  %11638 = vmatprep.subr.bf16.mxu0 %v16256_v41  ;;  %v3003_v3 = vsel %vm1067_vm0, %v2998_v16, %v3002_v24  ;;  %v3008_v20 = vrot.slane %v12459_v37, 1  ;;  %v2663_v16 = vpop.f32.mrb[33].mxu1  ;;  %v3004_v24 = vrot.slane %v2796_v4, 1  ;;  %v3005_v37 = vrot.slane %v12460_v11, 1  ;;  %v10115_v4 = vld [vmem:[%s16227_s2 + $0x730] sm:$0xff] }
 0x20f   : > { %v1696_v27 = vpop.f32.mrb[96].mxu0  ;;  %12073 = vmatpush1.bf16.msra.mxu1 %v14208_v32  ;;  %v2802_v16 = vld [vmem:[#allocation2 + $0x120] sm:$0xfe] }
 0x210   : > { %v14211_v50 = vadd.f32 %v1696_v27, %v13831_v22  ;;  %v1698_v46 = vpop.f32.mrb[97].mxu0  ;;  %3311 = vmatmul.mubr.f32.gmra.mrb[202].mxu0 %v2991_v47  ;;  %v10091_v22 = vld [vmem:[%s16227_s2 + $0x670] sm:$0xff]  ;;  %v10092_v47 = vld [vmem:[%s16227_s2 + $0x678] sm:$0xff]  ;;  %12058 = vmatprep.subr.bf16.mxu1 %v16256_v41  ;;  %v10093_v27 = vld [vmem:[%s16227_s2 + $0x680] sm:$0xff]  ;;  %v3009_v30 = vsel %vm1067_vm0, %v3007_v12, %v3008_v20 }
 0x211   : > { %3315 = vmatprep.mubr.f32.mxu0 %v2999_v31  ;;  %11640 = vmatpush1.bf16.msra.mxu0 %v11639_v60  ;;  %v3001_v31 = vsel %vm1067_vm0, %v2995_v14, %v3000_v9  ;;  %v11645_v6 = vpack.c.bf16 %v10092_v47, %v10091_v22  ;;  %v3012_v46 = vrot.slane %v2801_v61, 1  ;;  %v14238_v14 = vpop.f32.mrb[34].mxu1  ;;  %v3010_v61 = vrot.slane %v2800_v43, 1 }
 0x212   : > { %11641 = vmatprep.subr.bf16.mxu0 %v16256_v41  ;;  %16266 = vst [vmem:[#allocation24_spill] sm:$0xff] %v14238_v14 }
 0x213   : > { %v1701_v48 = vpop.f32.mrb[98].mxu0  ;;  %v3013_v11 = vsel %vm1067_vm0, %v3008_v20, %v3012_v46  ;;  %v3011_v46 = vsel %vm1067_vm0, %v3005_v37, %v3010_v61  ;;  %v10117_v61 = vld [vmem:[%s16227_s2 + $0x740] sm:$0xff] }
 0x214   : > { %v14227_v60 = vadd.f32 %v1701_v48, %v13845_v63  ;;  %v1703_v33 = vpop.f32.mrb[99].mxu0  ;;  %3316 = vmatmul.mubr.f32.gmra.mrb[204].mxu0 %v2996_v0  ;;  %v10094_v63 = vld [vmem:[%s16227_s2 + $0x688] sm:$0xff]  ;;  %v10116_v0 = vld [vmem:[%s16227_s2 + $0x738] sm:$0xff]  ;;  %v3006_v48 = vsel %vm1067_vm0, %v3004_v24, %v3005_v37 }
 0x215   : > { %3320 = vmatprep.mubr.f32.mxu0 %v3003_v3  ;;  %11643 = vmatpush1.bf16.msra.mxu0 %v11642_v54  ;;  %v2803_v54 = vld [vmem:[#allocation2 + $0x128] sm:$0xfe]  ;;  %v14246_v12 = vpack.c.bf16 %v10116_v0, %v10115_v4  ;;  %v2668_v3 = vpop.f32.mrb[35].mxu1  ;;  %v11648_v33 = vpack.c.bf16 %v10094_v63, %v10093_v27  ;;  %v12462_v63 = vld [vmem:[#allocation2 + $0x130] sm:$0xff]  ;;  %v2806_v0 = vld [vmem:[#allocation2 + $0x140] sm:$0x1] }
 0x216   : > { %16265 = vst [vmem:[#allocation23_spill] sm:$0xff] %v14227_v60  ;;  %11644 = vmatprep.subr.bf16.mxu0 %v16256_v41  ;;  %v3017_v14 = vrot.slane %v2803_v54, 1  ;;  %v12461_v60 = vld [vmem:[#allocation2 + $0x138] sm:$0xff]  ;;  %v14260_v24 = vpop.f32.mrb[36].mxu1  ;;  %v3015_v4 = vrot.slane %v12462_v63, 1  ;;  %v10097_v3 = vld [vmem:[%s16227_s2 + $0x6a0] sm:$0xff] }
 0x217   : > { %v1706_v9 = vpop.f32.mrb[100].mxu0  ;;  %v3018_v23 = vrot.slane %v12461_v60, 1  ;;  %16267 = vst [vmem:[#allocation25_spill] sm:$0xff] %v14260_v24  ;;  %12074 = vmatpush1.bf16.msra.mxu1 %v14246_v12  ;;  %v2673_v20 = vpop.f32.mrb[37].mxu1  ;;  %v2808_v24 = vld [vmem:[#allocation2 + $0x150] sm:$0xfe] }
 0x218   : > { %v14249_v22 = vadd.f32 %v1706_v9, %v13859_v38  ;;  %v1708_v47 = vpop.f32.mrb[101].mxu0  ;;  %3321 = vmatmul.mubr.f32.gmra.mrb[206].mxu0 %v3001_v31  ;;  %v10095_v38 = vld [vmem:[%s16227_s2 + $0x690] sm:$0xff]  ;;  %v10096_v31 = vld [vmem:[%s16227_s2 + $0x698] sm:$0xff]  ;;  %12059 = vmatprep.subr.bf16.mxu1 %v16256_v41  ;;  %v14276_v37 = vpop.f32.mrb[38].mxu1 }
 0x219   : > { %3325 = vmatprep.mubr.f32.mxu0 %v3009_v30  ;;  %11646 = vmatpush1.bf16.msra.mxu0 %v11645_v6  ;;  %v2807_v6 = vld [vmem:[#allocation2 + $0x148] sm:$0x1]  ;;  %v3014_v30 = vrot.slane %v2802_v16, 1  ;;  %v2809_v9 = vld [vmem:[#allocation2 + $0x158] sm:$0xfe]  ;;  %v11651_v54 = vpack.c.bf16 %v10096_v31, %v10095_v38  ;;  %v3019_v47 = vsel %vm1067_vm0, %v3017_v14, %v3018_v23  ;;  %16269 = vst [vmem:[#allocation27_spill] sm:$0xff] %v14276_v37 }
 0x21a   : > { %11647 = vmatprep.subr.bf16.mxu0 %v16256_v41  ;;  %v10118_v16 = vld [vmem:[%s16227_s2 + $0x748] sm:$0xff]  ;;  %v2678_v14 = vpop.f32.mrb[39].mxu1  ;;  %v3027_v20 = vrot.slane %v2809_v9, 1  ;;  %v2813_v9 = vld [vmem:[#allocation2 + $0x178] sm:$0x1] }
 0x21b   : > { %v1711_v43 = vpop.f32.mrb[102].mxu0  ;;  %v12463_v37 = vld [vmem:[#allocation2 + $0x168] sm:$0xff] }
 0x21c   : > { %v14265_v60 = vadd.f32 %v1711_v43, %v13873_v45  ;;  %v1713_v27 = vpop.f32.mrb[103].mxu0  ;;  %3326 = vmatmul.mubr.f32.gmra.mrb[208].mxu0 %v3006_v48  ;;  %v3022_v45 = vrot.slane %v2807_v6, 1  ;;  %v10098_v48 = vld [vmem:[%s16227_s2 + $0x6a8] sm:$0xff]  ;;  %v3016_v43 = vsel %vm1067_vm0, %v3014_v30, %v3015_v4  ;;  %v3020_v6 = vrot.slane %v2806_v0, 1  ;;  %v14298_v30 = vpop.f32.mrb[40].mxu1 }
 0x21d   : > { %3330 = vmatprep.mubr.f32.mxu0 %v3013_v11  ;;  %11649 = vmatpush1.bf16.msra.mxu0 %v11648_v33  ;;  %v14284_v11 = vpack.c.bf16 %v10118_v16, %v10117_v61  ;;  %v11654_v27 = vpack.c.bf16 %v10098_v48, %v10097_v3  ;;  %16270 = vst [vmem:[#allocation28_spill] sm:$0xff] %v14298_v30  ;;  %v12464_v48 = vld [vmem:[#allocation2 + $0x160] sm:$0xff]  ;;  %v2812_v61 = vld [vmem:[#allocation2 + $0x170] sm:$0x1] }
 0x21e   : > { %16268 = vst [vmem:[#allocation26_spill] sm:$0xff] %v14265_v60  ;;  %11650 = vmatprep.subr.bf16.mxu0 %v16256_v41  ;;  %v3023_v63 = vsel %vm1067_vm0, %v3018_v23, %v3022_v45  ;;  %v3028_v60 = vrot.slane %v12463_v37, 1  ;;  %v2683_v23 = vpop.f32.mrb[41].mxu1  ;;  %v3024_v45 = vrot.slane %v2808_v24, 1  ;;  %v3025_v37 = vrot.slane %v12464_v48, 1  ;;  %v10119_v24 = vld [vmem:[%s16227_s2 + $0x750] sm:$0xff] }
 0x21f   : > { %v1716_v33 = vpop.f32.mrb[104].mxu0  ;;  %12075 = vmatpush1.bf16.msra.mxu1 %v14284_v11  ;;  %v2814_v23 = vld [vmem:[#allocation2 + $0x180] sm:$0xfe] }
 0x220   : > { %v14287_v38 = vadd.f32 %v1716_v33, %v13886_v52  ;;  %v1718_v31 = vpop.f32.mrb[105].mxu0  ;;  %3331 = vmatmul.mubr.f32.gmra.mrb[210].mxu0 %v3011_v46  ;;  %v10099_v52 = vld [vmem:[%s16227_s2 + $0x6b0] sm:$0xff]  ;;  %v10100_v46 = vld [vmem:[%s16227_s2 + $0x6b8] sm:$0xff]  ;;  %12060 = vmatprep.subr.bf16.mxu1 %v16256_v41  ;;  %v10101_v33 = vld [vmem:[%s16227_s2 + $0x6c0] sm:$0xff]  ;;  %v3029_v14 = vsel %vm1067_vm0, %v3027_v20, %v3028_v60 }
 0x221   : > { %3335 = vmatprep.mubr.f32.mxu0 %v3019_v47  ;;  %11652 = vmatpush1.bf16.msra.mxu0 %v11651_v54  ;;  %v3021_v47 = vsel %vm1067_vm0, %v3015_v4, %v3020_v6  ;;  %v11657_v16 = vpack.c.bf16 %v10100_v46, %v10099_v52  ;;  %v3032_v31 = vrot.slane %v2813_v9, 1  ;;  %v14314_v4 = vpop.f32.mrb[42].mxu1  ;;  %v3030_v9 = vrot.slane %v2812_v61, 1 }
 0x222   : > { %11653 = vmatprep.subr.bf16.mxu0 %v16256_v41  ;;  %16272 = vst [vmem:[#allocation30_spill] sm:$0xff] %v14314_v4 }
 0x223   : > { %v1721_v0 = vpop.f32.mrb[106].mxu0  ;;  %v3033_v48 = vsel %vm1067_vm0, %v3028_v60, %v3032_v31  ;;  %v3031_v31 = vsel %vm1067_vm0, %v3025_v37, %v3030_v9  ;;  %v10121_v9 = vld [vmem:[%s16227_s2 + $0x760] sm:$0xff] }
 0x224   : > { %v14303_v54 = vadd.f32 %v1721_v0, %v13902_v8  ;;  %v1723_v3 = vpop.f32.mrb[107].mxu0  ;;  %3336 = vmatmul.mubr.f32.gmra.mrb[212].mxu0 %v3016_v43  ;;  %v10102_v8 = vld [vmem:[%s16227_s2 + $0x6c8] sm:$0xff]  ;;  %v10120_v43 = vld [vmem:[%s16227_s2 + $0x758] sm:$0xff]  ;;  %v3026_v0 = vsel %vm1067_vm0, %v3024_v45, %v3025_v37 }
 0x225   : > { %3340 = vmatprep.mubr.f32.mxu0 %v3023_v63  ;;  %11655 = vmatpush1.bf16.msra.mxu0 %v11654_v27  ;;  %v2815_v27 = vld [vmem:[#allocation2 + $0x188] sm:$0xfe]  ;;  %v14322_v20 = vpack.c.bf16 %v10120_v43, %v10119_v24  ;;  %v2688_v63 = vpop.f32.mrb[43].mxu1  ;;  %v11660_v3 = vpack.c.bf16 %v10102_v8, %v10101_v33  ;;  %v12466_v8 = vld [vmem:[#allocation2 + $0x190] sm:$0xff]  ;;  %v2818_v43 = vld [vmem:[#allocation2 + $0x1a0] sm:$0x1] }
 0x226   : > { %16271 = vst [vmem:[#allocation29_spill] sm:$0xff] %v14303_v54  ;;  %11656 = vmatprep.subr.bf16.mxu0 %v16256_v41  ;;  %v3037_v4 = vrot.slane %v2815_v27, 1  ;;  %v12465_v54 = vld [vmem:[#allocation2 + $0x198] sm:$0xff]  ;;  %v14336_v45 = vpop.f32.mrb[44].mxu1  ;;  %v3035_v24 = vrot.slane %v12466_v8, 1  ;;  %v10105_v63 = vld [vmem:[%s16227_s2 + $0x6e0] sm:$0xff] }
 0x227   : > { %v1726_v6 = vpop.f32.mrb[108].mxu0  ;;  %v3038_v30 = vrot.slane %v12465_v54, 1  ;;  %16273 = vst [vmem:[#allocation31_spill] sm:$0xff] %v14336_v45  ;;  %12076 = vmatpush1.bf16.msra.mxu1 %v14322_v20  ;;  %v2693_v60 = vpop.f32.mrb[45].mxu1  ;;  %v2820_v45 = vld [vmem:[#allocation2 + $0x1b0] sm:$0xfe] }
 0x228   : > { %v14325_v52 = vadd.f32 %v1726_v6, %v13915_v18  ;;  %v1728_v46 = vpop.f32.mrb[109].mxu0  ;;  %3341 = vmatmul.mubr.f32.gmra.mrb[214].mxu0 %v3021_v47  ;;  %v10103_v18 = vld [vmem:[%s16227_s2 + $0x6d0] sm:$0xff]  ;;  %v10104_v47 = vld [vmem:[%s16227_s2 + $0x6d8] sm:$0xff]  ;;  %12061 = vmatprep.subr.bf16.mxu1 %v16256_v41  ;;  %v14352_v37 = vpop.f32.mrb[46].mxu1 }
 0x229   : > { %3345 = vmatprep.mubr.f32.mxu0 %v3029_v14  ;;  %11658 = vmatpush1.bf16.msra.mxu0 %v11657_v16  ;;  %v2819_v16 = vld [vmem:[#allocation2 + $0x1a8] sm:$0x1]  ;;  %v3034_v14 = vrot.slane %v2814_v23, 1  ;;  %v2821_v6 = vld [vmem:[#allocation2 + $0x1b8] sm:$0xfe]  ;;  %v11663_v27 = vpack.c.bf16 %v10104_v47, %v10103_v18  ;;  %v3039_v46 = vsel %vm1067_vm0, %v3037_v4, %v3038_v30  ;;  %16275 = vst [vmem:[#allocation33_spill] sm:$0xff] %v14352_v37 }
 0x22a   : > { %11659 = vmatprep.subr.bf16.mxu0 %v16256_v41  ;;  %v10122_v23 = vld [vmem:[%s16227_s2 + $0x768] sm:$0xff]  ;;  %v2698_v4 = vpop.f32.mrb[47].mxu1  ;;  %v3047_v60 = vrot.slane %v2821_v6, 1  ;;  %v2825_v6 = vld [vmem:[#allocation2 + $0x1d8] sm:$0x1] }
 0x22b   : > { %v1731_v61 = vpop.f32.mrb[110].mxu0  ;;  %v12467_v37 = vld [vmem:[#allocation2 + $0x1c8] sm:$0xff]  ;;  %v2824_v4 = vld [vmem:[#allocation2 + $0x1d0] sm:$0x1] }
 0x22c   : > { %v14341_v54 = vadd.f32 %v1731_v61, %v13931_v2  ;;  %v1733_v33 = vpop.f32.mrb[111].mxu0  ;;  %3346 = vmatmul.mubr.f32.gmra.mrb[216].mxu0 %v3026_v0  ;;  %v3042_v2 = vrot.slane %v2819_v16, 1  ;;  %v10106_v0 = vld [vmem:[%s16227_s2 + $0x6e8] sm:$0xff]  ;;  %v3036_v61 = vsel %vm1067_vm0, %v3034_v14, %v3035_v24  ;;  %v3040_v16 = vrot.slane %v2818_v43, 1  ;;  %v14374_v14 = vpop.f32.mrb[48].mxu1 }
 0x22d   : > { %3350 = vmatprep.mubr.f32.mxu0 %v3033_v48  ;;  %11661 = vmatpush1.bf16.msra.mxu0 %v11660_v3  ;;  %v14360_v48 = vpack.c.bf16 %v10122_v23, %v10121_v9  ;;  %v11666_v33 = vpack.c.bf16 %v10106_v0, %v10105_v63  ;;  %v12468_v0 = vld [vmem:[#allocation2 + $0x1c0] sm:$0xff] }
 0x22e   : > { %16274 = vst [vmem:[#allocation32_spill] sm:$0xff] %v14341_v54  ;;  %11662 = vmatprep.subr.bf16.mxu0 %v16256_v41  ;;  %v3043_v8 = vsel %vm1067_vm0, %v3038_v30, %v3042_v2  ;;  %v3048_v54 = vrot.slane %v12467_v37, 1  ;;  %v2703_v30 = vpop.f32.mrb[49].mxu1  ;;  %v3044_v2 = vrot.slane %v2820_v45, 1  ;;  %v3045_v37 = vrot.slane %v12468_v0, 1  ;;  %v10124_v45 = vld [vmem:[%s16227_s2 + $0x778] sm:$0xff] }
 0x22f   : > { %v1736_v3 = vpop.f32.mrb[112].mxu0  ;;  %12077 = vmatpush1.bf16.msra.mxu1 %v14360_v48  ;;  %v12469_v30 = vld [vmem:[#allocation2 + $0x1f8] sm:$0xff]  ;;  %v2826_v0 = vld [vmem:[#allocation2 + $0x1e0] sm:$0xfe] }
 0x230   : > { %v1738_v18 = vpop.f32.mrb[113].mxu0  ;;  %3351 = vmatmul.mubr.f32.gmra.mrb[218].mxu0 %v3031_v31  ;;  %v14363_v47 = vadd.f32 %v1736_v3, %v13944_v19  ;;  %v10107_v31 = vld [vmem:[%s16227_s2 + $0x6f0] sm:$0xff]  ;;  %v10108_v19 = vld [vmem:[%s16227_s2 + $0x6f8] sm:$0xff]  ;;  %12062 = vmatprep.subr.bf16.mxu1 %v16256_v41  ;;  %v3049_v23 = vsel %vm1067_vm0, %v3047_v60, %v3048_v54  ;;  %v3052_v3 = vrot.slane %v2825_v6, 1 }
 0x231   : > { %3355 = vmatprep.mubr.f32.mxu0 %v3039_v46  ;;  %11664 = vmatpush1.bf16.msra.mxu0 %v11663_v27  ;;  %v3041_v46 = vsel %vm1067_vm0, %v3035_v24, %v3040_v16  ;;  %v11669_v9 = vpack.c.bf16 %v10108_v19, %v10107_v31  ;;  %v14384_v18 = vpop.f32.mrb[50].mxu1  ;;  %v3046_v31 = vsel %vm1067_vm0, %v3044_v2, %v3045_v37  ;;  %v3050_v19 = vrot.slane %v2824_v4, 1 }
 0x232   : > { %11665 = vmatprep.subr.bf16.mxu0 %v16256_v41  ;;  %v3054_v4 = vrot.slane %v2826_v0, 1 }
 0x233   : > { %v1741_v43 = vpop.f32.mrb[114].mxu0 }
 0x234   : > { %v1743_v27 = vpop.f32.mrb[115].mxu0  ;;  %3356 = vmatmul.mubr.f32.gmra.mrb[220].mxu0 %v3036_v61  ;;  %v14379_v63 = vadd.f32 %v1741_v43, %v13957_v26  ;;  %v10123_v26 = vld [vmem:[%s16227_s2 + $0x770] sm:$0xff]  ;;  %v2827_v61 = vld [vmem:[#allocation2 + $0x1e8] sm:$0xfe]  ;;  %v3053_v43 = vsel %vm1067_vm0, %v3048_v54, %v3052_v3  ;;  %v10125_v54 = vld [vmem:[%s16227_s2 + $0x780] sm:$0xff]  ;;  %v3051_v3 = vsel %vm1067_vm0, %v3045_v37, %v3050_v19 }
 0x235   : > { %3360 = vmatprep.mubr.f32.mxu0 %v3043_v8  ;;  %11667 = vmatpush1.bf16.msra.mxu0 %v11666_v33  ;;  %v14392_v16 = vpack.c.bf16 %v10124_v45, %v10123_v26  ;;  %v2708_v33 = vpop.f32.mrb[51].mxu1  ;;  %v3057_v6 = vrot.slane %v2827_v61, 1  ;;  %v3058_v27 = vrot.slane %v12469_v30, 1  ;;  %v10127_v19 = vld [vmem:[%s16227_s2 + $0x790] sm:$0xff] }
 0x236   : > { %11668 = vmatprep.subr.bf16.mxu0 %v16256_v41  ;;  %v14400_v26 = vpop.f32.mrb[52].mxu1 }
 0x237   : > { %v1746_v24 = vpop.f32.mrb[116].mxu0  ;;  %16276 = vst [vmem:[#allocation34_spill] sm:$0xff] %v14400_v26  ;;  %12078 = vmatpush1.bf16.msra.mxu1 %v14392_v16  ;;  %v2713_v45 = vpop.f32.mrb[53].mxu1  ;;  %v2854_v26 = vld [vmem:[#allocation2 + $0x2c0] sm:$0x1] }
 0x238   : > { %v1748_v60 = vpop.f32.mrb[117].mxu0  ;;  %3361 = vmatmul.mubr.f32.gmra.mrb[222].mxu0 %v3041_v46  ;;  %v14395_v8 = vadd.f32 %v1746_v24, %v13964_v58  ;;  %v2831_v58 = vld [vmem:[#allocation2 + $0x208] sm:$0x1]  ;;  %12063 = vmatprep.subr.bf16.mxu1 %v16256_v41  ;;  %v12470_v24 = vld [vmem:[#allocation2 + $0x1f0] sm:$0xff]  ;;  %v14417_v30 = vpop.f32.mrb[54].mxu1 }
 0x239   : > { %3365 = vmatprep.mubr.f32.mxu0 %v3049_v23  ;;  %11670 = vmatpush1.bf16.msra.mxu0 %v11669_v9  ;;  %v10126_v23 = vld [vmem:[%s16227_s2 + $0x788] sm:$0xff]  ;;  %v3055_v61 = vrot.slane %v12470_v24, 1  ;;  %v3059_v60 = vsel %vm1067_vm0, %v3057_v6, %v3058_v27  ;;  %16278 = vst [vmem:[#allocation36_spill] sm:$0xff] %v14417_v30  ;;  %v2833_v45 = vld [vmem:[#allocation2 + $0x218] sm:$0xfe] }
 0x23a   : > { %11671 = vmatprep.subr.bf16.mxu0 %v16256_v41  ;;  %v14414_v33 = vpack.c.bf16 %v10126_v23, %v10125_v54  ;;  %v12471_v54 = vld [vmem:[#allocation2 + $0x228] sm:$0xff] }
 0x23b   : > { %v1751_v46 = vpop.f32.mrb[118].mxu0  ;;  %v3056_v6 = vsel %vm1067_vm0, %v3054_v4, %v3055_v61  ;;  %v3068_v23 = vrot.slane %v12471_v54, 1 }
 0x23c   : > { %v1753_v2 = vpop.f32.mrb[119].mxu0  ;;  %3366 = vmatmul.mubr.f32.gmra.mrb[224].mxu0 %v3046_v31  ;;  %v14405_v9 = vadd.f32 %v1751_v46, %v13971_v5  ;;  %v3062_v5 = vrot.slane %v2831_v58, 1  ;;  %v2830_v31 = vld [vmem:[#allocation2 + $0x200] sm:$0x1]  ;;  %12079 = vmatpush1.bf16.msra.mxu1 %v14414_v33 }
 0x23d   : > { %3370 = vmatprep.mubr.f32.mxu0 %v3053_v43  ;;  %v2718_v2 = vpop.f32.mrb[55].mxu1  ;;  %12064 = vmatprep.subr.bf16.mxu1 %v16256_v41  ;;  %v10128_v43 = vld [vmem:[%s16227_s2 + $0x798] sm:$0xff]  ;;  %v3060_v0 = vrot.slane %v2830_v31, 1 }
 0x23e   : > { %16277 = vst [vmem:[#allocation35_spill] sm:$0xff] %v14405_v9  ;;  %v14431_v58 = vpack.c.bf16 %v10128_v43, %v10127_v19  ;;  %v14434_v24 = vpop.f32.mrb[56].mxu1  ;;  %v2837_v2 = vld [vmem:[#allocation2 + $0x238] sm:$0x1]  ;;  %v2836_v43 = vld [vmem:[#allocation2 + $0x230] sm:$0x1] }
 0x23f   : > { %v1756_v46 = vpop.f32.mrb[120].mxu0  ;;  %16280 = vst [vmem:[#allocation38_spill] sm:$0xff] %v14434_v24  ;;  %v3072_v19 = vrot.slane %v2837_v2, 1 }
 0x240   : > { %v1758_v9 = vpop.f32.mrb[121].mxu0  ;;  %3371 = vmatmul.mubr.f32.gmra.mrb[226].mxu0 %v3051_v3  ;;  %v14421_v37 = vadd.f32 %v1756_v46, %v13977_v36  ;;  %v3067_v36 = vrot.slane %v2833_v45, 1  ;;  %v2832_v3 = vld [vmem:[#allocation2 + $0x210] sm:$0xfe]  ;;  %12080 = vmatpush1.bf16.msra.mxu1 %v14431_v58  ;;  %v12472_v45 = vld [vmem:[#allocation2 + $0x220] sm:$0xff] }
 0x241   : > { %3375 = vmatprep.mubr.f32.mxu0 %v3059_v60  ;;  %v3063_v9 = vsel %vm1067_vm0, %v3058_v27, %v3062_v5  ;;  %12065 = vmatprep.subr.bf16.mxu1 %v16256_v41  ;;  %v10129_v27 = vld [vmem:[%s16227_s2 + $0x7a0] sm:$0xff]  ;;  %v10130_v60 = vld [vmem:[%s16227_s2 + $0x7a8] sm:$0xff]  ;;  %v3061_v5 = vsel %vm1067_vm0, %v3055_v61, %v3060_v0  ;;  %v3064_v31 = vrot.slane %v2832_v3, 1  ;;  %v10131_v0 = vld [vmem:[%s16227_s2 + $0x7b0] sm:$0xff]  ;;  %v3070_v3 = vrot.slane %v2836_v43, 1 }
 0x242   : > { %16279 = vst [vmem:[#allocation37_spill] sm:$0xff] %v14421_v37  ;;  %v2723_v37 = vpop.f32.mrb[57].mxu1 }
 0x243   : > { %v1761_v46 = vpop.f32.mrb[122].mxu0  ;;  %v14448_v37 = vpack.c.bf16 %v10130_v60, %v10129_v27  ;;  %v2838_v60 = vld [vmem:[#allocation2 + $0x240] sm:$0xfe] }
 0x244   : > { %v1763_v30 = vpop.f32.mrb[123].mxu0  ;;  %3376 = vmatmul.mubr.f32.gmra.mrb[228].mxu0 %v3056_v6  ;;  %v14438_v4 = vadd.f32 %v1761_v46, %v13983_v53  ;;  %v3069_v53 = vsel %vm1067_vm0, %v3067_v36, %v3068_v23  ;;  %v14451_v6 = vpop.f32.mrb[58].mxu1  ;;  %v2839_v46 = vld [vmem:[#allocation2 + $0x248] sm:$0xfe]  ;;  %v3074_v43 = vrot.slane %v2838_v60, 1 }
 0x245   : > { %3380 = vmatprep.mubr.f32.mxu0 %v3063_v9  ;;  %v3065_v30 = vrot.slane %v12472_v45, 1  ;;  %16282 = vst [vmem:[#allocation40_spill] sm:$0xff] %v14451_v6  ;;  %12081 = vmatpush1.bf16.msra.mxu1 %v14448_v37  ;;  %v10132_v9 = vld [vmem:[%s16227_s2 + $0x7b8] sm:$0xff] }
 0x246   : > { %16281 = vst [vmem:[#allocation39_spill] sm:$0xff] %v14438_v4  ;;  %v2728_v4 = vpop.f32.mrb[59].mxu1  ;;  %12066 = vmatprep.subr.bf16.mxu1 %v16256_v41  ;;  %v14465_v2 = vpack.c.bf16 %v10132_v9, %v10131_v0 }
 0x247   : > { %v1766_v54 = vpop.f32.mrb[124].mxu0  ;;  %v3066_v36 = vsel %vm1067_vm0, %v3064_v31, %v3065_v30  ;;  %v12473_v4 = vld [vmem:[#allocation2 + $0x258] sm:$0xff] }
 0x248   : > { %v1768_v24 = vpop.f32.mrb[125].mxu0  ;;  %3381 = vmatmul.mubr.f32.gmra.mrb[230].mxu0 %v3061_v5  ;;  %v14455_v61 = vadd.f32 %v1766_v54, %v13989_v21  ;;  %v3077_v21 = vrot.slane %v2839_v46, 1  ;;  %v3078_v27 = vrot.slane %v12473_v4, 1  ;;  %v14468_v5 = vpop.f32.mrb[60].mxu1  ;;  %v2843_v54 = vld [vmem:[#allocation2 + $0x268] sm:$0x1] }
 0x249   : > { %3385 = vmatprep.mubr.f32.mxu0 %v3069_v53  ;;  %v3073_v24 = vsel %vm1067_vm0, %v3068_v23, %v3072_v19  ;;  %16284 = vst [vmem:[#allocation42_spill] sm:$0xff] %v14468_v5  ;;  %12082 = vmatpush1.bf16.msra.mxu1 %v14465_v2  ;;  %v10133_v23 = vld [vmem:[%s16227_s2 + $0x7c0] sm:$0xff]  ;;  %v10134_v53 = vld [vmem:[%s16227_s2 + $0x7c8] sm:$0xff]  ;;  %v3071_v19 = vsel %vm1067_vm0, %v3065_v30, %v3070_v3  ;;  %v12474_v46 = vld [vmem:[#allocation2 + $0x250] sm:$0xff]  ;;  %v3082_v9 = vrot.slane %v2843_v54, 1 }
 0x24a   : > { %16283 = vst [vmem:[#allocation41_spill] sm:$0xff] %v14455_v61  ;;  %v2733_v61 = vpop.f32.mrb[61].mxu1  ;;  %12067 = vmatprep.subr.bf16.mxu1 %v16256_v41  ;;  %v14482_v0 = vpack.c.bf16 %v10134_v53, %v10133_v23  ;;  %v12475_v23 = vld [vmem:[#allocation2 + $0x288] sm:$0xff] }
 0x24b   : > { %v1771_v45 = vpop.f32.mrb[126].mxu0  ;;  %v2842_v61 = vld [vmem:[#allocation2 + $0x260] sm:$0x1]  ;;  %v14485_v4 = vpop.f32.mrb[62].mxu1  ;;  %v3088_v53 = vrot.slane %v12475_v23, 1 }
 0x24c   : > { %v1773_v6 = vpop.f32.mrb[127].mxu0  ;;  %3386 = vmatmul.mubr.f32.gmra.mrb[232].mxu0 %v3066_v36  ;;  %v14472_v31 = vadd.f32 %v1771_v45, %v13995_v56  ;;  %v3079_v56 = vsel %vm1067_vm0, %v3077_v21, %v3078_v27  ;;  %v2845_v36 = vld [vmem:[#allocation2 + $0x278] sm:$0xfe]  ;;  %16286 = vst [vmem:[#allocation44_spill] sm:$0xff] %v14485_v4  ;;  %v3080_v3 = vrot.slane %v2842_v61, 1 }
 0x24d   : > { %3390 = vmatprep.mubr.f32.mxu0 %v3073_v24  ;;  %v3075_v6 = vrot.slane %v12474_v46, 1  ;;  %12083 = vmatpush1.bf16.msra.mxu1 %v14482_v0  ;;  %v10135_v24 = vld [vmem:[%s16227_s2 + $0x7d0] sm:$0xff]  ;;  %v10136_v21 = vld [vmem:[%s16227_s2 + $0x7d8] sm:$0xff]  ;;  %v3087_v54 = vrot.slane %v2845_v36, 1 }
 0x24e   : > { %16285 = vst [vmem:[#allocation43_spill] sm:$0xff] %v14472_v31  ;;  %v2738_v31 = vpop.f32.mrb[63].mxu1  ;;  %12068 = vmatprep.subr.bf16.mxu1 %v16256_v41  ;;  %v2849_v46 = vld [vmem:[#allocation2 + $0x298] sm:$0x1] }
 0x24f   : > { %v2227_v45 = vpop.f32.mrb[128].mxu0  ;;  %v3076_v60 = vsel %vm1067_vm0, %v3074_v43, %v3075_v6  ;;  %v14497_v31 = vpack.c.bf16 %v10136_v21, %v10135_v24  ;;  %v14503_v61 = vpop.f32.mrb[64].mxu1  ;;  %v3081_v36 = vsel %vm1067_vm0, %v3075_v6, %v3080_v3  ;;  %v2848_v21 = vld [vmem:[#allocation2 + $0x290] sm:$0x1]  ;;  %v3089_v6 = vsel %vm1067_vm0, %v3087_v54, %v3088_v53  ;;  %v2851_v3 = vld [vmem:[#allocation2 + $0x2a8] sm:$0xfe] }
 0x250   : > { %v2229_v5 = vpop.f32.mrb[129].mxu0  ;;  %3391 = vmatmul.mubr.f32.gmra.mrb[234].mxu0 %v3071_v19  ;;  %v2386_v30 = vadd.f32 %v2227_v45, %v14002_v1  ;;  %v3083_v1 = vsel %vm1067_vm0, %v3078_v27, %v3082_v9  ;;  %v2844_v19 = vld [vmem:[#allocation2 + $0x270] sm:$0xfe]  ;;  %16288 = vst [vmem:[#allocation46_spill] sm:$0xff] %v14503_v61  ;;  %v10138_v27 = vld [vmem:[%s16227_s2 + $0x7e8] sm:$0xff]  ;;  %v10140_v54 = vld [vmem:[%s16227_s2 + $0x7f8] sm:$0xff] }
 0x251   : > { %3395 = vmatprep.mubr.f32.mxu0 %v3079_v56  ;;  %12084 = vmatpush1.bf16.msra.mxu1 %v14497_v31  ;;  %v3931_v56 = vpop.f32.mrb[65].mxu1  ;;  %v3084_v9 = vrot.slane %v2844_v19, 1 }
 0x252   : > { %v14500_v5 = vadd.f32 %v14008_v7, %v2386_v30  ;;  %12069 = vmatprep.subr.bf16.mxu1 %v16256_v41  ;;  %v10137_v7 = vld [vmem:[%s16227_s2 + $0x7e0] sm:$0xff]  ;;  %v14521_v23 = vpop.f32.mrb[66].mxu1 }
 0x253   : > { %v2232_v45 = vpop.f32.mrb[130].mxu0  ;;  %v12476_v30 = vld [vmem:[#allocation2 + $0x280] sm:$0xff]  ;;  %16290 = vst [vmem:[#allocation48_spill] sm:$0xff] %v14521_v23  ;;  %v3936_v56 = vpop.f32.mrb[67].mxu1 }
 0x254   : > { %16287 = vst [vmem:[#allocation45_spill] sm:$0xff] %v14500_v5  ;;  %v2234_v4 = vpop.f32.mrb[131].mxu0  ;;  %3396 = vmatmul.mubr.f32.gmra.mrb[236].mxu0 %v3076_v60  ;;  %v2387_v43 = vadd.f32 %v2232_v45, %v14011_v57  ;;  %v3085_v24 = vrot.slane %v12476_v30, 1  ;;  %v14515_v60 = vpack.c.bf16 %v10138_v27, %v10137_v7  ;;  %v2850_v30 = vld [vmem:[#allocation2 + $0x2a0] sm:$0xfe] }
 0x255   : > { %3400 = vmatprep.mubr.f32.mxu0 %v3083_v1  ;;  %v3092_v4 = vrot.slane %v2849_v46, 1  ;;  %v3090_v46 = vrot.slane %v2848_v21, 1  ;;  %v2855_v27 = vld [vmem:[#allocation2 + $0x2c8] sm:$0x1]  ;;  %v4548_v21 = vld [vmem:[#allocation2 + $0x2a8] sm:$0xfe] }
 0x256   : > { %v14518_v57 = vadd.f32 %v14017_v49, %v2387_v43  ;;  %12085 = vmatpush1.bf16.msra.mxu1 %v14515_v60  ;;  %v10139_v49 = vld [vmem:[%s16227_s2 + $0x7f0] sm:$0xff]  ;;  %v3086_v43 = vsel %vm1067_vm0, %v3084_v9, %v3085_v24  ;;  %v4790_v61 = vrot.slane %v4548_v21, 1  ;;  %v4547_v9 = vld [vmem:[#allocation2 + $0x2a0] sm:$0xfe] }
 0x257   : > { %v2237_v45 = vpop.f32.mrb[132].mxu0  ;;  %12070 = vmatprep.subr.bf16.mxu1 %v16256_v41  ;;  %v3093_v7 = vsel %vm1067_vm0, %v3088_v53, %v3092_v4  ;;  %v14545_v4 = vld [vmem:[#allocation2 + $0x2b0] sm:$0xff]  ;;  %v3091_v21 = vsel %vm1067_vm0, %v3085_v24, %v3090_v46 }
 0x258   : > { %16289 = vst [vmem:[#allocation47_spill] sm:$0xff] %v14518_v57  ;;  %v2239_v1 = vpop.f32.mrb[133].mxu0  ;;  %3401 = vmatmul.mubr.f32.gmra.mrb[238].mxu0 %v3081_v36  ;;  %v2388_v19 = vadd.f32 %v2237_v45, %v14020_v29  ;;  %v3097_v36 = vrot.slane %v2851_v3, 1  ;;  %v14534_v29 = vpack.c.bf16 %v10140_v54, %v10139_v49  ;;  %v14536_v45 = vld [vmem:[#allocation2 + $0x2b8] sm:$0xff]  ;;  %v14541_v57 = vpop.f32.mrb[68].mxu1  ;;  %16294 = vst [vmem:[#allocation52_spill] sm:$0xff] %v14545_v4 }
 0x259   : > { %3405 = vmatprep.mubr.f32.mxu0 %v3089_v6  ;;  %16291 = vst [vmem:[#allocation49_spill] sm:$0xff] %v14536_v45  ;;  %v12477_v1 = vld [vmem:[#allocation2 + $0x2b8] sm:$0xff]  ;;  %16293 = vst [vmem:[#allocation51_spill] sm:$0xff] %v14541_v57  ;;  %v4791_v6 = vrot.slane %v14536_v45, 1  ;;  %v3941_v53 = vpop.f32.mrb[69].mxu1  ;;  %v4787_v3 = vrot.slane %v4547_v9, 1 }
 0x25a   : > { %v14539_v56 = vadd.f32 %v14026_v55, %v2388_v19  ;;  %v3098_v23 = vrot.slane %v12477_v1, 1  ;;  %12086 = vmatpush1.bf16.msra.mxu1 %v14534_v29  ;;  %v3094_v19 = vrot.slane %v2850_v30, 1  ;;  %v4788_v1 = vrot.slane %v14545_v4, 1  ;;  %v12478_v45 = vld [vmem:[#allocation2 + $0x2b0] sm:$0xff]  ;;  %v4552_v53 = vld [vmem:[#allocation2 + $0x2c8] sm:$0x1] }
 0x25b   : > { %v2242_v5 = vpop.f32.mrb[134].mxu0  ;;  %v4792_v54 = vsel %vm1067_vm0, %v4790_v61, %v4791_v6  ;;  %v3095_v57 = vrot.slane %v12478_v45, 1  ;;  %v4795_v30 = vrot.slane %v4552_v53, 1  ;;  %v2861_v53 = vld [vmem:[#allocation2 + $0x2f8] sm:$0x1] }
 0x25c   : > { %16292 = vst [vmem:[#allocation50_spill] sm:$0xff] %v14539_v56  ;;  %v2244_v49 = vpop.f32.mrb[135].mxu0  ;;  %3406 = vmatmul.mubr.f32.gmra.mrb[240].mxu0 %v3086_v43  ;;  %v2389_v55 = vadd.f32 %v2242_v5, %v14029_v39  ;;  %v3102_v56 = vrot.slane %v2855_v27, 1  ;;  %5108 = vmatprep.mubr.f32.mxu1 %v4792_v54  ;;  %v3099_v43 = vsel %vm1067_vm0, %v3097_v36, %v3098_v23  ;;  %v2857_v39 = vld [vmem:[#allocation2 + $0x2d8] sm:$0xfe]  ;;  %v14555_v5 = vpop.f32.mrb[70].mxu1 }
 0x25d   : > { %3410 = vmatprep.mubr.f32.mxu0 %v3093_v7  ;;  %v4789_v61 = vsel %vm1067_vm0, %v4787_v3, %v4788_v1  ;;  %v4551_v7 = vld [vmem:[#allocation2 + $0x2c0] sm:$0x1]  ;;  %v3946_v24 = vpop.f32.mrb[71].mxu1  ;;  %v3100_v54 = vrot.slane %v2854_v26, 1  ;;  %v3096_v36 = vsel %vm1067_vm0, %v3094_v19, %v3095_v57  ;;  %v3107_v3 = vrot.slane %v2857_v39, 1 }
 0x25e   : > { %v14552_v9 = vadd.f32 %v14035_v62, %v2389_v55  ;;  %5109 = vmatmul.mubr.f32.vlgmr.msra.gmra.mrb[128].mxu1 %v4789_v61  ;;  %v4793_v46 = vrot.slane %v4551_v7, 1  ;;  %v2856_v62 = vld [vmem:[#allocation2 + $0x2d0] sm:$0xfe]  ;;  %v4796_v55 = vsel %vm1067_vm0, %v4791_v6, %v4795_v30  ;;  %v3103_v4 = vsel %vm1067_vm0, %v3098_v23, %v3102_v56  ;;  %v4554_v24 = vld [vmem:[#allocation2 + $0x2d8] sm:$0xfe]  ;;  %v14563_v7 = vld [vmem:[#allocation2 + $0x2e8] sm:$0xff] }
 0x25f   : > { %v2247_v49 = vpop.f32.mrb[136].mxu0  ;;  %5113 = vmatprep.mubr.f32.mxu1 %v4796_v55  ;;  %16295 = vst [vmem:[#allocation53_spill] sm:$0xff] %v14563_v7  ;;  %v4800_v6 = vrot.slane %v4554_v24, 1  ;;  %v4801_v19 = vrot.slane %v14563_v7, 1  ;;  %v14571_v39 = vld [vmem:[#allocation2 + $0x2e0] sm:$0xff]  ;;  %v3101_v55 = vsel %vm1067_vm0, %v3095_v57, %v3100_v54  ;;  %v3112_v7 = vrot.slane %v2861_v53, 1 }
 0x260   : > { %v2249_v27 = vpop.f32.mrb[137].mxu0  ;;  %3411 = vmatmul.mubr.f32.gmra.mrb[242].mxu0 %v3091_v21  ;;  %v2390_v45 = vadd.f32 %v2247_v49, %v14038_v51  ;;  %v4794_v61 = vsel %vm1067_vm0, %v4788_v1, %v4793_v46  ;;  %v12479_v51 = vld [vmem:[#allocation2 + $0x2e8] sm:$0xff]  ;;  %v14568_v49 = vpop.f32.mrb[72].mxu1  ;;  %16296 = vst [vmem:[#allocation54_spill] sm:$0xff] %v14571_v39  ;;  %v12480_v24 = vld [vmem:[#allocation2 + $0x2e0] sm:$0xff] }
 0x261   : > { %3415 = vmatprep.mubr.f32.mxu0 %v3099_v43  ;;  %v3108_v26 = vrot.slane %v12479_v51, 1  ;;  %v4553_v43 = vld [vmem:[#allocation2 + $0x2d0] sm:$0xfe]  ;;  %v3951_v56 = vpop.f32.mrb[73].mxu1  ;;  %v4802_v27 = vsel %vm1067_vm0, %v4800_v6, %v4801_v19  ;;  %v3105_v51 = vrot.slane %v12480_v24, 1 }
 0x262   : > { %v14566_v21 = vadd.f32 %v14044_v17, %v2390_v45  ;;  %5114 = vmatmul.mubr.f32.gmra.mrb[130].mxu1 %v4794_v61  ;;  %v4797_v1 = vrot.slane %v4553_v43, 1  ;;  %v3104_v17 = vrot.slane %v2856_v62, 1  ;;  %v4798_v45 = vrot.slane %v14571_v39, 1  ;;  %v2860_v61 = vld [vmem:[#allocation2 + $0x2f0] sm:$0x1]  ;;  %v14581_v62 = vpop.f32.mrb[74].mxu1 }
 0x263   : > { %v2252_v23 = vpop.f32.mrb[138].mxu0  ;;  %5118 = vmatprep.mubr.f32.mxu1 %v4802_v27  ;;  %v4558_v56 = vld [vmem:[#allocation2 + $0x2f8] sm:$0x1]  ;;  %16297 = vst [vmem:[#allocation55_spill] sm:$0xff] %v14581_v62  ;;  %v3956_v57 = vpop.f32.mrb[75].mxu1  ;;  %v3110_v24 = vrot.slane %v2860_v61, 1 }
 0x264   : > { %v2254_v30 = vpop.f32.mrb[139].mxu0  ;;  %3416 = vmatmul.mubr.f32.gmra.mrb[244].mxu0 %v3096_v36  ;;  %v2391_v46 = vadd.f32 %v2252_v23, %v14047_v40  ;;  %v3109_v36 = vsel %vm1067_vm0, %v3107_v3, %v3108_v26  ;;  %v2863_v40 = vld [vmem:[#allocation2 + $0x308] sm:$0xfe]  ;;  %v4799_v6 = vsel %vm1067_vm0, %v4797_v1, %v4798_v45  ;;  %v4805_v23 = vrot.slane %v4558_v56, 1  ;;  %v12481_v39 = vld [vmem:[#allocation2 + $0x318] sm:$0xff]  ;;  %v16298_v57 = vld [vmem:[#allocation9_spill] sm:$0xff] }
 0x265   : > { %3420 = vmatprep.mubr.f32.mxu0 %v3103_v4  ;;  %v4557_v4 = vld [vmem:[#allocation2 + $0x2f0] sm:$0x1]  ;;  %v3106_v3 = vsel %vm1067_vm0, %v3104_v17, %v3105_v51  ;;  %v3118_v62 = vrot.slane %v12481_v39, 1  ;;  %v2862_v1 = vld [vmem:[#allocation2 + $0x300] sm:$0xfe] }
 0x266   : > { %v14578_v43 = vadd.f32 %v14053_v44, %v2391_v46  ;;  %5119 = vmatmul.mubr.f32.gmra.mrb[132].mxu1 %v4799_v6  ;;  %v4803_v54 = vrot.slane %v4557_v4, 1  ;;  %v4806_v44 = vsel %vm1067_vm0, %v4801_v19, %v4805_v23  ;;  %v3117_v46 = vrot.slane %v2863_v40, 1  ;;  %v4560_v6 = vld [vmem:[#allocation2 + $0x308] sm:$0xfe]  ;;  %v14592_v61 = vpop.f32.mrb[76].mxu1  ;;  %v14594_v17 = vld [vmem:[#allocation2 + $0x310] sm:$0xff] }
 0x267   : > { %v2257_v30 = vpop.f32.mrb[140].mxu0  ;;  %5123 = vmatprep.mubr.f32.mxu1 %v4806_v44  ;;  %v4810_v19 = vrot.slane %v4560_v6, 1  ;;  %16299 = vst [vmem:[#allocation9_spill] sm:$0xff] %v14594_v17  ;;  %v3115_v39 = vrot.slane %v14594_v17, 1  ;;  %v3961_v40 = vpop.f32.mrb[77].mxu1 }
 0x268   : > { %v2259_v53 = vpop.f32.mrb[141].mxu0  ;;  %3421 = vmatmul.mubr.f32.gmra.mrb[246].mxu0 %v3101_v55  ;;  %v2392_v27 = vadd.f32 %v2257_v30, %v14056_v10  ;;  %v4804_v56 = vsel %vm1067_vm0, %v4798_v45, %v4803_v54  ;;  %v3113_v55 = vsel %vm1067_vm0, %v3108_v26, %v3112_v7  ;;  %v2867_v10 = vld [vmem:[#allocation2 + $0x328] sm:$0x1]  ;;  %v3111_v7 = vsel %vm1067_vm0, %v3105_v51, %v3110_v24 }
 0x269   : > { %3425 = vmatprep.mubr.f32.mxu0 %v3109_v36  ;;  %v4559_v36 = vld [vmem:[#allocation2 + $0x300] sm:$0xfe]  ;;  %v4812_v53 = vsel %vm1067_vm0, %v4810_v19, %v3118_v62  ;;  %v3114_v26 = vrot.slane %v2862_v1, 1  ;;  %v4564_v6 = vld [vmem:[#allocation2 + $0x328] sm:$0x1] }
 0x26a   : > { %v14589_v4 = vadd.f32 %v16298_v57, %v2392_v27  ;;  %5124 = vmatmul.mubr.f32.gmra.mrb[134].mxu1 %v4804_v56  ;;  %v4807_v30 = vrot.slane %v4559_v36, 1  ;;  %v3122_v27 = vrot.slane %v2867_v10, 1  ;;  %v16300_v57 = vld [vmem:[#allocation10_spill] sm:$0xff]  ;;  %v3119_v56 = vsel %vm1067_vm0, %v3117_v46, %v3118_v62  ;;  %v2866_v36 = vld [vmem:[#allocation2 + $0x320] sm:$0x1] }
 0x26b   : > { %v2262_v23 = vpop.f32.mrb[142].mxu0  ;;  %5128 = vmatprep.mubr.f32.mxu1 %v4812_v53  ;;  %v3116_v40 = vsel %vm1067_vm0, %v3114_v26, %v3115_v39 }
 0x26c   : > { %v2264_v45 = vpop.f32.mrb[143].mxu0  ;;  %3426 = vmatmul.mubr.f32.gmra.mrb[248].mxu0 %v3106_v3  ;;  %v2393_v54 = vadd.f32 %v2262_v23, %v14065_v15  ;;  %v4809_v44 = vsel %vm1067_vm0, %v4807_v30, %v3115_v39  ;;  %v14605_v3 = vpop.f32.mrb[78].mxu1  ;;  %v4815_v15 = vrot.slane %v4564_v6, 1  ;;  %v4563_v23 = vld [vmem:[#allocation2 + $0x320] sm:$0x1]  ;;  %v3120_v30 = vrot.slane %v2866_v36, 1 }
 0x26d   : > { %3430 = vmatprep.mubr.f32.mxu0 %v3113_v55  ;;  %v3966_v55 = vpop.f32.mrb[79].mxu1  ;;  %v4813_v51 = vrot.slane %v4563_v23, 1  ;;  %v4566_v45 = vld [vmem:[#allocation2 + $0x338] sm:$0xfe] }
 0x26e   : > { %v14602_v17 = vadd.f32 %v16300_v57, %v2393_v54  ;;  %5129 = vmatmul.mubr.f32.gmra.mrb[136].mxu1 %v4809_v44  ;;  %v4816_v10 = vsel %vm1067_vm0, %v3118_v62, %v4815_v15  ;;  %v16301_v54 = vld [vmem:[#allocation11_spill] sm:$0xff]  ;;  %v3123_v44 = vsel %vm1067_vm0, %v3118_v62, %v3122_v27  ;;  %v14615_v6 = vpop.f32.mrb[80].mxu1  ;;  %v14617_v57 = vld [vmem:[#allocation2 + $0x8] sm:$0xff]  ;;  %v3121_v62 = vsel %vm1067_vm0, %v3115_v39, %v3120_v30 }
 0x26f   : > { %v2267_v19 = vpop.f32.mrb[144].mxu0  ;;  %5133 = vmatprep.mubr.f32.mxu1 %v4816_v10  ;;  %v4814_v46 = vsel %vm1067_vm0, %v3115_v39, %v4813_v51  ;;  %v3971_v26 = vpop.f32.mrb[81].mxu1 }
 0x270   : > { %v2269_v24 = vpop.f32.mrb[145].mxu0  ;;  %3431 = vmatmul.mubr.f32.gmra.mrb[250].mxu0 %v3111_v7  ;;  %v2394_v1 = vadd.f32 %v2267_v19, %v14074_v35  ;;  %v4820_v7 = vrot.slane %v4566_v45, 1  ;;  %v4821_v35 = vrot.slane %v14617_v57, 1  ;;  %v16302_v19 = vld [vmem:[#allocation12_spill] sm:$0xff]  ;;  %v4122_v45 = vld [vmem:[#allocation2 + $0x68] sm:$0xff] }
 0x271   : > { %3435 = vmatprep.mubr.f32.mxu0 %v3119_v56  ;;  %v4565_v56 = vld [vmem:[#allocation2 + $0x330] sm:$0xfe]  ;;  %v4570_v24 = vld [vmem:[#allocation2 + $0x358] sm:$0x1] }
 0x272   : > { %v14612_v53 = vadd.f32 %v16301_v54, %v2394_v1  ;;  %5134 = vmatmul.mubr.f32.gmra.mrb[138].mxu1 %v4814_v46  ;;  %v4817_v36 = vrot.slane %v4565_v56, 1  ;;  %v4822_v51 = vsel %vm1067_vm0, %v4820_v7, %v4821_v35  ;;  %v16303_v1 = vld [vmem:[#allocation13_spill] sm:$0xff]  ;;  %v14627_v46 = vpop.f32.mrb[82].mxu1  ;;  %v4825_v54 = vrot.slane %v4570_v24, 1  ;;  %v4569_v56 = vld [vmem:[#allocation2 + $0x350] sm:$0x1] }
 0x273   : > { %v2272_v15 = vpop.f32.mrb[146].mxu0  ;;  %5138 = vmatprep.mubr.f32.mxu1 %v4822_v51  ;;  %v4823_v26 = vrot.slane %v4569_v56, 1 }
 0x274   : > { %v2274_v23 = vpop.f32.mrb[147].mxu0  ;;  %3436 = vmatmul.mubr.f32.gmra.mrb[252].mxu0 %v3116_v40  ;;  %v2395_v55 = vadd.f32 %v2272_v15, %v16302_v19  ;;  %v4819_v27 = vsel %vm1067_vm0, %v4817_v36, %v4821_v35  ;;  %v3976_v15 = vpop.f32.mrb[83].mxu1  ;;  %v4826_v30 = vsel %vm1067_vm0, %v4821_v35, %v4825_v54  ;;  %v14635_v19 = vld [vmem:[#allocation2 + $0x78] sm:$0xff] }
 0x275   : > { %3440 = vmatprep.mubr.f32.mxu0 %v3123_v44  ;;  %v4121_v44 = vld [vmem:[#allocation2 + $0x60] sm:$0xff]  ;;  %v4824_v36 = vsel %vm1067_vm0, %v4821_v35, %v4823_v26  ;;  %v16305_v35 = vld [vmem:[#allocation15_spill] sm:$0xff] }
 0x276   : > { %v14625_v10 = vadd.f32 %v16303_v1, %v2395_v55  ;;  %5139 = vmatmul.mubr.f32.gmra.mrb[140].mxu1 %v4819_v27  ;;  %v14637_v55 = vpop.f32.mrb[84].mxu1  ;;  %v14642_v1 = vld [vmem:[#allocation2 + $0x70] sm:$0xff] }
 0x277   : > { %v2277_v40 = vpop.f32.mrb[148].mxu0  ;;  %5143 = vmatprep.mubr.f32.mxu1 %v4826_v30  ;;  %v3981_v27 = vpop.f32.mrb[85].mxu1  ;;  %v4128_v30 = vld [vmem:[#allocation2 + $0xa8] sm:$0xff] }
 0x278   : > { %v2279_v7 = vpop.f32.mrb[149].mxu0  ;;  %3441 = vmatmul.mubr.f32.gmra.mrb[254].mxu0 %v3121_v62  ;;  %v2396_v39 = vadd.f32 %v2277_v40, %v14098_v59  ;;  %v16304_v59 = vld [vmem:[#allocation14_spill] sm:$0xff] }
 0x279   : > { %4282 = vmatprep.mubr.f32.mxu0 %v4122_v45  ;;  %v4126_v45 = vld [vmem:[#allocation2 + $0x98] sm:$0xff] }
 0x27a   : > { %v14633_v23 = vadd.f32 %v14110_v28, %v2396_v39  ;;  %5144 = vmatmul.mubr.f32.gmra.mrb[142].mxu1 %v4824_v36  ;;  %v14648_v54 = vpop.f32.mrb[86].mxu1  ;;  %v16306_v7 = vld [vmem:[#allocation16_spill] sm:$0xff] }
 0x27b   : > { %v2282_v51 = vpop.f32.mrb[150].mxu0  ;;  %v3986_v40 = vpop.f32.mrb[87].mxu1 }
 0x27c   : > { %v2284_v62 = vpop.f32.mrb[151].mxu0  ;;  %4283 = vmatmul.mubr.f32.vlgmr.msra.gmra.mrb[0].mxu0 %v4121_v44  ;;  %v2397_v24 = vadd.f32 %v2282_v51, %v16304_v59 }
 0x27d   : > { %11673 = vmatpush1.bf16.msra.mxu0 %v14132_v25  ;;  %4287 = vmatprep.mubr.f32.mxu0 %v14635_v19  ;;  %v4125_v25 = vld [vmem:[#allocation2 + $0x90] sm:$0xff]  ;;  %v16307_v62 = vld [vmem:[#allocation17_spill] sm:$0xff] }
 0x27e   : > { %v14645_v28 = vadd.f32 %v16305_v35, %v2397_v24  ;;  %11674 = vmatprep.subr.bf16.mxu0 %v16256_v41  ;;  %v14657_v44 = vpop.f32.mrb[88].mxu1  ;;  %v16308_v24 = vld [vmem:[#allocation18_spill] sm:$0xff] }
 0x27f   : > { %v2287_v56 = vpop.f32.mrb[152].mxu0  ;;  %v3991_v51 = vpop.f32.mrb[89].mxu1  ;;  %v4130_v35 = vld [vmem:[#allocation2 + $0xc8] sm:$0xff] }
 0x280   : > { %v2289_v15 = vpop.f32.mrb[153].mxu0  ;;  %4288 = vmatmul.mubr.f32.gmra.mrb[2].mxu0 %v14642_v1  ;;  %v2398_v26 = vadd.f32 %v2287_v56, %v14135_v13  ;;  %v4127_v13 = vld [vmem:[#allocation2 + $0xa0] sm:$0xff] }
 0x281   : > { %4292 = vmatprep.mubr.f32.mxu0 %v4126_v45  ;;  %11676 = vmatpush1.bf16.msra.mxu0 %v14170_v42 }
 0x282   : > { %v14654_v39 = vadd.f32 %v16306_v7, %v2398_v26  ;;  %11677 = vmatprep.subr.bf16.mxu0 %v16256_v41  ;;  %v14665_v45 = vpop.f32.mrb[90].mxu1  ;;  %v16309_v7 = vld [vmem:[#allocation19_spill] sm:$0xff] }
 0x283   : > { %v2292_v36 = vpop.f32.mrb[154].mxu0  ;;  %v3996_v40 = vpop.f32.mrb[91].mxu1 }
 0x284   : > { %v2294_v27 = vpop.f32.mrb[155].mxu0  ;;  %4293 = vmatmul.mubr.f32.gmra.mrb[4].mxu0 %v4125_v25  ;;  %v2399_v59 = vadd.f32 %v2292_v36, %v16307_v62  ;;  %v4129_v25 = vld [vmem:[#allocation2 + $0xc0] sm:$0xff] }
 0x285   : > { %4297 = vmatprep.mubr.f32.mxu0 %v4128_v30  ;;  %11679 = vmatpush1.bf16.msra.mxu0 %v14208_v32  ;;  %v4132_v30 = vld [vmem:[#allocation2 + $0xd8] sm:$0xff] }
 0x286   : > { %v14662_v42 = vadd.f32 %v16308_v24, %v2399_v59  ;;  %11680 = vmatprep.subr.bf16.mxu0 %v16256_v41  ;;  %v14673_v36 = vpop.f32.mrb[92].mxu1  ;;  %v16310_v59 = vld [vmem:[#allocation20_spill] sm:$0xff]  ;;  %v16311_v24 = vld [vmem:[#allocation21_spill] sm:$0xff] }
 0x287   : > { %v2297_v56 = vpop.f32.mrb[156].mxu0  ;;  %v4001_v27 = vpop.f32.mrb[93].mxu1 }
 0x288   : > { %v2299_v15 = vpop.f32.mrb[157].mxu0  ;;  %4298 = vmatmul.mubr.f32.gmra.mrb[6].mxu0 %v4127_v13  ;;  %v2400_v26 = vadd.f32 %v2297_v56, %v14173_v34  ;;  %v4131_v34 = vld [vmem:[#allocation2 + $0xd0] sm:$0xff] }
 0x289   : > { %4302 = vmatprep.mubr.f32.mxu0 %v4130_v35  ;;  %11682 = vmatpush1.bf16.msra.mxu0 %v14246_v12  ;;  %v4134_v35 = vld [vmem:[#allocation2 + $0xf8] sm:$0xff] }
 0x28a   : > { %v14670_v32 = vadd.f32 %v16309_v7, %v2400_v26  ;;  %11683 = vmatprep.subr.bf16.mxu0 %v16256_v41  ;;  %v14681_v56 = vpop.f32.mrb[94].mxu1  ;;  %v4133_v7 = vld [vmem:[#allocation2 + $0xf0] sm:$0xff] }
 0x28b   : > { %v2302_v51 = vpop.f32.mrb[158].mxu0  ;;  %v4006_v15 = vpop.f32.mrb[95].mxu1 }
 0x28c   : > { %v2304_v62 = vpop.f32.mrb[159].mxu0  ;;  %4303 = vmatmul.mubr.f32.gmra.mrb[8].mxu0 %v4129_v25  ;;  %v2401_v13 = vadd.f32 %v2302_v51, %v16310_v59  ;;  %v4136_v51 = vld [vmem:[#allocation2 + $0x108] sm:$0xff] }
 0x28d   : > { %4307 = vmatprep.mubr.f32.mxu0 %v4132_v30  ;;  %11685 = vmatpush1.bf16.msra.mxu0 %v14284_v11  ;;  %v16312_v30 = vld [vmem:[#allocation22_spill] sm:$0xff] }
 0x28e   : > { %v14678_v12 = vadd.f32 %v16311_v24, %v2401_v13  ;;  %11686 = vmatprep.subr.bf16.mxu0 %v16256_v41  ;;  %v14689_v27 = vpop.f32.mrb[96].mxu1  ;;  %v16313_v24 = vld [vmem:[#allocation23_spill] sm:$0xff] }
 0x28f   : > { %v2307_v40 = vpop.f32.mrb[160].mxu0  ;;  %v4011_v59 = vpop.f32.mrb[97].mxu1 }
 0x290   : > { %v2309_v26 = vpop.f32.mrb[161].mxu0  ;;  %4308 = vmatmul.mubr.f32.gmra.mrb[10].mxu0 %v4131_v34  ;;  %v2402_v25 = vadd.f32 %v2307_v40, %v14211_v50  ;;  %v4135_v50 = vld [vmem:[#allocation2 + $0x100] sm:$0xff]  ;;  %v4138_v40 = vld [vmem:[#allocation2 + $0x128] sm:$0xff]  ;;  %v4140_v59 = vld [vmem:[#allocation2 + $0x138] sm:$0xff] }
 0x291   : > { %4312 = vmatprep.mubr.f32.mxu0 %v4134_v35  ;;  %11688 = vmatpush1.bf16.msra.mxu0 %v14322_v20  ;;  %v16314_v35 = vld [vmem:[#allocation24_spill] sm:$0xff] }
 0x292   : > { %v14686_v11 = vadd.f32 %v16312_v30, %v2402_v25  ;;  %11689 = vmatprep.subr.bf16.mxu0 %v16256_v41  ;;  %v14697_v15 = vpop.f32.mrb[98].mxu1 }
 0x293   : > { %v2312_v62 = vpop.f32.mrb[162].mxu0  ;;  %v4016_v25 = vpop.f32.mrb[99].mxu1 }
 0x294   : > { %v2314_v13 = vpop.f32.mrb[163].mxu0  ;;  %4313 = vmatmul.mubr.f32.gmra.mrb[12].mxu0 %v4133_v7  ;;  %v2403_v34 = vadd.f32 %v2312_v62, %v16313_v24  ;;  %v4137_v62 = vld [vmem:[#allocation2 + $0x120] sm:$0xff]  ;;  %v16317_v25 = vld [vmem:[#allocation26_spill] sm:$0xff] }
 0x295   : > { %4317 = vmatprep.mubr.f32.mxu0 %v4136_v51  ;;  %11691 = vmatpush1.bf16.msra.mxu0 %v14360_v48  ;;  %v16315_v51 = vld [vmem:[#allocation25_spill] sm:$0xff] }
 0x296   : > { %v14694_v20 = vadd.f32 %v16314_v35, %v2403_v34  ;;  %11692 = vmatprep.subr.bf16.mxu0 %v16256_v41  ;;  %v14705_v13 = vpop.f32.mrb[100].mxu1 }
 0x297   : > { %v2317_v26 = vpop.f32.mrb[164].mxu0  ;;  %16316 = vst [vmem:[#allocation10_spill] sm:$0xff] %v14705_v13  ;;  %v4021_v34 = vpop.f32.mrb[101].mxu1 }
 0x298   : > { %v2319_v30 = vpop.f32.mrb[165].mxu0  ;;  %4318 = vmatmul.mubr.f32.gmra.mrb[14].mxu0 %v4135_v50  ;;  %v2404_v7 = vadd.f32 %v2317_v26, %v14249_v22  ;;  %v4139_v22 = vld [vmem:[#allocation2 + $0x130] sm:$0xff]  ;;  %v4142_v26 = vld [vmem:[#allocation2 + $0x158] sm:$0xff]  ;;  %v4144_v34 = vld [vmem:[#allocation2 + $0x168] sm:$0xff] }
 0x299   : > { %4322 = vmatprep.mubr.f32.mxu0 %v4138_v40  ;;  %11694 = vmatpush1.bf16.msra.mxu0 %v14392_v16  ;;  %v16318_v40 = vld [vmem:[#allocation27_spill] sm:$0xff] }
 0x29a   : > { %v14702_v48 = vadd.f32 %v16315_v51, %v2404_v7  ;;  %11695 = vmatprep.subr.bf16.mxu0 %v16256_v41  ;;  %v14713_v30 = vpop.f32.mrb[102].mxu1 }
 0x29b   : > { %v2322_v24 = vpop.f32.mrb[166].mxu0  ;;  %v4026_v51 = vpop.f32.mrb[103].mxu1 }
 0x29c   : > { %v2324_v35 = vpop.f32.mrb[167].mxu0  ;;  %4323 = vmatmul.mubr.f32.gmra.mrb[16].mxu0 %v4137_v62  ;;  %v2405_v50 = vadd.f32 %v2322_v24, %v16317_v25  ;;  %v4141_v24 = vld [vmem:[#allocation2 + $0x150] sm:$0xff] }
 0x29d   : > { %4327 = vmatprep.mubr.f32.mxu0 %v4140_v59  ;;  %11697 = vmatpush1.bf16.msra.mxu0 %v14414_v33  ;;  %v16319_v59 = vld [vmem:[#allocation28_spill] sm:$0xff] }
 0x29e   : > { %v14710_v16 = vadd.f32 %v16318_v40, %v2405_v50  ;;  %11698 = vmatprep.subr.bf16.mxu0 %v16256_v41  ;;  %v14721_v35 = vpop.f32.mrb[104].mxu1 }
 0x29f   : > { %v2327_v7 = vpop.f32.mrb[168].mxu0  ;;  %16320 = vst [vmem:[#allocation11_spill] sm:$0xff] %v14721_v35  ;;  %v4031_v50 = vpop.f32.mrb[105].mxu1 }
 0x2a0   : > { %v2329_v13 = vpop.f32.mrb[169].mxu0  ;;  %4328 = vmatmul.mubr.f32.gmra.mrb[18].mxu0 %v4139_v22  ;;  %v2406_v62 = vadd.f32 %v2327_v7, %v14287_v38  ;;  %v4143_v38 = vld [vmem:[#allocation2 + $0x160] sm:$0xff]  ;;  %v4146_v7 = vld [vmem:[#allocation2 + $0x188] sm:$0xff]  ;;  %v4148_v50 = vld [vmem:[#allocation2 + $0x198] sm:$0xff] }
 0x2a1   : > { %4332 = vmatprep.mubr.f32.mxu0 %v4142_v26  ;;  %11700 = vmatpush1.bf16.msra.mxu0 %v14431_v58  ;;  %v16321_v13 = vld [vmem:[#allocation29_spill] sm:$0xff]  ;;  %v16322_v26 = vld [vmem:[#allocation30_spill] sm:$0xff] }
 0x2a2   : > { %v14718_v33 = vadd.f32 %v16319_v59, %v2406_v62  ;;  %11701 = vmatprep.subr.bf16.mxu0 %v16256_v41  ;;  %v14729_v51 = vpop.f32.mrb[106].mxu1 }
 0x2a3   : > { %v2332_v25 = vpop.f32.mrb[170].mxu0  ;;  %v4036_v59 = vpop.f32.mrb[107].mxu1 }
 0x2a4   : > { %v2334_v40 = vpop.f32.mrb[171].mxu0  ;;  %4333 = vmatmul.mubr.f32.gmra.mrb[20].mxu0 %v4141_v24  ;;  %v2407_v22 = vadd.f32 %v2332_v25, %v16321_v13  ;;  %v4145_v25 = vld [vmem:[#allocation2 + $0x180] sm:$0xff] }
 0x2a5   : > { %4337 = vmatprep.mubr.f32.mxu0 %v4144_v34  ;;  %11703 = vmatpush1.bf16.msra.mxu0 %v14448_v37  ;;  %v16323_v34 = vld [vmem:[#allocation31_spill] sm:$0xff] }
 0x2a6   : > { %v14726_v58 = vadd.f32 %v16322_v26, %v2407_v22  ;;  %11704 = vmatprep.subr.bf16.mxu0 %v16256_v41 }
 0x2a7   : > { %v2337_v62 = vpop.f32.mrb[172].mxu0  ;;  %v14737_v40 = vpop.f32.mrb[108].mxu1 }
 0x2a8   : > { %v2339_v35 = vpop.f32.mrb[173].mxu0  ;;  %4338 = vmatmul.mubr.f32.gmra.mrb[22].mxu0 %v4143_v38  ;;  %v2408_v24 = vadd.f32 %v2337_v62, %v14325_v52  ;;  %v4041_v22 = vpop.f32.mrb[109].mxu1  ;;  %v4147_v52 = vld [vmem:[#allocation2 + $0x190] sm:$0xff]  ;;  %v4150_v62 = vld [vmem:[#allocation2 + $0x1b8] sm:$0xff] }
 0x2a9   : > { %4342 = vmatprep.mubr.f32.mxu0 %v4146_v7  ;;  %11706 = vmatpush1.bf16.msra.mxu0 %v14465_v2  ;;  %v16324_v35 = vld [vmem:[#allocation32_spill] sm:$0xff]  ;;  %v16325_v7 = vld [vmem:[#allocation33_spill] sm:$0xff] }
 0x2aa   : > { %v14734_v37 = vadd.f32 %v16323_v34, %v2408_v24  ;;  %11707 = vmatprep.subr.bf16.mxu0 %v16256_v41 }
 0x2ab   : > { %v2342_v13 = vpop.f32.mrb[174].mxu0  ;;  %v14745_v59 = vpop.f32.mrb[110].mxu1 }
 0x2ac   : > { %v2344_v26 = vpop.f32.mrb[175].mxu0  ;;  %4343 = vmatmul.mubr.f32.gmra.mrb[24].mxu0 %v4145_v25  ;;  %v2409_v38 = vadd.f32 %v2342_v13, %v16324_v35  ;;  %v4046_v34 = vpop.f32.mrb[111].mxu1  ;;  %v4149_v25 = vld [vmem:[#allocation2 + $0x1b0] sm:$0xff] }
 0x2ad   : > { %4347 = vmatprep.mubr.f32.mxu0 %v4148_v50  ;;  %11709 = vmatpush1.bf16.msra.mxu0 %v14482_v0  ;;  %v4152_v50 = vld [vmem:[#allocation2 + $0x1c8] sm:$0xff] }
 0x2ae   : > { %v14742_v2 = vadd.f32 %v16325_v7, %v2409_v38  ;;  %11710 = vmatprep.subr.bf16.mxu0 %v16256_v41 }
 0x2af   : > { %v2347_v24 = vpop.f32.mrb[176].mxu0  ;;  %v14753_v13 = vpop.f32.mrb[112].mxu1 }
 0x2b0   : > { %v2410_v22 = vadd.f32 %v2347_v24, %v14363_v47  ;;  %v2349_v26 = vpop.f32.mrb[177].mxu0  ;;  %4348 = vmatmul.mubr.f32.gmra.mrb[26].mxu0 %v4147_v52  ;;  %v4051_v38 = vpop.f32.mrb[113].mxu1  ;;  %v4151_v47 = vld [vmem:[#allocation2 + $0x1c0] sm:$0xff] }
 0x2b1   : > { %4352 = vmatprep.mubr.f32.mxu0 %v4150_v62  ;;  %11712 = vmatpush1.bf16.msra.mxu0 %v14497_v31 }
 0x2b2   : > { %v14750_v0 = vadd.f32 %v14374_v14, %v2410_v22  ;;  %11713 = vmatprep.subr.bf16.mxu0 %v16256_v41  ;;  %v4154_v14 = vld [vmem:[#allocation2 + $0x1e8] sm:$0xff] }
 0x2b3   : > { %v2352_v35 = vpop.f32.mrb[178].mxu0  ;;  %v14761_v52 = vpop.f32.mrb[114].mxu1 }
 0x2b4   : > { %v2411_v7 = vadd.f32 %v2352_v35, %v14379_v63  ;;  %v2354_v34 = vpop.f32.mrb[179].mxu0  ;;  %4353 = vmatmul.mubr.f32.gmra.mrb[28].mxu0 %v4149_v25  ;;  %16326 = vst [vmem:[#allocation12_spill] sm:$0xff] %v14761_v52  ;;  %v4056_v24 = vpop.f32.mrb[115].mxu1  ;;  %v4153_v63 = vld [vmem:[#allocation2 + $0x1e0] sm:$0xff]  ;;  %v16327_v25 = vld [vmem:[#allocation34_spill] sm:$0xff] }
 0x2b5   : > { %4357 = vmatprep.mubr.f32.mxu0 %v4152_v50  ;;  %11715 = vmatpush1.bf16.msra.mxu0 %v14515_v60 }
 0x2b6   : > { %v14758_v31 = vadd.f32 %v14384_v18, %v2411_v7  ;;  %11716 = vmatprep.subr.bf16.mxu0 %v16256_v41  ;;  %v4156_v18 = vld [vmem:[#allocation2 + $0x1f8] sm:$0xff]  ;;  %v16330_v7 = vld [vmem:[#allocation35_spill] sm:$0xff] }
 0x2b7   : > { %v2357_v62 = vpop.f32.mrb[180].mxu0  ;;  %v14769_v50 = vpop.f32.mrb[116].mxu1 }
 0x2b8   : > { %v2412_v22 = vadd.f32 %v2357_v62, %v14395_v8  ;;  %v2359_v26 = vpop.f32.mrb[181].mxu0  ;;  %4358 = vmatmul.mubr.f32.gmra.mrb[30].mxu0 %v4151_v47  ;;  %16329 = vst [vmem:[#allocation14_spill] sm:$0xff] %v14769_v50  ;;  %v4061_v38 = vpop.f32.mrb[117].mxu1  ;;  %v4155_v8 = vld [vmem:[#allocation2 + $0x1f0] sm:$0xff]  ;;  %v16331_v47 = vld [vmem:[#allocation36_spill] sm:$0xff]  ;;  %v16335_v50 = vld [vmem:[#allocation38_spill] sm:$0xff] }
 0x2b9   : > { %4362 = vmatprep.mubr.f32.mxu0 %v4154_v14  ;;  %11718 = vmatpush1.bf16.msra.mxu0 %v14534_v29  ;;  %v4158_v29 = vld [vmem:[#allocation2 + $0x218] sm:$0xff]  ;;  %v4157_v38 = vld [vmem:[#allocation2 + $0x210] sm:$0xff] }
 0x2ba   : > { %v14766_v60 = vadd.f32 %v16327_v25, %v2412_v22  ;;  %11719 = vmatprep.subr.bf16.mxu0 %v16256_v41  ;;  %v16334_v25 = vld [vmem:[#allocation37_spill] sm:$0xff] }
 0x2bb   : > { %v2362_v35 = vpop.f32.mrb[182].mxu0  ;;  %v14775_v62 = vpop.f32.mrb[118].mxu1 }
 0x2bc   : > { %16328 = vst [vmem:[#allocation13_spill] sm:$0xff] %v14766_v60  ;;  %v2413_v34 = vadd.f32 %v2362_v35, %v16330_v7  ;;  %v2364_v24 = vpop.f32.mrb[183].mxu0  ;;  %4363 = vmatmul.mubr.f32.gmra.mrb[32].mxu0 %v4153_v63  ;;  %16333 = vst [vmem:[#allocation16_spill] sm:$0xff] %v14775_v62  ;;  %v4066_v26 = vpop.f32.mrb[119].mxu1  ;;  %v4160_v63 = vld [vmem:[#allocation2 + $0x228] sm:$0xff]  ;;  %v16339_v62 = vld [vmem:[#allocation40_spill] sm:$0xff] }
 0x2bd   : > { %4367 = vmatprep.mubr.f32.mxu0 %v4156_v18  ;;  %v16338_v24 = vld [vmem:[#allocation39_spill] sm:$0xff]  ;;  %v4159_v26 = vld [vmem:[#allocation2 + $0x220] sm:$0xff] }
 0x2be   : > { %v14773_v14 = vadd.f32 %v16331_v47, %v2413_v34 }
 0x2bf   : > { %v2367_v22 = vpop.f32.mrb[184].mxu0 }
 0x2c0   : > { %16332 = vst [vmem:[#allocation15_spill] sm:$0xff] %v14773_v14  ;;  %v2414_v60 = vadd.f32 %v2367_v22, %v16334_v25  ;;  %v2369_v52 = vpop.f32.mrb[185].mxu0  ;;  %4368 = vmatmul.mubr.f32.gmra.mrb[34].mxu0 %v4155_v8  ;;  %v14781_v18 = vpop.f32.mrb[120].mxu1 }
 0x2c1   : > { %4372 = vmatprep.mubr.f32.mxu0 %v4158_v29  ;;  %16337 = vst [vmem:[#allocation18_spill] sm:$0xff] %v14781_v18  ;;  %v4071_v34 = vpop.f32.mrb[121].mxu1  ;;  %v4162_v52 = vld [vmem:[#allocation2 + $0x248] sm:$0xff] }
 0x2c2   : > { %v14779_v35 = vadd.f32 %v16335_v50, %v2414_v60  ;;  %v16342_v50 = vld [vmem:[#allocation41_spill] sm:$0xff]  ;;  %v16343_v18 = vld [vmem:[#allocation42_spill] sm:$0xff] }
 0x2c3   : > { %v2372_v7 = vpop.f32.mrb[186].mxu0  ;;  %v4161_v34 = vld [vmem:[#allocation2 + $0x240] sm:$0xff] }
 0x2c4   : > { %16336 = vst [vmem:[#allocation17_spill] sm:$0xff] %v14779_v35  ;;  %v2415_v47 = vadd.f32 %v2372_v7, %v16338_v24  ;;  %v2374_v14 = vpop.f32.mrb[187].mxu0  ;;  %4373 = vmatmul.mubr.f32.gmra.mrb[36].mxu0 %v4157_v38  ;;  %v14787_v8 = vpop.f32.mrb[122].mxu1  ;;  %v16346_v24 = vld [vmem:[#allocation43_spill] sm:$0xff] }
 0x2c5   : > { %4377 = vmatprep.mubr.f32.mxu0 %v4160_v63  ;;  %16341 = vst [vmem:[#allocation20_spill] sm:$0xff] %v14787_v8  ;;  %v4076_v60 = vpop.f32.mrb[123].mxu1  ;;  %v4164_v14 = vld [vmem:[#allocation2 + $0x258] sm:$0xff] }
 0x2c6   : > { %v14785_v22 = vadd.f32 %v16339_v62, %v2415_v47  ;;  %v4163_v60 = vld [vmem:[#allocation2 + $0x250] sm:$0xff]  ;;  %v16347_v8 = vld [vmem:[#allocation44_spill] sm:$0xff] }
 0x2c7   : > { %v2377_v29 = vpop.f32.mrb[188].mxu0 }
 0x2c8   : > { %16340 = vst [vmem:[#allocation19_spill] sm:$0xff] %v14785_v22  ;;  %v2416_v25 = vadd.f32 %v2377_v29, %v16342_v50  ;;  %v2379_v35 = vpop.f32.mrb[189].mxu0  ;;  %4378 = vmatmul.mubr.f32.gmra.mrb[38].mxu0 %v4159_v26  ;;  %v14793_v38 = vpop.f32.mrb[124].mxu1  ;;  %v16350_v50 = vld [vmem:[#allocation45_spill] sm:$0xff] }
 0x2c9   : > { %4382 = vmatprep.mubr.f32.mxu0 %v4162_v52  ;;  %16345 = vst [vmem:[#allocation22_spill] sm:$0xff] %v14793_v38  ;;  %v4081_v62 = vpop.f32.mrb[125].mxu1  ;;  %v4166_v35 = vld [vmem:[#allocation2 + $0x278] sm:$0xff]  ;;  %v16351_v38 = vld [vmem:[#allocation46_spill] sm:$0xff] }
 0x2ca   : > { %v14791_v7 = vadd.f32 %v16343_v18, %v2416_v25  ;;  %v4165_v62 = vld [vmem:[#allocation2 + $0x270] sm:$0xff] }
 0x2cb   : > { %v2382_v63 = vpop.f32.mrb[190].mxu0 }
 0x2cc   : > { %16344 = vst [vmem:[#allocation21_spill] sm:$0xff] %v14791_v7  ;;  %v2417_v47 = vadd.f32 %v2382_v63, %v16346_v24  ;;  %v2384_v22 = vpop.f32.mrb[191].mxu0  ;;  %4383 = vmatmul.mubr.f32.gmra.mrb[40].mxu0 %v4161_v34  ;;  %v14799_v26 = vpop.f32.mrb[126].mxu1 }
 0x2cd   : > { %4387 = vmatprep.mubr.f32.mxu0 %v4164_v14  ;;  %16349 = vst [vmem:[#allocation24_spill] sm:$0xff] %v14799_v26  ;;  %v4086_v18 = vpop.f32.mrb[127].mxu1  ;;  %v4168_v22 = vld [vmem:[#allocation2 + $0x288] sm:$0xff]  ;;  %v16353_v14 = vld [vmem:[#allocation47_spill] sm:$0xff]  ;;  %v16354_v26 = vld [vmem:[#allocation48_spill] sm:$0xff] }
 0x2ce   : > { %v14797_v29 = vadd.f32 %v16347_v8, %v2417_v47  ;;  %v4167_v47 = vld [vmem:[#allocation2 + $0x280] sm:$0xff]  ;;  %v4170_v18 = vld [vmem:[#allocation2 + $0x2a8] sm:$0xff] }
 0x2cf   : > { %v3287_v52 = vpop.f32.mrb[192].mxu0 }
 0x2d0   : > { %16348 = vst [vmem:[#allocation23_spill] sm:$0xff] %v14797_v29  ;;  %v3446_v25 = vadd.f32 %v3287_v52, %v16350_v50  ;;  %v3289_v7 = vpop.f32.mrb[193].mxu0  ;;  %4388 = vmatmul.mubr.f32.gmra.mrb[42].mxu0 %v4163_v60  ;;  %v16356_v50 = vld [vmem:[#allocation51_spill] sm:$0xff] }
 0x2d1   : > { %4392 = vmatprep.mubr.f32.mxu0 %v4166_v35  ;;  %v16355_v7 = vld [vmem:[#allocation50_spill] sm:$0xff] }
 0x2d2   : > { %v14803_v63 = vadd.f32 %v16351_v38, %v3446_v25  ;;  %v4169_v38 = vld [vmem:[#allocation2 + $0x2a0] sm:$0xff] }
 0x2d3   : > { %v3292_v34 = vpop.f32.mrb[194].mxu0 }
 0x2d4   : > { %16352 = vst [vmem:[#allocation25_spill] sm:$0xff] %v14803_v63  ;;  %v3447_v24 = vadd.f32 %v3292_v34, %v16353_v14  ;;  %v3294_v8 = vpop.f32.mrb[195].mxu0  ;;  %4393 = vmatmul.mubr.f32.gmra.mrb[44].mxu0 %v4165_v62  ;;  %v4174_v14 = vld [vmem:[#allocation2 + $0x2d8] sm:$0xff] }
 0x2d5   : > { %4397 = vmatprep.mubr.f32.mxu0 %v4168_v22  ;;  %v16357_v22 = vld [vmem:[#allocation49_spill] sm:$0xff] }
 0x2d6   : > { %v14807_v29 = vadd.f32 %v16354_v26, %v3447_v24 }
 0x2d7   : > { %v3297_v52 = vpop.f32.mrb[196].mxu0 }
 0x2d8   : > { %v3448_v60 = vadd.f32 %v3297_v52, %v16355_v7  ;;  %v3299_v35 = vpop.f32.mrb[197].mxu0  ;;  %4398 = vmatmul.mubr.f32.gmra.mrb[46].mxu0 %v4167_v47  ;;  %v4173_v52 = vld [vmem:[#allocation2 + $0x2d0] sm:$0xff] }
 0x2d9   : > { %4402 = vmatprep.mubr.f32.mxu0 %v4170_v18  ;;  %v16358_v18 = vld [vmem:[#allocation52_spill] sm:$0xff]  ;;  %v16359_v35 = vld [vmem:[#allocation53_spill] sm:$0xff] }
 0x2da   : > { %v14811_v25 = vadd.f32 %v16356_v50, %v3448_v60  ;;  %v4178_v50 = vld [vmem:[#allocation2 + $0x308] sm:$0xff] }
 0x2db   : > { %v3302_v63 = vpop.f32.mrb[198].mxu0 }
 0x2dc   : > { %v3449_v34 = vadd.f32 %v3302_v63, %v14552_v9  ;;  %v3304_v62 = vpop.f32.mrb[199].mxu0  ;;  %4403 = vmatmul.mubr.f32.gmra.mrb[48].mxu0 %v4169_v38 }
 0x2dd   : > { %4407 = vmatprep.mubr.f32.mxu0 %v16357_v22  ;;  %v16361_v22 = vld [vmem:[#allocation54_spill] sm:$0xff] }
 0x2de   : > { %v14816_v26 = vadd.f32 %v14555_v5, %v3449_v34  ;;  %v16360_v5 = vld [vmem:[#allocation55_spill] sm:$0xff] }
 0x2df   : > { %v3307_v24 = vpop.f32.mrb[200].mxu0 }
 0x2e0   : > { %v3450_v8 = vadd.f32 %v3307_v24, %v14566_v21  ;;  %v3309_v47 = vpop.f32.mrb[201].mxu0  ;;  %4408 = vmatmul.mubr.f32.gmra.mrb[50].mxu0 %v16358_v18 }
 0x2e1   : > { %4412 = vmatprep.mubr.f32.mxu0 %v4174_v14 }
 0x2e2   : > { %v14821_v7 = vadd.f32 %v14568_v49, %v3450_v8  ;;  %v4177_v49 = vld [vmem:[#allocation2 + $0x300] sm:$0xff] }
 0x2e3   : > { %v3312_v9 = vpop.f32.mrb[202].mxu0 }
 0x2e4   : > { %v3451_v63 = vadd.f32 %v3312_v9, %v14578_v43  ;;  %v3314_v60 = vpop.f32.mrb[203].mxu0  ;;  %4413 = vmatmul.mubr.f32.gmra.mrb[52].mxu0 %v4173_v52  ;;  %v4180_v43 = vld [vmem:[#allocation2 + $0x318] sm:$0xff] }
 0x2e5   : > { %4417 = vmatprep.mubr.f32.mxu0 %v16359_v35  ;;  %v16362_v60 = vld [vmem:[#allocation9_spill] sm:$0xff] }
 0x2e6   : > { %v14826_v38 = vadd.f32 %v16360_v5, %v3451_v63  ;;  %v4475_v5 = vld [vmem:[#allocation2 + $0x60] sm:$0xfe] }
 0x2e7   : > { %v3317_v21 = vpop.f32.mrb[204].mxu0 }
 0x2e8   : > { %v3452_v34 = vadd.f32 %v3317_v21, %v14589_v4  ;;  %v3319_v62 = vpop.f32.mrb[205].mxu0  ;;  %4418 = vmatmul.mubr.f32.gmra.mrb[54].mxu0 %v16361_v22  ;;  %v4476_v4 = vld [vmem:[#allocation2 + $0x68] sm:$0xfe]  ;;  %v4480_v21 = vld [vmem:[#allocation2 + $0x88] sm:$0x1] }
 0x2e9   : > { %4422 = vmatprep.mubr.f32.mxu0 %v4178_v50  ;;  %v4670_v35 = vrot.slane %v4476_v4, 1  ;;  %v4668_v62 = vrot.slane %v14642_v1, 1 }
 0x2ea   : > { %v14831_v14 = vadd.f32 %v14592_v61, %v3452_v34 }
 0x2eb   : > { %v3322_v24 = vpop.f32.mrb[206].mxu0 }
 0x2ec   : > { %v3453_v8 = vadd.f32 %v3322_v24, %v14602_v17  ;;  %v3324_v47 = vpop.f32.mrb[207].mxu0  ;;  %4423 = vmatmul.mubr.f32.gmra.mrb[56].mxu0 %v4177_v49  ;;  %v4671_v17 = vrot.slane %v14635_v19, 1  ;;  %v10141_v19 = vld [vmem:[%s16227_s2 + $0x800] sm:$0xff]  ;;  %v4675_v49 = vrot.slane %v4480_v21, 1 }
 0x2ed   : > { %4427 = vmatprep.mubr.f32.mxu0 %v4180_v43  ;;  %v4479_v43 = vld [vmem:[#allocation2 + $0x80] sm:$0x1]  ;;  %v14858_v47 = vld [vmem:[#allocation2 + $0xa8] sm:$0xff] }
 0x2ee   : > { %v14835_v18 = vadd.f32 %v14605_v3, %v3453_v8  ;;  %v4482_v8 = vld [vmem:[#allocation2 + $0x98] sm:$0xfe]  ;;  %v14874_v21 = vld [vmem:[#allocation2 + $0xa0] sm:$0xff] }
 0x2ef   : > { %v3327_v52 = vpop.f32.mrb[208].mxu0 }
 0x2f0   : > { %v3454_v9 = vadd.f32 %v3327_v52, %v14612_v53  ;;  %v3329_v63 = vpop.f32.mrb[209].mxu0  ;;  %4428 = vmatmul.mubr.f32.gmra.mrb[58].mxu0 %v16362_v60  ;;  %v4667_v53 = vrot.slane %v4475_v5, 1  ;;  %v4680_v5 = vrot.slane %v4482_v8, 1  ;;  %v4485_v8 = vld [vmem:[#allocation2 + $0xb0] sm:$0x1] }
 0x2f1   : > { %4432 = vmatprep.mubr.f32.mxu0 %v14617_v57  ;;  %v4481_v63 = vld [vmem:[#allocation2 + $0x90] sm:$0xfe] }
 0x2f2   : > { %v14841_v61 = vadd.f32 %v14615_v6, %v3454_v9  ;;  %v4672_v6 = vsel %vm1067_vm0, %v4670_v35, %v4671_v17  ;;  %v4669_v52 = vsel %vm1067_vm0, %v4667_v53, %v4668_v62  ;;  %v4673_v9 = vrot.slane %v4479_v43, 1 }
 0x2f3   : > { %v3332_v50 = vpop.f32.mrb[210].mxu0  ;;  %v4676_v35 = vsel %vm1067_vm0, %v4671_v17, %v4675_v49 }
 0x2f4   : > { %v3455_v3 = vadd.f32 %v3332_v50, %v14625_v10  ;;  %v3334_v34 = vpop.f32.mrb[211].mxu0  ;;  %4433 = vmatmul.mubr.f32.gmra.mrb[60].mxu0 %v14617_v57  ;;  %v10142_v10 = vld [vmem:[%s16227_s2 + $0x808] sm:$0xff]  ;;  %v4681_v50 = vrot.slane %v14858_v47, 1  ;;  %v4674_v17 = vsel %vm1067_vm0, %v4668_v62, %v4673_v9 }
 0x2f5   : > { %4437 = vmatprep.mubr.f32.mxu0 %v14617_v57  ;;  %v11720_v4 = vpack.c.bf16 %v10142_v10, %v10141_v19  ;;  %v4486_v34 = vld [vmem:[#allocation2 + $0xb8] sm:$0x1]  ;;  %v4677_v19 = vrot.slane %v4481_v63, 1  ;;  %v4678_v10 = vrot.slane %v14874_v21, 1  ;;  %v10146_v62 = vld [vmem:[%s16227_s2 + $0x828] sm:$0xff]  ;;  %v4683_v63 = vrot.slane %v4485_v8, 1 }
 0x2f6   : > { %v14849_v22 = vadd.f32 %v14627_v46, %v3455_v3  ;;  %v4682_v43 = vsel %vm1067_vm0, %v4680_v5, %v4681_v50  ;;  %v4487_v5 = vld [vmem:[#allocation2 + $0xc0] sm:$0xfe] }
 0x2f7   : > { %v3337_v24 = vpop.f32.mrb[212].mxu0  ;;  %v4679_v9 = vsel %vm1067_vm0, %v4677_v19, %v4678_v10  ;;  %v4684_v19 = vsel %vm1067_vm0, %v4678_v10, %v4683_v63  ;;  %v10150_v10 = vld [vmem:[%s16227_s2 + $0x848] sm:$0xff] }
 0x2f8   : > { %v3456_v1 = vadd.f32 %v3337_v24, %v14633_v23  ;;  %v3339_v46 = vpop.f32.mrb[213].mxu0  ;;  %4438 = vmatmul.mubr.f32.gmra.mrb[62].mxu0 %v14617_v57  ;;  %v10143_v23 = vld [vmem:[%s16227_s2 + $0x810] sm:$0xff]  ;;  %v10144_v57 = vld [vmem:[%s16227_s2 + $0x818] sm:$0xff]  ;;  %v4685_v24 = vrot.slane %v4486_v34, 1 }
 0x2f9   : > { %4988 = vmatprep.mubr.f32.mxu0 %v4672_v6  ;;  %v11723_v6 = vpack.c.bf16 %v10144_v57, %v10143_v23  ;;  %v4488_v46 = vld [vmem:[#allocation2 + $0xc8] sm:$0xfe] }
 0x2fa   : > { %v14864_v60 = vadd.f32 %v14637_v55, %v3456_v1  ;;  %v4686_v57 = vsel %vm1067_vm0, %v4681_v50, %v4685_v24 }
 0x2fb   : > { %v3342_v3 = vpop.f32.mrb[214].mxu0 }
 0x2fc   : > { %v3457_v55 = vadd.f32 %v3342_v3, %v14645_v28  ;;  %v3344_v53 = vpop.f32.mrb[215].mxu0  ;;  %4989 = vmatmul.mubr.f32.vlgmr.msra.gmra.mrb[64].mxu0 %v4669_v52  ;;  %v10145_v28 = vld [vmem:[%s16227_s2 + $0x820] sm:$0xff]  ;;  %v14890_v52 = vld [vmem:[#allocation2 + $0xd8] sm:$0xff]  ;;  %v4690_v3 = vrot.slane %v4488_v46, 1 }
 0x2fd   : > { %11721 = vmatpush1.bf16.msra.mxu0 %v11720_v4  ;;  %4993 = vmatprep.mubr.f32.mxu0 %v4676_v35  ;;  %v11726_v35 = vpack.c.bf16 %v10146_v62, %v10145_v28  ;;  %v4691_v34 = vrot.slane %v14890_v52, 1  ;;  %v10148_v53 = vld [vmem:[%s16227_s2 + $0x838] sm:$0xff]  ;;  %v4491_v46 = vld [vmem:[#allocation2 + $0xe0] sm:$0x1] }
 0x2fe   : > { %v14880_v49 = vadd.f32 %v14648_v54, %v3457_v55  ;;  %11722 = vmatprep.subr.bf16.mxu0 %v16256_v41  ;;  %v10147_v55 = vld [vmem:[%s16227_s2 + $0x830] sm:$0xff] }
 0x2ff   : > { %v3347_v1 = vpop.f32.mrb[216].mxu0  ;;  %v11729_v8 = vpack.c.bf16 %v10148_v53, %v10147_v55  ;;  %v4692_v62 = vsel %vm1067_vm0, %v4690_v3, %v4691_v34 }
 0x300   : > { %v3458_v54 = vadd.f32 %v3347_v1, %v14654_v39  ;;  %v3349_v4 = vpop.f32.mrb[217].mxu0  ;;  %4994 = vmatmul.mubr.f32.gmra.mrb[66].mxu0 %v4674_v17  ;;  %v14900_v39 = vld [vmem:[#allocation2 + $0xd0] sm:$0xff] }
 0x301   : > { %4998 = vmatprep.mubr.f32.mxu0 %v4682_v43  ;;  %11724 = vmatpush1.bf16.msra.mxu0 %v11723_v6  ;;  %v4687_v43 = vrot.slane %v4487_v5, 1  ;;  %v4688_v24 = vrot.slane %v14900_v39, 1  ;;  %v4494_v4 = vld [vmem:[#allocation2 + $0xf8] sm:$0xfe]  ;;  %v4693_v5 = vrot.slane %v4491_v46, 1 }
 0x302   : > { %v14895_v23 = vadd.f32 %v14657_v44, %v3458_v54  ;;  %11725 = vmatprep.subr.bf16.mxu0 %v16256_v41  ;;  %v4492_v44 = vld [vmem:[#allocation2 + $0xe8] sm:$0x1] }
 0x303   : > { %v3352_v17 = vpop.f32.mrb[218].mxu0  ;;  %v4695_v1 = vrot.slane %v4492_v44, 1 }
 0x304   : > { %v3459_v6 = vadd.f32 %v3352_v17, %v14662_v42  ;;  %v3354_v50 = vpop.f32.mrb[219].mxu0  ;;  %4999 = vmatmul.mubr.f32.gmra.mrb[68].mxu0 %v4679_v9  ;;  %v10149_v42 = vld [vmem:[%s16227_s2 + $0x840] sm:$0xff]  ;;  %v14922_v9 = vld [vmem:[#allocation2 + $0x108] sm:$0xff]  ;;  %v4700_v17 = vrot.slane %v4494_v4, 1  ;;  %v4497_v4 = vld [vmem:[#allocation2 + $0x110] sm:$0x1] }
 0x305   : > { %5003 = vmatprep.mubr.f32.mxu0 %v4686_v57  ;;  %11727 = vmatpush1.bf16.msra.mxu0 %v11726_v35  ;;  %v4689_v35 = vsel %vm1067_vm0, %v4687_v43, %v4688_v24  ;;  %v14926_v57 = vld [vmem:[#allocation2 + $0x100] sm:$0xff]  ;;  %v11732_v3 = vpack.c.bf16 %v10150_v10, %v10149_v42  ;;  %v4696_v53 = vsel %vm1067_vm0, %v4691_v34, %v4695_v1  ;;  %v4701_v44 = vrot.slane %v14922_v9, 1  ;;  %v10152_v50 = vld [vmem:[%s16227_s2 + $0x858] sm:$0xff] }
 0x306   : > { %v14912_v28 = vadd.f32 %v14665_v45, %v3459_v6  ;;  %11728 = vmatprep.subr.bf16.mxu0 %v16256_v41  ;;  %v4493_v6 = vld [vmem:[#allocation2 + $0xf0] sm:$0xfe]  ;;  %v4498_v43 = vld [vmem:[#allocation2 + $0x118] sm:$0x1]  ;;  %v4694_v34 = vsel %vm1067_vm0, %v4688_v24, %v4693_v5  ;;  %v4698_v1 = vrot.slane %v14926_v57, 1  ;;  %v10154_v24 = vld [vmem:[%s16227_s2 + $0x868] sm:$0xff] }
 0x307   : > { %v3357_v54 = vpop.f32.mrb[220].mxu0  ;;  %v4702_v10 = vsel %vm1067_vm0, %v4700_v17, %v4701_v44  ;;  %v4499_v17 = vld [vmem:[#allocation2 + $0x120] sm:$0xfe] }
 0x308   : > { %v3460_v45 = vadd.f32 %v3357_v54, %v14670_v32  ;;  %v3359_v63 = vpop.f32.mrb[221].mxu0  ;;  %5004 = vmatmul.mubr.f32.gmra.mrb[70].mxu0 %v4684_v19  ;;  %v10151_v32 = vld [vmem:[%s16227_s2 + $0x850] sm:$0xff]  ;;  %v4705_v54 = vrot.slane %v4498_v43, 1 }
 0x309   : > { %5008 = vmatprep.mubr.f32.mxu0 %v4692_v62  ;;  %11730 = vmatpush1.bf16.msra.mxu0 %v11729_v8  ;;  %v4697_v62 = vrot.slane %v4493_v6, 1  ;;  %v11735_v46 = vpack.c.bf16 %v10152_v50, %v10151_v32  ;;  %v4500_v63 = vld [vmem:[#allocation2 + $0x128] sm:$0xfe] }
 0x30a   : > { %v14929_v55 = vadd.f32 %v14673_v36, %v3460_v45  ;;  %11731 = vmatprep.subr.bf16.mxu0 %v16256_v41  ;;  %v4706_v50 = vsel %vm1067_vm0, %v4701_v44, %v4705_v54 }
 0x30b   : > { %v3362_v19 = vpop.f32.mrb[222].mxu0 }
 0x30c   : > { %v3461_v36 = vadd.f32 %v3362_v19, %v14678_v12  ;;  %v3364_v8 = vpop.f32.mrb[223].mxu0  ;;  %5009 = vmatmul.mubr.f32.gmra.mrb[72].mxu0 %v4689_v35  ;;  %v10153_v12 = vld [vmem:[%s16227_s2 + $0x860] sm:$0xff]  ;;  %v14954_v35 = vld [vmem:[#allocation2 + $0x138] sm:$0xff]  ;;  %v4710_v19 = vrot.slane %v4500_v63, 1 }
 0x30d   : > { %5013 = vmatprep.mubr.f32.mxu0 %v4696_v53  ;;  %11733 = vmatpush1.bf16.msra.mxu0 %v11732_v3  ;;  %v4699_v3 = vsel %vm1067_vm0, %v4697_v62, %v4698_v1  ;;  %v4703_v53 = vrot.slane %v4497_v4, 1  ;;  %v11738_v6 = vpack.c.bf16 %v10154_v24, %v10153_v12  ;;  %v4711_v43 = vrot.slane %v14954_v35, 1  ;;  %v10156_v8 = vld [vmem:[%s16227_s2 + $0x878] sm:$0xff]  ;;  %v4503_v63 = vld [vmem:[#allocation2 + $0x140] sm:$0x1] }
 0x30e   : > { %v14944_v42 = vadd.f32 %v14681_v56, %v3461_v36  ;;  %11734 = vmatprep.subr.bf16.mxu0 %v16256_v41  ;;  %v14963_v36 = vld [vmem:[#allocation2 + $0x130] sm:$0xff] }
 0x30f   : > { %v3367_v45 = vpop.f32.mrb[224].mxu0  ;;  %v4708_v54 = vrot.slane %v14963_v36, 1  ;;  %v4712_v24 = vsel %vm1067_vm0, %v4710_v19, %v4711_v43 }
 0x310   : > { %v3462_v56 = vadd.f32 %v3367_v45, %v14686_v11  ;;  %v3369_v5 = vpop.f32.mrb[225].mxu0  ;;  %5014 = vmatmul.mubr.f32.gmra.mrb[74].mxu0 %v4694_v34  ;;  %v10155_v11 = vld [vmem:[%s16227_s2 + $0x870] sm:$0xff] }
 0x311   : > { %5018 = vmatprep.mubr.f32.mxu0 %v4702_v10  ;;  %11736 = vmatpush1.bf16.msra.mxu0 %v11735_v46  ;;  %v4704_v46 = vsel %vm1067_vm0, %v4698_v1, %v4703_v53  ;;  %v4707_v10 = vrot.slane %v4499_v17, 1  ;;  %v11741_v4 = vpack.c.bf16 %v10156_v8, %v10155_v11  ;;  %v10158_v1 = vld [vmem:[%s16227_s2 + $0x888] sm:$0xff]  ;;  %v4506_v5 = vld [vmem:[#allocation2 + $0x158] sm:$0xfe] }
 0x312   : > { %v14959_v32 = vadd.f32 %v14689_v27, %v3462_v56  ;;  %11737 = vmatprep.subr.bf16.mxu0 %v16256_v41  ;;  %v4504_v27 = vld [vmem:[#allocation2 + $0x148] sm:$0x1] }
 0x313   : > { %v3372_v34 = vpop.f32.mrb[226].mxu0  ;;  %v4715_v45 = vrot.slane %v4504_v27, 1  ;;  %v4709_v17 = vsel %vm1067_vm0, %v4707_v10, %v4708_v54  ;;  %v16363_v11 = vld [vmem:[#allocation10_spill] sm:$0xff]  ;;  %v4720_v27 = vrot.slane %v4506_v5, 1 }
 0x314   : > { %v3463_v62 = vadd.f32 %v3372_v34, %v14694_v20  ;;  %v3374_v44 = vpop.f32.mrb[227].mxu0  ;;  %5019 = vmatmul.mubr.f32.gmra.mrb[76].mxu0 %v4699_v3  ;;  %v10157_v20 = vld [vmem:[%s16227_s2 + $0x880] sm:$0xff]  ;;  %v14986_v3 = vld [vmem:[#allocation2 + $0x168] sm:$0xff] }
 0x315   : > { %5023 = vmatprep.mubr.f32.mxu0 %v4706_v50  ;;  %11739 = vmatpush1.bf16.msra.mxu0 %v11738_v6  ;;  %v4713_v6 = vrot.slane %v4503_v63, 1  ;;  %v4505_v50 = vld [vmem:[#allocation2 + $0x150] sm:$0xfe]  ;;  %v11744_v19 = vpack.c.bf16 %v10158_v1, %v10157_v20  ;;  %v4716_v34 = vsel %vm1067_vm0, %v4711_v43, %v4715_v45  ;;  %v14995_v44 = vld [vmem:[#allocation2 + $0x160] sm:$0xff] }
 0x316   : > { %v14976_v12 = vadd.f32 %v14697_v15, %v3463_v62  ;;  %11740 = vmatprep.subr.bf16.mxu0 %v16256_v41  ;;  %v4721_v62 = vrot.slane %v14986_v3, 1  ;;  %v4717_v63 = vrot.slane %v4505_v50, 1  ;;  %v4718_v20 = vrot.slane %v14995_v44, 1  ;;  %v15018_v50 = vld [vmem:[#allocation2 + $0x198] sm:$0xff] }
 0x317   : > { %v3377_v56 = vpop.f32.mrb[228].mxu0  ;;  %v4714_v45 = vsel %vm1067_vm0, %v4708_v54, %v4713_v6  ;;  %v10162_v54 = vld [vmem:[%s16227_s2 + $0x8a8] sm:$0xff] }
 0x318   : > { %v3464_v15 = vadd.f32 %v3377_v56, %v14702_v48  ;;  %v3379_v53 = vpop.f32.mrb[229].mxu0  ;;  %5024 = vmatmul.mubr.f32.gmra.mrb[78].mxu0 %v4704_v46  ;;  %v10159_v48 = vld [vmem:[%s16227_s2 + $0x890] sm:$0xff]  ;;  %v10160_v46 = vld [vmem:[%s16227_s2 + $0x898] sm:$0xff]  ;;  %v4722_v5 = vsel %vm1067_vm0, %v4720_v27, %v4721_v62  ;;  %v4512_v6 = vld [vmem:[#allocation2 + $0x188] sm:$0xfe] }
 0x319   : > { %5028 = vmatprep.mubr.f32.mxu0 %v4712_v24  ;;  %11742 = vmatpush1.bf16.msra.mxu0 %v11741_v4  ;;  %v4510_v4 = vld [vmem:[#allocation2 + $0x178] sm:$0x1]  ;;  %v11747_v1 = vpack.c.bf16 %v10160_v46, %v10159_v48  ;;  %v4509_v53 = vld [vmem:[#allocation2 + $0x170] sm:$0x1] }
 0x31a   : > { %v14991_v8 = vadd.f32 %v16363_v11, %v3464_v15  ;;  %11743 = vmatprep.subr.bf16.mxu0 %v16256_v41  ;;  %v4725_v15 = vrot.slane %v4510_v4, 1  ;;  %v4719_v11 = vsel %vm1067_vm0, %v4717_v63, %v4718_v20  ;;  %v15022_v27 = vld [vmem:[#allocation2 + $0x190] sm:$0xff] }
 0x31b   : > { %v3382_v10 = vpop.f32.mrb[230].mxu0  ;;  %v16365_v46 = vld [vmem:[#allocation11_spill] sm:$0xff] }
 0x31c   : > { %v3465_v24 = vadd.f32 %v3382_v10, %v14710_v16  ;;  %v3384_v43 = vpop.f32.mrb[231].mxu0  ;;  %5029 = vmatmul.mubr.f32.gmra.mrb[80].mxu0 %v4709_v17  ;;  %v10161_v16 = vld [vmem:[%s16227_s2 + $0x8a0] sm:$0xff]  ;;  %v4726_v4 = vsel %vm1067_vm0, %v4721_v62, %v4725_v15 }
 0x31d   : > { %5033 = vmatprep.mubr.f32.mxu0 %v4716_v34  ;;  %11745 = vmatpush1.bf16.msra.mxu0 %v11744_v19  ;;  %v4723_v34 = vrot.slane %v4509_v53, 1  ;;  %v11750_v48 = vpack.c.bf16 %v10162_v54, %v10161_v16  ;;  %v4731_v43 = vrot.slane %v15018_v50, 1  ;;  %v4728_v16 = vrot.slane %v15022_v27, 1 }
 0x31e   : > { %v15008_v56 = vadd.f32 %v14713_v30, %v3465_v24  ;;  %11746 = vmatprep.subr.bf16.mxu0 %v16256_v41  ;;  %v4730_v24 = vrot.slane %v4512_v6, 1 }
 0x31f   : > { %v3387_v17 = vpop.f32.mrb[232].mxu0  ;;  %v4724_v62 = vsel %vm1067_vm0, %v4718_v20, %v4723_v34  ;;  %v10166_v20 = vld [vmem:[%s16227_s2 + $0x8c8] sm:$0xff] }
 0x320   : > { %16364 = vst [vmem:[#allocation26_spill] sm:$0xff] %v15008_v56  ;;  %v3466_v30 = vadd.f32 %v3387_v17, %v14718_v33  ;;  %v3389_v19 = vpop.f32.mrb[233].mxu0  ;;  %5034 = vmatmul.mubr.f32.gmra.mrb[82].mxu0 %v4714_v45  ;;  %v4511_v56 = vld [vmem:[#allocation2 + $0x180] sm:$0xfe]  ;;  %v10163_v33 = vld [vmem:[%s16227_s2 + $0x8b0] sm:$0xff]  ;;  %v10164_v45 = vld [vmem:[%s16227_s2 + $0x8b8] sm:$0xff]  ;;  %v4732_v6 = vsel %vm1067_vm0, %v4730_v24, %v4731_v43 }
 0x321   : > { %5038 = vmatprep.mubr.f32.mxu0 %v4722_v5  ;;  %11748 = vmatpush1.bf16.msra.mxu0 %v11747_v1  ;;  %v4516_v1 = vld [vmem:[#allocation2 + $0x1a8] sm:$0x1]  ;;  %v4727_v15 = vrot.slane %v4511_v56, 1  ;;  %v11753_v54 = vpack.c.bf16 %v10164_v45, %v10163_v33  ;;  %v4515_v19 = vld [vmem:[#allocation2 + $0x1a0] sm:$0x1] }
 0x322   : > { %v15025_v10 = vadd.f32 %v16365_v46, %v3466_v30  ;;  %11749 = vmatprep.subr.bf16.mxu0 %v16256_v41  ;;  %v4735_v30 = vrot.slane %v4516_v1, 1  ;;  %v15050_v34 = vld [vmem:[#allocation2 + $0x1c8] sm:$0xff]  ;;  %v4517_v24 = vld [vmem:[#allocation2 + $0x1b0] sm:$0xfe] }
 0x323   : > { %v3392_v63 = vpop.f32.mrb[234].mxu0  ;;  %v4729_v46 = vsel %vm1067_vm0, %v4727_v15, %v4728_v16 }
 0x324   : > { %v3467_v5 = vadd.f32 %v3392_v63, %v14726_v58  ;;  %v3394_v53 = vpop.f32.mrb[235].mxu0  ;;  %5039 = vmatmul.mubr.f32.gmra.mrb[84].mxu0 %v4719_v11  ;;  %v10165_v58 = vld [vmem:[%s16227_s2 + $0x8c0] sm:$0xff]  ;;  %v4518_v11 = vld [vmem:[#allocation2 + $0x1b8] sm:$0xfe]  ;;  %v4736_v63 = vsel %vm1067_vm0, %v4731_v43, %v4735_v30  ;;  %v4737_v30 = vrot.slane %v4517_v24, 1 }
 0x325   : > { %5043 = vmatprep.mubr.f32.mxu0 %v4726_v4  ;;  %11751 = vmatpush1.bf16.msra.mxu0 %v11750_v48  ;;  %v4733_v4 = vrot.slane %v4515_v19, 1  ;;  %v11756_v33 = vpack.c.bf16 %v10166_v20, %v10165_v58  ;;  %v4740_v1 = vrot.slane %v4518_v11, 1  ;;  %v15059_v53 = vld [vmem:[#allocation2 + $0x1c0] sm:$0xff] }
 0x326   : > { %v15040_v17 = vadd.f32 %v14729_v51, %v3467_v5  ;;  %11752 = vmatprep.subr.bf16.mxu0 %v16256_v41  ;;  %v4741_v5 = vrot.slane %v15050_v34, 1  ;;  %v4738_v19 = vrot.slane %v15059_v53, 1 }
 0x327   : > { %v3397_v56 = vpop.f32.mrb[236].mxu0 }
 0x328   : > { %v3468_v51 = vadd.f32 %v3397_v56, %v14734_v37  ;;  %v3399_v48 = vpop.f32.mrb[237].mxu0  ;;  %5044 = vmatmul.mubr.f32.gmra.mrb[86].mxu0 %v4724_v62  ;;  %v10167_v37 = vld [vmem:[%s16227_s2 + $0x8d0] sm:$0xff]  ;;  %v10168_v62 = vld [vmem:[%s16227_s2 + $0x8d8] sm:$0xff]  ;;  %v4742_v56 = vsel %vm1067_vm0, %v4740_v1, %v4741_v5  ;;  %v4523_v1 = vld [vmem:[#allocation2 + $0x1e0] sm:$0xfe] }
 0x329   : > { %5048 = vmatprep.mubr.f32.mxu0 %v4732_v6  ;;  %11754 = vmatpush1.bf16.msra.mxu0 %v11753_v54  ;;  %v4734_v6 = vsel %vm1067_vm0, %v4728_v16, %v4733_v4  ;;  %v11759_v58 = vpack.c.bf16 %v10168_v62, %v10167_v37  ;;  %v10170_v16 = vld [vmem:[%s16227_s2 + $0x8e8] sm:$0xff]  ;;  %v15082_v4 = vld [vmem:[#allocation2 + $0x1f8] sm:$0xff] }
 0x32a   : > { %v15055_v45 = vadd.f32 %v14737_v40, %v3468_v51  ;;  %11755 = vmatprep.subr.bf16.mxu0 %v16256_v41  ;;  %v4522_v40 = vld [vmem:[#allocation2 + $0x1d8] sm:$0x1]  ;;  %v4521_v51 = vld [vmem:[#allocation2 + $0x1d0] sm:$0x1] }
 0x32b   : > { %v3402_v15 = vpop.f32.mrb[238].mxu0  ;;  %v4745_v11 = vrot.slane %v4522_v40, 1 }
 0x32c   : > { %16366 = vst [vmem:[#allocation27_spill] sm:$0xff] %v15055_v45  ;;  %v3469_v54 = vadd.f32 %v3402_v15, %v14742_v2  ;;  %v3404_v43 = vpop.f32.mrb[239].mxu0  ;;  %5049 = vmatmul.mubr.f32.gmra.mrb[88].mxu0 %v4729_v46  ;;  %v10169_v2 = vld [vmem:[%s16227_s2 + $0x8e0] sm:$0xff]  ;;  %v4524_v46 = vld [vmem:[#allocation2 + $0x1e8] sm:$0xfe] }
 0x32d   : > { %5053 = vmatprep.mubr.f32.mxu0 %v4736_v63  ;;  %11757 = vmatpush1.bf16.msra.mxu0 %v11756_v33  ;;  %v4739_v33 = vsel %vm1067_vm0, %v4737_v30, %v4738_v19  ;;  %v4743_v63 = vrot.slane %v4521_v51, 1  ;;  %v11762_v37 = vpack.c.bf16 %v10170_v16, %v10169_v2  ;;  %v4746_v15 = vsel %vm1067_vm0, %v4741_v5, %v4745_v11  ;;  %v15091_v43 = vld [vmem:[#allocation2 + $0x1f0] sm:$0xff]  ;;  %v5182_v45 = vld [vmem:[#allocation2 + $0x68] sm:$0xfc] }
 0x32e   : > { %v15072_v20 = vadd.f32 %v14745_v59, %v3469_v54  ;;  %11758 = vmatprep.subr.bf16.mxu0 %v16256_v41  ;;  %v4750_v40 = vrot.slane %v4524_v46, 1  ;;  %v4751_v54 = vrot.slane %v15082_v4, 1  ;;  %v4747_v2 = vrot.slane %v4523_v1, 1  ;;  %v16370_v46 = vld [vmem:[#allocation12_spill] sm:$0xff] }
 0x32f   : > { %v3407_v48 = vpop.f32.mrb[240].mxu0  ;;  %v4744_v51 = vsel %vm1067_vm0, %v4738_v19, %v4743_v63  ;;  %v4748_v16 = vrot.slane %v15091_v43, 1  ;;  %v16373_v63 = vld [vmem:[#allocation13_spill] sm:$0xff] }
 0x330   : > { %16367 = vst [vmem:[#allocation28_spill] sm:$0xff] %v15072_v20  ;;  %v3470_v59 = vadd.f32 %v3407_v48, %v14750_v0  ;;  %v3409_v24 = vpop.f32.mrb[241].mxu0  ;;  %5054 = vmatmul.mubr.f32.gmra.mrb[90].mxu0 %v4734_v6  ;;  %v10171_v0 = vld [vmem:[%s16227_s2 + $0x8f0] sm:$0xff]  ;;  %v10172_v6 = vld [vmem:[%s16227_s2 + $0x8f8] sm:$0xff] }
 0x331   : > { %5058 = vmatprep.mubr.f32.mxu0 %v4742_v56  ;;  %11760 = vmatpush1.bf16.msra.mxu0 %v11759_v58  ;;  %v15100_v30 = vpop.f32.mrb[128].mxu1  ;;  %v4528_v58 = vld [vmem:[#allocation2 + $0x208] sm:$0x1]  ;;  %v11765_v48 = vpack.c.bf16 %v10172_v6, %v10171_v0  ;;  %v4752_v24 = vsel %vm1067_vm0, %v4750_v40, %v4751_v54  ;;  %v4749_v0 = vsel %vm1067_vm0, %v4747_v2, %v4748_v16  ;;  %v4542_v20 = vld [vmem:[#allocation2 + $0x278] sm:$0xfe] }
 0x332   : > { %v15087_v62 = vadd.f32 %v14753_v13, %v3470_v59  ;;  %11761 = vmatprep.subr.bf16.mxu0 %v16256_v41  ;;  %16369 = vst [vmem:[#allocation30_spill] sm:$0xff] %v15100_v30  ;;  %v5112_v5 = vpop.f32.mrb[129].mxu1  ;;  %v4755_v30 = vrot.slane %v4528_v58, 1  ;;  %v16374_v40 = vld [vmem:[#allocation14_spill] sm:$0xff] }
 0x333   : > { %v3412_v13 = vpop.f32.mrb[242].mxu0 }
 0x334   : > { %16368 = vst [vmem:[#allocation29_spill] sm:$0xff] %v15087_v62  ;;  %v3471_v56 = vadd.f32 %v3412_v13, %v14758_v31  ;;  %v3414_v11 = vpop.f32.mrb[243].mxu0  ;;  %5059 = vmatmul.mubr.f32.gmra.mrb[92].mxu0 %v4739_v33  ;;  %v4527_v62 = vld [vmem:[#allocation2 + $0x200] sm:$0x1]  ;;  %v15112_v13 = vld [vmem:[#allocation2 + $0x228] sm:$0xff] }
 0x335   : > { %5063 = vmatprep.mubr.f32.mxu0 %v4746_v15  ;;  %11763 = vmatpush1.bf16.msra.mxu0 %v11762_v37  ;;  %v15110_v31 = vpop.f32.mrb[130].mxu1  ;;  %v4530_v15 = vld [vmem:[#allocation2 + $0x218] sm:$0xfe]  ;;  %v4753_v6 = vrot.slane %v4527_v62, 1  ;;  %v4529_v11 = vld [vmem:[#allocation2 + $0x210] sm:$0xfe] }
 0x336   : > { %v15106_v59 = vadd.f32 %v16370_v46, %v3471_v56  ;;  %11764 = vmatprep.subr.bf16.mxu0 %v16256_v41  ;;  %16372 = vst [vmem:[#allocation32_spill] sm:$0xff] %v15110_v31  ;;  %v5117_v19 = vpop.f32.mrb[131].mxu1  ;;  %v4756_v41 = vsel %vm1067_vm0, %v4751_v54, %v4755_v30  ;;  %v4760_v5 = vrot.slane %v4530_v15, 1  ;;  %v4761_v56 = vrot.slane %v15112_v13, 1  ;;  %v15121_v46 = vld [vmem:[#allocation2 + $0x220] sm:$0xff]  ;;  %v16378_v30 = vld [vmem:[#allocation16_spill] sm:$0xff] }
 0x337   : > { %v3417_v33 = vpop.f32.mrb[244].mxu0  ;;  %v4758_v54 = vrot.slane %v15121_v46, 1  ;;  %v4536_v31 = vld [vmem:[#allocation2 + $0x248] sm:$0xfe] }
 0x338   : > { %16371 = vst [vmem:[#allocation31_spill] sm:$0xff] %v15106_v59  ;;  %v3472_v1 = vadd.f32 %v3417_v33, %v16373_v63  ;;  %v3419_v37 = vpop.f32.mrb[245].mxu0  ;;  %5064 = vmatmul.mubr.f32.gmra.mrb[94].mxu0 %v4744_v51  ;;  %v4534_v51 = vld [vmem:[#allocation2 + $0x238] sm:$0x1]  ;;  %v16377_v63 = vld [vmem:[#allocation15_spill] sm:$0xff] }
 0x339   : > { %5068 = vmatprep.mubr.f32.mxu0 %v4752_v24  ;;  %11766 = vmatpush1.bf16.msra.mxu0 %v11765_v48  ;;  %v15123_v19 = vpop.f32.mrb[132].mxu1  ;;  %v4754_v48 = vsel %vm1067_vm0, %v4748_v16, %v4753_v6  ;;  %v4762_v37 = vsel %vm1067_vm0, %v4760_v5, %v4761_v56 }
 0x33a   : > { %v15117_v58 = vadd.f32 %v16374_v40, %v3472_v1  ;;  %16376 = vst [vmem:[#allocation34_spill] sm:$0xff] %v15123_v19  ;;  %v5122_v24 = vpop.f32.mrb[133].mxu1  ;;  %v4757_v1 = vrot.slane %v4529_v11, 1  ;;  %v4765_v40 = vrot.slane %v4534_v51, 1  ;;  %v4533_v19 = vld [vmem:[#allocation2 + $0x230] sm:$0x1] }
 0x33b   : > { %v3422_v33 = vpop.f32.mrb[246].mxu0  ;;  %v4763_v11 = vrot.slane %v4533_v19, 1  ;;  %v4770_v51 = vrot.slane %v4536_v31, 1 }
 0x33c   : > { %16375 = vst [vmem:[#allocation33_spill] sm:$0xff] %v15117_v58  ;;  %v3473_v2 = vadd.f32 %v3422_v33, %v16377_v63  ;;  %v3424_v62 = vpop.f32.mrb[247].mxu0  ;;  %5069 = vmatmul.mubr.f32.gmra.mrb[96].mxu0 %v4749_v0  ;;  %v15134_v33 = vld [vmem:[#allocation2 + $0x258] sm:$0xff]  ;;  %v4759_v6 = vsel %vm1067_vm0, %v4757_v1, %v4758_v54  ;;  %v4766_v5 = vsel %vm1067_vm0, %v4761_v56, %v4765_v40 }
 0x33d   : > { %5073 = vmatprep.mubr.f32.mxu0 %v4756_v41  ;;  %v15132_v58 = vpop.f32.mrb[134].mxu1  ;;  %v16381_v41 = vld [vmem:[#allocation17_spill] sm:$0xff]  ;;  %v4764_v19 = vsel %vm1067_vm0, %v4758_v54, %v4763_v11  ;;  %v16386_v56 = vld [vmem:[#allocation20_spill] sm:$0xff] }
 0x33e   : > { %v15129_v15 = vadd.f32 %v16378_v30, %v3473_v2  ;;  %16380 = vst [vmem:[#allocation36_spill] sm:$0xff] %v15132_v58  ;;  %v5127_v0 = vpop.f32.mrb[135].mxu1  ;;  %v16382_v2 = vld [vmem:[#allocation18_spill] sm:$0xff]  ;;  %v4771_v30 = vrot.slane %v15134_v33, 1  ;;  %v4535_v58 = vld [vmem:[#allocation2 + $0x240] sm:$0xfe] }
 0x33f   : > { %v3427_v24 = vpop.f32.mrb[248].mxu0 }
 0x340   : > { %16379 = vst [vmem:[#allocation35_spill] sm:$0xff] %v15129_v15  ;;  %v3474_v63 = vadd.f32 %v3427_v24, %v16381_v41  ;;  %v3429_v16 = vpop.f32.mrb[249].mxu0  ;;  %5074 = vmatmul.mubr.f32.gmra.mrb[98].mxu0 %v4754_v48  ;;  %v15143_v15 = vld [vmem:[#allocation2 + $0x250] sm:$0xff]  ;;  %v4540_v41 = vld [vmem:[#allocation2 + $0x268] sm:$0x1] }
 0x341   : > { %5078 = vmatprep.mubr.f32.mxu0 %v4762_v37  ;;  %v15145_v0 = vpop.f32.mrb[136].mxu1  ;;  %v16385_v37 = vld [vmem:[#allocation19_spill] sm:$0xff]  ;;  %v4768_v31 = vrot.slane %v15143_v15, 1 }
 0x342   : > { %v15139_v62 = vadd.f32 %v16382_v2, %v3474_v63  ;;  %16384 = vst [vmem:[#allocation38_spill] sm:$0xff] %v15145_v0  ;;  %v5132_v48 = vpop.f32.mrb[137].mxu1  ;;  %v4767_v63 = vrot.slane %v4535_v58, 1  ;;  %v4772_v2 = vsel %vm1067_vm0, %v4770_v51, %v4771_v30  ;;  %v4539_v0 = vld [vmem:[#allocation2 + $0x260] sm:$0x1] }
 0x343   : > { %v3432_v24 = vpop.f32.mrb[250].mxu0  ;;  %v4773_v11 = vrot.slane %v4539_v0, 1 }
 0x344   : > { %16383 = vst [vmem:[#allocation37_spill] sm:$0xff] %v15139_v62  ;;  %v3475_v16 = vadd.f32 %v3432_v24, %v16385_v37  ;;  %v3434_v1 = vpop.f32.mrb[251].mxu0  ;;  %5079 = vmatmul.mubr.f32.gmra.mrb[100].mxu0 %v4759_v6  ;;  %v4775_v62 = vrot.slane %v4540_v41, 1  ;;  %v15156_v24 = vld [vmem:[#allocation2 + $0x288] sm:$0xff]  ;;  %v4769_v58 = vsel %vm1067_vm0, %v4767_v63, %v4768_v31  ;;  %v4780_v41 = vrot.slane %v4542_v20, 1 }
 0x345   : > { %5083 = vmatprep.mubr.f32.mxu0 %v4766_v5  ;;  %v15154_v59 = vpop.f32.mrb[138].mxu1  ;;  %16389 = vst [vmem:[#allocation41_spill] sm:$0xff] %v15156_v24  ;;  %v16390_v5 = vld [vmem:[#allocation21_spill] sm:$0xff]  ;;  %v4774_v0 = vsel %vm1067_vm0, %v4768_v31, %v4773_v11 }
 0x346   : > { %v15151_v40 = vadd.f32 %v16386_v56, %v3475_v16  ;;  %16388 = vst [vmem:[#allocation40_spill] sm:$0xff] %v15154_v59  ;;  %v5137_v6 = vpop.f32.mrb[139].mxu1  ;;  %v16391_v16 = vld [vmem:[#allocation22_spill] sm:$0xff]  ;;  %v4776_v51 = vsel %vm1067_vm0, %v4771_v30, %v4775_v62  ;;  %v4781_v56 = vrot.slane %v15156_v24, 1  ;;  %v4541_v59 = vld [vmem:[#allocation2 + $0x270] sm:$0xfe] }
 0x347   : > { %v3437_v48 = vpop.f32.mrb[252].mxu0  ;;  %v16395_v62 = vld [vmem:[#allocation24_spill] sm:$0xff] }
 0x348   : > { %16387 = vst [vmem:[#allocation39_spill] sm:$0xff] %v15151_v40  ;;  %v3476_v37 = vadd.f32 %v3437_v48, %v16390_v5  ;;  %v3439_v54 = vpop.f32.mrb[253].mxu0  ;;  %5084 = vmatmul.mubr.f32.gmra.mrb[102].mxu0 %v4764_v19  ;;  %v15165_v40 = vld [vmem:[#allocation2 + $0x280] sm:$0xff]  ;;  %v4546_v5 = vld [vmem:[#allocation2 + $0x298] sm:$0x1] }
 0x349   : > { %5088 = vmatprep.mubr.f32.mxu0 %v4772_v2  ;;  %v15167_v6 = vpop.f32.mrb[140].mxu1  ;;  %v16394_v2 = vld [vmem:[#allocation23_spill] sm:$0xff]  ;;  %v4778_v20 = vrot.slane %v15165_v40, 1 }
 0x34a   : > { %v15161_v1 = vadd.f32 %v16391_v16, %v3476_v37  ;;  %16393 = vst [vmem:[#allocation43_spill] sm:$0xff] %v15167_v6  ;;  %v5142_v19 = vpop.f32.mrb[141].mxu1  ;;  %v4777_v37 = vrot.slane %v4541_v59, 1  ;;  %v4782_v16 = vsel %vm1067_vm0, %v4780_v41, %v4781_v56  ;;  %v4545_v6 = vld [vmem:[#allocation2 + $0x290] sm:$0x1]  ;;  %v12484_v41 = vld [vmem:[#allocation2 + $0x78] sm:$0xff] }
 0x34b   : > { %v3442_v48 = vpop.f32.mrb[254].mxu0  ;;  %v4783_v31 = vrot.slane %v4545_v6, 1 }
 0x34c   : > { %16392 = vst [vmem:[#allocation42_spill] sm:$0xff] %v15161_v1  ;;  %v3477_v54 = vadd.f32 %v3442_v48, %v16394_v2  ;;  %v3444_v63 = vpop.f32.mrb[255].mxu0  ;;  %5089 = vmatmul.mubr.f32.gmra.mrb[104].mxu0 %v4769_v58  ;;  %v4785_v1 = vrot.slane %v4546_v5, 1  ;;  %v16398_v2 = vld [vmem:[#allocation25_spill] sm:$0xff]  ;;  %v4779_v59 = vsel %vm1067_vm0, %v4777_v37, %v4778_v20  ;;  %v5313_v5 = vrot.slane %v12484_v41, 2 }
 0x34d   : > { %5093 = vmatprep.mubr.f32.mxu0 %v4776_v51  ;;  %v15176_v24 = vpop.f32.mrb[142].mxu1  ;;  %v5181_v63 = vld [vmem:[#allocation2 + $0x60] sm:$0xfc] }
 0x34e   : > { %v15173_v30 = vadd.f32 %v16395_v62, %v3477_v54  ;;  %16397 = vst [vmem:[#allocation45_spill] sm:$0xff] %v15176_v24  ;;  %v5147_v48 = vpop.f32.mrb[143].mxu1  ;;  %v4786_v11 = vsel %vm1067_vm0, %v4781_v56, %v4785_v1  ;;  %v5312_v54 = vrot.slane %v5182_v45, 2  ;;  %v5184_v24 = vld [vmem:[#allocation2 + $0x88] sm:$0x3] }
 0x34f   : > { %v4284_v19 = vpop.f32.mrb[0].mxu0  ;;  %v5317_v1 = vrot.slane %v5184_v24, 2  ;;  %v5183_v45 = vld [vmem:[#allocation2 + $0x80] sm:$0x3]  ;;  %v5188_v24 = vld [vmem:[#allocation2 + $0xb8] sm:$0x3] }
 0x350   : > { %16396 = vst [vmem:[#allocation44_spill] sm:$0xff] %v15173_v30  ;;  %v15179_v58 = vadd.f32 %v4284_v19, %v16398_v2  ;;  %v4286_v51 = vpop.f32.mrb[1].mxu0  ;;  %5094 = vmatmul.mubr.f32.gmra.mrb[106].mxu0 %v4774_v0  ;;  %v4784_v0 = vsel %vm1067_vm0, %v4778_v20, %v4783_v31  ;;  %v12485_v19 = vld [vmem:[#allocation2 + $0x70] sm:$0xff]  ;;  %v5314_v6 = vsel %vm1903_vm2, %v5312_v54, %v5313_v5  ;;  %v5186_v2 = vld [vmem:[#allocation2 + $0x98] sm:$0xfc] }
 0x351   : > { %5098 = vmatprep.mubr.f32.mxu0 %v4782_v16  ;;  %v5309_v16 = vrot.slane %v5181_v63, 2  ;;  %v5310_v37 = vrot.slane %v12485_v19, 2  ;;  %v5318_v20 = vsel %vm1903_vm2, %v5313_v5, %v5317_v1  ;;  %v5322_v31 = vrot.slane %v5186_v2, 2  ;;  %v5185_v63 = vld [vmem:[#allocation2 + $0x90] sm:$0xfc] }
 0x352   : > { %v5327_v5 = vrot.slane %v5188_v24, 2  ;;  %v5330_v24 = vrot.slane %v14900_v39, 2  ;;  %v5343_v39 = vrot.slane %v14922_v9, 2  ;;  %v5198_v9 = vld [vmem:[#allocation2 + $0x128] sm:$0xfc] }
 0x353   : > { %v4289_v62 = vpop.f32.mrb[2].mxu0 }
 0x354   : > { %v15184_v30 = vadd.f32 %v4289_v62, %v14807_v29  ;;  %v4291_v48 = vpop.f32.mrb[3].mxu0  ;;  %5099 = vmatmul.mubr.f32.gmra.mrb[108].mxu0 %v4779_v59  ;;  %v5311_v29 = vsel %vm1903_vm2, %v5309_v16, %v5310_v37  ;;  %v5315_v59 = vrot.slane %v5183_v45, 2  ;;  %v5320_v16 = vrot.slane %v14874_v21, 2 }
 0x355   : > { %5103 = vmatprep.mubr.f32.mxu0 %v4786_v11  ;;  %v5323_v11 = vrot.slane %v14858_v47, 2  ;;  %v5190_v47 = vld [vmem:[#allocation2 + $0xc8] sm:$0xfc]  ;;  %v5333_v21 = vrot.slane %v14890_v52, 2  ;;  %v5194_v52 = vld [vmem:[#allocation2 + $0xf8] sm:$0xfc] }
 0x357   : > { %v4294_v56 = vpop.f32.mrb[4].mxu0  ;;  %v5324_v19 = vsel %vm1903_vm2, %v5322_v31, %v5323_v11 }
 0x358   : > { %v15189_v51 = vadd.f32 %v4294_v56, %v14811_v25  ;;  %v4296_v41 = vpop.f32.mrb[5].mxu0  ;;  %5104 = vmatmul.mubr.f32.gmra.mrb[110].mxu0 %v4784_v0  ;;  %v5316_v25 = vsel %vm1903_vm2, %v5310_v37, %v5315_v59  ;;  %v5319_v0 = vrot.slane %v5185_v63, 2  ;;  %v5328_v37 = vsel %vm1903_vm2, %v5323_v11, %v5327_v5 }
 0x359   : > { %5630 = vmatprep.mubr.f32.mxu0 %v5314_v6  ;;  %v5187_v6 = vld [vmem:[#allocation2 + $0xb0] sm:$0x3]  ;;  %v5332_v41 = vrot.slane %v5190_v47, 2  ;;  %v5193_v47 = vld [vmem:[#allocation2 + $0xf0] sm:$0xfc] }
 0x35a   : > { %v5325_v2 = vrot.slane %v5187_v6, 2 }
 0x35b   : > { %v4299_v54 = vpop.f32.mrb[6].mxu0 }
 0x35c   : > { %v15195_v62 = vadd.f32 %v4299_v54, %v14816_v26  ;;  %v4301_v48 = vpop.f32.mrb[7].mxu0  ;;  %5631 = vmatmul.mubr.f32.vlgmr.msra.gmra.mrb[112].mxu0 %v5311_v29  ;;  %v5321_v26 = vsel %vm1903_vm2, %v5319_v0, %v5320_v16  ;;  %v5189_v29 = vld [vmem:[#allocation2 + $0xc0] sm:$0xfc] }
 0x35d   : > { %5635 = vmatprep.mubr.f32.mxu0 %v5318_v20  ;;  %v5192_v20 = vld [vmem:[#allocation2 + $0xe8] sm:$0x3]  ;;  %v5329_v54 = vrot.slane %v5189_v29, 2  ;;  %v5334_v48 = vsel %vm1903_vm2, %v5332_v41, %v5333_v21  ;;  %v5339_v41 = vrot.slane %v5193_v47, 2  ;;  %v5340_v29 = vrot.slane %v14926_v57, 2 }
 0x35e   : > { %v5337_v11 = vrot.slane %v5192_v20, 2  ;;  %v5195_v20 = vld [vmem:[#allocation2 + $0x110] sm:$0x3]  ;;  %v5353_v57 = vrot.slane %v14954_v35, 2  ;;  %v5199_v47 = vld [vmem:[#allocation2 + $0x140] sm:$0x3] }
 0x35f   : > { %v4304_v1 = vpop.f32.mrb[8].mxu0  ;;  %v5202_v35 = vld [vmem:[#allocation2 + $0x158] sm:$0xfc] }
 0x360   : > { %v15201_v45 = vadd.f32 %v4304_v1, %v14821_v7  ;;  %v4306_v56 = vpop.f32.mrb[9].mxu0  ;;  %5636 = vmatmul.mubr.f32.gmra.mrb[114].mxu0 %v5316_v25  ;;  %v5326_v7 = vsel %vm1903_vm2, %v5320_v16, %v5325_v2  ;;  %v5191_v25 = vld [vmem:[#allocation2 + $0xe0] sm:$0x3]  ;;  %v5338_v16 = vsel %vm1903_vm2, %v5333_v21, %v5337_v11  ;;  %v5342_v1 = vrot.slane %v5194_v52, 2  ;;  %v5200_v52 = vld [vmem:[#allocation2 + $0x148] sm:$0x3] }
 0x361   : > { %5640 = vmatprep.mubr.f32.mxu0 %v5324_v19  ;;  %v5335_v6 = vrot.slane %v5191_v25, 2  ;;  %v5352_v11 = vrot.slane %v5198_v9, 2  ;;  %v5197_v25 = vld [vmem:[#allocation2 + $0x120] sm:$0xfc] }
 0x363   : > { %v4309_v59 = vpop.f32.mrb[10].mxu0 }
 0x364   : > { %v15207_v31 = vadd.f32 %v4309_v59, %v14826_v38  ;;  %v4311_v63 = vpop.f32.mrb[11].mxu0  ;;  %5641 = vmatmul.mubr.f32.gmra.mrb[116].mxu0 %v5321_v26  ;;  %v5331_v38 = vsel %vm1903_vm2, %v5329_v54, %v5330_v24  ;;  %v5196_v26 = vld [vmem:[#allocation2 + $0x118] sm:$0x3]  ;;  %v5344_v59 = vsel %vm1903_vm2, %v5342_v1, %v5343_v39  ;;  %v5354_v1 = vsel %vm1903_vm2, %v5352_v11, %v5353_v57  ;;  %v5203_v11 = vld [vmem:[#allocation2 + $0x170] sm:$0x3] }
 0x365   : > { %5645 = vmatprep.mubr.f32.mxu0 %v5328_v37  ;;  %v5347_v21 = vrot.slane %v5196_v26, 2 }
 0x367   : > { %v4314_v0 = vpop.f32.mrb[12].mxu0 }
 0x368   : > { %v15213_v19 = vadd.f32 %v4314_v0, %v14831_v14  ;;  %v4316_v5 = vpop.f32.mrb[13].mxu0  ;;  %5646 = vmatmul.mubr.f32.gmra.mrb[118].mxu0 %v5326_v7  ;;  %v5336_v14 = vsel %vm1903_vm2, %v5330_v24, %v5335_v6  ;;  %v5348_v24 = vsel %vm1903_vm2, %v5343_v39, %v5347_v21  ;;  %v5349_v6 = vrot.slane %v5197_v25, 2 }
 0x369   : > { %5650 = vmatprep.mubr.f32.mxu0 %v5334_v48  ;;  %v5345_v48 = vrot.slane %v5195_v20, 2  ;;  %v5357_v39 = vrot.slane %v5200_v52, 2  ;;  %v5204_v20 = vld [vmem:[#allocation2 + $0x178] sm:$0x3]  ;;  %v5365_v52 = vrot.slane %v5203_v11, 2  ;;  %v5380_v11 = vrot.slane %v15059_v53, 2 }
 0x36a   : > { %v5393_v53 = vrot.slane %v15082_v4, 2  ;;  %v5218_v4 = vld [vmem:[#allocation2 + $0x218] sm:$0xfc] }
 0x36b   : > { %v4319_v56 = vpop.f32.mrb[14].mxu0 }
 0x36c   : > { %v15219_v2 = vadd.f32 %v4319_v56, %v14835_v18  ;;  %v4321_v37 = vpop.f32.mrb[15].mxu0  ;;  %5651 = vmatmul.mubr.f32.gmra.mrb[120].mxu0 %v5331_v38  ;;  %v5341_v18 = vsel %vm1903_vm2, %v5339_v41, %v5340_v29  ;;  %v5358_v41 = vsel %vm1903_vm2, %v5353_v57, %v5357_v39 }
 0x36d   : > { %5655 = vmatprep.mubr.f32.mxu0 %v5338_v16  ;;  %v5350_v16 = vrot.slane %v14963_v36, 2  ;;  %v5363_v36 = vrot.slane %v14986_v3, 2  ;;  %v5206_v3 = vld [vmem:[#allocation2 + $0x188] sm:$0xfc] }
 0x36f   : > { %v4324_v63 = vpop.f32.mrb[16].mxu0 }
 0x370   : > { %v15225_v7 = vadd.f32 %v4324_v63, %v14841_v61  ;;  %v4326_v54 = vpop.f32.mrb[17].mxu0  ;;  %5656 = vmatmul.mubr.f32.gmra.mrb[122].mxu0 %v5336_v14  ;;  %v5346_v61 = vsel %vm1903_vm2, %v5340_v29, %v5345_v48  ;;  %v5355_v14 = vrot.slane %v5199_v47, 2  ;;  %v5362_v29 = vrot.slane %v5202_v35, 2 }
 0x371   : > { %5660 = vmatprep.mubr.f32.mxu0 %v5344_v59  ;;  %v5201_v59 = vld [vmem:[#allocation2 + $0x150] sm:$0xfc]  ;;  %v5370_v35 = vrot.slane %v15022_v27, 2  ;;  %v5383_v27 = vrot.slane %v15050_v34, 2  ;;  %v5214_v34 = vld [vmem:[#allocation2 + $0x1e8] sm:$0xfc] }
 0x372   : > { %v5359_v54 = vrot.slane %v5201_v59, 2  ;;  %v5364_v48 = vsel %vm1903_vm2, %v5362_v29, %v5363_v36 }
 0x373   : > { %v4329_v0 = vpop.f32.mrb[18].mxu0 }
 0x374   : > { %v15231_v5 = vadd.f32 %v4329_v0, %v14849_v22  ;;  %v4331_v38 = vpop.f32.mrb[19].mxu0  ;;  %5661 = vmatmul.mubr.f32.gmra.mrb[124].mxu0 %v5341_v18  ;;  %v5351_v22 = vsel %vm1903_vm2, %v5349_v6, %v5350_v16  ;;  %v5360_v18 = vrot.slane %v14995_v44, 2  ;;  %v5373_v44 = vrot.slane %v15018_v50, 2  ;;  %v5205_v6 = vld [vmem:[#allocation2 + $0x180] sm:$0xfc] }
 0x375   : > { %5665 = vmatprep.mubr.f32.mxu0 %v5348_v24  ;;  %v5367_v24 = vrot.slane %v5204_v20, 2  ;;  %v5210_v50 = vld [vmem:[#allocation2 + $0x1b8] sm:$0xfc] }
 0x376   : > { %v5382_v20 = vrot.slane %v5210_v50, 2 }
 0x377   : > { %v4334_v56 = vpop.f32.mrb[20].mxu0  ;;  %v5368_v38 = vsel %vm1903_vm2, %v5363_v36, %v5367_v24 }
 0x378   : > { %v15237_v26 = vadd.f32 %v4334_v56, %v14864_v60  ;;  %v4336_v37 = vpop.f32.mrb[21].mxu0  ;;  %5666 = vmatmul.mubr.f32.gmra.mrb[126].mxu0 %v5346_v61  ;;  %v5356_v60 = vsel %vm1903_vm2, %v5350_v16, %v5355_v14  ;;  %v5372_v61 = vrot.slane %v5206_v3, 2  ;;  %v5369_v56 = vrot.slane %v5205_v6, 2  ;;  %v5207_v14 = vld [vmem:[#allocation2 + $0x1a0] sm:$0x3] }
 0x379   : > { %5670 = vmatprep.mubr.f32.mxu0 %v5354_v1  ;;  %v5208_v1 = vld [vmem:[#allocation2 + $0x1a8] sm:$0x3]  ;;  %v5375_v59 = vrot.slane %v5207_v14, 2  ;;  %v5392_v6 = vrot.slane %v5214_v34, 2  ;;  %v6311_v34 = vld [vmem:[#allocation3 + $0x80] sm:$0xff] }
 0x37a   : > { %v5374_v37 = vsel %vm1903_vm2, %v5372_v61, %v5373_v44 }
 0x37b   : > { %v4339_v21 = vpop.f32.mrb[22].mxu0 }
 0x37c   : > { %v15243_v63 = vadd.f32 %v4339_v21, %v14880_v49  ;;  %v4341_v9 = vpop.f32.mrb[23].mxu0  ;;  %5671 = vmatmul.mubr.f32.gmra.mrb[128].mxu0 %v5351_v22  ;;  %v5361_v49 = vsel %vm1903_vm2, %v5359_v54, %v5360_v18  ;;  %v5377_v22 = vrot.slane %v5208_v1, 2  ;;  %v5212_v54 = vld [vmem:[#allocation2 + $0x1d8] sm:$0x3] }
 0x37d   : > { %5675 = vmatprep.mubr.f32.mxu0 %v5358_v41  ;;  %v5209_v9 = vld [vmem:[#allocation2 + $0x1b0] sm:$0xfc]  ;;  %v5387_v3 = vrot.slane %v5212_v54, 2  ;;  %v16399_v54 = vld [vmem:[#allocation26_spill] sm:$0xff] }
 0x37e   : > { %v5378_v21 = vsel %vm1903_vm2, %v5373_v44, %v5377_v22  ;;  %v5379_v24 = vrot.slane %v5209_v9, 2  ;;  %v5394_v22 = vsel %vm1903_vm2, %v5392_v6, %v5393_v53 }
 0x37f   : > { %v4344_v57 = vpop.f32.mrb[24].mxu0  ;;  %v5388_v44 = vsel %vm1903_vm2, %v5383_v27, %v5387_v3 }
 0x380   : > { %v15249_v25 = vadd.f32 %v4344_v57, %v14895_v23  ;;  %v4346_v0 = vpop.f32.mrb[25].mxu0  ;;  %5676 = vmatmul.mubr.f32.gmra.mrb[130].mxu0 %v5356_v60  ;;  %v5366_v23 = vsel %vm1903_vm2, %v5360_v18, %v5365_v52  ;;  %v5384_v57 = vsel %vm1903_vm2, %v5382_v20, %v5383_v27  ;;  %v5402_v20 = vrot.slane %v5218_v4, 2  ;;  %v5217_v27 = vld [vmem:[#allocation2 + $0x210] sm:$0xfc] }
 0x381   : > { %5680 = vmatprep.mubr.f32.mxu0 %v5364_v48  ;;  %v5211_v0 = vld [vmem:[#allocation2 + $0x1d0] sm:$0x3]  ;;  %v5410_v4 = vrot.slane %v15143_v15, 2 }
 0x382   : > { %v5385_v61 = vrot.slane %v5211_v0, 2  ;;  %v5219_v0 = vld [vmem:[#allocation2 + $0x230] sm:$0x3] }
 0x383   : > { %v4349_v16 = vpop.f32.mrb[26].mxu0 }
 0x384   : > { %v15255_v39 = vadd.f32 %v4349_v16, %v14912_v28  ;;  %v4351_v47 = vpop.f32.mrb[27].mxu0  ;;  %5681 = vmatmul.mubr.f32.gmra.mrb[132].mxu0 %v5361_v49  ;;  %v5371_v28 = vsel %vm1903_vm2, %v5369_v56, %v5370_v35  ;;  %v5213_v16 = vld [vmem:[#allocation2 + $0x1e0] sm:$0xfc] }
 0x385   : > { %5685 = vmatprep.mubr.f32.mxu0 %v5368_v38  ;;  %v5216_v47 = vld [vmem:[#allocation2 + $0x208] sm:$0x3] }
 0x386   : > { %v5397_v14 = vrot.slane %v5216_v47, 2  ;;  %v5221_v47 = vld [vmem:[#allocation2 + $0x240] sm:$0xfc] }
 0x387   : > { %v4354_v41 = vpop.f32.mrb[28].mxu0 }
 0x388   : > { %v15261_v29 = vadd.f32 %v4354_v41, %v14929_v55  ;;  %v4356_v36 = vpop.f32.mrb[29].mxu0  ;;  %5686 = vmatmul.mubr.f32.gmra.mrb[134].mxu0 %v5366_v23  ;;  %v5376_v55 = vsel %vm1903_vm2, %v5370_v35, %v5375_v59  ;;  %v5389_v35 = vrot.slane %v5213_v16, 2  ;;  %v5215_v41 = vld [vmem:[#allocation2 + $0x200] sm:$0x3] }
 0x389   : > { %5690 = vmatprep.mubr.f32.mxu0 %v5374_v37  ;;  %v5390_v37 = vrot.slane %v15091_v43, 2  ;;  %v5395_v59 = vrot.slane %v5215_v41, 2  ;;  %v5403_v43 = vrot.slane %v15112_v13, 2  ;;  %v5222_v13 = vld [vmem:[#allocation2 + $0x248] sm:$0xfc] }
 0x38a   : > { %v5412_v16 = vrot.slane %v5222_v13, 2  ;;  %v6318_v13 = vld [vmem:[#allocation3 + $0xb8] sm:$0xff] }
 0x38b   : > { %v4359_v60 = vpop.f32.mrb[30].mxu0 }
 0x38c   : > { %v15267_v18 = vadd.f32 %v4359_v60, %v14944_v42  ;;  %v4361_v48 = vpop.f32.mrb[31].mxu0  ;;  %5691 = vmatmul.mubr.f32.gmra.mrb[136].mxu0 %v5371_v28  ;;  %v5381_v42 = vsel %vm1903_vm2, %v5379_v24, %v5380_v11  ;;  %v5220_v60 = vld [vmem:[#allocation2 + $0x238] sm:$0x3]  ;;  %v5399_v24 = vrot.slane %v5217_v27, 2 }
 0x38d   : > { %5695 = vmatprep.mubr.f32.mxu0 %v5378_v21  ;;  %v5398_v21 = vsel %vm1903_vm2, %v5393_v53, %v5397_v14  ;;  %v5407_v3 = vrot.slane %v5220_v60, 2  ;;  %v5405_v53 = vrot.slane %v5219_v0, 2  ;;  %v5228_v0 = vld [vmem:[#allocation2 + $0x298] sm:$0x3] }
 0x38f   : > { %v4364_v49 = vpop.f32.mrb[32].mxu0 }
 0x390   : > { %v15273_v52 = vadd.f32 %v4364_v49, %v14959_v32  ;;  %v4366_v38 = vpop.f32.mrb[33].mxu0  ;;  %5696 = vmatmul.mubr.f32.gmra.mrb[138].mxu0 %v5376_v55  ;;  %v5386_v32 = vsel %vm1903_vm2, %v5380_v11, %v5385_v61  ;;  %v5400_v11 = vrot.slane %v15121_v46, 2  ;;  %v5408_v46 = vsel %vm1903_vm2, %v5403_v43, %v5407_v3 }
 0x391   : > { %5700 = vmatprep.mubr.f32.mxu0 %v5384_v57  ;;  %v5404_v57 = vsel %vm1903_vm2, %v5402_v20, %v5403_v43  ;;  %v6312_v38 = vld [vmem:[#allocation3 + $0x88] sm:$0xff]  ;;  %v6315_v20 = vld [vmem:[#allocation3 + $0xa0] sm:$0xff]  ;;  %v16400_v43 = vld [vmem:[#allocation27_spill] sm:$0xff] }
 0x392   : > { %v5401_v6 = vsel %vm1903_vm2, %v5399_v24, %v5400_v11  ;;  %v5406_v41 = vsel %vm1903_vm2, %v5400_v11, %v5405_v53  ;;  %v16401_v24 = vld [vmem:[#allocation41_spill] sm:$0xff] }
 0x393   : > { %v4369_v1 = vpop.f32.mrb[34].mxu0  ;;  %v5423_v11 = vrot.slane %v16401_v24, 2 }
 0x394   : > { %v15279_v23 = vadd.f32 %v4369_v1, %v14976_v12  ;;  %v4371_v56 = vpop.f32.mrb[35].mxu0  ;;  %5701 = vmatmul.mubr.f32.gmra.mrb[140].mxu0 %v5381_v42  ;;  %v5391_v12 = vsel %vm1903_vm2, %v5389_v35, %v5390_v37  ;;  %v5413_v1 = vrot.slane %v15134_v33, 2  ;;  %v6313_v35 = vld [vmem:[#allocation3 + $0x90] sm:$0xff] }
 0x395   : > { %5705 = vmatprep.mubr.f32.mxu0 %v5388_v44  ;;  %v11767_v44 = vpack.c.bf16 %v6312_v38, %v6311_v34  ;;  %v16402_v34 = vld [vmem:[#allocation28_spill] sm:$0xff] }
 0x396   : > { %v5414_v33 = vsel %vm1903_vm2, %v5412_v16, %v5413_v1 }
 0x397   : > { %v4374_v50 = vpop.f32.mrb[36].mxu0  ;;  %11768 = vmatprep.subr.bf16.mxu1 %v11767_v44 }
 0x398   : > { %v15285_v36 = vadd.f32 %v4374_v50, %v14991_v8  ;;  %v4376_v28 = vpop.f32.mrb[37].mxu0  ;;  %5706 = vmatmul.mubr.f32.gmra.mrb[142].mxu0 %v5386_v32  ;;  %v5396_v8 = vsel %vm1903_vm2, %v5390_v37, %v5395_v59  ;;  %v5224_v32 = vld [vmem:[#allocation2 + $0x268] sm:$0x3]  ;;  %11770 = vmatpush3.bf16.msra.mxu1 %v11767_v44  ;;  %v5409_v50 = vrot.slane %v5221_v47, 2  ;;  %v5227_v47 = vld [vmem:[#allocation2 + $0x290] sm:$0x3] }
 0x399   : > { %5710 = vmatprep.mubr.f32.mxu0 %v5394_v22  ;;  %v5417_v28 = vrot.slane %v5224_v32, 2  ;;  %v5230_v32 = vld [vmem:[#allocation2 + $0x2a8] sm:$0xfc] }
 0x39b   : > { %v4379_v9 = vpop.f32.mrb[38].mxu0 }
 0x39c   : > { %v15291_v48 = vadd.f32 %v4379_v9, %v16399_v54  ;;  %v4381_v55 = vpop.f32.mrb[39].mxu0  ;;  %5711 = vmatmul.mubr.f32.gmra.mrb[144].mxu0 %v5391_v12  ;;  %v5223_v12 = vld [vmem:[#allocation2 + $0x260] sm:$0x3]  ;;  %v5411_v54 = vsel %vm1903_vm2, %v5409_v50, %v5410_v4 }
 0x39d   : > { %5715 = vmatprep.mubr.f32.mxu0 %v5398_v21  ;;  %v5226_v21 = vld [vmem:[#allocation2 + $0x278] sm:$0xfc]  ;;  %v5415_v15 = vrot.slane %v5223_v12, 2  ;;  %v5418_v55 = vsel %vm1903_vm2, %v5413_v1, %v5417_v28  ;;  %v5427_v1 = vrot.slane %v5228_v0, 2 }
 0x39f   : > { %v4384_v49 = vpop.f32.mrb[40].mxu0  ;;  %v5428_v12 = vsel %vm1903_vm2, %v5423_v11, %v5427_v1  ;;  %v6324_v1 = vld [vmem:[#allocation3 + $0xe8] sm:$0xff] }
 0x3a0   : > { %v15297_v42 = vadd.f32 %v4384_v49, %v15025_v10  ;;  %v4386_v61 = vpop.f32.mrb[41].mxu0  ;;  %5716 = vmatmul.mubr.f32.gmra.mrb[146].mxu0 %v5396_v8  ;;  %v6314_v10 = vld [vmem:[#allocation3 + $0x98] sm:$0xff]  ;;  %v5422_v8 = vrot.slane %v5226_v21, 2  ;;  %v6317_v49 = vld [vmem:[#allocation3 + $0xb0] sm:$0xff] }
 0x3a1   : > { %5720 = vmatprep.mubr.f32.mxu0 %v5404_v57  ;;  %v11771_v14 = vpack.c.bf16 %v6314_v10, %v6313_v35  ;;  %v5225_v57 = vld [vmem:[#allocation2 + $0x270] sm:$0xfc]  ;;  %v11779_v44 = vpack.c.bf16 %v6318_v13, %v6317_v49  ;;  %v6319_v35 = vld [vmem:[#allocation3 + $0xc0] sm:$0xff]  ;;  %v6320_v10 = vld [vmem:[#allocation3 + $0xc8] sm:$0xff] }
 0x3a2   : > { %v5419_v53 = vrot.slane %v5225_v57, 2  ;;  %v5424_v16 = vsel %vm1903_vm2, %v5422_v8, %v5423_v11  ;;  %v11783_v50 = vpack.c.bf16 %v6320_v10, %v6319_v35  ;;  %v12486_v21 = vld [vmem:[#allocation2 + $0x2b8] sm:$0xff]  ;;  %v12487_v11 = vld [vmem:[#allocation2 + $0x2b0] sm:$0xff] }
 0x3a3   : > { %v4389_v56 = vpop.f32.mrb[42].mxu0  ;;  %11772 = vmatprep.subr.bf16.mxu1 %v11771_v14  ;;  %v5430_v0 = vrot.slane %v12487_v11, 2  ;;  %v16406_v49 = vld [vmem:[#allocation32_spill] sm:$0xff] }
 0x3a4   : > { %v15303_v37 = vadd.f32 %v4389_v56, %v15040_v17  ;;  %v4391_v22 = vpop.f32.mrb[43].mxu0  ;;  %5721 = vmatmul.mubr.f32.gmra.mrb[148].mxu0 %v5401_v6  ;;  %11774 = vmatpush3.bf16.msra.mxu1 %v11771_v14  ;;  %v6316_v17 = vld [vmem:[#allocation3 + $0xa8] sm:$0xff]  ;;  %v5416_v6 = vsel %vm1903_vm2, %v5410_v4, %v5415_v15  ;;  %v16405_v15 = vld [vmem:[#allocation31_spill] sm:$0xff] }
 0x3a5   : > { %5725 = vmatprep.mubr.f32.mxu0 %v5408_v46  ;;  %v11775_v60 = vpack.c.bf16 %v6316_v17, %v6315_v20  ;;  %v5420_v46 = vrot.slane %v15165_v40, 2  ;;  %v16403_v22 = vld [vmem:[#allocation29_spill] sm:$0xff]  ;;  %v16404_v40 = vld [vmem:[#allocation30_spill] sm:$0xff]  ;;  %v5433_v20 = vrot.slane %v12486_v21, 2  ;;  %v6325_v21 = vld [vmem:[#allocation3 + $0xf0] sm:$0xff] }
 0x3a6   : > { %v5229_v17 = vld [vmem:[#allocation2 + $0x2a0] sm:$0xfc] }
 0x3a7   : > { %v4394_v59 = vpop.f32.mrb[44].mxu0  ;;  %11776 = vmatprep.subr.bf16.mxu1 %v11775_v60  ;;  %v5421_v4 = vsel %vm1903_vm2, %v5419_v53, %v5420_v46  ;;  %v5234_v53 = vld [vmem:[#allocation2 + $0x2d8] sm:$0xfc] }
 0x3a8   : > { %v15309_v27 = vadd.f32 %v4394_v59, %v16400_v43  ;;  %v4396_v9 = vpop.f32.mrb[45].mxu0  ;;  %5726 = vmatmul.mubr.f32.gmra.mrb[150].mxu0 %v5406_v41  ;;  %11778 = vmatpush3.bf16.msra.mxu1 %v11775_v60  ;;  %v5432_v59 = vrot.slane %v5230_v32, 2  ;;  %v6321_v60 = vld [vmem:[#allocation3 + $0xd0] sm:$0xff] }
 0x3a9   : > { %5730 = vmatprep.mubr.f32.mxu0 %v5414_v33  ;;  %11780 = vmatprep.subr.bf16.mxu1 %v11779_v44  ;;  %v5425_v33 = vrot.slane %v5227_v47, 2  ;;  %v5232_v9 = vld [vmem:[#allocation2 + $0x2c8] sm:$0x3]  ;;  %v16407_v47 = vld [vmem:[#allocation33_spill] sm:$0xff] }
 0x3ab   : > { %v4399_v3 = vpop.f32.mrb[46].mxu0  ;;  %v5426_v57 = vsel %vm1903_vm2, %v5420_v46, %v5425_v33 }
 0x3ac   : > { %v15315_v38 = vadd.f32 %v4399_v3, %v16402_v34  ;;  %v4401_v61 = vpop.f32.mrb[47].mxu0  ;;  %5731 = vmatmul.mubr.f32.gmra.mrb[152].mxu0 %v5411_v54  ;;  %11782 = vmatpush3.bf16.msra.mxu1 %v11779_v44  ;;  %v6322_v54 = vld [vmem:[#allocation3 + $0xd8] sm:$0xff]  ;;  %v5429_v3 = vrot.slane %v5229_v17, 2  ;;  %v5434_v34 = vsel %vm1903_vm2, %v5432_v59, %v5433_v20  ;;  %v5231_v44 = vld [vmem:[#allocation2 + $0x2c0] sm:$0x3] }
 0x3ad   : > { %5735 = vmatprep.mubr.f32.mxu0 %v5418_v55  ;;  %11784 = vmatprep.subr.bf16.mxu1 %v11783_v50  ;;  %v11787_v24 = vpack.c.bf16 %v6322_v54, %v6321_v60  ;;  %v5437_v61 = vrot.slane %v5232_v9, 2  ;;  %v5435_v10 = vrot.slane %v5231_v44, 2  ;;  %v6326_v17 = vld [vmem:[#allocation3 + $0xf8] sm:$0xff]  ;;  %v12490_v44 = vld [vmem:[#allocation2 + $0x8] sm:$0xff] }
 0x3ae   : > { %v5431_v35 = vsel %vm1903_vm2, %v5429_v3, %v5430_v0  ;;  %v11795_v54 = vpack.c.bf16 %v6326_v17, %v6325_v21  ;;  %v16410_v3 = vld [vmem:[#allocation36_spill] sm:$0xff]  ;;  %v5237_v21 = vld [vmem:[#allocation2 + $0x300] sm:$0xfc] }
 0x3af   : > { %v4404_v56 = vpop.f32.mrb[48].mxu0 }
 0x3b0   : > { %v4467_v14 = vadd.f32 %v4404_v56, %v16403_v22  ;;  %v4406_v41 = vpop.f32.mrb[49].mxu0  ;;  %5736 = vmatmul.mubr.f32.gmra.mrb[154].mxu0 %v5416_v6  ;;  %11786 = vmatpush3.bf16.msra.mxu1 %v11783_v50  ;;  %v16408_v22 = vld [vmem:[#allocation34_spill] sm:$0xff]  ;;  %v5442_v50 = vrot.slane %v5234_v53, 2  ;;  %v6119_v53 = vld [vmem:[#allocation2 + $0x20] sm:$0x1] }
 0x3b1   : > { %5740 = vmatprep.mubr.f32.mxu0 %v5424_v16  ;;  %11788 = vmatprep.subr.bf16.mxu1 %v11787_v24  ;;  %v6323_v16 = vld [vmem:[#allocation3 + $0xe0] sm:$0xff]  ;;  %v5438_v41 = vsel %vm1903_vm2, %v5433_v20, %v5437_v61 }
 0x3b2   : > { %v15323_v28 = vadd.f32 %v16404_v40, %v4467_v14  ;;  %v11791_v46 = vpack.c.bf16 %v6324_v1, %v6323_v16  ;;  %v5233_v40 = vld [vmem:[#allocation2 + $0x2d0] sm:$0xfc]  ;;  %v12489_v20 = vld [vmem:[#allocation2 + $0x2e0] sm:$0xff]  ;;  %v5238_v1 = vld [vmem:[#allocation2 + $0x308] sm:$0xfc] }
 0x3b3   : > { %v4409_v43 = vpop.f32.mrb[50].mxu0 }
 0x3b4   : > { %v4468_v55 = vadd.f32 %v4409_v43, %v16405_v15  ;;  %v4411_v8 = vpop.f32.mrb[51].mxu0  ;;  %5741 = vmatmul.mubr.f32.gmra.mrb[156].mxu0 %v5421_v4  ;;  %11790 = vmatpush3.bf16.msra.mxu1 %v11787_v24  ;;  %v12488_v4 = vld [vmem:[#allocation2 + $0x2e8] sm:$0xff]  ;;  %v16409_v43 = vld [vmem:[#allocation35_spill] sm:$0xff]  ;;  %v5436_v15 = vsel %vm1903_vm2, %v5430_v0, %v5435_v10  ;;  %v6201_v0 = vrot.slane %v6119_v53, 1 }
 0x3b5   : > { %5745 = vmatprep.mubr.f32.mxu0 %v5428_v12  ;;  %v5443_v33 = vrot.slane %v12488_v4, 2  ;;  %v5236_v12 = vld [vmem:[#allocation2 + $0x2f8] sm:$0x3]  ;;  %11792 = vmatprep.subr.bf16.mxu1 %v11791_v46  ;;  %v5440_v8 = vrot.slane %v12489_v20, 2  ;;  %v12492_v20 = vld [vmem:[#allocation2 + $0x310] sm:$0xff]  ;;  %v16415_v53 = vld [vmem:[#allocation42_spill] sm:$0xff] }
 0x3b6   : > { %v15329_v13 = vadd.f32 %v16406_v49, %v4468_v55  ;;  %v5439_v55 = vrot.slane %v5233_v40, 2  ;;  %v5447_v24 = vrot.slane %v5236_v12, 2  ;;  %v5452_v40 = vrot.slane %v5238_v1, 2  ;;  %v12491_v12 = vld [vmem:[#allocation2 + $0x318] sm:$0xff] }
 0x3b7   : > { %v4414_v6 = vpop.f32.mrb[52].mxu0  ;;  %v5444_v49 = vsel %vm1903_vm2, %v5442_v50, %v5443_v33 }
 0x3b8   : > { %v4469_v56 = vadd.f32 %v4414_v6, %v16407_v47  ;;  %v4416_v32 = vpop.f32.mrb[53].mxu0  ;;  %5746 = vmatmul.mubr.f32.gmra.mrb[158].mxu0 %v5426_v57  ;;  %11794 = vmatpush3.bf16.msra.mxu1 %v11791_v46  ;;  %v6118_v57 = vld [vmem:[#allocation2] sm:$0xfe]  ;;  %v6199_v6 = vrot.slane %v12490_v44, 1  ;;  %v5448_v4 = vsel %vm1903_vm2, %v5443_v33, %v5447_v24 }
 0x3b9   : > { %5750 = vmatprep.mubr.f32.mxu0 %v5434_v34  ;;  %v5235_v34 = vld [vmem:[#allocation2 + $0x2f0] sm:$0x3]  ;;  %11796 = vmatprep.subr.bf16.mxu1 %v11795_v54  ;;  %v6198_v61 = vrot.slane %v6118_v57, 1  ;;  %v16411_v47 = vld [vmem:[#allocation37_spill] sm:$0xff]  ;;  %v5450_v57 = vrot.slane %v12492_v20, 2 }
 0x3ba   : > { %v15335_v14 = vadd.f32 %v16408_v22, %v4469_v56  ;;  %v5445_v10 = vrot.slane %v5235_v34, 2  ;;  %v6202_v22 = vsel %vm1067_vm0, %v6199_v6, %v6201_v0  ;;  %v5239_v34 = vld [vmem:[#allocation2 + $0x320] sm:$0x3] }
 0x3bb   : > { %v4419_v59 = vpop.f32.mrb[54].mxu0  ;;  %v6200_v46 = vsel %vm1067_vm0, %v6198_v61, %v6199_v6  ;;  %v5242_v6 = vld [vmem:[#allocation2 + $0x338] sm:$0xfc] }
 0x3bc   : > { %v4470_v9 = vadd.f32 %v4419_v59, %v16409_v43  ;;  %v4421_v60 = vpop.f32.mrb[55].mxu0  ;;  %5751 = vmatmul.mubr.f32.gmra.mrb[160].mxu0 %v5431_v35  ;;  %11798 = vmatpush3.bf16.msra.mxu1 %v11795_v54  ;;  %v5441_v35 = vsel %vm1903_vm2, %v5439_v55, %v5440_v8  ;;  %v5453_v59 = vrot.slane %v12491_v12, 2  ;;  %v5240_v43 = vld [vmem:[#allocation2 + $0x328] sm:$0x3]  ;;  %v5449_v55 = vrot.slane %v5237_v21, 2 }
 0x3bd   : > { %5755 = vmatprep.mubr.f32.mxu0 %v5438_v41  ;;  %10647 = vmatprep.mubr.f32.mxu1 %v6200_v46  ;;  %v16412_v41 = vld [vmem:[#allocation38_spill] sm:$0xff]  ;;  %v5457_v24 = vrot.slane %v5240_v43, 2  ;;  %v5462_v46 = vrot.slane %v5242_v6, 2  ;;  %v16418_v43 = vld [vmem:[#allocation45_spill] sm:$0xff] }
 0x3be   : > { %v15341_v11 = vadd.f32 %v16410_v3, %v4470_v9  ;;  %v16413_v9 = vld [vmem:[#allocation39_spill] sm:$0xff]  ;;  %v16414_v3 = vld [vmem:[#allocation40_spill] sm:$0xff]  ;;  %v5454_v33 = vsel %vm1903_vm2, %v5452_v40, %v5453_v59  ;;  %v5451_v0 = vsel %vm1903_vm2, %v5449_v55, %v5450_v57 }
 0x3bf   : > { %v4424_v16 = vpop.f32.mrb[56].mxu0  ;;  %10648 = vmatmul.mubr.f32.vlgmr.msra.gmra.mrb[144].mxu1 %v6202_v22 }
 0x3c0   : > { %v4471_v56 = vadd.f32 %v4424_v16, %v16411_v47  ;;  %v4426_v32 = vpop.f32.mrb[57].mxu0  ;;  %5756 = vmatmul.mubr.f32.gmra.mrb[162].mxu0 %v5436_v15  ;;  %v5446_v15 = vsel %vm1903_vm2, %v5440_v8, %v5445_v10  ;;  %v5455_v8 = vrot.slane %v5239_v34, 2  ;;  %v16416_v47 = vld [vmem:[#allocation43_spill] sm:$0xff] }
 0x3c1   : > { %5760 = vmatprep.mubr.f32.mxu0 %v5444_v49  ;;  %v5458_v32 = vsel %vm1903_vm2, %v5453_v59, %v5457_v24  ;;  %v5241_v10 = vld [vmem:[#allocation2 + $0x330] sm:$0xfc]  ;;  %v5243_v59 = vld [vmem:[#allocation2 + $0x350] sm:$0x3] }
 0x3c2   : > { %v15349_v50 = vadd.f32 %v16412_v41, %v4471_v56  ;;  %v5244_v41 = vld [vmem:[#allocation2 + $0x358] sm:$0x3]  ;;  %v5456_v21 = vsel %vm1903_vm2, %v5450_v57, %v5455_v8 }
 0x3c3   : > { %v4429_v17 = vpop.f32.mrb[58].mxu0 }
 0x3c4   : > { %v4472_v60 = vadd.f32 %v4429_v17, %v16413_v9  ;;  %v4431_v54 = vpop.f32.mrb[59].mxu0  ;;  %5761 = vmatmul.mubr.f32.gmra.mrb[164].mxu0 %v5441_v35  ;;  %v5463_v35 = vrot.slane %v12490_v44, 2  ;;  %v5459_v17 = vrot.slane %v5241_v10, 2 }
 0x3c5   : > { %5765 = vmatprep.mubr.f32.mxu0 %v5448_v4  ;;  %v16417_v4 = vld [vmem:[#allocation44_spill] sm:$0xff]  ;;  %v5467_v54 = vrot.slane %v5244_v41, 2 }
 0x3c6   : > { %v15355_v49 = vadd.f32 %v16414_v3, %v4472_v60  ;;  %v5464_v60 = vsel %vm1903_vm2, %v5462_v46, %v5463_v35  ;;  %v5461_v20 = vsel %vm1903_vm2, %v5459_v17, %v5463_v35  ;;  %v5465_v3 = vrot.slane %v5243_v59, 2 }
 0x3c7   : > { %v4434_v61 = vpop.f32.mrb[60].mxu0  ;;  %v5468_v57 = vsel %vm1903_vm2, %v5463_v35, %v5467_v54 }
 0x3c8   : > { %v4473_v16 = vadd.f32 %v4434_v61, %v16415_v53  ;;  %v4436_v1 = vpop.f32.mrb[61].mxu0  ;;  %5766 = vmatmul.mubr.f32.gmra.mrb[166].mxu0 %v5446_v15  ;;  %v5466_v61 = vsel %vm1903_vm2, %v5463_v35, %v5465_v3 }
 0x3c9   : > { %5770 = vmatprep.mubr.f32.mxu0 %v5454_v33 }
 0x3ca   : > { %v15361_v56 = vadd.f32 %v16416_v47, %v4473_v16 }
 0x3cb   : > { %v4439_v22 = vpop.f32.mrb[62].mxu0 }
 0x3cc   : > { %v4474_v40 = vadd.f32 %v4439_v22, %v16417_v4  ;;  %v4441_v12 = vpop.f32.mrb[63].mxu0  ;;  %5771 = vmatmul.mubr.f32.gmra.mrb[168].mxu0 %v5451_v0 }
 0x3cd   : > { %5775 = vmatprep.mubr.f32.mxu0 %v5458_v32 }
 0x3ce   : > { %v15367_v9 = vadd.f32 %v16418_v43, %v4474_v40 }
 0x3cf   : > { %v4990_v15 = vpop.f32.mrb[64].mxu0 }
 0x3d0   : > { %v15371_v44 = vadd.f32 %v4990_v15, %v15179_v58  ;;  %v4992_v55 = vpop.f32.mrb[65].mxu0  ;;  %5776 = vmatmul.mubr.f32.gmra.mrb[170].mxu0 %v5456_v21 }
 0x3d1   : > { %5780 = vmatprep.mubr.f32.mxu0 %v5464_v60 }
 0x3d3   : > { %v4995_v33 = vpop.f32.mrb[66].mxu0 }
 0x3d4   : > { %v15376_v24 = vadd.f32 %v4995_v33, %v15184_v30  ;;  %v4997_v34 = vpop.f32.mrb[67].mxu0  ;;  %5781 = vmatmul.mubr.f32.gmra.mrb[172].mxu0 %v5461_v20  ;;  %v6103_v33 = vld [vmem:[#allocation3 + $0x8] sm:$0xff] }
 0x3d5   : > { %5785 = vmatprep.mubr.f32.mxu0 %v5468_v57  ;;  %v6102_v57 = vld [vmem:[#allocation3] sm:$0xff] }
 0x3d7   : > { %v5000_v6 = vpop.f32.mrb[68].mxu0 }
 0x3d8   : > { %v15380_v58 = vadd.f32 %v5000_v6, %v15189_v51  ;;  %v5002_v53 = vpop.f32.mrb[69].mxu0  ;;  %5786 = vmatmul.mubr.f32.gmra.mrb[174].mxu0 %v5466_v61 }
 0x3db   : > { %v5005_v16 = vpop.f32.mrb[70].mxu0 }
 0x3dc   : > { %v15383_v1 = vadd.f32 %v5005_v16, %v15195_v62  ;;  %v5007_v0 = vpop.f32.mrb[71].mxu0  ;;  %v6104_v16 = vld [vmem:[#allocation3 + $0x10] sm:$0xff] }
 0x3dd   : > { %v6105_v0 = vld [vmem:[#allocation3 + $0x18] sm:$0xff] }
 0x3df   : > { %v5010_v8 = vpop.f32.mrb[72].mxu0 }
 0x3e0   : > { %v15386_v30 = vadd.f32 %v5010_v8, %v15201_v45  ;;  %v5012_v47 = vpop.f32.mrb[73].mxu0 }
 0x3e3   : > { %v5015_v32 = vpop.f32.mrb[74].mxu0 }
 0x3e4   : > { %v15389_v46 = vadd.f32 %v5015_v32, %v15207_v31  ;;  %v5017_v35 = vpop.f32.mrb[75].mxu0 }
 0x3e7   : > { %v5020_v10 = vpop.f32.mrb[76].mxu0 }
 0x3e8   : > { %v15392_v51 = vadd.f32 %v5020_v10, %v15213_v19  ;;  %v5022_v22 = vpop.f32.mrb[77].mxu0 }
 0x3e9   : > { %v6106_v22 = vld [vmem:[#allocation3 + $0x20] sm:$0xff] }
 0x3eb   : > { %v5025_v41 = vpop.f32.mrb[78].mxu0 }
 0x3ec   : > { %v15395_v62 = vadd.f32 %v5025_v41, %v15219_v2  ;;  %v5027_v4 = vpop.f32.mrb[79].mxu0  ;;  %v6107_v41 = vld [vmem:[#allocation3 + $0x28] sm:$0xff] }
 0x3ef   : > { %v5030_v40 = vpop.f32.mrb[80].mxu0 }
 0x3f0   : > { %v15398_v45 = vadd.f32 %v5030_v40, %v15225_v7  ;;  %v5032_v12 = vpop.f32.mrb[81].mxu0 }
 0x3f3   : > { %v5035_v21 = vpop.f32.mrb[82].mxu0 }
 0x3f4   : > { %v15401_v31 = vadd.f32 %v5035_v21, %v15231_v5  ;;  %v5037_v17 = vpop.f32.mrb[83].mxu0 }
 0x3f7   : > { %v5040_v43 = vpop.f32.mrb[84].mxu0 }
 0x3f8   : > { %v15404_v19 = vadd.f32 %v5040_v43, %v15237_v26  ;;  %v5042_v60 = vpop.f32.mrb[85].mxu0  ;;  %v11799_v26 = vpack.c.bf16 %v6103_v33, %v6102_v57  ;;  %v6108_v43 = vld [vmem:[#allocation3 + $0x30] sm:$0xff]  ;;  %v6111_v57 = vld [vmem:[#allocation3 + $0x48] sm:$0xff] }
 0x3f9   : > { %v6109_v60 = vld [vmem:[#allocation3 + $0x38] sm:$0xff] }
 0x3fa   : > { %11800 = vmatprep.subr.bf16.mxu1 %v11799_v26 }
 0x3fb   : > { %v5045_v54 = vpop.f32.mrb[86].mxu0  ;;  %11802 = vmatpush3.bf16.msra.mxu1 %v11799_v26 }
 0x3fc   : > { %v15407_v2 = vadd.f32 %v5045_v54, %v15243_v63  ;;  %v5047_v59 = vpop.f32.mrb[87].mxu0 }
 0x3ff   : > { %v5050_v15 = vpop.f32.mrb[88].mxu0 }
 0x400   : > { %v15410_v7 = vadd.f32 %v5050_v15, %v15249_v25  ;;  %v5052_v55 = vpop.f32.mrb[89].mxu0 }
 0x403   : > { %v5055_v20 = vpop.f32.mrb[90].mxu0 }
 0x404   : > { %v15413_v5 = vadd.f32 %v5055_v20, %v15255_v39  ;;  %v5057_v3 = vpop.f32.mrb[91].mxu0  ;;  %v11803_v39 = vpack.c.bf16 %v6105_v0, %v6104_v16  ;;  %v6113_v16 = vld [vmem:[#allocation3 + $0x58] sm:$0xff] }
 0x405   : > { %v6110_v3 = vld [vmem:[#allocation3 + $0x40] sm:$0xff] }
 0x406   : > { %11804 = vmatprep.subr.bf16.mxu1 %v11803_v39 }
 0x407   : > { %v5060_v34 = vpop.f32.mrb[92].mxu0  ;;  %11806 = vmatpush3.bf16.msra.mxu1 %v11803_v39  ;;  %v15448_v39 = vld [vmem:[%s16228_s3] ss:$0 sm:$0xff] }
 0x408   : > { %v15416_v61 = vadd.f32 %v5060_v34, %v15261_v29  ;;  %v5062_v63 = vpop.f32.mrb[93].mxu0 }
 0x40b   : > { %v5065_v6 = vpop.f32.mrb[94].mxu0 }
 0x40c   : > { %v15419_v25 = vadd.f32 %v5065_v6, %v15267_v18  ;;  %v5067_v53 = vpop.f32.mrb[95].mxu0  ;;  %v11807_v18 = vpack.c.bf16 %v6107_v41, %v6106_v22 }
 0x40d   : > { %v6112_v53 = vld [vmem:[#allocation3 + $0x50] sm:$0xff] }
 0x40e   : > { %11808 = vmatprep.subr.bf16.mxu1 %v11807_v18 }
 0x40f   : > { %v5070_v8 = vpop.f32.mrb[96].mxu0  ;;  %11810 = vmatpush3.bf16.msra.mxu1 %v11807_v18 }
 0x410   : > { %v15422_v47 = vadd.f32 %v5070_v8, %v15273_v52  ;;  %v5072_v32 = vpop.f32.mrb[97].mxu0 }
 0x411   : > { %v6114_v32 = vld [vmem:[#allocation3 + $0x60] sm:$0xff] }
 0x413   : > { %v5075_v29 = vpop.f32.mrb[98].mxu0 }
 0x414   : > { %v15425_v35 = vadd.f32 %v5075_v29, %v15279_v23  ;;  %v5077_v10 = vpop.f32.mrb[99].mxu0  ;;  %v11811_v23 = vpack.c.bf16 %v6109_v60, %v6108_v43  ;;  %v6115_v29 = vld [vmem:[#allocation3 + $0x68] sm:$0xff] }
 0x415   : > { %v11823_v10 = vpack.c.bf16 %v6115_v29, %v6114_v32 }
 0x416   : > { %11812 = vmatprep.subr.bf16.mxu1 %v11811_v23 }
 0x417   : > { %v5080_v4 = vpop.f32.mrb[100].mxu0  ;;  %11814 = vmatpush3.bf16.msra.mxu1 %v11811_v23 }
 0x418   : > { %v15428_v40 = vadd.f32 %v5080_v4, %v15285_v36  ;;  %v5082_v12 = vpop.f32.mrb[101].mxu0 }
 0x419   : > { %v6116_v12 = vld [vmem:[#allocation3 + $0x70] sm:$0xff] }
 0x41b   : > { %v5085_v52 = vpop.f32.mrb[102].mxu0 }
 0x41c   : > { %v15431_v21 = vadd.f32 %v5085_v52, %v15291_v48  ;;  %v5087_v17 = vpop.f32.mrb[103].mxu0  ;;  %v11815_v48 = vpack.c.bf16 %v6111_v57, %v6110_v3  ;;  %v6117_v52 = vld [vmem:[#allocation3 + $0x78] sm:$0xff]  ;;  %v6954_v3 = vld [vmem:[#allocation3 + $0x100] sm:$0xff]  ;;  %v6955_v57 = vld [vmem:[#allocation3 + $0x108] sm:$0xff] }
 0x41d   : > { %v11827_v17 = vpack.c.bf16 %v6117_v52, %v6116_v12 }
 0x41e   : > { %11816 = vmatprep.subr.bf16.mxu1 %v11815_v48 }
 0x41f   : > { %v5090_v54 = vpop.f32.mrb[104].mxu0  ;;  %11818 = vmatpush3.bf16.msra.mxu1 %v11815_v48 }
 0x420   : > { %v15434_v59 = vadd.f32 %v5090_v54, %v15297_v42  ;;  %v5092_v15 = vpop.f32.mrb[105].mxu0 }
 0x423   : > { %v5095_v36 = vpop.f32.mrb[106].mxu0 }
 0x424   : > { %v15437_v55 = vadd.f32 %v5095_v36, %v15303_v37  ;;  %v5097_v20 = vpop.f32.mrb[107].mxu0  ;;  %v11819_v37 = vpack.c.bf16 %v6113_v16, %v6112_v53 }
 0x426   : > { %11820 = vmatprep.subr.bf16.mxu1 %v11819_v37 }
 0x427   : > { %v5100_v33 = vpop.f32.mrb[108].mxu0  ;;  %11822 = vmatpush3.bf16.msra.mxu1 %v11819_v37 }
 0x428   : > { %v15440_v26 = vadd.f32 %v5100_v33, %v15309_v27  ;;  %v5102_v34 = vpop.f32.mrb[109].mxu0  ;;  %11824 = vmatprep.subr.bf16.mxu1 %v11823_v10 }
 0x42b   : > { %v5105_v42 = vpop.f32.mrb[110].mxu0  ;;  %11826 = vmatpush3.bf16.msra.mxu1 %v11823_v10 }
 0x42c   : > { %v15443_v63 = vadd.f32 %v5105_v42, %v15315_v38  ;;  %v5107_v6 = vpop.f32.mrb[111].mxu0  ;;  %11828 = vmatprep.subr.bf16.mxu1 %v11827_v17 }
 0x42d   : > { %v15460_v6 = vpack.c.bf16 %v6955_v57, %v6954_v3 }
 0x42f   : > { %v5632_v0 = vpop.f32.mrb[112].mxu0  ;;  %11830 = vmatpush3.bf16.msra.mxu1 %v11827_v17 }
 0x430   : > { %v5791_v27 = vadd.f32 %v5632_v0, %v15371_v44  ;;  %v5634_v8 = vpop.f32.mrb[113].mxu0  ;;  %11832 = vmatprep.subr.bf16.mxu1 %v15460_v6 }
 0x432   : > { %v5830_v38 = vadd.f32 %v15448_v39, %v5791_v27 }
 0x433   : > { %v5637_v22 = vpop.f32.mrb[114].mxu0 }
 0x434   : > { %v5862_v41 = vmax.f32 %v5830_v38, 0.0  ;;  %v5792_v18 = vadd.f32 %v5637_v22, %v15376_v24  ;;  %v5639_v4 = vpop.f32.mrb[115].mxu0 }
 0x436   : > { %v5926_v43 = vrot.slane %v5862_v41, 7  ;;  %v5831_v44 = vadd.f32 %v15448_v39, %v5792_v18 }
 0x437   : > { %v5642_v60 = vpop.f32.mrb[116].mxu0 }
 0x438   : > { %6022 = vst [vmem:[#allocation2 + $0x30] sm:$0xfe] %v5926_v43  ;;  %v5863_v23 = vmax.f32 %v5831_v44, 0.0  ;;  %v5793_v54 = vadd.f32 %v5642_v60, %v15380_v58  ;;  %v5644_v15 = vpop.f32.mrb[117].mxu0 }
 0x43a   : > { %v5927_v36 = vrot.slane %v5863_v23, 7  ;;  %v5832_v20 = vadd.f32 %v15448_v39, %v5793_v54 }
 0x43b   : > { %v5647_v24 = vpop.f32.mrb[118].mxu0 }
 0x43c   : > { %v15457_v48 = vsel %vm457_vm1, %v5926_v43, %v5927_v36  ;;  %6024 = vst [vmem:[#allocation2 + $0x50] sm:$0x1] %v5927_v36  ;;  %v5864_v33 = vmax.f32 %v5832_v20, 0.0  ;;  %v5794_v34 = vadd.f32 %v5647_v24, %v15383_v1  ;;  %v5649_v42 = vpop.f32.mrb[119].mxu0 }
 0x43d   : > { %6023 = vst [vmem:[#allocation2 + $0x40] sm:$0xff] %v15457_v48  ;;  %v6204_v1 = vrot.slane %v15457_v48, 1 }
 0x43e   : > { %v5929_v58 = vrot.slane %v5864_v33, 7  ;;  %v5833_v53 = vadd.f32 %v15448_v39, %v5794_v34 }
 0x43f   : > { %v5652_v16 = vpop.f32.mrb[120].mxu0  ;;  %v6120_v37 = vld [vmem:[#allocation2 + $0x30] sm:$0xfe] }
 0x440   : > { %6025 = vst [vmem:[#allocation2 + $0x60] sm:$0xfe] %v5929_v58  ;;  %v5865_v0 = vmax.f32 %v5833_v53, 0.0  ;;  %v5795_v27 = vadd.f32 %v5652_v16, %v15386_v30  ;;  %v5654_v8 = vpop.f32.mrb[121].mxu0  ;;  %v6203_v32 = vrot.slane %v6120_v37, 1 }
 0x442   : > { %v5930_v29 = vrot.slane %v5865_v0, 7  ;;  %v5834_v10 = vadd.f32 %v15448_v39, %v5795_v27  ;;  %v6205_v38 = vsel %vm1067_vm0, %v6203_v32, %v6204_v1 }
 0x443   : > { %v5657_v22 = vpop.f32.mrb[122].mxu0  ;;  %10650 = vmatprep.mubr.f32.mxu1 %v6205_v38  ;;  %v6121_v41 = vld [vmem:[#allocation2 + $0x50] sm:$0x1] }
 0x444   : > { %v15470_v18 = vsel %vm457_vm1, %v5929_v58, %v5930_v29  ;;  %6027 = vst [vmem:[#allocation2 + $0x80] sm:$0x1] %v5930_v29  ;;  %v5866_v4 = vmax.f32 %v5834_v10, 0.0  ;;  %v5796_v12 = vadd.f32 %v5657_v22, %v15389_v46  ;;  %v5659_v30 = vpop.f32.mrb[123].mxu0  ;;  %v6206_v52 = vrot.slane %v6121_v41, 1 }
 0x445   : > { %6026 = vst [vmem:[#allocation2 + $0x70] sm:$0xff] %v15470_v18  ;;  %v6209_v46 = vrot.slane %v15470_v18, 1 }
 0x446   : > { %v5932_v17 = vrot.slane %v5866_v4, 7  ;;  %v5835_v43 = vadd.f32 %v15448_v39, %v5796_v12  ;;  %v6207_v44 = vsel %vm1067_vm0, %v6204_v1, %v6206_v52 }
 0x447   : > { %v5662_v60 = vpop.f32.mrb[124].mxu0  ;;  %10651 = vmatmul.mubr.f32.gmra.mrb[146].mxu1 %v6207_v44  ;;  %v6122_v23 = vld [vmem:[#allocation2 + $0x60] sm:$0xfe] }
 0x448   : > { %6028 = vst [vmem:[#allocation2 + $0x90] sm:$0xfe] %v5932_v17  ;;  %v5867_v54 = vmax.f32 %v5835_v43, 0.0  ;;  %v5797_v15 = vadd.f32 %v5662_v60, %v15392_v51  ;;  %v5664_v36 = vpop.f32.mrb[125].mxu0  ;;  %v6208_v20 = vrot.slane %v6122_v23, 1 }
 0x44a   : > { %v5933_v24 = vrot.slane %v5867_v54, 7  ;;  %v5836_v3 = vadd.f32 %v15448_v39, %v5797_v15  ;;  %v6210_v57 = vsel %vm1067_vm0, %v6208_v20, %v6209_v46 }
 0x44b   : > { %v5667_v33 = vpop.f32.mrb[126].mxu0  ;;  %10653 = vmatprep.mubr.f32.mxu1 %v6210_v57  ;;  %v6123_v34 = vld [vmem:[#allocation2 + $0x80] sm:$0x1] }
 0x44c   : > { %v15481_v42 = vsel %vm457_vm1, %v5932_v17, %v5933_v24  ;;  %6030 = vst [vmem:[#allocation2 + $0xb0] sm:$0x1] %v5933_v24  ;;  %v5868_v58 = vmax.f32 %v5836_v3, 0.0  ;;  %v5798_v53 = vadd.f32 %v5667_v33, %v15395_v62  ;;  %v5669_v51 = vpop.f32.mrb[127].mxu0  ;;  %v6211_v16 = vrot.slane %v6123_v34, 1 }
 0x44d   : > { %6029 = vst [vmem:[#allocation2 + $0xa0] sm:$0xff] %v15481_v42  ;;  %v6214_v62 = vrot.slane %v15481_v42, 1 }
 0x44e   : > { %v5935_v37 = vrot.slane %v5868_v58, 7  ;;  %v5837_v0 = vadd.f32 %v15448_v39, %v5798_v53  ;;  %v6212_v27 = vsel %vm1067_vm0, %v6209_v46, %v6211_v16 }
 0x44f   : > { %v5672_v8 = vpop.f32.mrb[128].mxu0  ;;  %10654 = vmatmul.mubr.f32.gmra.mrb[148].mxu1 %v6212_v27  ;;  %v6124_v32 = vld [vmem:[#allocation2 + $0x90] sm:$0xfe] }
 0x450   : > { %6031 = vst [vmem:[#allocation2 + $0xc0] sm:$0xfe] %v5935_v37  ;;  %v5869_v1 = vmax.f32 %v5837_v0, 0.0  ;;  %v5799_v29 = vadd.f32 %v5672_v8, %v15398_v45  ;;  %v5674_v10 = vpop.f32.mrb[129].mxu0  ;;  %v6213_v38 = vrot.slane %v6124_v32, 1 }
 0x452   : > { %v5936_v22 = vrot.slane %v5869_v1, 7  ;;  %v5838_v41 = vadd.f32 %v15448_v39, %v5799_v29  ;;  %v6215_v4 = vsel %vm1067_vm0, %v6213_v38, %v6214_v62 }
 0x453   : > { %v5677_v12 = vpop.f32.mrb[130].mxu0  ;;  %10656 = vmatprep.mubr.f32.mxu1 %v6215_v4  ;;  %v6125_v30 = vld [vmem:[#allocation2 + $0xb0] sm:$0x1] }
 0x454   : > { %v15492_v52 = vsel %vm457_vm1, %v5935_v37, %v5936_v22  ;;  %6033 = vst [vmem:[#allocation2 + $0xe0] sm:$0x1] %v5936_v22  ;;  %v5870_v17 = vmax.f32 %v5838_v41, 0.0  ;;  %v5800_v43 = vadd.f32 %v5677_v12, %v15401_v31  ;;  %v5679_v45 = vpop.f32.mrb[131].mxu0  ;;  %v6216_v44 = vrot.slane %v6125_v30, 1 }
 0x455   : > { %6032 = vst [vmem:[#allocation2 + $0xd0] sm:$0xff] %v15492_v52  ;;  %v6219_v31 = vrot.slane %v15492_v52, 1 }
 0x456   : > { %v5938_v60 = vrot.slane %v5870_v17, 7  ;;  %v5839_v23 = vadd.f32 %v15448_v39, %v5800_v43  ;;  %v6217_v54 = vsel %vm1067_vm0, %v6214_v62, %v6216_v44 }
 0x457   : > { %v5682_v15 = vpop.f32.mrb[132].mxu0  ;;  %10657 = vmatmul.mubr.f32.gmra.mrb[150].mxu1 %v6217_v54  ;;  %v6126_v36 = vld [vmem:[#allocation2 + $0xc0] sm:$0xfe] }
 0x458   : > { %6034 = vst [vmem:[#allocation2 + $0xf0] sm:$0xfe] %v5938_v60  ;;  %v5871_v20 = vmax.f32 %v5839_v23, 0.0  ;;  %v5801_v46 = vadd.f32 %v5682_v15, %v15404_v19  ;;  %v5684_v24 = vpop.f32.mrb[133].mxu0  ;;  %v6218_v3 = vrot.slane %v6126_v36, 1 }
 0x45a   : > { %v5939_v57 = vrot.slane %v5871_v20, 7  ;;  %v5840_v33 = vadd.f32 %v15448_v39, %v5801_v46  ;;  %v6220_v34 = vsel %vm1067_vm0, %v6218_v3, %v6219_v31 }
 0x45b   : > { %v5687_v58 = vpop.f32.mrb[134].mxu0  ;;  %10659 = vmatprep.mubr.f32.mxu1 %v6220_v34  ;;  %v6127_v53 = vld [vmem:[#allocation2 + $0xe0] sm:$0x1] }
 0x45c   : > { %v15503_v51 = vsel %vm457_vm1, %v5938_v60, %v5939_v57  ;;  %6036 = vst [vmem:[#allocation2 + $0x110] sm:$0x1] %v5939_v57  ;;  %v5872_v16 = vmax.f32 %v5840_v33, 0.0  ;;  %v5802_v37 = vadd.f32 %v5687_v58, %v15407_v2  ;;  %v5689_v19 = vpop.f32.mrb[135].mxu0  ;;  %v6221_v0 = vrot.slane %v6127_v53, 1 }
 0x45d   : > { %6035 = vst [vmem:[#allocation2 + $0x100] sm:$0xff] %v15503_v51  ;;  %v6224_v2 = vrot.slane %v15503_v51, 1 }
 0x45e   : > { %v5941_v27 = vrot.slane %v5872_v16, 7  ;;  %v5841_v8 = vadd.f32 %v15448_v39, %v5802_v37  ;;  %v6222_v32 = vsel %vm1067_vm0, %v6219_v31, %v6221_v0 }
 0x45f   : > { %v5692_v1 = vpop.f32.mrb[136].mxu0  ;;  %10660 = vmatmul.mubr.f32.gmra.mrb[152].mxu1 %v6222_v32  ;;  %v6128_v29 = vld [vmem:[#allocation2 + $0xf0] sm:$0xfe] }
 0x460   : > { %6037 = vst [vmem:[#allocation2 + $0x120] sm:$0xfe] %v5941_v27  ;;  %v5873_v10 = vmax.f32 %v5841_v8, 0.0  ;;  %v5803_v38 = vadd.f32 %v5692_v1, %v15410_v7  ;;  %v5694_v62 = vpop.f32.mrb[137].mxu0  ;;  %v6223_v22 = vrot.slane %v6128_v29, 1 }
 0x462   : > { %v5942_v41 = vrot.slane %v5873_v10, 7  ;;  %v5842_v4 = vadd.f32 %v15448_v39, %v5803_v38  ;;  %v6225_v12 = vsel %vm1067_vm0, %v6223_v22, %v6224_v2 }
 0x463   : > { %v5697_v30 = vpop.f32.mrb[138].mxu0  ;;  %10662 = vmatprep.mubr.f32.mxu1 %v6225_v12  ;;  %v6129_v17 = vld [vmem:[#allocation2 + $0x110] sm:$0x1] }
 0x464   : > { %v15514_v43 = vsel %vm457_vm1, %v5941_v27, %v5942_v41  ;;  %6039 = vst [vmem:[#allocation2 + $0x140] sm:$0x1] %v5942_v41  ;;  %v5874_v45 = vmax.f32 %v5842_v4, 0.0  ;;  %v5804_v44 = vadd.f32 %v5697_v30, %v15413_v5  ;;  %v5699_v7 = vpop.f32.mrb[139].mxu0  ;;  %v6226_v60 = vrot.slane %v6129_v17, 1 }
 0x465   : > { %6038 = vst [vmem:[#allocation2 + $0x130] sm:$0xff] %v15514_v43  ;;  %v6229_v5 = vrot.slane %v15514_v43, 1 }
 0x466   : > { %v5944_v23 = vrot.slane %v5874_v45, 7  ;;  %v5843_v54 = vadd.f32 %v15448_v39, %v5804_v44  ;;  %v6227_v15 = vsel %vm1067_vm0, %v6224_v2, %v6226_v60 }
 0x467   : > { %v5702_v36 = vpop.f32.mrb[140].mxu0  ;;  %10663 = vmatmul.mubr.f32.gmra.mrb[154].mxu1 %v6227_v15  ;;  %v6130_v20 = vld [vmem:[#allocation2 + $0x120] sm:$0xfe] }
 0x468   : > { %6040 = vst [vmem:[#allocation2 + $0x150] sm:$0xfe] %v5944_v23  ;;  %v5875_v46 = vmax.f32 %v5843_v54, 0.0  ;;  %v5805_v24 = vadd.f32 %v5702_v36, %v15416_v61  ;;  %v5704_v3 = vpop.f32.mrb[141].mxu0  ;;  %v6228_v31 = vrot.slane %v6130_v20, 1 }
 0x46a   : > { %v5945_v57 = vrot.slane %v5875_v46, 7  ;;  %v5844_v33 = vadd.f32 %v15448_v39, %v5805_v24  ;;  %v6230_v34 = vsel %vm1067_vm0, %v6228_v31, %v6229_v5 }
 0x46b   : > { %v5707_v58 = vpop.f32.mrb[142].mxu0  ;;  %10665 = vmatprep.mubr.f32.mxu1 %v6230_v34  ;;  %v6131_v53 = vld [vmem:[#allocation2 + $0x140] sm:$0x1] }
 0x46c   : > { %v15525_v16 = vsel %vm457_vm1, %v5944_v23, %v5945_v57  ;;  %6042 = vst [vmem:[#allocation2 + $0x170] sm:$0x1] %v5945_v57  ;;  %v5876_v37 = vmax.f32 %v5844_v33, 0.0  ;;  %v5806_v19 = vadd.f32 %v5707_v58, %v15419_v25  ;;  %v5709_v61 = vpop.f32.mrb[143].mxu0  ;;  %v6231_v0 = vrot.slane %v6131_v53, 1 }
 0x46d   : > { %6041 = vst [vmem:[#allocation2 + $0x160] sm:$0xff] %v15525_v16  ;;  %v6234_v25 = vrot.slane %v15525_v16, 1 }
 0x46e   : > { %v5947_v27 = vrot.slane %v5876_v37, 7  ;;  %v5845_v8 = vadd.f32 %v15448_v39, %v5806_v19  ;;  %v6232_v32 = vsel %vm1067_vm0, %v6229_v5, %v6231_v0 }
 0x46f   : > { %v5712_v1 = vpop.f32.mrb[144].mxu0  ;;  %10666 = vmatmul.mubr.f32.gmra.mrb[156].mxu1 %v6232_v32  ;;  %v6132_v29 = vld [vmem:[#allocation2 + $0x150] sm:$0xfe] }
 0x470   : > { %6043 = vst [vmem:[#allocation2 + $0x180] sm:$0xfe] %v5947_v27  ;;  %v5877_v10 = vmax.f32 %v5845_v8, 0.0  ;;  %v5807_v38 = vadd.f32 %v5712_v1, %v15422_v47  ;;  %v5714_v62 = vpop.f32.mrb[145].mxu0  ;;  %v6233_v22 = vrot.slane %v6132_v29, 1 }
 0x472   : > { %v5948_v2 = vrot.slane %v5877_v10, 7  ;;  %v5846_v41 = vadd.f32 %v15448_v39, %v5807_v38  ;;  %v6235_v4 = vsel %vm1067_vm0, %v6233_v22, %v6234_v25 }
 0x473   : > { %v5717_v12 = vpop.f32.mrb[146].mxu0  ;;  %10668 = vmatprep.mubr.f32.mxu1 %v6235_v4  ;;  %v6133_v30 = vld [vmem:[#allocation2 + $0x170] sm:$0x1] }
 0x474   : > { %v15536_v17 = vsel %vm457_vm1, %v5947_v27, %v5948_v2  ;;  %6045 = vst [vmem:[#allocation2 + $0x1a0] sm:$0x1] %v5948_v2  ;;  %v5878_v45 = vmax.f32 %v5846_v41, 0.0  ;;  %v5808_v44 = vadd.f32 %v5717_v12, %v15425_v35  ;;  %v5719_v47 = vpop.f32.mrb[147].mxu0  ;;  %v6236_v7 = vrot.slane %v6133_v30, 1 }
 0x475   : > { %6044 = vst [vmem:[#allocation2 + $0x190] sm:$0xff] %v15536_v17  ;;  %v6239_v35 = vrot.slane %v15536_v17, 1 }
 0x476   : > { %v5950_v60 = vrot.slane %v5878_v45, 7  ;;  %v5847_v23 = vadd.f32 %v15448_v39, %v5808_v44  ;;  %v6237_v54 = vsel %vm1067_vm0, %v6234_v25, %v6236_v7 }
 0x477   : > { %v5722_v15 = vpop.f32.mrb[148].mxu0  ;;  %10669 = vmatmul.mubr.f32.gmra.mrb[158].mxu1 %v6237_v54  ;;  %v6134_v36 = vld [vmem:[#allocation2 + $0x180] sm:$0xfe] }
 0x478   : > { %6046 = vst [vmem:[#allocation2 + $0x1b0] sm:$0xfe] %v5950_v60  ;;  %v5879_v20 = vmax.f32 %v5847_v23, 0.0  ;;  %v5809_v46 = vadd.f32 %v5722_v15, %v15428_v40  ;;  %v5724_v24 = vpop.f32.mrb[149].mxu0  ;;  %v6238_v3 = vrot.slane %v6134_v36, 1 }
 0x47a   : > { %v5951_v31 = vrot.slane %v5879_v20, 7  ;;  %v5848_v5 = vadd.f32 %v15448_v39, %v5809_v46  ;;  %v6240_v57 = vsel %vm1067_vm0, %v6238_v3, %v6239_v35 }
 0x47b   : > { %v5727_v33 = vpop.f32.mrb[150].mxu0  ;;  %10671 = vmatprep.mubr.f32.mxu1 %v6240_v57  ;;  %v6135_v34 = vld [vmem:[#allocation2 + $0x1a0] sm:$0x1] }
 0x47c   : > { %v15547_v58 = vsel %vm457_vm1, %v5950_v60, %v5951_v31  ;;  %6048 = vst [vmem:[#allocation2 + $0x1d0] sm:$0x1] %v5951_v31  ;;  %v5880_v53 = vmax.f32 %v5848_v5, 0.0  ;;  %v5810_v37 = vadd.f32 %v5727_v33, %v15431_v21  ;;  %v5729_v40 = vpop.f32.mrb[151].mxu0  ;;  %v6241_v19 = vrot.slane %v6135_v34, 1 }
 0x47d   : > { %6047 = vst [vmem:[#allocation2 + $0x1c0] sm:$0xff] %v15547_v58  ;;  %v6244_v21 = vrot.slane %v15547_v58, 1 }
 0x47e   : > { %v5953_v61 = vrot.slane %v5880_v53, 7  ;;  %v5849_v0 = vadd.f32 %v15448_v39, %v5810_v37  ;;  %v6242_v27 = vsel %vm1067_vm0, %v6239_v35, %v6241_v19 }
 0x47f   : > { %v5732_v8 = vpop.f32.mrb[152].mxu0  ;;  %10672 = vmatmul.mubr.f32.gmra.mrb[160].mxu1 %v6242_v27  ;;  %v6136_v32 = vld [vmem:[#allocation2 + $0x1b0] sm:$0xfe] }
 0x480   : > { %6049 = vst [vmem:[#allocation2 + $0x1e0] sm:$0xfe] %v5953_v61  ;;  %v5881_v1 = vmax.f32 %v5849_v0, 0.0  ;;  %v5811_v29 = vadd.f32 %v5732_v8, %v15434_v59  ;;  %v5734_v10 = vpop.f32.mrb[153].mxu0  ;;  %v6243_v38 = vrot.slane %v6136_v32, 1 }
 0x482   : > { %v5954_v62 = vrot.slane %v5881_v1, 7  ;;  %v5850_v22 = vadd.f32 %v15448_v39, %v5811_v29  ;;  %v6245_v25 = vsel %vm1067_vm0, %v6243_v38, %v6244_v21 }
 0x483   : > { %v5737_v2 = vpop.f32.mrb[154].mxu0  ;;  %10674 = vmatprep.mubr.f32.mxu1 %v6245_v25  ;;  %v6137_v41 = vld [vmem:[#allocation2 + $0x1d0] sm:$0x1] }
 0x484   : > { %v15558_v4 = vsel %vm457_vm1, %v5953_v61, %v5954_v62  ;;  %6051 = vst [vmem:[#allocation2 + $0x200] sm:$0x1] %v5954_v62  ;;  %v5882_v12 = vmax.f32 %v5850_v22, 0.0  ;;  %v5812_v30 = vadd.f32 %v5737_v2, %v15437_v55  ;;  %v5739_v59 = vpop.f32.mrb[155].mxu0  ;;  %v6246_v45 = vrot.slane %v6137_v41, 1 }
 0x485   : > { %6050 = vst [vmem:[#allocation2 + $0x1f0] sm:$0xff] %v15558_v4  ;;  %v6249_v55 = vrot.slane %v15558_v4, 1 }
 0x486   : > { %v5956_v44 = vrot.slane %v5882_v12, 7  ;;  %v5851_v47 = vadd.f32 %v15448_v39, %v5812_v30  ;;  %v6247_v7 = vsel %vm1067_vm0, %v6244_v21, %v6246_v45 }
 0x487   : > { %v5742_v60 = vpop.f32.mrb[156].mxu0  ;;  %10675 = vmatmul.mubr.f32.gmra.mrb[162].mxu1 %v6247_v7  ;;  %v6138_v23 = vld [vmem:[#allocation2 + $0x1e0] sm:$0xfe] }
 0x488   : > { %6052 = vst [vmem:[#allocation2 + $0x210] sm:$0xfe] %v5956_v44  ;;  %v5883_v54 = vmax.f32 %v5851_v47, 0.0  ;;  %v5813_v15 = vadd.f32 %v5742_v60, %v15440_v26  ;;  %v5744_v36 = vpop.f32.mrb[157].mxu0  ;;  %v6248_v20 = vrot.slane %v6138_v23, 1 }
 0x48a   : > { %v5957_v46 = vrot.slane %v5883_v54, 7  ;;  %v5852_v24 = vadd.f32 %v15448_v39, %v5813_v15  ;;  %v6250_v3 = vsel %vm1067_vm0, %v6248_v20, %v6249_v55 }
 0x48b   : > { %v5747_v35 = vpop.f32.mrb[158].mxu0  ;;  %10677 = vmatprep.mubr.f32.mxu1 %v6250_v3  ;;  %v6139_v31 = vld [vmem:[#allocation2 + $0x200] sm:$0x1] }
 0x48c   : > { %v15569_v5 = vsel %vm457_vm1, %v5956_v44, %v5957_v46  ;;  %6054 = vst [vmem:[#allocation2 + $0x230] sm:$0x1] %v5957_v46  ;;  %v5884_v57 = vmax.f32 %v5852_v24, 0.0  ;;  %v5814_v33 = vadd.f32 %v5747_v35, %v15443_v63  ;;  %v5749_v26 = vpop.f32.mrb[159].mxu0  ;;  %v6251_v34 = vrot.slane %v6139_v31, 1 }
 0x48d   : > { %6053 = vst [vmem:[#allocation2 + $0x220] sm:$0xff] %v15569_v5  ;;  %v6254_v63 = vrot.slane %v15569_v5, 1 }
 0x48e   : > { %v5959_v53 = vrot.slane %v5884_v57, 7  ;;  %v5853_v37 = vadd.f32 %v15448_v39, %v5814_v33  ;;  %v6252_v40 = vsel %vm1067_vm0, %v6249_v55, %v6251_v34 }
 0x48f   : > { %v5752_v19 = vpop.f32.mrb[160].mxu0  ;;  %10678 = vmatmul.mubr.f32.gmra.mrb[164].mxu1 %v6252_v40  ;;  %v6140_v61 = vld [vmem:[#allocation2 + $0x210] sm:$0xfe] }
 0x490   : > { %6055 = vst [vmem:[#allocation2 + $0x240] sm:$0xfe] %v5959_v53  ;;  %v5885_v0 = vmax.f32 %v5853_v37, 0.0  ;;  %v5815_v27 = vadd.f32 %v5752_v19, %v15323_v28  ;;  %v5754_v8 = vpop.f32.mrb[161].mxu0  ;;  %v6253_v32 = vrot.slane %v6140_v61, 1 }
 0x492   : > { %v5960_v1 = vrot.slane %v5885_v0, 7  ;;  %v5854_v29 = vadd.f32 %v15448_v39, %v5815_v27  ;;  %v6255_v10 = vsel %vm1067_vm0, %v6253_v32, %v6254_v63 }
 0x493   : > { %v5757_v38 = vpop.f32.mrb[162].mxu0  ;;  %10680 = vmatprep.mubr.f32.mxu1 %v6255_v10  ;;  %v6141_v21 = vld [vmem:[#allocation2 + $0x230] sm:$0x1] }
 0x494   : > { %v15580_v62 = vsel %vm457_vm1, %v5959_v53, %v5960_v1  ;;  %6057 = vst [vmem:[#allocation2 + $0x260] sm:$0x1] %v5960_v1  ;;  %v5886_v22 = vmax.f32 %v5854_v29, 0.0  ;;  %v5816_v25 = vadd.f32 %v5757_v38, %v15329_v13  ;;  %v5759_v28 = vpop.f32.mrb[163].mxu0  ;;  %v6256_v2 = vrot.slane %v6141_v21, 1 }
 0x495   : > { %6056 = vst [vmem:[#allocation2 + $0x250] sm:$0xff] %v15580_v62  ;;  %v6259_v13 = vrot.slane %v15580_v62, 1 }
 0x496   : > { %v5962_v41 = vrot.slane %v5886_v22, 7  ;;  %v5855_v12 = vadd.f32 %v15448_v39, %v5816_v25  ;;  %v6257_v30 = vsel %vm1067_vm0, %v6254_v63, %v6256_v2 }
 0x497   : > { %v5762_v59 = vpop.f32.mrb[164].mxu0  ;;  %10681 = vmatmul.mubr.f32.gmra.mrb[166].mxu1 %v6257_v30  ;;  %v6142_v45 = vld [vmem:[#allocation2 + $0x240] sm:$0xfe] }
 0x498   : > { %6058 = vst [vmem:[#allocation2 + $0x270] sm:$0xfe] %v5962_v41  ;;  %v5887_v44 = vmax.f32 %v5855_v12, 0.0  ;;  %v5817_v47 = vadd.f32 %v5762_v59, %v15335_v14  ;;  %v5764_v7 = vpop.f32.mrb[165].mxu0  ;;  %v6258_v60 = vrot.slane %v6142_v45, 1 }
 0x49a   : > { %v5963_v23 = vrot.slane %v5887_v44, 7  ;;  %v5856_v54 = vadd.f32 %v15448_v39, %v5817_v47  ;;  %v6260_v15 = vsel %vm1067_vm0, %v6258_v60, %v6259_v13 }
 0x49b   : > { %v5767_v36 = vpop.f32.mrb[166].mxu0  ;;  %10683 = vmatprep.mubr.f32.mxu1 %v6260_v15  ;;  %v6143_v20 = vld [vmem:[#allocation2 + $0x260] sm:$0x1] }
 0x49c   : > { %v15591_v55 = vsel %vm457_vm1, %v5962_v41, %v5963_v23  ;;  %6060 = vst [vmem:[#allocation2 + $0x290] sm:$0x1] %v5963_v23  ;;  %v5888_v46 = vmax.f32 %v5856_v54, 0.0  ;;  %v5818_v24 = vadd.f32 %v5767_v36, %v15341_v11  ;;  %v5769_v14 = vpop.f32.mrb[167].mxu0  ;;  %v6261_v3 = vrot.slane %v6143_v20, 1 }
 0x49d   : > { %6059 = vst [vmem:[#allocation2 + $0x280] sm:$0xff] %v15591_v55  ;;  %v6264_v11 = vrot.slane %v15591_v55, 1 }
 0x49e   : > { %v5965_v35 = vrot.slane %v5888_v46, 7  ;;  %v5857_v31 = vadd.f32 %v15448_v39, %v5818_v24  ;;  %v6262_v57 = vsel %vm1067_vm0, %v6259_v13, %v6261_v3 }
 0x49f   : > { %v5772_v33 = vpop.f32.mrb[168].mxu0  ;;  %10684 = vmatmul.mubr.f32.gmra.mrb[168].mxu1 %v6262_v57  ;;  %v6144_v26 = vld [vmem:[#allocation2 + $0x270] sm:$0xfe] }
 0x4a0   : > { %6061 = vst [vmem:[#allocation2 + $0x2a0] sm:$0xfe] %v5965_v35  ;;  %v5889_v34 = vmax.f32 %v5857_v31, 0.0  ;;  %v5819_v53 = vadd.f32 %v5772_v33, %v15349_v50  ;;  %v5774_v37 = vpop.f32.mrb[169].mxu0  ;;  %v6263_v40 = vrot.slane %v6144_v26, 1  ;;  %v6956_v33 = vld [vmem:[#allocation3 + $0x110] sm:$0xff] }
 0x4a1   : > { %v6957_v26 = vld [vmem:[#allocation3 + $0x118] sm:$0xff]  ;;  %v6958_v37 = vld [vmem:[#allocation3 + $0x120] sm:$0xff] }
 0x4a2   : > { %v5966_v19 = vrot.slane %v5889_v34, 7  ;;  %v5858_v61 = vadd.f32 %v15448_v39, %v5819_v53  ;;  %v6265_v0 = vsel %vm1067_vm0, %v6263_v40, %v6264_v11  ;;  %v15626_v34 = vld [vmem:[#allocation2 + $0x8] sm:$0xff]  ;;  %v11835_v53 = vpack.c.bf16 %v6957_v26, %v6956_v33  ;;  %v7263_v33 = vld [vmem:[#allocation3 + $0x198] sm:$0xff] }
 0x4a3   : > { %v5777_v27 = vpop.f32.mrb[170].mxu0  ;;  %10686 = vmatprep.mubr.f32.mxu1 %v6265_v0  ;;  %v6145_v8 = vld [vmem:[#allocation2 + $0x290] sm:$0x1]  ;;  %v6959_v40 = vld [vmem:[#allocation3 + $0x128] sm:$0xff]  ;;  %v6961_v0 = vld [vmem:[#allocation3 + $0x138] sm:$0xff] }
 0x4a4   : > { %v15602_v32 = vsel %vm457_vm1, %v5965_v35, %v5966_v19  ;;  %6063 = vst [vmem:[#allocation2 + $0x2c0] sm:$0x1] %v5966_v19  ;;  %v5890_v63 = vmax.f32 %v5858_v61, 0.0  ;;  %v5820_v1 = vadd.f32 %v5777_v27, %v15355_v49  ;;  %v5779_v50 = vpop.f32.mrb[171].mxu0  ;;  %v6266_v29 = vrot.slane %v6145_v8, 1  ;;  %v6960_v61 = vld [vmem:[#allocation3 + $0x130] sm:$0xff] }
 0x4a5   : > { %6062 = vst [vmem:[#allocation2 + $0x2b0] sm:$0xff] %v15602_v32  ;;  %v6269_v49 = vrot.slane %v15602_v32, 1  ;;  %v11839_v19 = vpack.c.bf16 %v6959_v40, %v6958_v37  ;;  %v15635_v27 = vld [vmem:[#allocation2 + $0x60] sm:$0xff]  ;;  %v11843_v8 = vpack.c.bf16 %v6961_v0, %v6960_v61  ;;  %v15639_v50 = vld [vmem:[#allocation2 + $0x90] sm:$0xff]  ;;  %v6847_v40 = vrot.slane %v15457_v48, 2 }
 0x4a6   : > { %v5968_v10 = vrot.slane %v5890_v63, 7  ;;  %v5859_v38 = vadd.f32 %v15448_v39, %v5820_v1  ;;  %v6267_v21 = vsel %vm1067_vm0, %v6264_v11, %v6266_v29  ;;  %v15630_v11 = vld [vmem:[#allocation2 + $0x30] sm:$0xff]  ;;  %v6962_v63 = vld [vmem:[#allocation3 + $0x140] sm:$0xff]  ;;  %v6963_v1 = vld [vmem:[#allocation3 + $0x148] sm:$0xff] }
 0x4a7   : > { %v5782_v22 = vpop.f32.mrb[172].mxu0  ;;  %10687 = vmatmul.mubr.f32.gmra.mrb[170].mxu1 %v6267_v21  ;;  %v6146_v25 = vld [vmem:[#allocation2 + $0x2a0] sm:$0xfe]  ;;  %v6964_v29 = vld [vmem:[#allocation3 + $0x150] sm:$0xff] }
 0x4a8   : > { %6064 = vst [vmem:[#allocation2 + $0x2d0] sm:$0xfe] %v5968_v10  ;;  %v5891_v28 = vmax.f32 %v5859_v38, 0.0  ;;  %v5821_v2 = vadd.f32 %v5782_v22, %v15361_v56  ;;  %v5784_v41 = vpop.f32.mrb[173].mxu0  ;;  %v6268_v12 = vrot.slane %v6146_v25, 1  ;;  %v15643_v38 = vld [vmem:[#allocation2 + $0xc0] sm:$0xff] }
 0x4a9   : > { %v6966_v22 = vld [vmem:[#allocation3 + $0x160] sm:$0xff]  ;;  %v6967_v25 = vld [vmem:[#allocation3 + $0x168] sm:$0xff]  ;;  %v6968_v41 = vld [vmem:[#allocation3 + $0x170] sm:$0xff] }
 0x4aa   : > { %v5969_v30 = vrot.slane %v5891_v28, 7  ;;  %v5860_v59 = vadd.f32 %v15448_v39, %v5821_v2  ;;  %v6270_v45 = vsel %vm1067_vm0, %v6268_v12, %v6269_v49  ;;  %v15647_v28 = vld [vmem:[#allocation2 + $0xf0] sm:$0xff]  ;;  %v11855_v2 = vpack.c.bf16 %v6967_v25, %v6966_v22  ;;  %v6969_v12 = vld [vmem:[#allocation3 + $0x178] sm:$0xff]  ;;  %v6781_v37 = vld [vmem:[#allocation2 + $0x60] sm:$0xfc] }
 0x4ab   : > { %v5787_v44 = vpop.f32.mrb[174].mxu0  ;;  %10689 = vmatprep.mubr.f32.mxu1 %v6270_v45  ;;  %v6147_v47 = vld [vmem:[#allocation2 + $0x2c0] sm:$0x1]  ;;  %v7261_v45 = vld [vmem:[#allocation3 + $0x188] sm:$0xff] }
 0x4ac   : > { %v15613_v7 = vsel %vm457_vm1, %v5968_v10, %v5969_v30  ;;  %6066 = vst [vmem:[#allocation2 + $0x2f0] sm:$0x1] %v5969_v30  ;;  %v5892_v60 = vmax.f32 %v5860_v59, 0.0  ;;  %v5822_v13 = vadd.f32 %v5787_v44, %v15367_v9  ;;  %v6271_v56 = vrot.slane %v6147_v47, 1  ;;  %v5789_v23 = vpop.f32.mrb[175].mxu0  ;;  %v6965_v10 = vld [vmem:[#allocation3 + $0x158] sm:$0xff] }
 0x4ad   : > { %6065 = vst [vmem:[#allocation2 + $0x2e0] sm:$0xff] %v15613_v7  ;;  %v6274_v14 = vrot.slane %v15613_v7, 1  ;;  %v11851_v21 = vpack.c.bf16 %v6965_v10, %v6964_v29  ;;  %v11859_v30 = vpack.c.bf16 %v6969_v12, %v6968_v41  ;;  %v7260_v59 = vld [vmem:[#allocation3 + $0x180] sm:$0xff]  ;;  %v15655_v44 = vld [vmem:[#allocation2 + $0x150] sm:$0xff]  ;;  %v6852_v10 = vrot.slane %v15470_v18, 2 }
 0x4ae   : > { %v5971_v54 = vrot.slane %v5892_v60, 7  ;;  %v5861_v15 = vadd.f32 %v15448_v39, %v5822_v13  ;;  %v6272_v36 = vsel %vm1067_vm0, %v6269_v49, %v6271_v56  ;;  %v15651_v49 = vld [vmem:[#allocation2 + $0x120] sm:$0xff]  ;;  %v11863_v47 = vpack.c.bf16 %v7261_v45, %v7260_v59  ;;  %v15663_v13 = vld [vmem:[#allocation2 + $0x1b0] sm:$0xff] }
 0x4af   : > { %10690 = vmatmul.mubr.f32.gmra.mrb[172].mxu1 %v6272_v36  ;;  %v6148_v20 = vld [vmem:[#allocation2 + $0x2d0] sm:$0xfe]  ;;  %v15659_v60 = vld [vmem:[#allocation2 + $0x180] sm:$0xff]  ;;  %v6857_v45 = vrot.slane %v15481_v42, 2 }
 0x4b0   : > { %6067 = vst [vmem:[#allocation2 + $0x300] sm:$0xfe] %v5971_v54  ;;  %v5893_v46 = vmax.f32 %v5861_v15, 0.0  ;;  %v6273_v24 = vrot.slane %v6148_v20, 1  ;;  %v15667_v56 = vld [vmem:[#allocation2 + $0x1e0] sm:$0xff]  ;;  %v15671_v23 = vld [vmem:[#allocation2 + $0x210] sm:$0xff] }
 0x4b1   : > { %v15679_v15 = vld [vmem:[#allocation2 + $0x270] sm:$0xff]  ;;  %v6777_v36 = vld [vmem:[#allocation2] sm:$0xfc] }
 0x4b2   : > { %v5972_v3 = vrot.slane %v5893_v46, 7  ;;  %v6275_v35 = vsel %vm1067_vm0, %v6273_v24, %v6274_v14  ;;  %v15683_v20 = vld [vmem:[#allocation2 + $0x2a0] sm:$0xff]  ;;  %v6841_v46 = vrot.slane %v6777_v36, 2  ;;  %v6842_v24 = vrot.slane %v15626_v34, 2  ;;  %v6783_v29 = vld [vmem:[#allocation2 + $0x90] sm:$0xfc] }
 0x4b3   : > { %10692 = vmatprep.mubr.f32.mxu1 %v6275_v35  ;;  %v6149_v9 = vld [vmem:[#allocation2 + $0x2f0] sm:$0x1]  ;;  %v7264_v0 = vld [vmem:[#allocation3 + $0x1a0] sm:$0xff]  ;;  %v6856_v12 = vrot.slane %v6783_v29, 2 }
 0x4b4   : > { %v15622_v31 = vsel %vm457_vm1, %v5971_v54, %v5972_v3  ;;  %6069 = vst [vmem:[#allocation2 + $0x320] sm:$0x1] %v5972_v3  ;;  %v6276_v57 = vrot.slane %v6149_v9, 1  ;;  %v15675_v54 = vld [vmem:[#allocation2 + $0x240] sm:$0xff]  ;;  %v15688_v3 = vld [vmem:[#allocation2 + $0x2d0] sm:$0xff] }
 0x4b5   : > { %6068 = vst [vmem:[#allocation2 + $0x310] sm:$0xff] %v15622_v31  ;;  %v6779_v9 = vld [vmem:[#allocation2 + $0x30] sm:$0xfc]  ;;  %v6785_v59 = vld [vmem:[#allocation2 + $0xc0] sm:$0xfc] }
 0x4b6   : > { %v6277_v39 = vsel %vm1067_vm0, %v6274_v14, %v6276_v57  ;;  %v6778_v14 = vld [vmem:[#allocation2 + $0x20] sm:$0x3]  ;;  %v6843_v57 = vsel %vm1903_vm2, %v6841_v46, %v6842_v24  ;;  %v6846_v26 = vrot.slane %v6779_v9, 2 }
 0x4b7   : > { %10693 = vmatmul.mubr.f32.gmra.mrb[174].mxu1 %v6277_v39  ;;  %v6844_v35 = vrot.slane %v6778_v14, 2  ;;  %v7262_v39 = vld [vmem:[#allocation3 + $0x190] sm:$0xff]  ;;  %v7268_v46 = vld [vmem:[#allocation3 + $0x1c0] sm:$0xff]  ;;  %v6858_v14 = vsel %vm1903_vm2, %v6856_v12, %v6857_v45  ;;  %v7275_v12 = vld [vmem:[#allocation3 + $0x1f8] sm:$0xff] }
 0x4b8   : > { %10727 = vmatprep.mubr.f32.mxu1 %v15626_v34  ;;  %v6786_v9 = vld [vmem:[#allocation2 + $0xe0] sm:$0x3] }
 0x4bb   : > { %10728 = vmatmul.mubr.f32.vlgmr.msra.gmra.mrb[144].mxu1 %v15626_v34  ;;  %v6845_v34 = vsel %vm1903_vm2, %v6842_v24, %v6844_v35  ;;  %v7269_v24 = vld [vmem:[#allocation3 + $0x1c8] sm:$0xff]  ;;  %v6861_v35 = vrot.slane %v6785_v59, 2 }
 0x4bc   : > { %10730 = vmatprep.mubr.f32.mxu1 %v15630_v11  ;;  %11834 = vmatpush3.bf16.msra.mxu1 %v15460_v6  ;;  %v11847_v6 = vpack.c.bf16 %v6963_v1, %v6962_v63  ;;  %v6848_v63 = vsel %vm1903_vm2, %v6846_v26, %v6847_v40  ;;  %v6851_v1 = vrot.slane %v6781_v37, 2  ;;  %v6864_v26 = vrot.slane %v6786_v9, 2 }
 0x4bd   : > { %11836 = vmatprep.subr.bf16.mxu1 %v11835_v53 }
 0x4be   : > { %v6853_v41 = vsel %vm1903_vm2, %v6851_v1, %v6852_v10  ;;  %v7272_v1 = vld [vmem:[#allocation3 + $0x1e0] sm:$0xff] }
 0x4bf   : > { %10731 = vmatmul.mubr.f32.gmra.mrb[146].mxu1 %v15457_v48  ;;  %v7266_v48 = vld [vmem:[#allocation3 + $0x1b0] sm:$0xff] }
 0x4c0   : > { %10733 = vmatprep.mubr.f32.mxu1 %v15635_v27  ;;  %11838 = vmatpush3.bf16.msra.mxu1 %v11835_v53  ;;  %v6780_v53 = vld [vmem:[#allocation2 + $0x50] sm:$0x3] }
 0x4c1   : > { %11840 = vmatprep.subr.bf16.mxu1 %v11839_v19  ;;  %v6849_v61 = vrot.slane %v6780_v53, 2  ;;  %v7270_v53 = vld [vmem:[#allocation3 + $0x1d0] sm:$0xff] }
 0x4c3   : > { %10734 = vmatmul.mubr.f32.gmra.mrb[148].mxu1 %v15470_v18  ;;  %v6850_v22 = vsel %vm1903_vm2, %v6847_v40, %v6849_v61  ;;  %v6789_v61 = vld [vmem:[#allocation2 + $0x120] sm:$0xfc] }
 0x4c4   : > { %10736 = vmatprep.mubr.f32.mxu1 %v15639_v50  ;;  %11842 = vmatpush3.bf16.msra.mxu1 %v11839_v19  ;;  %v11867_v19 = vpack.c.bf16 %v7263_v33, %v7262_v39  ;;  %v6862_v39 = vrot.slane %v15492_v52, 2  ;;  %v11879_v33 = vpack.c.bf16 %v7269_v24, %v7268_v46  ;;  %v7742_v24 = vld [vmem:[#allocation3 + $0x200] sm:$0xff] }
 0x4c5   : > { %11844 = vmatprep.subr.bf16.mxu1 %v11843_v8 }
 0x4c6   : > { %v6863_v37 = vsel %vm1903_vm2, %v6861_v35, %v6862_v39 }
 0x4c7   : > { %10737 = vmatmul.mubr.f32.gmra.mrb[150].mxu1 %v15481_v42 }
 0x4c8   : > { %10739 = vmatprep.mubr.f32.mxu1 %v15643_v38  ;;  %11846 = vmatpush3.bf16.msra.mxu1 %v11843_v8  ;;  %v7265_v8 = vld [vmem:[#allocation3 + $0x1a8] sm:$0xff] }
 0x4c9   : > { %11848 = vmatprep.subr.bf16.mxu1 %v11847_v6 }
 0x4cb   : > { %10740 = vmatmul.mubr.f32.gmra.mrb[152].mxu1 %v15492_v52  ;;  %v6865_v52 = vsel %vm1903_vm2, %v6862_v39, %v6864_v26  ;;  %v6795_v39 = vld [vmem:[#allocation2 + $0x1b0] sm:$0xfc] }
 0x4cc   : > { %10742 = vmatprep.mubr.f32.mxu1 %v15647_v28  ;;  %11850 = vmatpush3.bf16.msra.mxu1 %v11847_v6  ;;  %v6782_v6 = vld [vmem:[#allocation2 + $0x80] sm:$0x3] }
 0x4cd   : > { %11852 = vmatprep.subr.bf16.mxu1 %v11851_v21  ;;  %v6854_v25 = vrot.slane %v6782_v6, 2  ;;  %v7273_v6 = vld [vmem:[#allocation3 + $0x1e8] sm:$0xff] }
 0x4cf   : > { %10743 = vmatmul.mubr.f32.gmra.mrb[154].mxu1 %v15503_v51  ;;  %v6855_v18 = vsel %vm1903_vm2, %v6852_v10, %v6854_v25  ;;  %v6871_v10 = vrot.slane %v6789_v61, 2  ;;  %v6872_v25 = vrot.slane %v15514_v43, 2 }
 0x4d0   : > { %10745 = vmatprep.mubr.f32.mxu1 %v15651_v49  ;;  %11854 = vmatpush3.bf16.msra.mxu1 %v11851_v21  ;;  %v11871_v21 = vpack.c.bf16 %v7265_v8, %v7264_v0  ;;  %v6867_v0 = vrot.slane %v15503_v51, 2 }
 0x4d1   : > { %11856 = vmatprep.subr.bf16.mxu1 %v11855_v2 }
 0x4d3   : > { %10746 = vmatmul.mubr.f32.gmra.mrb[156].mxu1 %v15514_v43 }
 0x4d4   : > { %10748 = vmatprep.mubr.f32.mxu1 %v15655_v44  ;;  %11858 = vmatpush3.bf16.msra.mxu1 %v11855_v2  ;;  %v7267_v2 = vld [vmem:[#allocation3 + $0x1b8] sm:$0xff] }
 0x4d5   : > { %11860 = vmatprep.subr.bf16.mxu1 %v11859_v30 }
 0x4d7   : > { %10749 = vmatmul.mubr.f32.gmra.mrb[158].mxu1 %v15525_v16 }
 0x4d8   : > { %10751 = vmatprep.mubr.f32.mxu1 %v15659_v60  ;;  %11862 = vmatpush3.bf16.msra.mxu1 %v11859_v30  ;;  %v6784_v30 = vld [vmem:[#allocation2 + $0xb0] sm:$0x3] }
 0x4d9   : > { %11864 = vmatprep.subr.bf16.mxu1 %v11863_v47  ;;  %v6859_v36 = vrot.slane %v6784_v30, 2  ;;  %v6873_v30 = vsel %vm1903_vm2, %v6871_v10, %v6872_v25 }
 0x4db   : > { %10752 = vmatmul.mubr.f32.gmra.mrb[160].mxu1 %v15536_v17  ;;  %v6860_v42 = vsel %vm1903_vm2, %v6857_v45, %v6859_v36  ;;  %v6792_v45 = vld [vmem:[#allocation2 + $0x170] sm:$0x3] }
 0x4dc   : > { %10754 = vmatprep.mubr.f32.mxu1 %v15663_v13  ;;  %v6879_v46 = vrot.slane %v6792_v45, 2 }
 0x4df   : > { %10755 = vmatmul.mubr.f32.gmra.mrb[162].mxu1 %v15547_v58 }
 0x4e0   : > { %10757 = vmatprep.mubr.f32.mxu1 %v15667_v56 }
 0x4e3   : > { %10758 = vmatmul.mubr.f32.gmra.mrb[164].mxu1 %v15558_v4 }
 0x4e4   : > { %10760 = vmatprep.mubr.f32.mxu1 %v15671_v23 }
 0x4e7   : > { %10761 = vmatmul.mubr.f32.gmra.mrb[166].mxu1 %v15569_v5 }
 0x4e8   : > { %10763 = vmatprep.mubr.f32.mxu1 %v15675_v54 }
 0x4eb   : > { %10764 = vmatmul.mubr.f32.gmra.mrb[168].mxu1 %v15580_v62 }
 0x4ec   : > { %10766 = vmatprep.mubr.f32.mxu1 %v15679_v15 }
 0x4ef   : > { %10767 = vmatmul.mubr.f32.gmra.mrb[170].mxu1 %v15591_v55 }
 0x4f0   : > { %10769 = vmatprep.mubr.f32.mxu1 %v15683_v20 }
 0x4f3   : > { %10770 = vmatmul.mubr.f32.gmra.mrb[172].mxu1 %v15602_v32 }
 0x4f4   : > { %10772 = vmatprep.mubr.f32.mxu1 %v15688_v3 }
 0x4f7   : > { %10773 = vmatmul.mubr.f32.gmra.mrb[174].mxu1 %v15613_v7 }
 0x4f8   : > { %10807 = vmatprep.mubr.f32.mxu1 %v6843_v57  ;;  %v6787_v57 = vld [vmem:[#allocation2 + $0xf0] sm:$0xfc] }
 0x4f9   : > { %v6866_v40 = vrot.slane %v6787_v57, 2  ;;  %v6794_v57 = vld [vmem:[#allocation2 + $0x1a0] sm:$0x3] }
 0x4fa   : > { %v6884_v26 = vrot.slane %v6794_v57, 2  ;;  %v6807_v57 = vld [vmem:[#allocation2 + $0x2d0] sm:$0xfc] }
 0x4fb   : > { %10808 = vmatmul.mubr.f32.vlgmr.msra.gmra.mrb[144].mxu1 %v6845_v34  ;;  %v7271_v34 = vld [vmem:[#allocation3 + $0x1d8] sm:$0xff]  ;;  %v6868_v29 = vsel %vm1903_vm2, %v6866_v40, %v6867_v0  ;;  %v6797_v40 = vld [vmem:[#allocation2 + $0x1e0] sm:$0xfc] }
 0x4fc   : > { %10810 = vmatprep.mubr.f32.mxu1 %v6848_v63  ;;  %11866 = vmatpush3.bf16.msra.mxu1 %v11863_v47  ;;  %v11875_v47 = vpack.c.bf16 %v7267_v2, %v7266_v48  ;;  %v11883_v8 = vpack.c.bf16 %v7271_v34, %v7270_v53  ;;  %v11887_v48 = vpack.c.bf16 %v7273_v6, %v7272_v1  ;;  %v6886_v34 = vrot.slane %v6795_v39, 2 }
 0x4fd   : > { %11868 = vmatprep.subr.bf16.mxu1 %v11867_v19  ;;  %v6892_v1 = vrot.slane %v15558_v4, 2  ;;  %v6802_v4 = vld [vmem:[#allocation2 + $0x260] sm:$0x3]  ;;  %v6912_v39 = vrot.slane %v15602_v32, 2 }
 0x4fe   : > { %v6904_v45 = vrot.slane %v6802_v4, 2  ;;  %v7754_v4 = vld [vmem:[#allocation3 + $0x260] sm:$0xff] }
 0x4ff   : > { %10811 = vmatmul.mubr.f32.gmra.mrb[146].mxu1 %v6850_v22  ;;  %v6791_v22 = vld [vmem:[#allocation2 + $0x150] sm:$0xfc] }
 0x500   : > { %10813 = vmatprep.mubr.f32.mxu1 %v6853_v41  ;;  %11870 = vmatpush3.bf16.msra.mxu1 %v11867_v19  ;;  %v6788_v19 = vld [vmem:[#allocation2 + $0x110] sm:$0x3]  ;;  %v6876_v59 = vrot.slane %v6791_v22, 2  ;;  %v6801_v22 = vld [vmem:[#allocation2 + $0x240] sm:$0xfc] }
 0x501   : > { %11872 = vmatprep.subr.bf16.mxu1 %v11871_v21  ;;  %v6869_v63 = vrot.slane %v6788_v19, 2  ;;  %v7274_v41 = vld [vmem:[#allocation3 + $0x1f0] sm:$0xff]  ;;  %v6887_v19 = vrot.slane %v15547_v58, 2 }
 0x502   : > { %v11891_v36 = vpack.c.bf16 %v7275_v12, %v7274_v41  ;;  %v6901_v41 = vrot.slane %v6801_v22, 2  ;;  %v6803_v12 = vld [vmem:[#allocation2 + $0x270] sm:$0xfc]  ;;  %v15752_v22 = vld [vmem:[#allocation2 + $0xa0] sm:$0xff] }
 0x503   : > { %10814 = vmatmul.mubr.f32.gmra.mrb[148].mxu1 %v6855_v18  ;;  %v6870_v51 = vsel %vm1903_vm2, %v6867_v0, %v6869_v63  ;;  %v6877_v18 = vrot.slane %v15525_v16, 2  ;;  %v6888_v0 = vsel %vm1903_vm2, %v6886_v34, %v6887_v19  ;;  %v6799_v63 = vld [vmem:[#allocation2 + $0x210] sm:$0xfc]  ;;  %v6808_v34 = vld [vmem:[#allocation2 + $0x2f0] sm:$0x3] }
 0x504   : > { %10816 = vmatprep.mubr.f32.mxu1 %v6858_v14  ;;  %11874 = vmatpush3.bf16.msra.mxu1 %v11871_v21  ;;  %v6790_v21 = vld [vmem:[#allocation2 + $0x140] sm:$0x3]  ;;  %v7743_v14 = vld [vmem:[#allocation3 + $0x208] sm:$0xff]  ;;  %v6896_v10 = vrot.slane %v6799_v63, 2 }
 0x505   : > { %11876 = vmatprep.subr.bf16.mxu1 %v11875_v47  ;;  %v6874_v2 = vrot.slane %v6790_v21, 2  ;;  %v6878_v35 = vsel %vm1903_vm2, %v6876_v59, %v6877_v18  ;;  %v6880_v16 = vsel %vm1903_vm2, %v6877_v18, %v6879_v46  ;;  %v6800_v21 = vld [vmem:[#allocation2 + $0x230] sm:$0x3]  ;;  %v6906_v18 = vrot.slane %v6803_v12, 2  ;;  %v15743_v63 = vld [vmem:[#allocation2 + $0x40] sm:$0xff]  ;;  %v7755_v12 = vld [vmem:[#allocation3 + $0x268] sm:$0xff] }
 0x507   : > { %10817 = vmatmul.mubr.f32.gmra.mrb[150].mxu1 %v6860_v42  ;;  %v6875_v43 = vsel %vm1903_vm2, %v6872_v25, %v6874_v2  ;;  %v15715_v42 = vpack.c.bf16 %v7743_v14, %v7742_v24  ;;  %v6897_v25 = vrot.slane %v15569_v5, 2  ;;  %v6804_v5 = vld [vmem:[#allocation2 + $0x290] sm:$0x3] }
 0x508   : > { %10819 = vmatprep.mubr.f32.mxu1 %v6863_v37  ;;  %11878 = vmatpush3.bf16.msra.mxu1 %v11875_v47  ;;  %v6793_v47 = vld [vmem:[#allocation2 + $0x180] sm:$0xfc]  ;;  %v6796_v37 = vld [vmem:[#allocation2 + $0x1d0] sm:$0x3]  ;;  %v6909_v24 = vrot.slane %v6804_v5, 2  ;;  %v8193_v5 = vld [vmem:[#allocation3 + $0x288] sm:$0xff] }
 0x509   : > { %11880 = vmatprep.subr.bf16.mxu1 %v11879_v33  ;;  %v6881_v9 = vrot.slane %v6793_v47, 2  ;;  %v6889_v61 = vrot.slane %v6796_v37, 2  ;;  %v6898_v2 = vsel %vm1903_vm2, %v6896_v10, %v6897_v25  ;;  %v6917_v37 = vrot.slane %v15613_v7, 2  ;;  %v7748_v10 = vld [vmem:[#allocation3 + $0x230] sm:$0xff] }
 0x50b   : > { %10820 = vmatmul.mubr.f32.gmra.mrb[152].mxu1 %v6865_v52  ;;  %v6798_v52 = vld [vmem:[#allocation2 + $0x200] sm:$0x3]  ;;  %v6890_v6 = vsel %vm1903_vm2, %v6887_v19, %v6889_v61  ;;  %v6919_v19 = vrot.slane %v6808_v34, 2 }
 0x50c   : > { %10822 = vmatprep.mubr.f32.mxu1 %v6868_v29  ;;  %11882 = vmatpush3.bf16.msra.mxu1 %v11879_v33  ;;  %v6882_v33 = vrot.slane %v15536_v17, 2  ;;  %v6894_v29 = vrot.slane %v6798_v52, 2 }
 0x50d   : > { %11884 = vmatprep.subr.bf16.mxu1 %v11883_v8  ;;  %v6920_v61 = vsel %vm1903_vm2, %v6917_v37, %v6919_v19  ;;  %v7542_v19 = vld [vmem:[#allocation2 + $0xc0] sm:$0xfe] }
 0x50e   : > { %v6883_v53 = vsel %vm1903_vm2, %v6881_v9, %v6882_v33  ;;  %v6885_v17 = vsel %vm1903_vm2, %v6882_v33, %v6884_v26  ;;  %v6806_v9 = vld [vmem:[#allocation2 + $0x2c0] sm:$0x3] }
 0x50f   : > { %10823 = vmatmul.mubr.f32.gmra.mrb[154].mxu1 %v6870_v51  ;;  %v6899_v51 = vrot.slane %v6800_v21, 2  ;;  %v7749_v21 = vld [vmem:[#allocation3 + $0x238] sm:$0xff] }
 0x510   : > { %10825 = vmatprep.mubr.f32.mxu1 %v6873_v30  ;;  %11886 = vmatpush3.bf16.msra.mxu1 %v11883_v8  ;;  %v6891_v8 = vrot.slane %v6797_v40, 2  ;;  %v6902_v30 = vrot.slane %v15580_v62, 2 }
 0x511   : > { %11888 = vmatprep.subr.bf16.mxu1 %v11887_v48  ;;  %v6900_v59 = vsel %vm1903_vm2, %v6897_v25, %v6899_v51  ;;  %v7750_v25 = vld [vmem:[#allocation3 + $0x240] sm:$0xff]  ;;  %v7752_v51 = vld [vmem:[#allocation3 + $0x250] sm:$0xff] }
 0x512   : > { %v6893_v58 = vsel %vm1903_vm2, %v6891_v8, %v6892_v1  ;;  %v6903_v47 = vsel %vm1903_vm2, %v6901_v41, %v6902_v30  ;;  %v6905_v46 = vsel %vm1903_vm2, %v6902_v30, %v6904_v45  ;;  %v7745_v8 = vld [vmem:[#allocation3 + $0x218] sm:$0xff]  ;;  %v15760_v41 = vld [vmem:[#allocation2 + $0x100] sm:$0xff]  ;;  %v15764_v30 = vld [vmem:[#allocation2 + $0x130] sm:$0xff] }
 0x513   : > { %10826 = vmatmul.mubr.f32.gmra.mrb[156].mxu1 %v6875_v43  ;;  %v6907_v43 = vrot.slane %v15591_v55, 2  ;;  %v7757_v45 = vld [vmem:[#allocation3 + $0x278] sm:$0xff] }
 0x514   : > { %10828 = vmatprep.mubr.f32.mxu1 %v6878_v35  ;;  %11890 = vmatpush3.bf16.msra.mxu1 %v11887_v48  ;;  %v6895_v48 = vsel %vm1903_vm2, %v6892_v1, %v6894_v29  ;;  %v7746_v1 = vld [vmem:[#allocation3 + $0x220] sm:$0xff] }
 0x515   : > { %11892 = vmatprep.subr.bf16.mxu1 %v11891_v36  ;;  %v6908_v14 = vsel %vm1903_vm2, %v6906_v18, %v6907_v43  ;;  %v6910_v33 = vsel %vm1903_vm2, %v6907_v43, %v6909_v24  ;;  %v8192_v18 = vld [vmem:[#allocation3 + $0x280] sm:$0xff]  ;;  %v15780_v43 = vld [vmem:[#allocation2 + $0x1f0] sm:$0xff]  ;;  %v8195_v24 = vld [vmem:[#allocation3 + $0x298] sm:$0xff] }
 0x517   : > { %10829 = vmatmul.mubr.f32.gmra.mrb[158].mxu1 %v6880_v16  ;;  %v6914_v16 = vrot.slane %v6806_v9, 2 }
 0x518   : > { %10831 = vmatprep.mubr.f32.mxu1 %v6883_v53  ;;  %11894 = vmatpush3.bf16.msra.mxu1 %v11891_v36  ;;  %v6805_v36 = vld [vmem:[#allocation2 + $0x2a0] sm:$0xfc]  ;;  %v6916_v53 = vrot.slane %v6807_v57, 2  ;;  %v7539_v57 = vld [vmem:[#allocation2 + $0x90] sm:$0xfe] }
 0x519   : > { %11896 = vmatprep.subr.bf16.mxu1 %v15715_v42  ;;  %v6911_v35 = vrot.slane %v6805_v36, 2  ;;  %v6915_v40 = vsel %vm1903_vm2, %v6912_v39, %v6914_v16  ;;  %v15772_v36 = vld [vmem:[#allocation2 + $0x190] sm:$0xff] }
 0x51b   : > { %10832 = vmatmul.mubr.f32.gmra.mrb[160].mxu1 %v6885_v17  ;;  %v6913_v26 = vsel %vm1903_vm2, %v6911_v35, %v6912_v39  ;;  %v6918_v17 = vsel %vm1903_vm2, %v6916_v53, %v6917_v37  ;;  %v8196_v39 = vld [vmem:[#allocation3 + $0x2a0] sm:$0xff]  ;;  %v7639_v53 = vrot.slane %v7539_v57, 1  ;;  %v8207_v57 = vld [vmem:[#allocation3 + $0x2f8] sm:$0xff] }
 0x51c   : > { %10834 = vmatprep.mubr.f32.mxu1 %v6888_v0  ;;  %v7744_v0 = vld [vmem:[#allocation3 + $0x210] sm:$0xff] }
 0x51d   : > { %v11899_v52 = vpack.c.bf16 %v7745_v8, %v7744_v0 }
 0x51f   : > { %10835 = vmatmul.mubr.f32.gmra.mrb[162].mxu1 %v6890_v6  ;;  %v7747_v6 = vld [vmem:[#allocation3 + $0x228] sm:$0xff] }
 0x520   : > { %10837 = vmatprep.mubr.f32.mxu1 %v6893_v58  ;;  %v11903_v29 = vpack.c.bf16 %v7747_v6, %v7746_v1  ;;  %v15748_v58 = vld [vmem:[#allocation2 + $0x70] sm:$0xff]  ;;  %v7644_v1 = vrot.slane %v7542_v19, 1  ;;  %v8499_v19 = vld [vmem:[#allocation3 + $0x308] sm:$0xff] }
 0x523   : > { %10838 = vmatmul.mubr.f32.gmra.mrb[164].mxu1 %v6895_v48  ;;  %v7751_v48 = vld [vmem:[#allocation3 + $0x248] sm:$0xff] }
 0x524   : > { %10840 = vmatprep.mubr.f32.mxu1 %v6898_v2  ;;  %v7753_v2 = vld [vmem:[#allocation3 + $0x258] sm:$0xff] }
 0x527   : > { %10841 = vmatmul.mubr.f32.gmra.mrb[166].mxu1 %v6900_v59  ;;  %v7756_v59 = vld [vmem:[#allocation3 + $0x270] sm:$0xff] }
 0x528   : > { %10843 = vmatprep.mubr.f32.mxu1 %v6903_v47  ;;  %v15768_v47 = vld [vmem:[#allocation2 + $0x160] sm:$0xff] }
 0x52b   : > { %10844 = vmatmul.mubr.f32.gmra.mrb[168].mxu1 %v6905_v46  ;;  %v7536_v46 = vld [vmem:[#allocation2 + $0x60] sm:$0xfe] }
 0x52c   : > { %10846 = vmatprep.mubr.f32.mxu1 %v6908_v14 }
 0x52f   : > { %10847 = vmatmul.mubr.f32.gmra.mrb[170].mxu1 %v6910_v33  ;;  %v8197_v33 = vld [vmem:[#allocation3 + $0x2a8] sm:$0xff] }
 0x530   : > { %10849 = vmatprep.mubr.f32.mxu1 %v6913_v26  ;;  %v7640_v26 = vrot.slane %v15752_v22, 1  ;;  %v11935_v34 = vpack.c.bf16 %v8197_v33, %v8196_v39  ;;  %v7665_v33 = vrot.slane %v15772_v36, 1 }
 0x532   : > { %v7641_v0 = vsel %vm1067_vm0, %v7639_v53, %v7640_v26 }
 0x533   : > { %10850 = vmatmul.mubr.f32.gmra.mrb[172].mxu1 %v6915_v40 }
 0x534   : > { %10852 = vmatprep.mubr.f32.mxu1 %v6918_v17  ;;  %v8198_v17 = vld [vmem:[#allocation3 + $0x2b0] sm:$0xff] }
 0x537   : > { %10853 = vmatmul.mubr.f32.gmra.mrb[174].mxu1 %v6920_v61  ;;  %v8199_v61 = vld [vmem:[#allocation3 + $0x2b8] sm:$0xff] }
 0x538   : > { %10887 = vmatprep.mubr.f32.mxu1 %v15630_v11  ;;  %v11907_v11 = vpack.c.bf16 %v7749_v21, %v7748_v10  ;;  %v11939_v6 = vpack.c.bf16 %v8199_v61, %v8198_v17  ;;  %v7545_v21 = vld [vmem:[#allocation2 + $0xf0] sm:$0xfe] }
 0x53b   : > { %10888 = vmatmul.mubr.f32.vlgmr.msra.gmra.mrb[144].mxu1 %v15743_v63 }
 0x53c   : > { %10890 = vmatprep.mubr.f32.mxu1 %v15635_v27  ;;  %11898 = vmatpush3.bf16.msra.mxu1 %v15715_v42  ;;  %v11911_v27 = vpack.c.bf16 %v7751_v48, %v7750_v25  ;;  %v15756_v42 = vld [vmem:[#allocation2 + $0xd0] sm:$0xff]  ;;  %v8201_v25 = vld [vmem:[#allocation3 + $0x2c8] sm:$0xff] }
 0x53d   : > { %11900 = vmatprep.subr.bf16.mxu1 %v11899_v52  ;;  %v7645_v8 = vrot.slane %v15756_v42, 1 }
 0x53f   : > { %10891 = vmatmul.mubr.f32.gmra.mrb[146].mxu1 %v15748_v58  ;;  %v7646_v48 = vsel %vm1067_vm0, %v7644_v1, %v7645_v8 }
 0x540   : > { %10893 = vmatprep.mubr.f32.mxu1 %v15639_v50  ;;  %11902 = vmatpush3.bf16.msra.mxu1 %v11899_v52  ;;  %v11915_v50 = vpack.c.bf16 %v7753_v2, %v7752_v51  ;;  %v7544_v52 = vld [vmem:[#allocation2 + $0xe0] sm:$0x1]  ;;  %v7547_v51 = vld [vmem:[#allocation2 + $0x110] sm:$0x1]  ;;  %v7649_v2 = vrot.slane %v7545_v21, 1  ;;  %v7675_v21 = vrot.slane %v15780_v43, 1 }
 0x541   : > { %11904 = vmatprep.subr.bf16.mxu1 %v11903_v29  ;;  %v7647_v10 = vrot.slane %v7544_v52, 1 }
 0x543   : > { %10894 = vmatmul.mubr.f32.gmra.mrb[148].mxu1 %v15752_v22 }
 0x544   : > { %10896 = vmatprep.mubr.f32.mxu1 %v15643_v38  ;;  %11906 = vmatpush3.bf16.msra.mxu1 %v11903_v29  ;;  %v11919_v38 = vpack.c.bf16 %v7755_v12, %v7754_v4  ;;  %v7648_v4 = vsel %vm1067_vm0, %v7645_v8, %v7647_v10  ;;  %v7652_v12 = vrot.slane %v7547_v51, 1  ;;  %v7563_v51 = vld [vmem:[#allocation2 + $0x210] sm:$0xfe] }
 0x545   : > { %11908 = vmatprep.subr.bf16.mxu1 %v11907_v11 }
 0x547   : > { %10897 = vmatmul.mubr.f32.gmra.mrb[150].mxu1 %v15756_v42 }
 0x548   : > { %10899 = vmatprep.mubr.f32.mxu1 %v15647_v28  ;;  %11910 = vmatpush3.bf16.msra.mxu1 %v11907_v11  ;;  %v11923_v28 = vpack.c.bf16 %v7757_v45, %v7756_v59  ;;  %v8200_v11 = vld [vmem:[#allocation3 + $0x2c0] sm:$0xff]  ;;  %v8202_v59 = vld [vmem:[#allocation3 + $0x2d0] sm:$0xff]  ;;  %v8203_v45 = vld [vmem:[#allocation3 + $0x2d8] sm:$0xff] }
 0x549   : > { %11912 = vmatprep.subr.bf16.mxu1 %v11911_v27 }
 0x54b   : > { %10900 = vmatmul.mubr.f32.gmra.mrb[152].mxu1 %v15760_v41 }
 0x54c   : > { %10902 = vmatprep.mubr.f32.mxu1 %v15651_v49  ;;  %11914 = vmatpush3.bf16.msra.mxu1 %v11911_v27  ;;  %v11927_v49 = vpack.c.bf16 %v8193_v5, %v8192_v18  ;;  %v7650_v27 = vrot.slane %v15760_v41, 1  ;;  %v7655_v18 = vrot.slane %v15764_v30, 1  ;;  %v7550_v5 = vld [vmem:[#allocation2 + $0x140] sm:$0x1] }
 0x54d   : > { %11916 = vmatprep.subr.bf16.mxu1 %v11915_v50 }
 0x54f   : > { %10903 = vmatmul.mubr.f32.gmra.mrb[154].mxu1 %v15764_v30 }
 0x550   : > { %10905 = vmatprep.mubr.f32.mxu1 %v15655_v44  ;;  %11918 = vmatpush3.bf16.msra.mxu1 %v11915_v50  ;;  %v15776_v44 = vld [vmem:[#allocation2 + $0x1c0] sm:$0xff]  ;;  %v11943_v50 = vpack.c.bf16 %v8201_v25, %v8200_v11 }
 0x551   : > { %11920 = vmatprep.subr.bf16.mxu1 %v11919_v38  ;;  %v7670_v61 = vrot.slane %v15776_v44, 1  ;;  %v7562_v11 = vld [vmem:[#allocation2 + $0x200] sm:$0x1] }
 0x553   : > { %10906 = vmatmul.mubr.f32.gmra.mrb[156].mxu1 %v15768_v47 }
 0x554   : > { %10908 = vmatprep.mubr.f32.mxu1 %v15659_v60  ;;  %11922 = vmatpush3.bf16.msra.mxu1 %v11919_v38  ;;  %v15784_v60 = vld [vmem:[#allocation2 + $0x220] sm:$0xff] }
 0x555   : > { %11924 = vmatprep.subr.bf16.mxu1 %v11923_v28  ;;  %v7548_v38 = vld [vmem:[#allocation2 + $0x120] sm:$0xfe] }
 0x557   : > { %10909 = vmatmul.mubr.f32.gmra.mrb[158].mxu1 %v15772_v36 }
 0x558   : > { %10911 = vmatprep.mubr.f32.mxu1 %v15663_v13  ;;  %11926 = vmatpush3.bf16.msra.mxu1 %v11923_v28  ;;  %v7533_v13 = vld [vmem:[#allocation2 + $0x30] sm:$0xfe]  ;;  %v7651_v28 = vsel %vm1067_vm0, %v7649_v2, %v7650_v27 }
 0x559   : > { %11928 = vmatprep.subr.bf16.mxu1 %v11927_v49 }
 0x55b   : > { %10912 = vmatmul.mubr.f32.gmra.mrb[160].mxu1 %v15776_v44 }
 0x55c   : > { %10914 = vmatprep.mubr.f32.mxu1 %v15667_v56  ;;  %v15795_v56 = vld [vmem:[#allocation2 + $0x300] sm:$0xff] }
 0x55f   : > { %10915 = vmatmul.mubr.f32.gmra.mrb[162].mxu1 %v15780_v43 }
 0x560   : > { %10917 = vmatprep.mubr.f32.mxu1 %v15671_v23  ;;  %v7630_v23 = vrot.slane %v15743_v63, 1 }
 0x563   : > { %10918 = vmatmul.mubr.f32.gmra.mrb[164].mxu1 %v15784_v60 }
 0x564   : > { %10920 = vmatprep.mubr.f32.mxu1 %v15675_v54  ;;  %v7535_v54 = vld [vmem:[#allocation2 + $0x50] sm:$0x1] }
 0x567   : > { %10921 = vmatmul.mubr.f32.gmra.mrb[166].mxu1 %v15580_v62  ;;  %v7629_v62 = vrot.slane %v7533_v13, 1  ;;  %v11947_v13 = vpack.c.bf16 %v8203_v45, %v8202_v59 }
 0x568   : > { %10923 = vmatprep.mubr.f32.mxu1 %v15679_v15  ;;  %v7632_v15 = vrot.slane %v7535_v54, 1  ;;  %v7657_v54 = vrot.slane %v7550_v5, 1 }
 0x56a   : > { %v7633_v35 = vsel %vm1067_vm0, %v7630_v23, %v7632_v15  ;;  %v8204_v15 = vld [vmem:[#allocation3 + $0x2e0] sm:$0xff] }
 0x56b   : > { %10924 = vmatmul.mubr.f32.gmra.mrb[168].mxu1 %v15591_v55  ;;  %v8194_v55 = vld [vmem:[#allocation3 + $0x290] sm:$0xff] }
 0x56c   : > { %10926 = vmatprep.mubr.f32.mxu1 %v15683_v20  ;;  %v7635_v20 = vrot.slane %v15748_v58, 1  ;;  %v11931_v14 = vpack.c.bf16 %v8195_v24, %v8194_v55  ;;  %v7660_v24 = vrot.slane %v15768_v47, 1 }
 0x56f   : > { %10927 = vmatmul.mubr.f32.gmra.mrb[170].mxu1 %v15602_v32  ;;  %v7631_v32 = vsel %vm1067_vm0, %v7629_v62, %v7630_v23  ;;  %v7653_v23 = vsel %vm1067_vm0, %v7650_v27, %v7652_v12  ;;  %v7551_v62 = vld [vmem:[#allocation2 + $0x150] sm:$0xfe]  ;;  %v7677_v27 = vrot.slane %v7562_v11, 1 }
 0x570   : > { %10929 = vmatprep.mubr.f32.mxu1 %v15688_v3  ;;  %v7538_v3 = vld [vmem:[#allocation2 + $0x80] sm:$0x1]  ;;  %v15832_v12 = vld [vmem:[#allocation2 + $0x250] sm:$0xff] }
 0x571   : > { %v7637_v9 = vrot.slane %v7538_v3, 1  ;;  %v7678_v59 = vsel %vm1067_vm0, %v7675_v21, %v7677_v27  ;;  %v15837_v5 = vrot.slane %v15832_v12, 1  ;;  %v8015_v11 = vld [vmem:[#allocation2 + $0x30] sm:$0xfc]  ;;  %v8016_v27 = vld [vmem:[#allocation2 + $0x50] sm:$0x3] }
 0x573   : > { %10930 = vmatmul.mubr.f32.gmra.mrb[172].mxu1 %v15613_v7  ;;  %v7634_v7 = vrot.slane %v7536_v46, 1  ;;  %v7638_v37 = vsel %vm1067_vm0, %v7635_v20, %v7637_v9  ;;  %v8205_v46 = vld [vmem:[#allocation3 + $0x2e8] sm:$0xff]  ;;  %v8206_v9 = vld [vmem:[#allocation3 + $0x2f0] sm:$0xff] }
 0x574   : > { %10932 = vmatprep.mubr.f32.mxu1 %v15795_v56  ;;  %v11951_v3 = vpack.c.bf16 %v8205_v46, %v8204_v15  ;;  %v7569_v15 = vld [vmem:[#allocation2 + $0x270] sm:$0xfe] }
 0x575   : > { %v7636_v16 = vsel %vm1067_vm0, %v7634_v7, %v7635_v20  ;;  %v7659_v20 = vrot.slane %v7551_v62, 1  ;;  %v7658_v7 = vsel %vm1067_vm0, %v7655_v18, %v7657_v54 }
 0x577   : > { %10933 = vmatmul.mubr.f32.gmra.mrb[174].mxu1 %v15622_v31  ;;  %v7541_v31 = vld [vmem:[#allocation2 + $0xb0] sm:$0x1]  ;;  %v7661_v39 = vsel %vm1067_vm0, %v7659_v20, %v7660_v24  ;;  %v7689_v20 = vrot.slane %v7569_v15, 1  ;;  %v8502_v15 = vld [vmem:[#allocation3 + $0x320] sm:$0xff] }
 0x578   : > { %10967 = vmatprep.mubr.f32.mxu1 %v7631_v32  ;;  %v7642_v40 = vrot.slane %v7541_v31, 1  ;;  %v7553_v32 = vld [vmem:[#allocation2 + $0x170] sm:$0x1]  ;;  %v11955_v31 = vpack.c.bf16 %v8207_v57, %v8206_v9  ;;  %v7574_v57 = vld [vmem:[#allocation2 + $0x2c0] sm:$0x1] }
 0x57a   : > { %v7643_v29 = vsel %vm1067_vm0, %v7640_v26, %v7642_v40  ;;  %v8498_v40 = vld [vmem:[#allocation3 + $0x300] sm:$0xff] }
 0x57b   : > { %10968 = vmatmul.mubr.f32.vlgmr.msra.gmra.mrb[144].mxu1 %v7633_v35  ;;  %v7554_v35 = vld [vmem:[#allocation2 + $0x180] sm:$0xfe]  ;;  %v15823_v52 = vpack.c.bf16 %v8499_v19, %v8498_v40  ;;  %v15865_v40 = vld [vmem:[#allocation2 + $0x310] sm:$0xff] }
 0x57c   : > { %10970 = vmatprep.mubr.f32.mxu1 %v7636_v16  ;;  %11930 = vmatpush3.bf16.msra.mxu1 %v11927_v49  ;;  %v7654_v49 = vrot.slane %v7548_v38, 1  ;;  %v7556_v16 = vld [vmem:[#allocation2 + $0x1a0] sm:$0x1]  ;;  %v7664_v26 = vrot.slane %v7554_v35, 1  ;;  %v7679_v38 = vrot.slane %v7563_v51, 1  ;;  %v8079_v51 = vrot.slane %v8015_v11, 2 }
 0x57d   : > { %11932 = vmatprep.subr.bf16.mxu1 %v11931_v14 }
 0x57e   : > { %v7656_v55 = vsel %vm1067_vm0, %v7654_v49, %v7655_v18  ;;  %v7666_v17 = vsel %vm1067_vm0, %v7664_v26, %v7665_v33  ;;  %v7568_v49 = vld [vmem:[#allocation2 + $0x260] sm:$0x1]  ;;  %v7697_v26 = vrot.slane %v7574_v57, 1 }
 0x57f   : > { %10971 = vmatmul.mubr.f32.gmra.mrb[146].mxu1 %v7638_v37  ;;  %v7557_v37 = vld [vmem:[#allocation2 + $0x1b0] sm:$0xfe]  ;;  %v7687_v62 = vrot.slane %v7568_v49, 1 }
 0x580   : > { %10973 = vmatprep.mubr.f32.mxu1 %v7641_v0  ;;  %11934 = vmatpush3.bf16.msra.mxu1 %v11931_v14  ;;  %v7662_v14 = vrot.slane %v7553_v32, 1  ;;  %v7559_v0 = vld [vmem:[#allocation2 + $0x1d0] sm:$0x1]  ;;  %v7669_v8 = vrot.slane %v7557_v37, 1 }
 0x581   : > { %11936 = vmatprep.subr.bf16.mxu1 %v11935_v34  ;;  %v15847_v32 = vld [vmem:[#allocation2 + $0x2b0] sm:$0xff] }
 0x582   : > { %v7663_v53 = vsel %vm1067_vm0, %v7660_v24, %v7662_v14  ;;  %v7671_v10 = vsel %vm1067_vm0, %v7669_v8, %v7670_v61  ;;  %v7571_v24 = vld [vmem:[#allocation2 + $0x290] sm:$0x1]  ;;  %v7572_v14 = vld [vmem:[#allocation2 + $0x2a0] sm:$0xfe]  ;;  %v15854_v9 = vrot.slane %v15847_v32, 1 }
 0x583   : > { %10974 = vmatmul.mubr.f32.gmra.mrb[148].mxu1 %v7643_v29  ;;  %v7560_v29 = vld [vmem:[#allocation2 + $0x1e0] sm:$0xfe]  ;;  %v7577_v37 = vld [vmem:[#allocation2 + $0x2f0] sm:$0x1] }
 0x584   : > { %10976 = vmatprep.mubr.f32.mxu1 %v7646_v48  ;;  %11938 = vmatpush3.bf16.msra.mxu1 %v11935_v34  ;;  %v7667_v34 = vrot.slane %v7556_v16, 1  ;;  %v7674_v25 = vrot.slane %v7560_v29, 1 }
 0x585   : > { %11940 = vmatprep.subr.bf16.mxu1 %v11939_v6 }
 0x586   : > { %v7668_v1 = vsel %vm1067_vm0, %v7665_v33, %v7667_v34  ;;  %v7676_v2 = vsel %vm1067_vm0, %v7674_v25, %v7675_v21  ;;  %v7694_v33 = vrot.slane %v7572_v14, 1 }
 0x587   : > { %10977 = vmatmul.mubr.f32.gmra.mrb[150].mxu1 %v7648_v4  ;;  %v7565_v4 = vld [vmem:[#allocation2 + $0x230] sm:$0x1] }
 0x588   : > { %10979 = vmatprep.mubr.f32.mxu1 %v7651_v28  ;;  %11942 = vmatpush3.bf16.msra.mxu1 %v11939_v6  ;;  %v7672_v6 = vrot.slane %v7559_v0, 1  ;;  %v7682_v45 = vrot.slane %v7565_v4, 1  ;;  %v7566_v28 = vld [vmem:[#allocation2 + $0x240] sm:$0xfe] }
 0x589   : > { %11944 = vmatprep.subr.bf16.mxu1 %v11943_v50  ;;  %v7578_v0 = vld [vmem:[#allocation2 + $0x300] sm:$0xfe] }
 0x58a   : > { %v7673_v48 = vsel %vm1067_vm0, %v7670_v61, %v7672_v6  ;;  %v7702_v61 = vrot.slane %v7577_v37, 1  ;;  %v7580_v6 = vld [vmem:[#allocation2 + $0x320] sm:$0x1]  ;;  %v7704_v29 = vrot.slane %v7578_v0, 1  ;;  %v8017_v4 = vld [vmem:[#allocation2 + $0x60] sm:$0xfc] }
 0x58b   : > { %10980 = vmatmul.mubr.f32.gmra.mrb[152].mxu1 %v7653_v23  ;;  %v7684_v23 = vrot.slane %v7566_v28, 1  ;;  %v7707_v21 = vrot.slane %v7580_v6, 1  ;;  %v8085_v28 = vrot.slane %v15748_v58, 2  ;;  %v8084_v49 = vrot.slane %v8017_v4, 2  ;;  %v8022_v37 = vld [vmem:[#allocation2 + $0xe0] sm:$0x3] }
 0x58c   : > { %10982 = vmatprep.mubr.f32.mxu1 %v7656_v55  ;;  %11946 = vmatpush3.bf16.msra.mxu1 %v11943_v50  ;;  %v7680_v50 = vrot.slane %v15784_v60, 1  ;;  %v8023_v0 = vld [vmem:[#allocation2 + $0xf0] sm:$0xfc]  ;;  %v8507_v6 = vld [vmem:[#allocation3 + $0x348] sm:$0xff] }
 0x58d   : > { %11948 = vmatprep.subr.bf16.mxu1 %v11947_v13  ;;  %v7686_v46 = vsel %vm1067_vm0, %v7684_v23, %v15837_v5  ;;  %v8099_v11 = vrot.slane %v8023_v0, 2 }
 0x58e   : > { %v7681_v18 = vsel %vm1067_vm0, %v7679_v38, %v7680_v50  ;;  %v7683_v54 = vsel %vm1067_vm0, %v7680_v50, %v7682_v45  ;;  %v8082_v50 = vrot.slane %v8016_v27, 2  ;;  %v8500_v38 = vld [vmem:[#allocation3 + $0x310] sm:$0xff] }
 0x58f   : > { %10983 = vmatmul.mubr.f32.gmra.mrb[154].mxu1 %v7658_v7  ;;  %v7692_v7 = vrot.slane %v7571_v24, 1  ;;  %v8086_v24 = vsel %vm1903_vm2, %v8084_v49, %v8085_v28 }
 0x590   : > { %10985 = vmatprep.mubr.f32.mxu1 %v7661_v39  ;;  %11950 = vmatpush3.bf16.msra.mxu1 %v11947_v13  ;;  %v15839_v13 = vld [vmem:[#allocation2 + $0x280] sm:$0xff] }
 0x591   : > { %11952 = vmatprep.subr.bf16.mxu1 %v11951_v3  ;;  %v15845_v55 = vrot.slane %v15839_v13, 1  ;;  %v15856_v39 = vld [vmem:[#allocation2 + $0x2e0] sm:$0xff] }
 0x592   : > { %v15863_v34 = vrot.slane %v15856_v39, 1 }
 0x593   : > { %10986 = vmatmul.mubr.f32.gmra.mrb[156].mxu1 %v7663_v53  ;;  %v7691_v35 = vsel %vm1067_vm0, %v7689_v20, %v15845_v55  ;;  %v7693_v16 = vsel %vm1067_vm0, %v15845_v55, %v7692_v7  ;;  %v7696_v53 = vsel %vm1067_vm0, %v7694_v33, %v15854_v9  ;;  %v8090_v20 = vrot.slane %v15752_v22, 2  ;;  %v8021_v33 = vld [vmem:[#allocation2 + $0xc0] sm:$0xfc] }
 0x594   : > { %10988 = vmatprep.mubr.f32.mxu1 %v7666_v17  ;;  %11954 = vmatpush3.bf16.msra.mxu1 %v11951_v3  ;;  %v7688_v3 = vsel %vm1067_vm0, %v15837_v5, %v7687_v62  ;;  %v7698_v17 = vsel %vm1067_vm0, %v15854_v9, %v7697_v26  ;;  %v8019_v62 = vld [vmem:[#allocation2 + $0x90] sm:$0xfc]  ;;  %v8505_v26 = vld [vmem:[#allocation3 + $0x338] sm:$0xff] }
 0x595   : > { %11956 = vmatprep.subr.bf16.mxu1 %v11955_v31  ;;  %v8089_v7 = vrot.slane %v8019_v62, 2 }
 0x597   : > { %10989 = vmatmul.mubr.f32.gmra.mrb[158].mxu1 %v7668_v1  ;;  %v15872_v1 = vrot.slane %v15865_v40, 1 }
 0x598   : > { %10991 = vmatprep.mubr.f32.mxu1 %v7671_v10  ;;  %11958 = vmatpush3.bf16.msra.mxu1 %v11955_v31  ;;  %v7575_v31 = vld [vmem:[#allocation2 + $0x2d0] sm:$0xfe]  ;;  %v7703_v10 = vsel %vm1067_vm0, %v15863_v34, %v7702_v61  ;;  %v8097_v61 = vrot.slane %v8022_v37, 2 }
 0x599   : > { %11960 = vmatprep.subr.bf16.mxu1 %v15823_v52  ;;  %v7699_v19 = vrot.slane %v7575_v31, 1  ;;  %v7706_v25 = vsel %vm1067_vm0, %v7704_v29, %v15872_v1  ;;  %v8091_v31 = vsel %vm1903_vm2, %v8089_v7, %v8090_v20 }
 0x59b   : > { %10992 = vmatmul.mubr.f32.gmra.mrb[160].mxu1 %v7673_v48  ;;  %v7701_v8 = vsel %vm1067_vm0, %v7699_v19, %v15863_v34  ;;  %v8080_v48 = vrot.slane %v15743_v63, 2  ;;  %v8094_v19 = vrot.slane %v8021_v33, 2 }
 0x59c   : > { %10994 = vmatprep.mubr.f32.mxu1 %v7676_v2  ;;  %v7708_v2 = vsel %vm1067_vm0, %v15872_v1, %v7707_v21  ;;  %v8024_v21 = vld [vmem:[#allocation2 + $0x110] sm:$0x3] }
 0x59d   : > { %v8081_v45 = vsel %vm1903_vm2, %v8079_v51, %v8080_v48  ;;  %v8083_v63 = vsel %vm1903_vm2, %v8080_v48, %v8082_v50  ;;  %v8102_v27 = vrot.slane %v8024_v21, 2  ;;  %v8025_v51 = vld [vmem:[#allocation2 + $0x120] sm:$0xfc]  ;;  %v8509_v50 = vld [vmem:[#allocation3 + $0x358] sm:$0xff] }
 0x59f   : > { %10995 = vmatmul.mubr.f32.gmra.mrb[162].mxu1 %v7678_v59  ;;  %v8501_v59 = vld [vmem:[#allocation3 + $0x318] sm:$0xff] }
 0x5a0   : > { %10997 = vmatprep.mubr.f32.mxu1 %v7681_v18  ;;  %v8018_v18 = vld [vmem:[#allocation2 + $0x80] sm:$0x3]  ;;  %v11963_v23 = vpack.c.bf16 %v8501_v59, %v8500_v38  ;;  %v8105_v38 = vrot.slane %v15764_v30, 2 }
 0x5a1   : > { %v8026_v59 = vld [vmem:[#allocation2 + $0x140] sm:$0x3] }
 0x5a2   : > { %v8107_v49 = vrot.slane %v8026_v59, 2 }
 0x5a3   : > { %10998 = vmatmul.mubr.f32.gmra.mrb[164].mxu1 %v7683_v54  ;;  %v8087_v54 = vrot.slane %v8018_v18, 2 }
 0x5a4   : > { %11000 = vmatprep.mubr.f32.mxu1 %v7686_v46  ;;  %v8503_v46 = vld [vmem:[#allocation3 + $0x328] sm:$0xff] }
 0x5a5   : > { %v11967_v14 = vpack.c.bf16 %v8503_v46, %v8502_v15  ;;  %v8110_v15 = vrot.slane %v15768_v47, 2  ;;  %v8028_v46 = vld [vmem:[#allocation2 + $0x170] sm:$0x3] }
 0x5a6   : > { %v8112_v7 = vrot.slane %v8028_v46, 2 }
 0x5a7   : > { %11001 = vmatmul.mubr.f32.gmra.mrb[166].mxu1 %v7688_v3  ;;  %v8020_v3 = vld [vmem:[#allocation2 + $0xb0] sm:$0x3] }
 0x5a8   : > { %11003 = vmatprep.mubr.f32.mxu1 %v7691_v35  ;;  %v8088_v35 = vsel %vm1903_vm2, %v8085_v28, %v8087_v54  ;;  %v8092_v57 = vrot.slane %v8020_v3, 2  ;;  %v8511_v54 = vld [vmem:[#allocation3 + $0x368] sm:$0xff]  ;;  %v8108_v3 = vsel %vm1903_vm2, %v8105_v38, %v8107_v49  ;;  %v8113_v37 = vsel %vm1903_vm2, %v8110_v15, %v8112_v7 }
 0x5ab   : > { %11004 = vmatmul.mubr.f32.gmra.mrb[168].mxu1 %v7693_v16  ;;  %v8504_v16 = vld [vmem:[#allocation3 + $0x330] sm:$0xff] }
 0x5ac   : > { %11006 = vmatprep.mubr.f32.mxu1 %v7696_v53  ;;  %v8095_v53 = vrot.slane %v15756_v42, 2 }
 0x5ae   : > { %v8096_v29 = vsel %vm1903_vm2, %v8094_v19, %v8095_v53  ;;  %v8098_v48 = vsel %vm1903_vm2, %v8095_v53, %v8097_v61  ;;  %v8981_v61 = vld [vmem:[#allocation3 + $0x388] sm:$0xff] }
 0x5af   : > { %11007 = vmatmul.mubr.f32.gmra.mrb[170].mxu1 %v7698_v17  ;;  %v8093_v17 = vsel %vm1903_vm2, %v8090_v20, %v8092_v57  ;;  %v8513_v57 = vld [vmem:[#allocation3 + $0x378] sm:$0xff] }
 0x5b0   : > { %11009 = vmatprep.mubr.f32.mxu1 %v7701_v8  ;;  %v8506_v8 = vld [vmem:[#allocation3 + $0x340] sm:$0xff] }
 0x5b3   : > { %11010 = vmatmul.mubr.f32.gmra.mrb[172].mxu1 %v7703_v10  ;;  %v8100_v10 = vrot.slane %v15760_v41, 2 }
 0x5b4   : > { %11012 = vmatprep.mubr.f32.mxu1 %v7706_v25  ;;  %v11975_v25 = vpack.c.bf16 %v8507_v6, %v8506_v8  ;;  %v8120_v8 = vrot.slane %v15776_v44, 2  ;;  %v8032_v6 = vld [vmem:[#allocation2 + $0x1d0] sm:$0x3] }
 0x5b5   : > { %v8101_v4 = vsel %vm1903_vm2, %v8099_v11, %v8100_v10  ;;  %v8103_v18 = vsel %vm1903_vm2, %v8100_v10, %v8102_v27  ;;  %v8122_v11 = vrot.slane %v8032_v6, 2  ;;  %v8125_v27 = vrot.slane %v15780_v43, 2  ;;  %v8044_v6 = vld [vmem:[#allocation2 + $0x2f0] sm:$0x3] }
 0x5b7   : > { %11013 = vmatmul.mubr.f32.gmra.mrb[174].mxu1 %v7708_v2  ;;  %v8508_v2 = vld [vmem:[#allocation3 + $0x350] sm:$0xff] }
 0x5b8   : > { %11047 = vmatprep.mubr.f32.mxu1 %v8081_v45  ;;  %v8104_v45 = vrot.slane %v8025_v51, 2  ;;  %v11979_v28 = vpack.c.bf16 %v8509_v50, %v8508_v2  ;;  %v8034_v51 = vld [vmem:[#allocation2 + $0x200] sm:$0x3]  ;;  %v8123_v50 = vsel %vm1903_vm2, %v8120_v8, %v8122_v11  ;;  %v8152_v11 = vrot.slane %v8044_v6, 2  ;;  %v8479_v6 = vld [vmem:[#allocation2 + $0x1b0] sm:$0xff] }
 0x5ba   : > { %v8106_v62 = vsel %vm1903_vm2, %v8104_v45, %v8105_v38  ;;  %v8035_v38 = vld [vmem:[#allocation2 + $0x210] sm:$0xfc]  ;;  %v8130_v45 = vrot.slane %v15784_v60, 2 }
 0x5bb   : > { %11048 = vmatmul.mubr.f32.vlgmr.msra.gmra.mrb[144].mxu1 %v8083_v63  ;;  %v8510_v63 = vld [vmem:[#allocation3 + $0x360] sm:$0xff] }
 0x5bc   : > { %11050 = vmatprep.mubr.f32.mxu1 %v8086_v24  ;;  %11962 = vmatpush3.bf16.msra.mxu1 %v15823_v52  ;;  %v11971_v52 = vpack.c.bf16 %v8505_v26, %v8504_v16  ;;  %v11983_v20 = vpack.c.bf16 %v8511_v54, %v8510_v63  ;;  %v8115_v16 = vrot.slane %v15772_v36, 2  ;;  %v8030_v26 = vld [vmem:[#allocation2 + $0x1a0] sm:$0x3]  ;;  %v8037_v63 = vld [vmem:[#allocation2 + $0x240] sm:$0xfc] }
 0x5bd   : > { %11964 = vmatprep.subr.bf16.mxu1 %v11963_v23  ;;  %v8117_v19 = vrot.slane %v8030_v26, 2  ;;  %v8134_v46 = vrot.slane %v8037_v63, 2  ;;  %v8041_v26 = vld [vmem:[#allocation2 + $0x2a0] sm:$0xfc]  ;;  %v8985_v63 = vld [vmem:[#allocation3 + $0x3a8] sm:$0xff] }
 0x5bf   : > { %11051 = vmatmul.mubr.f32.gmra.mrb[146].mxu1 %v8088_v35  ;;  %v8512_v35 = vld [vmem:[#allocation3 + $0x370] sm:$0xff]  ;;  %v8118_v21 = vsel %vm1903_vm2, %v8115_v16, %v8117_v19  ;;  %v8144_v19 = vrot.slane %v8041_v26, 2  ;;  %v8992_v26 = vld [vmem:[#allocation3 + $0x3e0] sm:$0xff] }
 0x5c0   : > { %11053 = vmatprep.mubr.f32.mxu1 %v8091_v31  ;;  %11966 = vmatpush3.bf16.msra.mxu1 %v11963_v23  ;;  %v8027_v23 = vld [vmem:[#allocation2 + $0x150] sm:$0xfc]  ;;  %v11987_v53 = vpack.c.bf16 %v8513_v57, %v8512_v35  ;;  %v8040_v35 = vld [vmem:[#allocation2 + $0x290] sm:$0x3] }
 0x5c1   : > { %11968 = vmatprep.subr.bf16.mxu1 %v11967_v14  ;;  %v8109_v24 = vrot.slane %v8027_v23, 2 }
 0x5c3   : > { %11054 = vmatmul.mubr.f32.gmra.mrb[148].mxu1 %v8093_v17  ;;  %v8111_v33 = vsel %vm1903_vm2, %v8109_v24, %v8110_v15  ;;  %v8980_v17 = vld [vmem:[#allocation3 + $0x380] sm:$0xff] }
 0x5c4   : > { %11056 = vmatprep.mubr.f32.mxu1 %v8096_v29  ;;  %11970 = vmatpush3.bf16.msra.mxu1 %v11967_v14  ;;  %v8029_v14 = vld [vmem:[#allocation2 + $0x180] sm:$0xfc]  ;;  %v15905_v10 = vpack.c.bf16 %v8981_v61, %v8980_v17  ;;  %v8038_v15 = vld [vmem:[#allocation2 + $0x260] sm:$0x3]  ;;  %v8043_v61 = vld [vmem:[#allocation2 + $0x2d0] sm:$0xfc] }
 0x5c5   : > { %11972 = vmatprep.subr.bf16.mxu1 %v11971_v52  ;;  %v8114_v31 = vrot.slane %v8029_v14, 2  ;;  %v15923_v14 = vrot.slane %v15839_v13, 2 }
 0x5c7   : > { %11057 = vmatmul.mubr.f32.gmra.mrb[150].mxu1 %v8098_v48  ;;  %v8116_v0 = vsel %vm1903_vm2, %v8114_v31, %v8115_v16  ;;  %v8142_v16 = vrot.slane %v8040_v35, 2  ;;  %v8989_v35 = vld [vmem:[#allocation3 + $0x3c8] sm:$0xff] }
 0x5c8   : > { %11059 = vmatprep.mubr.f32.mxu1 %v8101_v4  ;;  %11974 = vmatpush3.bf16.msra.mxu1 %v11971_v52  ;;  %v8031_v52 = vld [vmem:[#allocation2 + $0x1b0] sm:$0xfc]  ;;  %v8127_v4 = vrot.slane %v8034_v51, 2  ;;  %v8046_v51 = vld [vmem:[#allocation2 + $0x320] sm:$0x3] }
 0x5c9   : > { %11976 = vmatprep.subr.bf16.mxu1 %v11975_v25  ;;  %v8119_v29 = vrot.slane %v8031_v52, 2  ;;  %v8143_v52 = vsel %vm1903_vm2, %v15923_v14, %v8142_v16  ;;  %v8473_v16 = vld [vmem:[#allocation2 + $0x120] sm:$0xff] }
 0x5ca   : > { %v8128_v49 = vsel %vm1903_vm2, %v8125_v27, %v8127_v4  ;;  %v8157_v4 = vrot.slane %v8046_v51, 2 }
 0x5cb   : > { %11060 = vmatmul.mubr.f32.gmra.mrb[152].mxu1 %v8103_v18  ;;  %v8121_v48 = vsel %vm1903_vm2, %v8119_v29, %v8120_v8  ;;  %v8129_v18 = vrot.slane %v8035_v38, 2  ;;  %v15937_v8 = vrot.slane %v15856_v39, 2  ;;  %v8149_v29 = vrot.slane %v8043_v61, 2  ;;  %v9430_v61 = vld [vmem:[#allocation3 + $0x400] sm:$0xff] }
 0x5cc   : > { %11062 = vmatprep.mubr.f32.mxu1 %v8106_v62  ;;  %11978 = vmatpush3.bf16.msra.mxu1 %v11975_v25  ;;  %v8033_v25 = vld [vmem:[#allocation2 + $0x1e0] sm:$0xfc]  ;;  %v15917_v62 = vrot.slane %v15832_v12, 2 }
 0x5cd   : > { %11980 = vmatprep.subr.bf16.mxu1 %v11979_v28  ;;  %v8124_v2 = vrot.slane %v8033_v25, 2  ;;  %v8131_v54 = vsel %vm1903_vm2, %v8129_v18, %v8130_v45  ;;  %v8045_v25 = vld [vmem:[#allocation2 + $0x300] sm:$0xfc] }
 0x5ce   : > { %v8136_v7 = vsel %vm1903_vm2, %v8134_v46, %v15917_v62  ;;  %v8465_v18 = vld [vmem:[#allocation2 + $0x60] sm:$0xff]  ;;  %v8986_v46 = vld [vmem:[#allocation3 + $0x3b0] sm:$0xff] }
 0x5cf   : > { %11063 = vmatmul.mubr.f32.gmra.mrb[154].mxu1 %v8108_v3  ;;  %v8126_v59 = vsel %vm1903_vm2, %v8124_v2, %v8125_v27  ;;  %v8039_v3 = vld [vmem:[#allocation2 + $0x270] sm:$0xfc]  ;;  %v15944_v27 = vrot.slane %v15865_v40, 2  ;;  %v8154_v2 = vrot.slane %v8045_v25, 2  ;;  %v8773_v25 = vld [vmem:[#allocation2 + $0x80] sm:$0x1] }
 0x5d0   : > { %11065 = vmatprep.mubr.f32.mxu1 %v8111_v33  ;;  %11982 = vmatpush3.bf16.msra.mxu1 %v11979_v28  ;;  %v8036_v28 = vld [vmem:[#allocation2 + $0x230] sm:$0x3]  ;;  %v8139_v57 = vrot.slane %v8039_v3, 2  ;;  %v8870_v51 = vrot.slane %v8773_v25, 1 }
 0x5d1   : > { %11984 = vmatprep.subr.bf16.mxu1 %v11983_v20  ;;  %v8132_v23 = vrot.slane %v8036_v28, 2  ;;  %v8156_v38 = vsel %vm1903_vm2, %v8154_v2, %v15944_v27  ;;  %v8983_v28 = vld [vmem:[#allocation3 + $0x398] sm:$0xff]  ;;  %v8774_v2 = vld [vmem:[#allocation2 + $0x90] sm:$0xfe] }
 0x5d2   : > { %v8141_v31 = vsel %vm1903_vm2, %v8139_v57, %v15923_v14  ;;  %v8990_v57 = vld [vmem:[#allocation3 + $0x3d0] sm:$0xff] }
 0x5d3   : > { %11066 = vmatmul.mubr.f32.gmra.mrb[156].mxu1 %v8113_v37  ;;  %v8133_v24 = vsel %vm1903_vm2, %v8130_v45, %v8132_v23  ;;  %v8042_v37 = vld [vmem:[#allocation2 + $0x2c0] sm:$0x3]  ;;  %v8982_v45 = vld [vmem:[#allocation3 + $0x390] sm:$0xff] }
 0x5d4   : > { %11068 = vmatprep.mubr.f32.mxu1 %v8116_v0  ;;  %11986 = vmatpush3.bf16.msra.mxu1 %v11983_v20  ;;  %v8137_v20 = vrot.slane %v8038_v15, 2  ;;  %v8147_v17 = vrot.slane %v8042_v37, 2  ;;  %v8984_v23 = vld [vmem:[#allocation3 + $0x3a0] sm:$0xff]  ;;  %v8475_v37 = vld [vmem:[#allocation2 + $0x150] sm:$0xff] }
 0x5d5   : > { %11988 = vmatprep.subr.bf16.mxu1 %v11987_v53  ;;  %v11999_v15 = vpack.c.bf16 %v8985_v63, %v8984_v23  ;;  %v9434_v23 = vld [vmem:[#allocation3 + $0x420] sm:$0xff]  ;;  %v9435_v63 = vld [vmem:[#allocation3 + $0x428] sm:$0xff] }
 0x5d6   : > { %v8138_v33 = vsel %vm1903_vm2, %v15917_v62, %v8137_v20  ;;  %v8469_v20 = vld [vmem:[#allocation2 + $0xc0] sm:$0xff] }
 0x5d7   : > { %11069 = vmatmul.mubr.f32.gmra.mrb[158].mxu1 %v8118_v21 }
 0x5d8   : > { %11071 = vmatprep.mubr.f32.mxu1 %v8121_v48  ;;  %11990 = vmatpush3.bf16.msra.mxu1 %v11987_v53  ;;  %v15930_v53 = vrot.slane %v15847_v32, 2  ;;  %v8151_v48 = vsel %vm1903_vm2, %v8149_v29, %v15937_v8  ;;  %v8481_v29 = vld [vmem:[#allocation2 + $0x1e0] sm:$0xff] }
 0x5d9   : > { %11992 = vmatprep.subr.bf16.mxu1 %v15905_v10 }
 0x5da   : > { %v8146_v0 = vsel %vm1903_vm2, %v8144_v19, %v15930_v53  ;;  %v8148_v21 = vsel %vm1903_vm2, %v15930_v53, %v8147_v17  ;;  %v8994_v19 = vld [vmem:[#allocation3 + $0x3f0] sm:$0xff]  ;;  %v8477_v17 = vld [vmem:[#allocation2 + $0x180] sm:$0xff] }
 0x5db   : > { %11072 = vmatmul.mubr.f32.gmra.mrb[160].mxu1 %v8123_v50  ;;  %v8153_v50 = vsel %vm1903_vm2, %v15937_v8, %v8152_v11  ;;  %v8489_v11 = vld [vmem:[#allocation2 + $0x2a0] sm:$0xff] }
 0x5dc   : > { %11074 = vmatprep.mubr.f32.mxu1 %v8126_v59  ;;  %v8158_v59 = vsel %vm1903_vm2, %v15944_v27, %v8157_v4  ;;  %v8776_v4 = vld [vmem:[#allocation2 + $0xb0] sm:$0x1] }
 0x5df   : > { %11075 = vmatmul.mubr.f32.gmra.mrb[162].mxu1 %v8128_v49  ;;  %v11995_v49 = vpack.c.bf16 %v8983_v28, %v8982_v45 }
 0x5e0   : > { %11077 = vmatprep.mubr.f32.mxu1 %v8131_v54  ;;  %v8467_v54 = vld [vmem:[#allocation2 + $0x90] sm:$0xff] }
 0x5e3   : > { %11078 = vmatmul.mubr.f32.gmra.mrb[164].mxu1 %v8133_v24  ;;  %v8987_v24 = vld [vmem:[#allocation3 + $0x3b8] sm:$0xff] }
 0x5e4   : > { %11080 = vmatprep.mubr.f32.mxu1 %v8136_v7  ;;  %v12003_v3 = vpack.c.bf16 %v8987_v24, %v8986_v46  ;;  %v8988_v7 = vld [vmem:[#allocation3 + $0x3c0] sm:$0xff] }
 0x5e5   : > { %v8779_v46 = vld [vmem:[#allocation2 + $0xe0] sm:$0x1] }
 0x5e6   : > { %v15985_v24 = vld [vmem:[#allocation2 + $0x100] sm:$0xff] }
 0x5e7   : > { %11081 = vmatmul.mubr.f32.gmra.mrb[166].mxu1 %v8138_v33  ;;  %v8991_v33 = vld [vmem:[#allocation3 + $0x3d8] sm:$0xff] }
 0x5e8   : > { %11083 = vmatprep.mubr.f32.mxu1 %v8141_v31  ;;  %v8993_v31 = vld [vmem:[#allocation3 + $0x3e8] sm:$0xff] }
 0x5eb   : > { %11084 = vmatmul.mubr.f32.gmra.mrb[168].mxu1 %v8143_v52  ;;  %v8995_v52 = vld [vmem:[#allocation3 + $0x3f8] sm:$0xff] }
 0x5ec   : > { %11086 = vmatprep.mubr.f32.mxu1 %v8146_v0  ;;  %v9431_v0 = vld [vmem:[#allocation3 + $0x408] sm:$0xff] }
 0x5ef   : > { %11087 = vmatmul.mubr.f32.gmra.mrb[170].mxu1 %v8148_v21  ;;  %v8485_v21 = vld [vmem:[#allocation2 + $0x240] sm:$0xff] }
 0x5f0   : > { %11089 = vmatprep.mubr.f32.mxu1 %v8151_v48  ;;  %v15972_v48 = vld [vmem:[#allocation2 + $0x8] sm:$0xff] }
 0x5f3   : > { %11090 = vmatmul.mubr.f32.gmra.mrb[172].mxu1 %v8153_v50  ;;  %v9433_v50 = vld [vmem:[#allocation3 + $0x418] sm:$0xff] }
 0x5f4   : > { %11092 = vmatprep.mubr.f32.mxu1 %v8156_v38  ;;  %v15980_v38 = vld [vmem:[#allocation2 + $0xd0] sm:$0xff] }
 0x5f7   : > { %11093 = vmatmul.mubr.f32.gmra.mrb[174].mxu1 %v8158_v59  ;;  %v8872_v59 = vrot.slane %v8774_v2, 1 }
 0x5f8   : > { %11127 = vmatprep.mubr.f32.mxu1 %v8465_v18  ;;  %v8875_v18 = vrot.slane %v8776_v4, 1  ;;  %v9442_v4 = vld [vmem:[#allocation3 + $0x460] sm:$0xff] }
 0x5fb   : > { %11128 = vmatmul.mubr.f32.vlgmr.msra.gmra.mrb[144].mxu1 %v15748_v58  ;;  %v8471_v58 = vld [vmem:[#allocation2 + $0xf0] sm:$0xff] }
 0x5fc   : > { %11130 = vmatprep.mubr.f32.mxu1 %v8467_v54  ;;  %11994 = vmatpush3.bf16.msra.mxu1 %v15905_v10  ;;  %v12007_v10 = vpack.c.bf16 %v8989_v35, %v8988_v7  ;;  %v8880_v35 = vrot.slane %v8779_v46, 1  ;;  %v8792_v46 = vld [vmem:[#allocation2 + $0x1b0] sm:$0xfe] }
 0x5fd   : > { %11996 = vmatprep.subr.bf16.mxu1 %v11995_v49 }
 0x5ff   : > { %11131 = vmatmul.mubr.f32.gmra.mrb[146].mxu1 %v15752_v22  ;;  %v12011_v22 = vpack.c.bf16 %v8991_v33, %v8990_v57  ;;  %v9437_v57 = vld [vmem:[#allocation3 + $0x438] sm:$0xff] }
 0x600   : > { %11133 = vmatprep.mubr.f32.mxu1 %v8469_v20  ;;  %11998 = vmatpush3.bf16.msra.mxu1 %v11995_v49  ;;  %v8777_v49 = vld [vmem:[#allocation2 + $0xc0] sm:$0xfe] }
 0x601   : > { %12000 = vmatprep.subr.bf16.mxu1 %v11999_v15  ;;  %v8877_v20 = vrot.slane %v8777_v49, 1  ;;  %v16005_v49 = vld [vmem:[#allocation2 + $0x1c0] sm:$0xff] }
 0x603   : > { %11134 = vmatmul.mubr.f32.gmra.mrb[148].mxu1 %v15756_v42  ;;  %v12015_v42 = vpack.c.bf16 %v8993_v31, %v8992_v26  ;;  %v15990_v26 = vld [vmem:[#allocation2 + $0x130] sm:$0xff] }
 0x604   : > { %11136 = vmatprep.mubr.f32.mxu1 %v8471_v58  ;;  %12002 = vmatpush3.bf16.msra.mxu1 %v11999_v15  ;;  %v8878_v15 = vrot.slane %v15980_v38, 1  ;;  %v8780_v58 = vld [vmem:[#allocation2 + $0xf0] sm:$0xfe] }
 0x605   : > { %12004 = vmatprep.subr.bf16.mxu1 %v12003_v3  ;;  %v8882_v31 = vrot.slane %v8780_v58, 1  ;;  %v8794_v58 = vld [vmem:[#allocation2 + $0x1d0] sm:$0x1] }
 0x606   : > { %v8879_v33 = vsel %vm1067_vm0, %v8877_v20, %v8878_v15  ;;  %v9444_v20 = vld [vmem:[#allocation3 + $0x470] sm:$0xff] }
 0x607   : > { %11137 = vmatmul.mubr.f32.gmra.mrb[150].mxu1 %v15760_v41  ;;  %v12019_v41 = vpack.c.bf16 %v8995_v52, %v8994_v19  ;;  %v8783_v52 = vld [vmem:[#allocation2 + $0x120] sm:$0xfe] }
 0x608   : > { %11139 = vmatprep.mubr.f32.mxu1 %v8473_v16  ;;  %12006 = vmatpush3.bf16.msra.mxu1 %v12003_v3  ;;  %v12031_v3 = vpack.c.bf16 %v9435_v63, %v9434_v23  ;;  %v8883_v16 = vrot.slane %v15985_v24, 1 }
 0x609   : > { %12008 = vmatprep.subr.bf16.mxu1 %v12007_v10 }
 0x60b   : > { %11140 = vmatmul.mubr.f32.gmra.mrb[152].mxu1 %v15764_v30  ;;  %v12023_v30 = vpack.c.bf16 %v9431_v0, %v9430_v61  ;;  %v8884_v61 = vsel %vm1067_vm0, %v8882_v31, %v8883_v16  ;;  %v8888_v0 = vrot.slane %v15990_v26, 1  ;;  %v8795_v31 = vld [vmem:[#allocation2 + $0x1e0] sm:$0xfe] }
 0x60c   : > { %11142 = vmatprep.mubr.f32.mxu1 %v8475_v37  ;;  %12010 = vmatpush3.bf16.msra.mxu1 %v12007_v10  ;;  %v9436_v10 = vld [vmem:[#allocation3 + $0x430] sm:$0xff] }
 0x60d   : > { %12012 = vmatprep.subr.bf16.mxu1 %v12011_v22  ;;  %v12035_v37 = vpack.c.bf16 %v9437_v57, %v9436_v10  ;;  %v16010_v10 = vld [vmem:[#allocation2 + $0x1f0] sm:$0xff]  ;;  %v8902_v57 = vrot.slane %v8792_v46, 1 }
 0x60f   : > { %11143 = vmatmul.mubr.f32.gmra.mrb[154].mxu1 %v15768_v47  ;;  %v8483_v47 = vld [vmem:[#allocation2 + $0x210] sm:$0xff] }
 0x610   : > { %11145 = vmatprep.mubr.f32.mxu1 %v8477_v17  ;;  %12014 = vmatpush3.bf16.msra.mxu1 %v12011_v22  ;;  %v8782_v22 = vld [vmem:[#allocation2 + $0x110] sm:$0x1]  ;;  %v9438_v17 = vld [vmem:[#allocation3 + $0x440] sm:$0xff] }
 0x611   : > { %12016 = vmatprep.subr.bf16.mxu1 %v12015_v42  ;;  %v8885_v19 = vrot.slane %v8782_v22, 1  ;;  %v8905_v22 = vrot.slane %v8794_v58, 1  ;;  %v8816_v58 = vld [vmem:[#allocation2 + $0x330] sm:$0xfe] }
 0x613   : > { %11146 = vmatmul.mubr.f32.gmra.mrb[156].mxu1 %v15772_v36  ;;  %v8487_v36 = vld [vmem:[#allocation2 + $0x270] sm:$0xff] }
 0x614   : > { %11148 = vmatprep.mubr.f32.mxu1 %v8479_v6  ;;  %12018 = vmatpush3.bf16.msra.mxu1 %v12015_v42  ;;  %v8881_v42 = vsel %vm1067_vm0, %v8878_v15, %v8880_v35  ;;  %v8785_v6 = vld [vmem:[#allocation2 + $0x140] sm:$0x1]  ;;  %v8903_v35 = vrot.slane %v16005_v49, 1 }
 0x615   : > { %12020 = vmatprep.subr.bf16.mxu1 %v12019_v41 }
 0x617   : > { %11149 = vmatmul.mubr.f32.gmra.mrb[158].mxu1 %v15776_v44  ;;  %v8491_v44 = vld [vmem:[#allocation2 + $0x2d0] sm:$0xff] }
 0x618   : > { %11151 = vmatprep.mubr.f32.mxu1 %v8481_v29  ;;  %12022 = vmatpush3.bf16.msra.mxu1 %v12019_v41  ;;  %v9439_v41 = vld [vmem:[#allocation3 + $0x448] sm:$0xff]  ;;  %v8887_v29 = vrot.slane %v8783_v52, 1  ;;  %v16015_v52 = vld [vmem:[#allocation2 + $0x220] sm:$0xff] }
 0x619   : > { %12024 = vmatprep.subr.bf16.mxu1 %v12023_v30 }
 0x61b   : > { %11152 = vmatmul.mubr.f32.gmra.mrb[160].mxu1 %v15780_v43  ;;  %v15968_v43 = vld [vmem:[#allocation2 + $0x70] sm:$0xff] }
 0x61c   : > { %11154 = vmatprep.mubr.f32.mxu1 %v8483_v47  ;;  %v12039_v47 = vpack.c.bf16 %v9439_v41, %v9438_v17  ;;  %v8907_v17 = vrot.slane %v8795_v31, 1  ;;  %v8906_v41 = vsel %vm1067_vm0, %v8903_v35, %v8905_v22  ;;  %v8943_v22 = vrot.slane %v15972_v48, 1  ;;  %v8818_v31 = vld [vmem:[#allocation2 + $0x350] sm:$0x1] }
 0x61f   : > { %11155 = vmatmul.mubr.f32.gmra.mrb[162].mxu1 %v15784_v60  ;;  %v8771_v60 = vld [vmem:[#allocation2 + $0x60] sm:$0xfe] }
 0x620   : > { %11157 = vmatprep.mubr.f32.mxu1 %v8485_v21  ;;  %v8886_v21 = vsel %vm1067_vm0, %v8883_v16, %v8885_v19  ;;  %v8797_v19 = vld [vmem:[#allocation2 + $0x200] sm:$0x1] }
 0x623   : > { %11158 = vmatmul.mubr.f32.gmra.mrb[164].mxu1 %v15832_v12  ;;  %v8868_v12 = vrot.slane %v15968_v43, 1 }
 0x624   : > { %11160 = vmatprep.mubr.f32.mxu1 %v8487_v36  ;;  %v8890_v36 = vrot.slane %v8785_v6, 1 }
 0x625   : > { %v8871_v28 = vsel %vm1067_vm0, %v8868_v12, %v8870_v51  ;;  %v16000_v51 = vld [vmem:[#allocation2 + $0x190] sm:$0xff] }
 0x627   : > { %11161 = vmatmul.mubr.f32.gmra.mrb[166].mxu1 %v15839_v13  ;;  %v15975_v13 = vld [vmem:[#allocation2 + $0xa0] sm:$0xff] }
 0x628   : > { %11163 = vmatprep.mubr.f32.mxu1 %v8489_v11  ;;  %v8786_v11 = vld [vmem:[#allocation2 + $0x150] sm:$0xfe] }
 0x629   : > { %v8892_v2 = vrot.slane %v8786_v11, 1 }
 0x62b   : > { %11164 = vmatmul.mubr.f32.gmra.mrb[168].mxu1 %v15847_v32  ;;  %v8867_v32 = vrot.slane %v8771_v60, 1  ;;  %v9441_v60 = vld [vmem:[#allocation3 + $0x458] sm:$0xff] }
 0x62c   : > { %11166 = vmatprep.mubr.f32.mxu1 %v8491_v44  ;;  %v9440_v44 = vld [vmem:[#allocation3 + $0x450] sm:$0xff] }
 0x62f   : > { %11167 = vmatmul.mubr.f32.gmra.mrb[170].mxu1 %v15856_v39  ;;  %v9432_v39 = vld [vmem:[#allocation3 + $0x410] sm:$0xff] }
 0x630   : > { %11169 = vmatprep.mubr.f32.mxu1 %v15795_v56  ;;  %v8869_v56 = vsel %vm1067_vm0, %v8867_v32, %v8868_v12  ;;  %v12027_v45 = vpack.c.bf16 %v9433_v50, %v9432_v39  ;;  %v8889_v12 = vsel %vm1067_vm0, %v8887_v29, %v8888_v0  ;;  %v8788_v32 = vld [vmem:[#allocation2 + $0x170] sm:$0x1]  ;;  %v12043_v39 = vpack.c.bf16 %v9441_v60, %v9440_v44  ;;  %v8801_v44 = vld [vmem:[#allocation2 + $0x240] sm:$0xfe] }
 0x631   : > { %v8891_v50 = vsel %vm1067_vm0, %v8888_v0, %v8890_v36  ;;  %v8798_v0 = vld [vmem:[#allocation2 + $0x210] sm:$0xfe]  ;;  %v8913_v29 = vrot.slane %v16015_v52, 1 }
 0x633   : > { %11170 = vmatmul.mubr.f32.gmra.mrb[172].mxu1 %v15865_v40  ;;  %v8873_v40 = vrot.slane %v15975_v13, 1 }
 0x634   : > { %11172 = vmatprep.mubr.f32.mxu1 %v15972_v48 }
 0x635   : > { %v8874_v54 = vsel %vm1067_vm0, %v8872_v59, %v8873_v40  ;;  %v8876_v7 = vsel %vm1067_vm0, %v8873_v40, %v8875_v18  ;;  %v8789_v40 = vld [vmem:[#allocation2 + $0x180] sm:$0xfe]  ;;  %v9443_v59 = vld [vmem:[#allocation3 + $0x468] sm:$0xff]  ;;  %v8791_v18 = vld [vmem:[#allocation2 + $0x1a0] sm:$0x1] }
 0x636   : > { %v8897_v23 = vrot.slane %v8789_v40, 1  ;;  %v12047_v63 = vpack.c.bf16 %v9443_v59, %v9442_v4  ;;  %v8900_v15 = vrot.slane %v8791_v18, 1  ;;  %v8809_v18 = vld [vmem:[#allocation2 + $0x2c0] sm:$0x1] }
 0x637   : > { %11173 = vmatmul.mubr.f32.gmra.mrb[174].mxu1 %v15972_v48 }
 0x638   : > { %11207 = vmatprep.mubr.f32.mxu1 %v8869_v56  ;;  %v8895_v56 = vrot.slane %v8788_v32, 1 }
 0x63b   : > { %11208 = vmatmul.mubr.f32.vlgmr.msra.gmra.mrb[144].mxu1 %v8871_v28  ;;  %v8898_v28 = vrot.slane %v16000_v51, 1 }
 0x63c   : > { %11210 = vmatprep.mubr.f32.mxu1 %v8874_v54  ;;  %12026 = vmatpush3.bf16.msra.mxu1 %v12023_v30  ;;  %v15995_v30 = vld [vmem:[#allocation2 + $0x160] sm:$0xff] }
 0x63d   : > { %12028 = vmatprep.subr.bf16.mxu1 %v12027_v45  ;;  %v8893_v25 = vrot.slane %v15995_v30, 1  ;;  %v8901_v16 = vsel %vm1067_vm0, %v8898_v28, %v8900_v15  ;;  %v8810_v15 = vld [vmem:[#allocation2 + $0x2d0] sm:$0xfe] }
 0x63f   : > { %11211 = vmatmul.mubr.f32.gmra.mrb[146].mxu1 %v8876_v7  ;;  %v8896_v54 = vsel %vm1067_vm0, %v8893_v25, %v8895_v56  ;;  %v8899_v7 = vsel %vm1067_vm0, %v8897_v23, %v8898_v28  ;;  %v8806_v56 = vld [vmem:[#allocation2 + $0x290] sm:$0x1] }
 0x640   : > { %11213 = vmatprep.mubr.f32.mxu1 %v8879_v33  ;;  %12030 = vmatpush3.bf16.msra.mxu1 %v12027_v45  ;;  %v8894_v45 = vsel %vm1067_vm0, %v8892_v2, %v8893_v25  ;;  %v8917_v25 = vrot.slane %v8801_v44, 1  ;;  %v8925_v59 = vrot.slane %v8806_v56, 1  ;;  %v9256_v44 = vld [vmem:[#allocation2 + $0xb0] sm:$0x3] }
 0x641   : > { %12032 = vmatprep.subr.bf16.mxu1 %v12031_v3 }
 0x643   : > { %11214 = vmatmul.mubr.f32.gmra.mrb[148].mxu1 %v8881_v42  ;;  %v8908_v42 = vrot.slane %v16010_v10, 1 }
 0x644   : > { %11216 = vmatprep.mubr.f32.mxu1 %v8884_v61  ;;  %12034 = vmatpush3.bf16.msra.mxu1 %v12031_v3  ;;  %v9445_v3 = vld [vmem:[#allocation3 + $0x478] sm:$0xff]  ;;  %v8910_v61 = vrot.slane %v8797_v19, 1  ;;  %v8945_v19 = vrot.slane %v8818_v31, 1 }
 0x645   : > { %12036 = vmatprep.subr.bf16.mxu1 %v12035_v37  ;;  %v12051_v33 = vpack.c.bf16 %v9445_v3, %v9444_v20  ;;  %v8909_v6 = vsel %vm1067_vm0, %v8907_v17, %v8908_v42  ;;  %v8812_v20 = vld [vmem:[#allocation2 + $0x2f0] sm:$0x1] }
 0x646   : > { %v8911_v36 = vsel %vm1067_vm0, %v8908_v42, %v8910_v61  ;;  %v9253_v61 = vld [vmem:[#allocation2 + $0x60] sm:$0xfc] }
 0x647   : > { %11217 = vmatmul.mubr.f32.gmra.mrb[150].mxu1 %v8886_v21  ;;  %v8912_v21 = vrot.slane %v8798_v0, 1  ;;  %v9318_v0 = vrot.slane %v15968_v43, 2 }
 0x648   : > { %11219 = vmatprep.mubr.f32.mxu1 %v8889_v12  ;;  %12038 = vmatpush3.bf16.msra.mxu1 %v12035_v37  ;;  %v8904_v37 = vsel %vm1067_vm0, %v8902_v57, %v8903_v35  ;;  %v8803_v12 = vld [vmem:[#allocation2 + $0x260] sm:$0x1]  ;;  %v8813_v35 = vld [vmem:[#allocation2 + $0x300] sm:$0xfe] }
 0x649   : > { %12040 = vmatprep.subr.bf16.mxu1 %v12039_v47  ;;  %v8914_v60 = vsel %vm1067_vm0, %v8912_v21, %v8913_v29  ;;  %v8920_v2 = vrot.slane %v8803_v12, 1  ;;  %v9255_v21 = vld [vmem:[#allocation2 + $0x90] sm:$0xfc]  ;;  %v9325_v12 = vrot.slane %v9256_v44, 2  ;;  %v9272_v44 = vld [vmem:[#allocation2 + $0x230] sm:$0x3] }
 0x64b   : > { %11220 = vmatmul.mubr.f32.gmra.mrb[152].mxu1 %v8891_v50  ;;  %v8919_v50 = vsel %vm1067_vm0, %v8917_v25, %v15837_v5  ;;  %v8921_v4 = vsel %vm1067_vm0, %v15837_v5, %v8920_v2  ;;  %v8932_v5 = vrot.slane %v8810_v15, 1  ;;  %v9257_v25 = vld [vmem:[#allocation2 + $0xc0] sm:$0xfc]  ;;  %v9258_v2 = vld [vmem:[#allocation2 + $0xe0] sm:$0x3] }
 0x64c   : > { %11222 = vmatprep.mubr.f32.mxu1 %v8894_v45  ;;  %12042 = vmatpush3.bf16.msra.mxu1 %v12039_v47  ;;  %v8800_v47 = vld [vmem:[#allocation2 + $0x230] sm:$0x1]  ;;  %v8807_v45 = vld [vmem:[#allocation2 + $0x2a0] sm:$0xfe]  ;;  %v9330_v56 = vrot.slane %v9258_v2, 2 }
 0x64d   : > { %12044 = vmatprep.subr.bf16.mxu1 %v12043_v39  ;;  %v8915_v11 = vrot.slane %v8800_v47, 1  ;;  %v8927_v23 = vrot.slane %v8807_v45, 1  ;;  %v8934_v57 = vsel %vm1067_vm0, %v8932_v5, %v15863_v34  ;;  %v9263_v5 = vld [vmem:[#allocation2 + $0x150] sm:$0xfc] }
 0x64f   : > { %11223 = vmatmul.mubr.f32.gmra.mrb[154].mxu1 %v8896_v54  ;;  %v8916_v32 = vsel %vm1067_vm0, %v8913_v29, %v8915_v11  ;;  %v8930_v54 = vrot.slane %v8809_v18, 1  ;;  %v8929_v46 = vsel %vm1067_vm0, %v8927_v23, %v15854_v9  ;;  %v9317_v29 = vrot.slane %v9253_v61, 2  ;;  %v9261_v23 = vld [vmem:[#allocation2 + $0x120] sm:$0xfc] }
 0x650   : > { %11225 = vmatprep.mubr.f32.mxu1 %v8899_v7  ;;  %12046 = vmatpush3.bf16.msra.mxu1 %v12043_v39  ;;  %v8804_v39 = vld [vmem:[#allocation2 + $0x270] sm:$0xfe]  ;;  %v8935_v7 = vrot.slane %v8812_v20, 1  ;;  %v9323_v11 = vrot.slane %v15975_v13, 2  ;;  %v9337_v15 = vrot.slane %v9261_v23, 2 }
 0x651   : > { %12048 = vmatprep.subr.bf16.mxu1 %v12047_v63  ;;  %v8922_v40 = vrot.slane %v8804_v39, 1  ;;  %v8931_v3 = vsel %vm1067_vm0, %v15854_v9, %v8930_v54  ;;  %v9327_v39 = vrot.slane %v9257_v25, 2  ;;  %v9262_v54 = vld [vmem:[#allocation2 + $0x140] sm:$0x3]  ;;  %v9273_v25 = vld [vmem:[#allocation2 + $0x240] sm:$0xfc] }
 0x652   : > { %v9340_v20 = vrot.slane %v9262_v54, 2 }
 0x653   : > { %11226 = vmatmul.mubr.f32.gmra.mrb[156].mxu1 %v8901_v16  ;;  %v8924_v28 = vsel %vm1067_vm0, %v8922_v40, %v15845_v55  ;;  %v8942_v16 = vrot.slane %v8816_v58, 1  ;;  %v9259_v40 = vld [vmem:[#allocation2 + $0xf0] sm:$0xfc] }
 0x654   : > { %11228 = vmatprep.mubr.f32.mxu1 %v8904_v37  ;;  %12050 = vmatpush3.bf16.msra.mxu1 %v12047_v63  ;;  %v8926_v63 = vsel %vm1067_vm0, %v15845_v55, %v8925_v59  ;;  %v8815_v55 = vld [vmem:[#allocation2 + $0x320] sm:$0x1]  ;;  %v8936_v37 = vsel %vm1067_vm0, %v15863_v34, %v8935_v7  ;;  %v8946_v34 = vsel %vm1067_vm0, %v8943_v22, %v8945_v19  ;;  %v9260_v59 = vld [vmem:[#allocation2 + $0x110] sm:$0x3]  ;;  %v9332_v45 = vrot.slane %v9259_v40, 2 }
 0x655   : > { %12052 = vmatprep.subr.bf16.mxu1 %v12051_v33  ;;  %v8940_v42 = vrot.slane %v8815_v55, 1  ;;  %v8944_v17 = vsel %vm1067_vm0, %v8942_v16, %v8943_v22  ;;  %v9335_v18 = vrot.slane %v9260_v59, 2  ;;  %v9264_v7 = vld [vmem:[#allocation2 + $0x170] sm:$0x3]  ;;  %v9265_v55 = vld [vmem:[#allocation2 + $0x180] sm:$0xfc] }
 0x656   : > { %v9266_v16 = vld [vmem:[#allocation2 + $0x1a0] sm:$0x3]  ;;  %v9347_v22 = vrot.slane %v9265_v55, 2  ;;  %v9268_v19 = vld [vmem:[#allocation2 + $0x1d0] sm:$0x3] }
 0x657   : > { %11229 = vmatmul.mubr.f32.gmra.mrb[158].mxu1 %v8906_v41  ;;  %v8941_v41 = vsel %vm1067_vm0, %v15872_v1, %v8940_v42  ;;  %v9267_v42 = vld [vmem:[#allocation2 + $0x1b0] sm:$0xfc]  ;;  %v9355_v61 = vrot.slane %v9268_v19, 2  ;;  %v9277_v59 = vld [vmem:[#allocation2 + $0x2a0] sm:$0xfc] }
 0x658   : > { %11231 = vmatprep.mubr.f32.mxu1 %v8909_v6  ;;  %12054 = vmatpush3.bf16.msra.mxu1 %v12051_v33  ;;  %v8937_v33 = vrot.slane %v8813_v35, 1  ;;  %v9254_v6 = vld [vmem:[#allocation2 + $0x80] sm:$0x3]  ;;  %v9342_v35 = vrot.slane %v9263_v5, 2  ;;  %v9281_v5 = vld [vmem:[#allocation2 + $0x300] sm:$0xfc] }
 0x659   : > { %v9320_v47 = vrot.slane %v9254_v6, 2  ;;  %v9358_v6 = vrot.slane %v16010_v10, 2 }
 0x65a   : > { %v8939_v9 = vsel %vm1067_vm0, %v8937_v33, %v15872_v1  ;;  %v9348_v33 = vrot.slane %v16000_v51, 2 }
 0x65b   : > { %11232 = vmatmul.mubr.f32.gmra.mrb[160].mxu1 %v8911_v36  ;;  %v9319_v36 = vsel %vm1903_vm2, %v9317_v29, %v9318_v0  ;;  %v9321_v1 = vsel %vm1903_vm2, %v9318_v0, %v9320_v47  ;;  %v9269_v0 = vld [vmem:[#allocation2 + $0x1e0] sm:$0xfc] }
 0x65c   : > { %11234 = vmatprep.mubr.f32.mxu1 %v8914_v60  ;;  %v9322_v60 = vrot.slane %v9255_v21, 2  ;;  %v9357_v29 = vrot.slane %v9269_v0, 2 }
 0x65e   : > { %v9324_v43 = vsel %vm1903_vm2, %v9322_v60, %v9323_v11 }
 0x65f   : > { %11235 = vmatmul.mubr.f32.gmra.mrb[162].mxu1 %v8916_v32  ;;  %v9328_v32 = vrot.slane %v15980_v38, 2 }
 0x660   : > { %11237 = vmatprep.mubr.f32.mxu1 %v8919_v50  ;;  %v9326_v50 = vsel %vm1903_vm2, %v9323_v11, %v9325_v12  ;;  %v9363_v11 = vrot.slane %v16015_v52, 2  ;;  %v9365_v12 = vrot.slane %v9272_v44, 2 }
 0x661   : > { %v9329_v13 = vsel %vm1903_vm2, %v9327_v39, %v9328_v32 }
 0x662   : > { %v9366_v2 = vsel %vm1903_vm2, %v9363_v11, %v9365_v12 }
 0x663   : > { %11238 = vmatmul.mubr.f32.gmra.mrb[164].mxu1 %v8921_v4  ;;  %v9333_v4 = vrot.slane %v15985_v24, 2 }
 0x664   : > { %11240 = vmatprep.mubr.f32.mxu1 %v8924_v28  ;;  %v9331_v28 = vsel %vm1903_vm2, %v9328_v32, %v9330_v56  ;;  %v9367_v32 = vrot.slane %v9273_v25, 2  ;;  %v9276_v56 = vld [vmem:[#allocation2 + $0x290] sm:$0x3] }
 0x665   : > { %v9334_v38 = vsel %vm1903_vm2, %v9332_v45, %v9333_v4 }
 0x666   : > { %v9369_v52 = vsel %vm1903_vm2, %v9367_v32, %v15917_v62 }
 0x667   : > { %11241 = vmatmul.mubr.f32.gmra.mrb[166].mxu1 %v8926_v63  ;;  %v9338_v63 = vrot.slane %v15990_v26, 2 }
 0x668   : > { %11243 = vmatprep.mubr.f32.mxu1 %v8929_v46  ;;  %v9336_v46 = vsel %vm1903_vm2, %v9333_v4, %v9335_v18  ;;  %v9375_v4 = vrot.slane %v9276_v56, 2  ;;  %v9377_v18 = vrot.slane %v9277_v59, 2 }
 0x669   : > { %v9339_v24 = vsel %vm1903_vm2, %v9337_v15, %v9338_v63  ;;  %v9341_v58 = vsel %vm1903_vm2, %v9338_v63, %v9340_v20  ;;  %v9279_v63 = vld [vmem:[#allocation2 + $0x2d0] sm:$0xfc]  ;;  %v9280_v15 = vld [vmem:[#allocation2 + $0x2f0] sm:$0x3] }
 0x66a   : > { %v9376_v23 = vsel %vm1903_vm2, %v15923_v14, %v9375_v4  ;;  %v9379_v54 = vsel %vm1903_vm2, %v9377_v18, %v15930_v53  ;;  %v9385_v20 = vrot.slane %v9280_v15, 2 }
 0x66b   : > { %11244 = vmatmul.mubr.f32.gmra.mrb[168].mxu1 %v8931_v3  ;;  %v9343_v3 = vrot.slane %v15995_v30, 2  ;;  %v9349_v30 = vsel %vm1903_vm2, %v9347_v22, %v9348_v33 }
 0x66c   : > { %11246 = vmatprep.mubr.f32.mxu1 %v8934_v57  ;;  %v9345_v57 = vrot.slane %v9264_v7, 2  ;;  %v9387_v7 = vrot.slane %v9281_v5, 2  ;;  %v9386_v55 = vsel %vm1903_vm2, %v15937_v8, %v9385_v20 }
 0x66d   : > { %v9344_v26 = vsel %vm1903_vm2, %v9342_v35, %v9343_v3 }
 0x66e   : > { %v9346_v31 = vsel %vm1903_vm2, %v9343_v3, %v9345_v57  ;;  %v9284_v57 = vld [vmem:[#allocation2 + $0x350] sm:$0x3] }
 0x66f   : > { %11247 = vmatmul.mubr.f32.gmra.mrb[170].mxu1 %v8936_v37  ;;  %v9350_v37 = vrot.slane %v9266_v16, 2 }
 0x670   : > { %11249 = vmatprep.mubr.f32.mxu1 %v8939_v9  ;;  %v9353_v9 = vrot.slane %v16005_v49, 2  ;;  %v9359_v49 = vsel %vm1903_vm2, %v9357_v29, %v9358_v6 }
 0x672   : > { %v9356_v47 = vsel %vm1903_vm2, %v9353_v9, %v9355_v61 }
 0x673   : > { %11250 = vmatmul.mubr.f32.gmra.mrb[172].mxu1 %v8941_v41  ;;  %v9351_v41 = vsel %vm1903_vm2, %v9348_v33, %v9350_v37  ;;  %v9395_v33 = vrot.slane %v9284_v57, 2 }
 0x674   : > { %11252 = vmatprep.mubr.f32.mxu1 %v8944_v17  ;;  %v9352_v17 = vrot.slane %v9267_v42, 2 }
 0x676   : > { %v9354_v51 = vsel %vm1903_vm2, %v9352_v17, %v9353_v9 }
 0x677   : > { %11253 = vmatmul.mubr.f32.gmra.mrb[174].mxu1 %v8946_v34  ;;  %v9270_v34 = vld [vmem:[#allocation2 + $0x200] sm:$0x3] }
 0x678   : > { %11287 = vmatprep.mubr.f32.mxu1 %v9319_v36  ;;  %v9360_v21 = vrot.slane %v9270_v34, 2  ;;  %v9271_v36 = vld [vmem:[#allocation2 + $0x210] sm:$0xfc] }
 0x679   : > { %v9362_v60 = vrot.slane %v9271_v36, 2 }
 0x67b   : > { %11288 = vmatmul.mubr.f32.vlgmr.msra.gmra.mrb[144].mxu1 %v9321_v1  ;;  %v9361_v1 = vsel %vm1903_vm2, %v9358_v6, %v9360_v21  ;;  %v9364_v10 = vsel %vm1903_vm2, %v9362_v60, %v9363_v11 }
 0x67c   : > { %11290 = vmatprep.mubr.f32.mxu1 %v9324_v43  ;;  %v9274_v43 = vld [vmem:[#allocation2 + $0x260] sm:$0x3] }
 0x67d   : > { %v9370_v39 = vrot.slane %v9274_v43, 2 }
 0x67f   : > { %11291 = vmatmul.mubr.f32.gmra.mrb[146].mxu1 %v9326_v50  ;;  %v9275_v50 = vld [vmem:[#allocation2 + $0x270] sm:$0xfc] }
 0x680   : > { %11293 = vmatprep.mubr.f32.mxu1 %v9329_v13  ;;  %v9372_v40 = vrot.slane %v9275_v50, 2  ;;  %v9371_v13 = vsel %vm1903_vm2, %v15917_v62, %v9370_v39  ;;  %v9382_v62 = vrot.slane %v9279_v63, 2 }
 0x682   : > { %v9374_v45 = vsel %vm1903_vm2, %v9372_v40, %v15923_v14  ;;  %v9384_v3 = vsel %vm1903_vm2, %v9382_v62, %v15937_v8  ;;  %v9282_v14 = vld [vmem:[#allocation2 + $0x320] sm:$0x3] }
 0x683   : > { %11294 = vmatmul.mubr.f32.gmra.mrb[148].mxu1 %v9331_v28  ;;  %v9278_v28 = vld [vmem:[#allocation2 + $0x2c0] sm:$0x3] }
 0x684   : > { %11296 = vmatprep.mubr.f32.mxu1 %v9334_v38  ;;  %v9380_v38 = vrot.slane %v9278_v28, 2  ;;  %v16103_v8 = vld [vmem:[%s16230_s5] ss:$0 sm:$0xff] }
 0x687   : > { %11297 = vmatmul.mubr.f32.gmra.mrb[150].mxu1 %v9336_v46  ;;  %v9381_v46 = vsel %vm1903_vm2, %v15930_v53, %v9380_v38  ;;  %v9390_v53 = vrot.slane %v9282_v14, 2 }
 0x688   : > { %11299 = vmatprep.mubr.f32.mxu1 %v9339_v24  ;;  %v9283_v24 = vld [vmem:[#allocation2 + $0x330] sm:$0xfc] }
 0x689   : > { %v9392_v35 = vrot.slane %v9283_v24, 2  ;;  %v9391_v22 = vsel %vm1903_vm2, %v15944_v27, %v9390_v53 }
 0x68b   : > { %11300 = vmatmul.mubr.f32.gmra.mrb[152].mxu1 %v9341_v58  ;;  %v9393_v58 = vrot.slane %v15972_v48, 2 }
 0x68c   : > { %11302 = vmatprep.mubr.f32.mxu1 %v9344_v26  ;;  %v9389_v26 = vsel %vm1903_vm2, %v9387_v7, %v15944_v27 }
 0x68d   : > { %v9394_v16 = vsel %vm1903_vm2, %v9392_v35, %v9393_v58  ;;  %v9396_v48 = vsel %vm1903_vm2, %v9393_v58, %v9395_v33 }
 0x68f   : > { %11303 = vmatmul.mubr.f32.gmra.mrb[154].mxu1 %v9346_v31 }
 0x690   : > { %11305 = vmatprep.mubr.f32.mxu1 %v9349_v30 }
 0x693   : > { %11306 = vmatmul.mubr.f32.gmra.mrb[156].mxu1 %v9351_v41 }
 0x694   : > { %11308 = vmatprep.mubr.f32.mxu1 %v9354_v51 }
 0x697   : > { %11309 = vmatmul.mubr.f32.gmra.mrb[158].mxu1 %v9356_v47 }
 0x698   : > { %11311 = vmatprep.mubr.f32.mxu1 %v9359_v49 }
 0x69b   : > { %11312 = vmatmul.mubr.f32.gmra.mrb[160].mxu1 %v9361_v1 }
 0x69c   : > { %11314 = vmatprep.mubr.f32.mxu1 %v9364_v10 }
 0x69f   : > { %11315 = vmatmul.mubr.f32.gmra.mrb[162].mxu1 %v9366_v2 }
 0x6a0   : > { %11317 = vmatprep.mubr.f32.mxu1 %v9369_v52 }
 0x6a3   : > { %11318 = vmatmul.mubr.f32.gmra.mrb[164].mxu1 %v9371_v13 }
 0x6a4   : > { %11320 = vmatprep.mubr.f32.mxu1 %v9374_v45 }
 0x6a7   : > { %11321 = vmatmul.mubr.f32.gmra.mrb[166].mxu1 %v9376_v23 }
 0x6a8   : > { %11323 = vmatprep.mubr.f32.mxu1 %v9379_v54 }
 0x6ab   : > { %11324 = vmatmul.mubr.f32.gmra.mrb[168].mxu1 %v9381_v46 }
 0x6ac   : > { %11326 = vmatprep.mubr.f32.mxu1 %v9384_v3 }
 0x6af   : > { %11327 = vmatmul.mubr.f32.gmra.mrb[170].mxu1 %v9386_v55 }
 0x6b0   : > { %11329 = vmatprep.mubr.f32.mxu1 %v9389_v26 }
 0x6b3   : > { %11330 = vmatmul.mubr.f32.gmra.mrb[172].mxu1 %v9391_v22 }
 0x6b4   : > { %11332 = vmatprep.mubr.f32.mxu1 %v9394_v16 }
 0x6b7   : > { %11333 = vmatmul.mubr.f32.gmra.mrb[174].mxu1 %v9396_v48 }
 0x74e   : > { %v11289_v31 = vpop.f32.mrb[144].mxu1 }
 0x74f   : > { %v9711_v37 = vadd.f32 %v11289_v31, %v16103_v8  ;;  %v9512_v42 = vpop.f32.mrb[145].mxu1 }
 0x750   : > { %v9710_v30 = vadd.f32 %v16103_v8, %v9512_v42 }
 0x751   : > { %v9743_v27 = vmax.f32 %v9711_v37, 0.0 }
 0x752   : > { %v9742_v9 = vmax.f32 %v9710_v30, 0.0  ;;  %v11292_v19 = vpop.f32.mrb[146].mxu1 }
 0x753   : > { %9775 = vst [vmem:[%s16109_s14 + $0x8] sm:$0xff] %v9743_v27  ;;  %v9713_v17 = vadd.f32 %v11292_v19, %v16103_v8  ;;  %v9522_v41 = vpop.f32.mrb[147].mxu1 }
 0x754   : > { %9774 = vst [vmem:[%s16109_s14] sm:$0xff] %v9742_v9  ;;  %v9712_v61 = vadd.f32 %v16103_v8, %v9522_v41 }
 0x755   : > { %v9745_v0 = vmax.f32 %v9713_v17, 0.0 }
 0x756   : > { %v9744_v51 = vmax.f32 %v9712_v61, 0.0  ;;  %v11295_v6 = vpop.f32.mrb[148].mxu1 }
 0x757   : > { %9777 = vst [vmem:[%s16109_s14 + $0x18] sm:$0xff] %v9745_v0  ;;  %v9715_v34 = vadd.f32 %v11295_v6, %v16103_v8  ;;  %v9532_v29 = vpop.f32.mrb[149].mxu1 }
 0x758   : > { %9776 = vst [vmem:[%s16109_s14 + $0x10] sm:$0xff] %v9744_v51  ;;  %v9714_v47 = vadd.f32 %v16103_v8, %v9532_v29 }
 0x759   : > { %v9747_v21 = vmax.f32 %v9715_v34, 0.0 }
 0x75a   : > { %v9746_v36 = vmax.f32 %v9714_v47, 0.0  ;;  %v11298_v49 = vpop.f32.mrb[150].mxu1 }
 0x75b   : > { %9779 = vst [vmem:[%s16109_s14 + $0x28] sm:$0xff] %v9747_v21  ;;  %v9717_v11 = vadd.f32 %v11298_v49, %v16103_v8  ;;  %v9542_v44 = vpop.f32.mrb[151].mxu1 }
 0x75c   : > { %9778 = vst [vmem:[%s16109_s14 + $0x20] sm:$0xff] %v9746_v36  ;;  %v9716_v60 = vadd.f32 %v16103_v8, %v9542_v44 }
 0x75d   : > { %v9749_v1 = vmax.f32 %v9717_v11, 0.0 }
 0x75e   : > { %v9748_v12 = vmax.f32 %v9716_v60, 0.0  ;;  %v11301_v25 = vpop.f32.mrb[152].mxu1 }
 0x75f   : > { %9781 = vst [vmem:[%s16109_s14 + $0x38] sm:$0xff] %v9749_v1  ;;  %v9719_v10 = vadd.f32 %v11301_v25, %v16103_v8  ;;  %v9552_v43 = vpop.f32.mrb[153].mxu1 }
 0x760   : > { %9780 = vst [vmem:[%s16109_s14 + $0x30] sm:$0xff] %v9748_v12  ;;  %v9718_v32 = vadd.f32 %v16103_v8, %v9552_v43 }
 0x761   : > { %v9751_v2 = vmax.f32 %v9719_v10, 0.0 }
 0x762   : > { %v9750_v39 = vmax.f32 %v9718_v32, 0.0  ;;  %v11304_v50 = vpop.f32.mrb[154].mxu1 }
 0x763   : > { %9783 = vst [vmem:[%s16109_s14 + $0x48] sm:$0xff] %v9751_v2  ;;  %v9721_v52 = vadd.f32 %v11304_v50, %v16103_v8  ;;  %v9562_v56 = vpop.f32.mrb[155].mxu1 }
 0x764   : > { %9782 = vst [vmem:[%s16109_s14 + $0x40] sm:$0xff] %v9750_v39  ;;  %v9720_v40 = vadd.f32 %v16103_v8, %v9562_v56 }
 0x765   : > { %v9753_v13 = vmax.f32 %v9721_v52, 0.0 }
 0x766   : > { %v9752_v4 = vmax.f32 %v9720_v40, 0.0  ;;  %v11307_v59 = vpop.f32.mrb[156].mxu1 }
 0x767   : > { %9785 = vst [vmem:[%s16109_s14 + $0x58] sm:$0xff] %v9753_v13  ;;  %v9723_v45 = vadd.f32 %v11307_v59, %v16103_v8  ;;  %v9572_v28 = vpop.f32.mrb[157].mxu1 }
 0x768   : > { %9784 = vst [vmem:[%s16109_s14 + $0x50] sm:$0xff] %v9752_v4  ;;  %v9722_v18 = vadd.f32 %v16103_v8, %v9572_v28 }
 0x769   : > { %v9755_v23 = vmax.f32 %v9723_v45, 0.0 }
 0x76a   : > { %v9754_v38 = vmax.f32 %v9722_v18, 0.0  ;;  %v11310_v63 = vpop.f32.mrb[158].mxu1 }
 0x76b   : > { %9787 = vst [vmem:[%s16109_s14 + $0x68] sm:$0xff] %v9755_v23  ;;  %v9725_v54 = vadd.f32 %v11310_v63, %v16103_v8  ;;  %v9582_v15 = vpop.f32.mrb[159].mxu1 }
 0x76c   : > { %9786 = vst [vmem:[%s16109_s14 + $0x60] sm:$0xff] %v9754_v38  ;;  %v9724_v62 = vadd.f32 %v16103_v8, %v9582_v15 }
 0x76d   : > { %v9757_v46 = vmax.f32 %v9725_v54, 0.0 }
 0x76e   : > { %v9756_v20 = vmax.f32 %v9724_v62, 0.0  ;;  %v11313_v5 = vpop.f32.mrb[160].mxu1 }
 0x76f   : > { %9789 = vst [vmem:[%s16109_s14 + $0x78] sm:$0xff] %v9757_v46  ;;  %v9727_v24 = vadd.f32 %v11313_v5, %v16103_v8  ;;  %v9592_v3 = vpop.f32.mrb[161].mxu1 }
 0x770   : > { %9788 = vst [vmem:[%s16109_s14 + $0x70] sm:$0xff] %v9756_v20  ;;  %v9726_v14 = vadd.f32 %v16103_v8, %v9592_v3 }
 0x771   : > { %v9759_v7 = vmax.f32 %v9727_v24, 0.0 }
 0x772   : > { %v9758_v35 = vmax.f32 %v9726_v14, 0.0  ;;  %v11316_v58 = vpop.f32.mrb[162].mxu1 }
 0x773   : > { %9791 = vst [vmem:[%s16109_s14 + $0x88] sm:$0xff] %v9759_v7  ;;  %v9729_v57 = vadd.f32 %v11316_v58, %v16103_v8  ;;  %v9602_v55 = vpop.f32.mrb[163].mxu1 }
 0x774   : > { %9790 = vst [vmem:[%s16109_s14 + $0x80] sm:$0xff] %v9758_v35  ;;  %v9728_v53 = vadd.f32 %v16103_v8, %v9602_v55 }
 0x775   : > { %v9761_v26 = vmax.f32 %v9729_v57, 0.0 }
 0x776   : > { %v9760_v33 = vmax.f32 %v9728_v53, 0.0  ;;  %v11319_v16 = vpop.f32.mrb[164].mxu1 }
 0x777   : > { %9793 = vst [vmem:[%s16109_s14 + $0x98] sm:$0xff] %v9761_v26  ;;  %v9731_v22 = vadd.f32 %v11319_v16, %v16103_v8  ;;  %v9612_v48 = vpop.f32.mrb[165].mxu1 }
 0x778   : > { %9792 = vst [vmem:[%s16109_s14 + $0x90] sm:$0xff] %v9760_v33  ;;  %v9730_v31 = vadd.f32 %v16103_v8, %v9612_v48 }
 0x779   : > { %v9763_v37 = vmax.f32 %v9731_v22, 0.0 }
 0x77a   : > { %v9762_v42 = vmax.f32 %v9730_v31, 0.0  ;;  %v11322_v30 = vpop.f32.mrb[166].mxu1 }
 0x77b   : > { %9795 = vst [vmem:[%s16109_s14 + $0xa8] sm:$0xff] %v9763_v37  ;;  %v9733_v27 = vadd.f32 %v11322_v30, %v16103_v8  ;;  %v9622_v9 = vpop.f32.mrb[167].mxu1 }
 0x77c   : > { %9794 = vst [vmem:[%s16109_s14 + $0xa0] sm:$0xff] %v9762_v42  ;;  %v9732_v19 = vadd.f32 %v16103_v8, %v9622_v9 }
 0x77d   : > { %v9765_v17 = vmax.f32 %v9733_v27, 0.0 }
 0x77e   : > { %v9764_v41 = vmax.f32 %v9732_v19, 0.0  ;;  %v11325_v61 = vpop.f32.mrb[168].mxu1 }
 0x77f   : > { %9797 = vst [vmem:[%s16109_s14 + $0xb8] sm:$0xff] %v9765_v17  ;;  %v9735_v0 = vadd.f32 %v11325_v61, %v16103_v8  ;;  %v9632_v51 = vpop.f32.mrb[169].mxu1 }
 0x780   : > { %9796 = vst [vmem:[%s16109_s14 + $0xb0] sm:$0xff] %v9764_v41  ;;  %v9734_v6 = vadd.f32 %v16103_v8, %v9632_v51 }
 0x781   : > { %v9767_v34 = vmax.f32 %v9735_v0, 0.0 }
 0x782   : > { %v9766_v29 = vmax.f32 %v9734_v6, 0.0  ;;  %v11328_v47 = vpop.f32.mrb[170].mxu1 }
 0x783   : > { %9799 = vst [vmem:[%s16109_s14 + $0xc8] sm:$0xff] %v9767_v34  ;;  %v9737_v21 = vadd.f32 %v11328_v47, %v16103_v8  ;;  %v9642_v36 = vpop.f32.mrb[171].mxu1 }
 0x784   : > { %9798 = vst [vmem:[%s16109_s14 + $0xc0] sm:$0xff] %v9766_v29  ;;  %v9736_v49 = vadd.f32 %v16103_v8, %v9642_v36 }
 0x785   : > { %v9769_v11 = vmax.f32 %v9737_v21, 0.0 }
 0x786   : > { %v9768_v44 = vmax.f32 %v9736_v49, 0.0  ;;  %v11331_v60 = vpop.f32.mrb[172].mxu1 }
 0x787   : > { %9801 = vst [vmem:[%s16109_s14 + $0xd8] sm:$0xff] %v9769_v11  ;;  %v9739_v1 = vadd.f32 %v11331_v60, %v16103_v8  ;;  %v9652_v12 = vpop.f32.mrb[173].mxu1 }
 0x788   : > { %9800 = vst [vmem:[%s16109_s14 + $0xd0] sm:$0xff] %v9768_v44  ;;  %v9738_v25 = vadd.f32 %v16103_v8, %v9652_v12 }
 0x789   : > { %v9771_v10 = vmax.f32 %v9739_v1, 0.0 }
 0x78a   : > { %v9770_v43 = vmax.f32 %v9738_v25, 0.0  ;;  %v11334_v32 = vpop.f32.mrb[174].mxu1 }
 0x78b   : > { %9803 = vst [vmem:[%s16109_s14 + $0xe8] sm:$0xff] %v9771_v10  ;;  %v9741_v2 = vadd.f32 %v11334_v32, %v16103_v8  ;;  %v9662_v39 = vpop.f32.mrb[175].mxu1 }
 0x78c   : > { %9802 = vst [vmem:[%s16109_s14 + $0xe0] sm:$0xff] %v9770_v43  ;;  %v9740_v50 = vadd.f32 %v16103_v8, %v9662_v39 }
 0x78d   : > { %v9773_v52 = vmax.f32 %v9741_v2, 0.0 }
 0x78e   : > { %v9772_v56 = vmax.f32 %v9740_v50, 0.0 }
 0x78f   : > { %9805 = vst [vmem:[%s16109_s14 + $0xf8] sm:$0xff] %v9773_v52 }
 0x790   : > { %9804 = vst [vmem:[%s16109_s14 + $0xf0] sm:$0xff] %v9772_v56 }
 0x791   : > { %12536 = shalt.err (!%p12533_p7)
}
 0x792   : > { %s12537_s15 = scalar_lea.hbm %s16176_s26, 4096  ;;  %s12541_s12 = scalar_lea.hbm %s16231_s6, 8192 }
 0x793   : > { %p12538_p8 = scmp.ne.s32.totalorder %s16176_s26, %s12537_s15  ;;  %p12542_p1 = scmp.lt.u32.totalorder %s16176_s26, %s16231_s6 }
 0x794   : > { %p12543_p0 = scmp.lt.u32.totalorder %s12541_s12, %s12537_s15  ;;  %p12545_p6 = scmp.lt.u32.totalorder %s12537_s15, %s16176_s26 }
 0x795   : > { %p12539_p11 = pnand %p12538_p8, %p16419_p9 }
 0x796   : > { %p12544_p5 = por %p12543_p0, %p12542_p1 }
 0x797   : > { %p12540_p13 = pneg %p12539_p11 }
 0x798   : > { %p12546_p10 = por %p12545_p6, %p12544_p5 }
 0x79a   : > { %p12547_p12 = pnand %p12546_p10, %p12540_p13 }
 0x79c   : > { %12550 = shalt.err (!%p12547_p12)
}
 0x79d   : > { %s12597_s16 = smov 128   ;;  %s12598_s19 = smov 8  }
 0x79e   : > { %12347 = dma.vmem_to_hbm [thread:$0]  (%p16419_p9), %s16178_s17, 4096, %s16176_s26, %s16184_s25, %s12597_s16, %s12597_s16, %s12598_s19  }
 0x79f PF: > { %p12359_p2 = scmp.ge.s32.totalorder %s12589_s24, 2  ;;  %s9835_s20 = sand.u32 1, %s12577_s21  }
 0x7a0   : > { %p16420_p3 = scmp.ne.s32.totalorder %s16244_s8, 0  ;;  %s9836_s28 = scalar_lea.sflag [#allocation5], %s9835_s20 }
 0x7a2   : > { %p12354_p4 = pnand %p12359_p2, %p16420_p3 }
 0x7a4   : > { %12572 = dma.done.wait (!%p12354_p4), %s9836_s28, 4096  }
 0x7a5   : > { %12574 = vsyncadd (!%p12354_p4), %s9836_s28, 4294963200  ;;  %p17_p7 = scmp.ge.s32.totalorder %s12659_s27, 4   ;;  %s16421_s21 = smov %s12581_s22 }
 0x7a6   : > { %s16422_s22 = smov %s12585_s23  ;;  %s16423_s23 = smov %s12670_s30 }
 0x7a7   : > { %s16424_s24 = smov %s12659_s27  ;;  %19 = sbr.rel (!%p17_p7) target bundleno = 4 (0x4), region = 105 }
 0x7ae   :  { %9841 = vsyncpa [#allocation4], 1 }
 0x7af   :  { %9843 = vsyncpa [#allocation4 + $0x1], 1 }
 0x7b0   :  { %9844 = vsyncpa [#allocation5], 1 }
 0x7b1   :  { %9846 = vsyncpa [#allocation5 + $0x1], 1 }

</bundles_post_ra>
